<compile_context>
chip_gen: v6e
topology: v6e:2x2x1
jax: 0.10.0
libtpu: 0.0.40
codegen_flags: <defaults>
</compile_context>

<pallas_src>
import numpy as np
import jax
import jax.numpy as jnp
from jax.experimental import pallas as pl
from jax.experimental.pallas import tpu as pltpu

CIN = 3
CIN_PAD = 8                       # pad input channels 3 -> 8 for sublane alignment
COUTS = [64, 128, 256, 256]


def _build_kernel(cfg):
    """cfg: tuple of (Wp_k, A_k) for the 4 conv blocks (static Python ints)."""

    def kernel(x_ref,
               w1_ref, b1_ref, s1_ref,
               w2_ref, b2_ref, s2_ref,
               w3_ref, b3_ref, s3_ref,
               w4_ref, b4_ref, s4_ref,
               out_ref,
               p2_ref, p3_ref, p4_ref):

        def conv_bn_relu(load_slab, w_ref, b_ref, n_rows):
            cout = w_ref.shape[3]
            acc = jnp.zeros((n_rows, cout), jnp.float32)
            for dy in range(3):
                for dx in range(3):
                    acc = acc + jnp.dot(load_slab(dy, dx), w_ref[dy, dx],
                                        preferred_element_type=jnp.float32)
            return jnp.maximum(acc + b_ref[...], 0.0)          # f32 (n_rows, cout)

        def maxpool_select(z, s_ref):
            # 2x2 stride-2 max-pool (plus zero re-padding for the next layer)
            # via four exact 0/1 selection matmuls + elementwise max.
            out = jnp.dot(s_ref[0], z, preferred_element_type=jnp.float32)
            for j in range(1, 4):
                out = jnp.maximum(
                    out, jnp.dot(s_ref[j], z, preferred_element_type=jnp.float32))
            return out

        (wp1, a1), (wp2, a2), (wp3, a3), (wp4, a4) = cfg

        # block 1 (reads the padded, flattened bf16 input directly)
        z = conv_bn_relu(lambda dy, dx: x_ref[0, pl.ds(dy * wp1 + dx, a1), :],
                         w1_ref, b1_ref, a1)
        p2_ref[...] = maxpool_select(z, s1_ref).astype(p2_ref.dtype)

        # block 2
        z = conv_bn_relu(lambda dy, dx: p2_ref[pl.ds(dy * wp2 + dx, a2), :],
                         w2_ref, b2_ref, a2)
        p3_ref[...] = maxpool_select(z, s2_ref).astype(p3_ref.dtype)

        # block 3
        z = conv_bn_relu(lambda dy, dx: p3_ref[pl.ds(dy * wp3 + dx, a3), :],
                         w3_ref, b3_ref, a3)
        p4_ref[...] = maxpool_select(z, s3_ref).astype(p4_ref.dtype)

        # block 4 -> final features (f32, lane-dense 256)
        z = conv_bn_relu(lambda dy, dx: p4_ref[pl.ds(dy * wp4 + dx, a4), :],
                         w4_ref, b4_ref, a4)
        out_ref[0] = maxpool_select(z, s4_ref).astype(out_ref.dtype)

    return kernel


def _make_pool_selectors(h_in, w_in, n_rows_out, final):
    """Four 0/1 selection matrices implementing 2x2/2 max-pool taps.

    Columns index the flattened conv output of shape (h_in * (w_in+2), C);
    rows index either the next layer's padded flat buffer (final=False) or the
    compact (h_out*w_out) feature layout (final=True)."""
    wp_in = w_in + 2
    a_in = h_in * wp_in
    h_out, w_out = h_in // 2, w_in // 2
    wp_out = w_out + 2
    sel = np.zeros((4, n_rows_out, a_in), np.float32)
    for a in (0, 1):
        for b in (0, 1):
            j = 2 * a + b
            for ho in range(h_out):
                for wo in range(w_out):
                    r = (ho * w_out + wo) if final else ((ho + 1) * wp_out + (wo + 1))
                    c = (2 * ho + a) * wp_in + (2 * wo + b)
                    sel[j, r, c] = 1.0
    return jnp.asarray(sel)


def feature_extractor_forward(x, params):
    """x: (N, 3, H, W) float32, H and W multiples of 16. Returns squeezed features."""
    N, C, H, W = x.shape
    assert C == CIN and H % 16 == 0 and W % 16 == 0

    hs = [H, H // 2, H // 4, H // 8]
    ws = [W, W // 2, W // 4, W // 8]
    wps = [w + 2 for w in ws]
    avs = [h * wp for h, wp in zip(hs, wps)]               # flattened conv-out rows
    pads = [(h + 2) * (w + 2) + 8 for h, w in zip(hs, ws)]  # padded flat buffer rows
    hf, wf = H // 16, W // 16
    nf = hf * wf

    # ---- plain-JAX glue: layout the input as a zero-padded flat bf16 slab ----
    xe = jnp.transpose(x, (0, 2, 3, 1))                               # NHWC
    xe = jnp.pad(xe, ((0, 0), (1, 1), (1, 1), (0, CIN_PAD - C)))      # spatial+chan pad
    xe = xe.reshape(N, (H + 2) * (W + 2), CIN_PAD)
    xe = jnp.pad(xe, ((0, 0), (0, pads[0] - (H + 2) * (W + 2)), (0, 0)))
    xe = xe.astype(jnp.bfloat16)

    # ---- pooling / re-padding selection matrices (constants) ----
    sels = []
    for k in range(4):
        final = (k == 3)
        rows = nf if final else pads[k + 1]
        sels.append(_make_pool_selectors(hs[k], ws[k], rows, final))

    def full(shape):
        return pl.BlockSpec(shape, lambda n, _s=len(shape): (0,) * _s)

    in_specs = [pl.BlockSpec((1, pads[0], CIN_PAD), lambda n: (n, 0, 0))]
    args = [xe]
    cfg = []
    for k in range(4):
        w, b, s = params["w"][k], params["b"][k], sels[k]
        in_specs += [full(w.shape), full(b.shape), full(s.shape)]
        args += [w, b, s]
        cfg.append((wps[k], avs[k]))

    y = pl.pallas_call(
        _build_kernel(tuple(cfg)),
        out_shape=jax.ShapeDtypeStruct((N, nf, 256), jnp.float32),
        grid=(N,),
        in_specs=in_specs,
        out_specs=pl.BlockSpec((1, nf, 256), lambda n: (n, 0, 0)),
        scratch_shapes=[pltpu.VMEM((pads[1], 64), jnp.bfloat16),
                        pltpu.VMEM((pads[2], 128), jnp.bfloat16),
                        pltpu.VMEM((pads[3], 256), jnp.bfloat16)],
        compiler_params=pltpu.CompilerParams(dimension_semantics=("parallel",)),
    )(*args)

    y = y.reshape(N, hf, wf, 256)
    y = jnp.transpose(y, (0, 3, 1, 2))      # NCHW, then .squeeze() like the module
    return jnp.squeeze(y)


def _init_params(key):
    """Synthetic Conv+BN parameters; BN (eval) + conv bias folded into (w, shift)."""
    eps = 1e-5
    cins = [CIN, 64, 128, 256]
    ws, bs = [], []
    for k in range(4):
        key, kw, kb, kg, kbe, km, kv = jax.random.split(key, 7)
        cin, cout = cins[k], COUTS[k]
        fan_in = 9 * cin
        w = jax.random.normal(kw, (3, 3, cin, cout), jnp.float32) * jnp.sqrt(2.0 / fan_in)
        b = 0.05 * jax.random.normal(kb, (cout,), jnp.float32)
        gamma = 1.0 + 0.1 * jax.random.normal(kg, (cout,), jnp.float32)
        beta = 0.1 * jax.random.normal(kbe, (cout,), jnp.float32)
        mean = 0.1 * jax.random.normal(km, (cout,), jnp.float32)
        var = 0.5 + jax.random.uniform(kv, (cout,), jnp.float32)
        scale = gamma / jnp.sqrt(var + eps)          # folded BN (eval mode)
        wf = w * scale                               # fold scale into conv weights
        bf = (b - mean) * scale + beta               # fold bias/mean/beta into shift
        if k == 0:
            wf = jnp.pad(wf, ((0, 0), (0, 0), (0, CIN_PAD - cin), (0, 0)))
        ws.append(wf.astype(jnp.bfloat16))
        bs.append(bf.reshape(1, cout))               # f32 shift
    return {"w": ws, "b": bs}


def _ref_forward(x, params):
    """Plain-JAX reference using the same folded bf16 weights and the same
    bf16 rounding points for activations as the kernel."""
    xh = jnp.transpose(x, (0, 2, 3, 1))
    xh = jnp.pad(xh, ((0, 0), (0, 0), (0, 0), (0, CIN_PAD - x.shape[1])))
    y = None
    for k in range(4):
        w = params["w"][k].astype(jnp.float32)       # (3,3,Cin,Cout) HWIO
        b = params["b"][k].reshape(1, 1, 1, -1)
        xb = xh.astype(jnp.bfloat16).astype(jnp.float32)
        y = jax.lax.conv_general_dilated(
            xb, w, window_strides=(1, 1), padding="SAME",
            dimension_numbers=("NHWC", "HWIO", "NHWC"),
            preferred_element_type=jnp.float32)
        y = jnp.maximum(y + b, 0.0)
        y = jax.lax.reduce_window(y, -jnp.inf, jax.lax.max,
                                  (1, 2, 2, 1), (1, 2, 2, 1), "VALID")
        xh = y
    y = jnp.transpose(y, (0, 3, 1, 2))
    return jnp.squeeze(y)


if __name__ == "__main__":
    key = jax.random.PRNGKey(0)
    kx, kp = jax.random.split(key)

    N, H, W = 2, 16, 16
    x = jax.random.normal(kx, (N, CIN, H, W), jnp.float32)
    params = _init_params(kp)

    y = feature_extractor_forward(x, params)
    y = jax.block_until_ready(y)

    y_ref = _ref_forward(x, params)
    assert y.shape == (N, 256), y.shape
    err = float(jnp.max(jnp.abs(y - y_ref)))
    assert jnp.allclose(y, y_ref, atol=1e-2, rtol=1e-2), err

    print("KERNEL_OK")
</pallas_src>

<mosaic_0001>
module attributes {stable_mosaic.version = 11 : i64} {
  func.func @kernel(%arg0: i32, %arg1: memref<1x332x8xbf16, #tpu.memory_space<vmem>>, %arg2: memref<3x3x8x64xbf16, #tpu.memory_space<vmem>>, %arg3: memref<1x64xf32, #tpu.memory_space<vmem>>, %arg4: memref<4x108x288xf32, #tpu.memory_space<vmem>>, %arg5: memref<3x3x64x128xbf16, #tpu.memory_space<vmem>>, %arg6: memref<1x128xf32, #tpu.memory_space<vmem>>, %arg7: memref<4x44x80xf32, #tpu.memory_space<vmem>>, %arg8: memref<3x3x128x256xbf16, #tpu.memory_space<vmem>>, %arg9: memref<1x256xf32, #tpu.memory_space<vmem>>, %arg10: memref<4x24x24xf32, #tpu.memory_space<vmem>>, %arg11: memref<3x3x256x256xbf16, #tpu.memory_space<vmem>>, %arg12: memref<1x256xf32, #tpu.memory_space<vmem>>, %arg13: memref<4x1x8xf32, #tpu.memory_space<vmem>>, %arg14: memref<1x1x256xf32, #tpu.memory_space<vmem>>, %arg15: memref<108x64xbf16, #tpu.memory_space<vmem>>, %arg16: memref<44x128xbf16, #tpu.memory_space<vmem>>, %arg17: memref<24x256xbf16, #tpu.memory_space<vmem>>) attributes {dimension_semantics = [#tpu.dimension_semantics<parallel>], iteration_bounds = array<i64: 2>, scalar_prefetch = 0 : i64, scratch_operands = 3 : i64, tpu.core_type = #tpu.core_type<tc>, window_params = [{transform_indices = @transform_0, window_bounds = array<i64: 1, 332, 8>}, {pipeline_mode = #tpu.pipeline_mode<synchronous>, transform_indices = @transform_1, window_bounds = array<i64: 3, 3, 8, 64>}, {pipeline_mode = #tpu.pipeline_mode<synchronous>, transform_indices = @transform_2, window_bounds = array<i64: 1, 64>}, {pipeline_mode = #tpu.pipeline_mode<synchronous>, transform_indices = @transform_3, window_bounds = array<i64: 4, 108, 288>}, {pipeline_mode = #tpu.pipeline_mode<synchronous>, transform_indices = @transform_4, window_bounds = array<i64: 3, 3, 64, 128>}, {pipeline_mode = #tpu.pipeline_mode<synchronous>, transform_indices = @transform_5, window_bounds = array<i64: 1, 128>}, {pipeline_mode = #tpu.pipeline_mode<synchronous>, transform_indices = @transform_6, window_bounds = array<i64: 4, 44, 80>}, {pipeline_mode = #tpu.pipeline_mode<synchronous>, transform_indices = @transform_7, window_bounds = array<i64: 3, 3, 128, 256>}, {pipeline_mode = #tpu.pipeline_mode<synchronous>, transform_indices = @transform_8, window_bounds = array<i64: 1, 256>}, {pipeline_mode = #tpu.pipeline_mode<synchronous>, transform_indices = @transform_9, window_bounds = array<i64: 4, 24, 24>}, {pipeline_mode = #tpu.pipeline_mode<synchronous>, transform_indices = @transform_10, window_bounds = array<i64: 3, 3, 256, 256>}, {pipeline_mode = #tpu.pipeline_mode<synchronous>, transform_indices = @transform_11, window_bounds = array<i64: 1, 256>}, {pipeline_mode = #tpu.pipeline_mode<synchronous>, transform_indices = @transform_12, window_bounds = array<i64: 4, 1, 8>}, {transform_indices = @transform_13, window_bounds = array<i64: 1, 1, 256>}]} {
    %cst = arith.constant 0.000000e+00 : f32
    %0 = vector.broadcast %cst : f32 to vector<288x64xf32>
    %c0 = arith.constant 0 : index
    %c0_0 = arith.constant 0 : index
    %c0_1 = arith.constant 0 : index
    %1 = vector.load %arg1[%c0, %c0_0, %c0_1] : memref<1x332x8xbf16, #tpu.memory_space<vmem>>, vector<1x288x8xbf16>
    %2 = vector.shape_cast %1 : vector<1x288x8xbf16> to vector<288x8xbf16>
    %c0_2 = arith.constant 0 : index
    %c0_3 = arith.constant 0 : index
    %c0_4 = arith.constant 0 : index
    %c0_5 = arith.constant 0 : index
    %3 = vector.load %arg2[%c0_2, %c0_3, %c0_4, %c0_5] : memref<3x3x8x64xbf16, #tpu.memory_space<vmem>>, vector<1x1x8x64xbf16>
    %4 = vector.shape_cast %3 : vector<1x1x8x64xbf16> to vector<8x64xbf16>
    %cst_6 = arith.constant dense<0.000000e+00> : vector<288x64xf32>
    %5 = tpu.matmul %2, %4, %cst_6 {dimension_numbers = #tpu.dot_dimension_numbers<[1], [0], [0], [1], [0, 0, 1, 1], [], []>} : vector<288x8xbf16>, vector<8x64xbf16>, vector<288x64xf32> -> vector<288x64xf32>
    %6 = arith.addf %0, %5 : vector<288x64xf32>
    %c0_7 = arith.constant 0 : index
    %c1 = arith.constant 1 : index
    %c0_8 = arith.constant 0 : index
    %7 = vector.load %arg1[%c0_7, %c1, %c0_8] : memref<1x332x8xbf16, #tpu.memory_space<vmem>>, vector<1x288x8xbf16>
    %8 = vector.shape_cast %7 : vector<1x288x8xbf16> to vector<288x8xbf16>
    %c0_9 = arith.constant 0 : index
    %c1_10 = arith.constant 1 : index
    %c0_11 = arith.constant 0 : index
    %c0_12 = arith.constant 0 : index
    %9 = vector.load %arg2[%c0_9, %c1_10, %c0_11, %c0_12] : memref<3x3x8x64xbf16, #tpu.memory_space<vmem>>, vector<1x1x8x64xbf16>
    %10 = vector.shape_cast %9 : vector<1x1x8x64xbf16> to vector<8x64xbf16>
    %cst_13 = arith.constant dense<0.000000e+00> : vector<288x64xf32>
    %11 = tpu.matmul %8, %10, %cst_13 {dimension_numbers = #tpu.dot_dimension_numbers<[1], [0], [0], [1], [0, 0, 1, 1], [], []>} : vector<288x8xbf16>, vector<8x64xbf16>, vector<288x64xf32> -> vector<288x64xf32>
    %12 = arith.addf %6, %11 : vector<288x64xf32>
    %c0_14 = arith.constant 0 : index
    %c2 = arith.constant 2 : index
    %c0_15 = arith.constant 0 : index
    %13 = vector.load %arg1[%c0_14, %c2, %c0_15] : memref<1x332x8xbf16, #tpu.memory_space<vmem>>, vector<1x288x8xbf16>
    %14 = vector.shape_cast %13 : vector<1x288x8xbf16> to vector<288x8xbf16>
    %c0_16 = arith.constant 0 : index
    %c2_17 = arith.constant 2 : index
    %c0_18 = arith.constant 0 : index
    %c0_19 = arith.constant 0 : index
    %15 = vector.load %arg2[%c0_16, %c2_17, %c0_18, %c0_19] : memref<3x3x8x64xbf16, #tpu.memory_space<vmem>>, vector<1x1x8x64xbf16>
    %16 = vector.shape_cast %15 : vector<1x1x8x64xbf16> to vector<8x64xbf16>
    %cst_20 = arith.constant dense<0.000000e+00> : vector<288x64xf32>
    %17 = tpu.matmul %14, %16, %cst_20 {dimension_numbers = #tpu.dot_dimension_numbers<[1], [0], [0], [1], [0, 0, 1, 1], [], []>} : vector<288x8xbf16>, vector<8x64xbf16>, vector<288x64xf32> -> vector<288x64xf32>
    %18 = arith.addf %12, %17 : vector<288x64xf32>
    %c0_21 = arith.constant 0 : index
    %c18 = arith.constant 18 : index
    %c0_22 = arith.constant 0 : index
    %19 = vector.load %arg1[%c0_21, %c18, %c0_22] : memref<1x332x8xbf16, #tpu.memory_space<vmem>>, vector<1x288x8xbf16>
    %20 = vector.shape_cast %19 : vector<1x288x8xbf16> to vector<288x8xbf16>
    %c1_23 = arith.constant 1 : index
    %c0_24 = arith.constant 0 : index
    %c0_25 = arith.constant 0 : index
    %c0_26 = arith.constant 0 : index
    %21 = vector.load %arg2[%c1_23, %c0_24, %c0_25, %c0_26] : memref<3x3x8x64xbf16, #tpu.memory_space<vmem>>, vector<1x1x8x64xbf16>
    %22 = vector.shape_cast %21 : vector<1x1x8x64xbf16> to vector<8x64xbf16>
    %cst_27 = arith.constant dense<0.000000e+00> : vector<288x64xf32>
    %23 = tpu.matmul %20, %22, %cst_27 {dimension_numbers = #tpu.dot_dimension_numbers<[1], [0], [0], [1], [0, 0, 1, 1], [], []>} : vector<288x8xbf16>, vector<8x64xbf16>, vector<288x64xf32> -> vector<288x64xf32>
    %24 = arith.addf %18, %23 : vector<288x64xf32>
    %c0_28 = arith.constant 0 : index
    %c19 = arith.constant 19 : index
    %c0_29 = arith.constant 0 : index
    %25 = vector.load %arg1[%c0_28, %c19, %c0_29] : memref<1x332x8xbf16, #tpu.memory_space<vmem>>, vector<1x288x8xbf16>
    %26 = vector.shape_cast %25 : vector<1x288x8xbf16> to vector<288x8xbf16>
    %c1_30 = arith.constant 1 : index
    %c1_31 = arith.constant 1 : index
    %c0_32 = arith.constant 0 : index
    %c0_33 = arith.constant 0 : index
    %27 = vector.load %arg2[%c1_30, %c1_31, %c0_32, %c0_33] : memref<3x3x8x64xbf16, #tpu.memory_space<vmem>>, vector<1x1x8x64xbf16>
    %28 = vector.shape_cast %27 : vector<1x1x8x64xbf16> to vector<8x64xbf16>
    %cst_34 = arith.constant dense<0.000000e+00> : vector<288x64xf32>
    %29 = tpu.matmul %26, %28, %cst_34 {dimension_numbers = #tpu.dot_dimension_numbers<[1], [0], [0], [1], [0, 0, 1, 1], [], []>} : vector<288x8xbf16>, vector<8x64xbf16>, vector<288x64xf32> -> vector<288x64xf32>
    %30 = arith.addf %24, %29 : vector<288x64xf32>
    %c0_35 = arith.constant 0 : index
    %c20 = arith.constant 20 : index
    %c0_36 = arith.constant 0 : index
    %31 = vector.load %arg1[%c0_35, %c20, %c0_36] : memref<1x332x8xbf16, #tpu.memory_space<vmem>>, vector<1x288x8xbf16>
    %32 = vector.shape_cast %31 : vector<1x288x8xbf16> to vector<288x8xbf16>
    %c1_37 = arith.constant 1 : index
    %c2_38 = arith.constant 2 : index
    %c0_39 = arith.constant 0 : index
    %c0_40 = arith.constant 0 : index
    %33 = vector.load %arg2[%c1_37, %c2_38, %c0_39, %c0_40] : memref<3x3x8x64xbf16, #tpu.memory_space<vmem>>, vector<1x1x8x64xbf16>
    %34 = vector.shape_cast %33 : vector<1x1x8x64xbf16> to vector<8x64xbf16>
    %cst_41 = arith.constant dense<0.000000e+00> : vector<288x64xf32>
    %35 = tpu.matmul %32, %34, %cst_41 {dimension_numbers = #tpu.dot_dimension_numbers<[1], [0], [0], [1], [0, 0, 1, 1], [], []>} : vector<288x8xbf16>, vector<8x64xbf16>, vector<288x64xf32> -> vector<288x64xf32>
    %36 = arith.addf %30, %35 : vector<288x64xf32>
    %c0_42 = arith.constant 0 : index
    %c36 = arith.constant 36 : index
    %c0_43 = arith.constant 0 : index
    %37 = vector.load %arg1[%c0_42, %c36, %c0_43] : memref<1x332x8xbf16, #tpu.memory_space<vmem>>, vector<1x288x8xbf16>
    %38 = vector.shape_cast %37 : vector<1x288x8xbf16> to vector<288x8xbf16>
    %c2_44 = arith.constant 2 : index
    %c0_45 = arith.constant 0 : index
    %c0_46 = arith.constant 0 : index
    %c0_47 = arith.constant 0 : index
    %39 = vector.load %arg2[%c2_44, %c0_45, %c0_46, %c0_47] : memref<3x3x8x64xbf16, #tpu.memory_space<vmem>>, vector<1x1x8x64xbf16>
    %40 = vector.shape_cast %39 : vector<1x1x8x64xbf16> to vector<8x64xbf16>
    %cst_48 = arith.constant dense<0.000000e+00> : vector<288x64xf32>
    %41 = tpu.matmul %38, %40, %cst_48 {dimension_numbers = #tpu.dot_dimension_numbers<[1], [0], [0], [1], [0, 0, 1, 1], [], []>} : vector<288x8xbf16>, vector<8x64xbf16>, vector<288x64xf32> -> vector<288x64xf32>
    %42 = arith.addf %36, %41 : vector<288x64xf32>
    %c0_49 = arith.constant 0 : index
    %c37 = arith.constant 37 : index
    %c0_50 = arith.constant 0 : index
    %43 = vector.load %arg1[%c0_49, %c37, %c0_50] : memref<1x332x8xbf16, #tpu.memory_space<vmem>>, vector<1x288x8xbf16>
    %44 = vector.shape_cast %43 : vector<1x288x8xbf16> to vector<288x8xbf16>
    %c2_51 = arith.constant 2 : index
    %c1_52 = arith.constant 1 : index
    %c0_53 = arith.constant 0 : index
    %c0_54 = arith.constant 0 : index
    %45 = vector.load %arg2[%c2_51, %c1_52, %c0_53, %c0_54] : memref<3x3x8x64xbf16, #tpu.memory_space<vmem>>, vector<1x1x8x64xbf16>
    %46 = vector.shape_cast %45 : vector<1x1x8x64xbf16> to vector<8x64xbf16>
    %cst_55 = arith.constant dense<0.000000e+00> : vector<288x64xf32>
    %47 = tpu.matmul %44, %46, %cst_55 {dimension_numbers = #tpu.dot_dimension_numbers<[1], [0], [0], [1], [0, 0, 1, 1], [], []>} : vector<288x8xbf16>, vector<8x64xbf16>, vector<288x64xf32> -> vector<288x64xf32>
    %48 = arith.addf %42, %47 : vector<288x64xf32>
    %c0_56 = arith.constant 0 : index
    %c38 = arith.constant 38 : index
    %c0_57 = arith.constant 0 : index
    %49 = vector.load %arg1[%c0_56, %c38, %c0_57] : memref<1x332x8xbf16, #tpu.memory_space<vmem>>, vector<1x288x8xbf16>
    %50 = vector.shape_cast %49 : vector<1x288x8xbf16> to vector<288x8xbf16>
    %c2_58 = arith.constant 2 : index
    %c2_59 = arith.constant 2 : index
    %c0_60 = arith.constant 0 : index
    %c0_61 = arith.constant 0 : index
    %51 = vector.load %arg2[%c2_58, %c2_59, %c0_60, %c0_61] : memref<3x3x8x64xbf16, #tpu.memory_space<vmem>>, vector<1x1x8x64xbf16>
    %52 = vector.shape_cast %51 : vector<1x1x8x64xbf16> to vector<8x64xbf16>
    %cst_62 = arith.constant dense<0.000000e+00> : vector<288x64xf32>
    %53 = tpu.matmul %50, %52, %cst_62 {dimension_numbers = #tpu.dot_dimension_numbers<[1], [0], [0], [1], [0, 0, 1, 1], [], []>} : vector<288x8xbf16>, vector<8x64xbf16>, vector<288x64xf32> -> vector<288x64xf32>
    %54 = arith.addf %48, %53 : vector<288x64xf32>
    %c0_63 = arith.constant 0 : index
    %c0_64 = arith.constant 0 : index
    %55 = vector.load %arg3[%c0_63, %c0_64] : memref<1x64xf32, #tpu.memory_space<vmem>>, vector<1x64xf32>
    %56 = vector.broadcast %55 : vector<1x64xf32> to vector<288x64xf32>
    %57 = arith.addf %54, %56 : vector<288x64xf32>
    %cst_65 = arith.constant 0.000000e+00 : f32
    %58 = vector.broadcast %cst_65 : f32 to vector<288x64xf32>
    %59 = arith.maximumf %57, %58 : vector<288x64xf32>
    %c0_66 = arith.constant 0 : index
    %c0_67 = arith.constant 0 : index
    %c0_68 = arith.constant 0 : index
    %60 = vector.load %arg4[%c0_66, %c0_67, %c0_68] : memref<4x108x288xf32, #tpu.memory_space<vmem>>, vector<1x108x288xf32>
    %61 = vector.shape_cast %60 : vector<1x108x288xf32> to vector<108x288xf32>
    %cst_69 = arith.constant dense<0.000000e+00> : vector<108x64xf32>
    %62 = tpu.matmul %61, %59, %cst_69 {dimension_numbers = #tpu.dot_dimension_numbers<[1], [0], [0], [1], [0, 0, 1, 1], [], []>} : vector<108x288xf32>, vector<288x64xf32>, vector<108x64xf32> -> vector<108x64xf32>
    %c1_70 = arith.constant 1 : index
    %c0_71 = arith.constant 0 : index
    %c0_72 = arith.constant 0 : index
    %63 = vector.load %arg4[%c1_70, %c0_71, %c0_72] : memref<4x108x288xf32, #tpu.memory_space<vmem>>, vector<1x108x288xf32>
    %64 = vector.shape_cast %63 : vector<1x108x288xf32> to vector<108x288xf32>
    %cst_73 = arith.constant dense<0.000000e+00> : vector<108x64xf32>
    %65 = tpu.matmul %64, %59, %cst_73 {dimension_numbers = #tpu.dot_dimension_numbers<[1], [0], [0], [1], [0, 0, 1, 1], [], []>} : vector<108x288xf32>, vector<288x64xf32>, vector<108x64xf32> -> vector<108x64xf32>
    %66 = arith.maximumf %62, %65 : vector<108x64xf32>
    %c2_74 = arith.constant 2 : index
    %c0_75 = arith.constant 0 : index
    %c0_76 = arith.constant 0 : index
    %67 = vector.load %arg4[%c2_74, %c0_75, %c0_76] : memref<4x108x288xf32, #tpu.memory_space<vmem>>, vector<1x108x288xf32>
    %68 = vector.shape_cast %67 : vector<1x108x288xf32> to vector<108x288xf32>
    %cst_77 = arith.constant dense<0.000000e+00> : vector<108x64xf32>
    %69 = tpu.matmul %68, %59, %cst_77 {dimension_numbers = #tpu.dot_dimension_numbers<[1], [0], [0], [1], [0, 0, 1, 1], [], []>} : vector<108x288xf32>, vector<288x64xf32>, vector<108x64xf32> -> vector<108x64xf32>
    %70 = arith.maximumf %66, %69 : vector<108x64xf32>
    %c3 = arith.constant 3 : index
    %c0_78 = arith.constant 0 : index
    %c0_79 = arith.constant 0 : index
    %71 = vector.load %arg4[%c3, %c0_78, %c0_79] : memref<4x108x288xf32, #tpu.memory_space<vmem>>, vector<1x108x288xf32>
    %72 = vector.shape_cast %71 : vector<1x108x288xf32> to vector<108x288xf32>
    %cst_80 = arith.constant dense<0.000000e+00> : vector<108x64xf32>
    %73 = tpu.matmul %72, %59, %cst_80 {dimension_numbers = #tpu.dot_dimension_numbers<[1], [0], [0], [1], [0, 0, 1, 1], [], []>} : vector<108x288xf32>, vector<288x64xf32>, vector<108x64xf32> -> vector<108x64xf32>
    %74 = arith.maximumf %70, %73 : vector<108x64xf32>
    %75 = arith.truncf %74 : vector<108x64xf32> to vector<108x64xbf16>
    %c0_81 = arith.constant 0 : index
    %c0_82 = arith.constant 0 : index
    %76 = vector.load %arg15[%c0_81, %c0_82] : memref<108x64xbf16, #tpu.memory_space<vmem>>, vector<108x64xbf16>
    tpu.vector_store %arg15[%c0_81, %c0_82], %75 {strides = array<i32>} : memref<108x64xbf16, #tpu.memory_space<vmem>>, vector<108x64xbf16>,
    %cst_83 = arith.constant 0.000000e+00 : f32
    %77 = vector.broadcast %cst_83 : f32 to vector<80x128xf32>
    %c0_84 = arith.constant 0 : index
    %c0_85 = arith.constant 0 : index
    %78 = vector.load %arg15[%c0_84, %c0_85] : memref<108x64xbf16, #tpu.memory_space<vmem>>, vector<80x64xbf16>
    %c0_86 = arith.constant 0 : index
    %c0_87 = arith.constant 0 : index
    %c0_88 = arith.constant 0 : index
    %c0_89 = arith.constant 0 : index
    %79 = vector.load %arg5[%c0_86, %c0_87, %c0_88, %c0_89] : memref<3x3x64x128xbf16, #tpu.memory_space<vmem>>, vector<1x1x64x128xbf16>
    %80 = vector.shape_cast %79 : vector<1x1x64x128xbf16> to vector<64x128xbf16>
    %cst_90 = arith.constant dense<0.000000e+00> : vector<80x128xf32>
    %81 = tpu.matmul %78, %80, %cst_90 {dimension_numbers = #tpu.dot_dimension_numbers<[1], [0], [0], [1], [0, 0, 1, 1], [], []>} : vector<80x64xbf16>, vector<64x128xbf16>, vector<80x128xf32> -> vector<80x128xf32>
    %82 = arith.addf %77, %81 : vector<80x128xf32>
    %c1_91 = arith.constant 1 : index
    %c0_92 = arith.constant 0 : index
    %83 = vector.load %arg15[%c1_91, %c0_92] : memref<108x64xbf16, #tpu.memory_space<vmem>>, vector<80x64xbf16>
    %c0_93 = arith.constant 0 : index
    %c1_94 = arith.constant 1 : index
    %c0_95 = arith.constant 0 : index
    %c0_96 = arith.constant 0 : index
    %84 = vector.load %arg5[%c0_93, %c1_94, %c0_95, %c0_96] : memref<3x3x64x128xbf16, #tpu.memory_space<vmem>>, vector<1x1x64x128xbf16>
    %85 = vector.shape_cast %84 : vector<1x1x64x128xbf16> to vector<64x128xbf16>
    %cst_97 = arith.constant dense<0.000000e+00> : vector<80x128xf32>
    %86 = tpu.matmul %83, %85, %cst_97 {dimension_numbers = #tpu.dot_dimension_numbers<[1], [0], [0], [1], [0, 0, 1, 1], [], []>} : vector<80x64xbf16>, vector<64x128xbf16>, vector<80x128xf32> -> vector<80x128xf32>
    %87 = arith.addf %82, %86 : vector<80x128xf32>
    %c2_98 = arith.constant 2 : index
    %c0_99 = arith.constant 0 : index
    %88 = vector.load %arg15[%c2_98, %c0_99] : memref<108x64xbf16, #tpu.memory_space<vmem>>, vector<80x64xbf16>
    %c0_100 = arith.constant 0 : index
    %c2_101 = arith.constant 2 : index
    %c0_102 = arith.constant 0 : index
    %c0_103 = arith.constant 0 : index
    %89 = vector.load %arg5[%c0_100, %c2_101, %c0_102, %c0_103] : memref<3x3x64x128xbf16, #tpu.memory_space<vmem>>, vector<1x1x64x128xbf16>
    %90 = vector.shape_cast %89 : vector<1x1x64x128xbf16> to vector<64x128xbf16>
    %cst_104 = arith.constant dense<0.000000e+00> : vector<80x128xf32>
    %91 = tpu.matmul %88, %90, %cst_104 {dimension_numbers = #tpu.dot_dimension_numbers<[1], [0], [0], [1], [0, 0, 1, 1], [], []>} : vector<80x64xbf16>, vector<64x128xbf16>, vector<80x128xf32> -> vector<80x128xf32>
    %92 = arith.addf %87, %91 : vector<80x128xf32>
    %c10 = arith.constant 10 : index
    %c0_105 = arith.constant 0 : index
    %93 = vector.load %arg15[%c10, %c0_105] : memref<108x64xbf16, #tpu.memory_space<vmem>>, vector<80x64xbf16>
    %c1_106 = arith.constant 1 : index
    %c0_107 = arith.constant 0 : index
    %c0_108 = arith.constant 0 : index
    %c0_109 = arith.constant 0 : index
    %94 = vector.load %arg5[%c1_106, %c0_107, %c0_108, %c0_109] : memref<3x3x64x128xbf16, #tpu.memory_space<vmem>>, vector<1x1x64x128xbf16>
    %95 = vector.shape_cast %94 : vector<1x1x64x128xbf16> to vector<64x128xbf16>
    %cst_110 = arith.constant dense<0.000000e+00> : vector<80x128xf32>
    %96 = tpu.matmul %93, %95, %cst_110 {dimension_numbers = #tpu.dot_dimension_numbers<[1], [0], [0], [1], [0, 0, 1, 1], [], []>} : vector<80x64xbf16>, vector<64x128xbf16>, vector<80x128xf32> -> vector<80x128xf32>
    %97 = arith.addf %92, %96 : vector<80x128xf32>
    %c11 = arith.constant 11 : index
    %c0_111 = arith.constant 0 : index
    %98 = vector.load %arg15[%c11, %c0_111] : memref<108x64xbf16, #tpu.memory_space<vmem>>, vector<80x64xbf16>
    %c1_112 = arith.constant 1 : index
    %c1_113 = arith.constant 1 : index
    %c0_114 = arith.constant 0 : index
    %c0_115 = arith.constant 0 : index
    %99 = vector.load %arg5[%c1_112, %c1_113, %c0_114, %c0_115] : memref<3x3x64x128xbf16, #tpu.memory_space<vmem>>, vector<1x1x64x128xbf16>
    %100 = vector.shape_cast %99 : vector<1x1x64x128xbf16> to vector<64x128xbf16>
    %cst_116 = arith.constant dense<0.000000e+00> : vector<80x128xf32>
    %101 = tpu.matmul %98, %100, %cst_116 {dimension_numbers = #tpu.dot_dimension_numbers<[1], [0], [0], [1], [0, 0, 1, 1], [], []>} : vector<80x64xbf16>, vector<64x128xbf16>, vector<80x128xf32> -> vector<80x128xf32>
    %102 = arith.addf %97, %101 : vector<80x128xf32>
    %c12 = arith.constant 12 : index
    %c0_117 = arith.constant 0 : index
    %103 = vector.load %arg15[%c12, %c0_117] : memref<108x64xbf16, #tpu.memory_space<vmem>>, vector<80x64xbf16>
    %c1_118 = arith.constant 1 : index
    %c2_119 = arith.constant 2 : index
    %c0_120 = arith.constant 0 : index
    %c0_121 = arith.constant 0 : index
    %104 = vector.load %arg5[%c1_118, %c2_119, %c0_120, %c0_121] : memref<3x3x64x128xbf16, #tpu.memory_space<vmem>>, vector<1x1x64x128xbf16>
    %105 = vector.shape_cast %104 : vector<1x1x64x128xbf16> to vector<64x128xbf16>
    %cst_122 = arith.constant dense<0.000000e+00> : vector<80x128xf32>
    %106 = tpu.matmul %103, %105, %cst_122 {dimension_numbers = #tpu.dot_dimension_numbers<[1], [0], [0], [1], [0, 0, 1, 1], [], []>} : vector<80x64xbf16>, vector<64x128xbf16>, vector<80x128xf32> -> vector<80x128xf32>
    %107 = arith.addf %102, %106 : vector<80x128xf32>
    %c20_123 = arith.constant 20 : index
    %c0_124 = arith.constant 0 : index
    %108 = vector.load %arg15[%c20_123, %c0_124] : memref<108x64xbf16, #tpu.memory_space<vmem>>, vector<80x64xbf16>
    %c2_125 = arith.constant 2 : index
    %c0_126 = arith.constant 0 : index
    %c0_127 = arith.constant 0 : index
    %c0_128 = arith.constant 0 : index
    %109 = vector.load %arg5[%c2_125, %c0_126, %c0_127, %c0_128] : memref<3x3x64x128xbf16, #tpu.memory_space<vmem>>, vector<1x1x64x128xbf16>
    %110 = vector.shape_cast %109 : vector<1x1x64x128xbf16> to vector<64x128xbf16>
    %cst_129 = arith.constant dense<0.000000e+00> : vector<80x128xf32>
    %111 = tpu.matmul %108, %110, %cst_129 {dimension_numbers = #tpu.dot_dimension_numbers<[1], [0], [0], [1], [0, 0, 1, 1], [], []>} : vector<80x64xbf16>, vector<64x128xbf16>, vector<80x128xf32> -> vector<80x128xf32>
    %112 = arith.addf %107, %111 : vector<80x128xf32>
    %c21 = arith.constant 21 : index
    %c0_130 = arith.constant 0 : index
    %113 = vector.load %arg15[%c21, %c0_130] : memref<108x64xbf16, #tpu.memory_space<vmem>>, vector<80x64xbf16>
    %c2_131 = arith.constant 2 : index
    %c1_132 = arith.constant 1 : index
    %c0_133 = arith.constant 0 : index
    %c0_134 = arith.constant 0 : index
    %114 = vector.load %arg5[%c2_131, %c1_132, %c0_133, %c0_134] : memref<3x3x64x128xbf16, #tpu.memory_space<vmem>>, vector<1x1x64x128xbf16>
    %115 = vector.shape_cast %114 : vector<1x1x64x128xbf16> to vector<64x128xbf16>
    %cst_135 = arith.constant dense<0.000000e+00> : vector<80x128xf32>
    %116 = tpu.matmul %113, %115, %cst_135 {dimension_numbers = #tpu.dot_dimension_numbers<[1], [0], [0], [1], [0, 0, 1, 1], [], []>} : vector<80x64xbf16>, vector<64x128xbf16>, vector<80x128xf32> -> vector<80x128xf32>
    %117 = arith.addf %112, %116 : vector<80x128xf32>
    %c22 = arith.constant 22 : index
    %c0_136 = arith.constant 0 : index
    %118 = vector.load %arg15[%c22, %c0_136] : memref<108x64xbf16, #tpu.memory_space<vmem>>, vector<80x64xbf16>
    %c2_137 = arith.constant 2 : index
    %c2_138 = arith.constant 2 : index
    %c0_139 = arith.constant 0 : index
    %c0_140 = arith.constant 0 : index
    %119 = vector.load %arg5[%c2_137, %c2_138, %c0_139, %c0_140] : memref<3x3x64x128xbf16, #tpu.memory_space<vmem>>, vector<1x1x64x128xbf16>
    %120 = vector.shape_cast %119 : vector<1x1x64x128xbf16> to vector<64x128xbf16>
    %cst_141 = arith.constant dense<0.000000e+00> : vector<80x128xf32>
    %121 = tpu.matmul %118, %120, %cst_141 {dimension_numbers = #tpu.dot_dimension_numbers<[1], [0], [0], [1], [0, 0, 1, 1], [], []>} : vector<80x64xbf16>, vector<64x128xbf16>, vector<80x128xf32> -> vector<80x128xf32>
    %122 = arith.addf %117, %121 : vector<80x128xf32>
    %c0_142 = arith.constant 0 : index
    %c0_143 = arith.constant 0 : index
    %123 = vector.load %arg6[%c0_142, %c0_143] : memref<1x128xf32, #tpu.memory_space<vmem>>, vector<1x128xf32>
    %124 = vector.broadcast %123 : vector<1x128xf32> to vector<80x128xf32>
    %125 = arith.addf %122, %124 : vector<80x128xf32>
    %cst_144 = arith.constant 0.000000e+00 : f32
    %126 = vector.broadcast %cst_144 : f32 to vector<80x128xf32>
    %127 = arith.maximumf %125, %126 : vector<80x128xf32>
    %c0_145 = arith.constant 0 : index
    %c0_146 = arith.constant 0 : index
    %c0_147 = arith.constant 0 : index
    %128 = vector.load %arg7[%c0_145, %c0_146, %c0_147] : memref<4x44x80xf32, #tpu.memory_space<vmem>>, vector<1x44x80xf32>
    %129 = vector.shape_cast %128 : vector<1x44x80xf32> to vector<44x80xf32>
    %cst_148 = arith.constant dense<0.000000e+00> : vector<44x128xf32>
    %130 = tpu.matmul %129, %127, %cst_148 {dimension_numbers = #tpu.dot_dimension_numbers<[1], [0], [0], [1], [0, 0, 1, 1], [], []>} : vector<44x80xf32>, vector<80x128xf32>, vector<44x128xf32> -> vector<44x128xf32>
    %c1_149 = arith.constant 1 : index
    %c0_150 = arith.constant 0 : index
    %c0_151 = arith.constant 0 : index
    %131 = vector.load %arg7[%c1_149, %c0_150, %c0_151] : memref<4x44x80xf32, #tpu.memory_space<vmem>>, vector<1x44x80xf32>
    %132 = vector.shape_cast %131 : vector<1x44x80xf32> to vector<44x80xf32>
    %cst_152 = arith.constant dense<0.000000e+00> : vector<44x128xf32>
    %133 = tpu.matmul %132, %127, %cst_152 {dimension_numbers = #tpu.dot_dimension_numbers<[1], [0], [0], [1], [0, 0, 1, 1], [], []>} : vector<44x80xf32>, vector<80x128xf32>, vector<44x128xf32> -> vector<44x128xf32>
    %134 = arith.maximumf %130, %133 : vector<44x128xf32>
    %c2_153 = arith.constant 2 : index
    %c0_154 = arith.constant 0 : index
    %c0_155 = arith.constant 0 : index
    %135 = vector.load %arg7[%c2_153, %c0_154, %c0_155] : memref<4x44x80xf32, #tpu.memory_space<vmem>>, vector<1x44x80xf32>
    %136 = vector.shape_cast %135 : vector<1x44x80xf32> to vector<44x80xf32>
    %cst_156 = arith.constant dense<0.000000e+00> : vector<44x128xf32>
    %137 = tpu.matmul %136, %127, %cst_156 {dimension_numbers = #tpu.dot_dimension_numbers<[1], [0], [0], [1], [0, 0, 1, 1], [], []>} : vector<44x80xf32>, vector<80x128xf32>, vector<44x128xf32> -> vector<44x128xf32>
    %138 = arith.maximumf %134, %137 : vector<44x128xf32>
    %c3_157 = arith.constant 3 : index
    %c0_158 = arith.constant 0 : index
    %c0_159 = arith.constant 0 : index
    %139 = vector.load %arg7[%c3_157, %c0_158, %c0_159] : memref<4x44x80xf32, #tpu.memory_space<vmem>>, vector<1x44x80xf32>
    %140 = vector.shape_cast %139 : vector<1x44x80xf32> to vector<44x80xf32>
    %cst_160 = arith.constant dense<0.000000e+00> : vector<44x128xf32>
    %141 = tpu.matmul %140, %127, %cst_160 {dimension_numbers = #tpu.dot_dimension_numbers<[1], [0], [0], [1], [0, 0, 1, 1], [], []>} : vector<44x80xf32>, vector<80x128xf32>, vector<44x128xf32> -> vector<44x128xf32>
    %142 = arith.maximumf %138, %141 : vector<44x128xf32>
    %143 = arith.truncf %142 : vector<44x128xf32> to vector<44x128xbf16>
    %c0_161 = arith.constant 0 : index
    %c0_162 = arith.constant 0 : index
    %144 = vector.load %arg16[%c0_161, %c0_162] : memref<44x128xbf16, #tpu.memory_space<vmem>>, vector<44x128xbf16>
    tpu.vector_store %arg16[%c0_161, %c0_162], %143 {strides = array<i32>} : memref<44x128xbf16, #tpu.memory_space<vmem>>, vector<44x128xbf16>,
    %cst_163 = arith.constant 0.000000e+00 : f32
    %145 = vector.broadcast %cst_163 : f32 to vector<24x256xf32>
    %c0_164 = arith.constant 0 : index
    %c0_165 = arith.constant 0 : index
    %146 = vector.load %arg16[%c0_164, %c0_165] : memref<44x128xbf16, #tpu.memory_space<vmem>>, vector<24x128xbf16>
    %c0_166 = arith.constant 0 : index
    %c0_167 = arith.constant 0 : index
    %c0_168 = arith.constant 0 : index
    %c0_169 = arith.constant 0 : index
    %147 = vector.load %arg8[%c0_166, %c0_167, %c0_168, %c0_169] : memref<3x3x128x256xbf16, #tpu.memory_space<vmem>>, vector<1x1x128x256xbf16>
    %148 = vector.shape_cast %147 : vector<1x1x128x256xbf16> to vector<128x256xbf16>
    %cst_170 = arith.constant dense<0.000000e+00> : vector<24x256xf32>
    %149 = tpu.matmul %146, %148, %cst_170 {dimension_numbers = #tpu.dot_dimension_numbers<[1], [0], [0], [1], [0, 0, 1, 1], [], []>} : vector<24x128xbf16>, vector<128x256xbf16>, vector<24x256xf32> -> vector<24x256xf32>
    %150 = arith.addf %145, %149 : vector<24x256xf32>
    %c1_171 = arith.constant 1 : index
    %c0_172 = arith.constant 0 : index
    %151 = vector.load %arg16[%c1_171, %c0_172] : memref<44x128xbf16, #tpu.memory_space<vmem>>, vector<24x128xbf16>
    %c0_173 = arith.constant 0 : index
    %c1_174 = arith.constant 1 : index
    %c0_175 = arith.constant 0 : index
    %c0_176 = arith.constant 0 : index
    %152 = vector.load %arg8[%c0_173, %c1_174, %c0_175, %c0_176] : memref<3x3x128x256xbf16, #tpu.memory_space<vmem>>, vector<1x1x128x256xbf16>
    %153 = vector.shape_cast %152 : vector<1x1x128x256xbf16> to vector<128x256xbf16>
    %cst_177 = arith.constant dense<0.000000e+00> : vector<24x256xf32>
    %154 = tpu.matmul %151, %153, %cst_177 {dimension_numbers = #tpu.dot_dimension_numbers<[1], [0], [0], [1], [0, 0, 1, 1], [], []>} : vector<24x128xbf16>, vector<128x256xbf16>, vector<24x256xf32> -> vector<24x256xf32>
    %155 = arith.addf %150, %154 : vector<24x256xf32>
    %c2_178 = arith.constant 2 : index
    %c0_179 = arith.constant 0 : index
    %156 = vector.load %arg16[%c2_178, %c0_179] : memref<44x128xbf16, #tpu.memory_space<vmem>>, vector<24x128xbf16>
    %c0_180 = arith.constant 0 : index
    %c2_181 = arith.constant 2 : index
    %c0_182 = arith.constant 0 : index
    %c0_183 = arith.constant 0 : index
    %157 = vector.load %arg8[%c0_180, %c2_181, %c0_182, %c0_183] : memref<3x3x128x256xbf16, #tpu.memory_space<vmem>>, vector<1x1x128x256xbf16>
    %158 = vector.shape_cast %157 : vector<1x1x128x256xbf16> to vector<128x256xbf16>
    %cst_184 = arith.constant dense<0.000000e+00> : vector<24x256xf32>
    %159 = tpu.matmul %156, %158, %cst_184 {dimension_numbers = #tpu.dot_dimension_numbers<[1], [0], [0], [1], [0, 0, 1, 1], [], []>} : vector<24x128xbf16>, vector<128x256xbf16>, vector<24x256xf32> -> vector<24x256xf32>
    %160 = arith.addf %155, %159 : vector<24x256xf32>
    %c6 = arith.constant 6 : index
    %c0_185 = arith.constant 0 : index
    %161 = vector.load %arg16[%c6, %c0_185] : memref<44x128xbf16, #tpu.memory_space<vmem>>, vector<24x128xbf16>
    %c1_186 = arith.constant 1 : index
    %c0_187 = arith.constant 0 : index
    %c0_188 = arith.constant 0 : index
    %c0_189 = arith.constant 0 : index
    %162 = vector.load %arg8[%c1_186, %c0_187, %c0_188, %c0_189] : memref<3x3x128x256xbf16, #tpu.memory_space<vmem>>, vector<1x1x128x256xbf16>
    %163 = vector.shape_cast %162 : vector<1x1x128x256xbf16> to vector<128x256xbf16>
    %cst_190 = arith.constant dense<0.000000e+00> : vector<24x256xf32>
    %164 = tpu.matmul %161, %163, %cst_190 {dimension_numbers = #tpu.dot_dimension_numbers<[1], [0], [0], [1], [0, 0, 1, 1], [], []>} : vector<24x128xbf16>, vector<128x256xbf16>, vector<24x256xf32> -> vector<24x256xf32>
    %165 = arith.addf %160, %164 : vector<24x256xf32>
    %c7 = arith.constant 7 : index
    %c0_191 = arith.constant 0 : index
    %166 = vector.load %arg16[%c7, %c0_191] : memref<44x128xbf16, #tpu.memory_space<vmem>>, vector<24x128xbf16>
    %c1_192 = arith.constant 1 : index
    %c1_193 = arith.constant 1 : index
    %c0_194 = arith.constant 0 : index
    %c0_195 = arith.constant 0 : index
    %167 = vector.load %arg8[%c1_192, %c1_193, %c0_194, %c0_195] : memref<3x3x128x256xbf16, #tpu.memory_space<vmem>>, vector<1x1x128x256xbf16>
    %168 = vector.shape_cast %167 : vector<1x1x128x256xbf16> to vector<128x256xbf16>
    %cst_196 = arith.constant dense<0.000000e+00> : vector<24x256xf32>
    %169 = tpu.matmul %166, %168, %cst_196 {dimension_numbers = #tpu.dot_dimension_numbers<[1], [0], [0], [1], [0, 0, 1, 1], [], []>} : vector<24x128xbf16>, vector<128x256xbf16>, vector<24x256xf32> -> vector<24x256xf32>
    %170 = arith.addf %165, %169 : vector<24x256xf32>
    %c8 = arith.constant 8 : index
    %c0_197 = arith.constant 0 : index
    %171 = vector.load %arg16[%c8, %c0_197] : memref<44x128xbf16, #tpu.memory_space<vmem>>, vector<24x128xbf16>
    %c1_198 = arith.constant 1 : index
    %c2_199 = arith.constant 2 : index
    %c0_200 = arith.constant 0 : index
    %c0_201 = arith.constant 0 : index
    %172 = vector.load %arg8[%c1_198, %c2_199, %c0_200, %c0_201] : memref<3x3x128x256xbf16, #tpu.memory_space<vmem>>, vector<1x1x128x256xbf16>
    %173 = vector.shape_cast %172 : vector<1x1x128x256xbf16> to vector<128x256xbf16>
    %cst_202 = arith.constant dense<0.000000e+00> : vector<24x256xf32>
    %174 = tpu.matmul %171, %173, %cst_202 {dimension_numbers = #tpu.dot_dimension_numbers<[1], [0], [0], [1], [0, 0, 1, 1], [], []>} : vector<24x128xbf16>, vector<128x256xbf16>, vector<24x256xf32> -> vector<24x256xf32>
    %175 = arith.addf %170, %174 : vector<24x256xf32>
    %c12_203 = arith.constant 12 : index
    %c0_204 = arith.constant 0 : index
    %176 = vector.load %arg16[%c12_203, %c0_204] : memref<44x128xbf16, #tpu.memory_space<vmem>>, vector<24x128xbf16>
    %c2_205 = arith.constant 2 : index
    %c0_206 = arith.constant 0 : index
    %c0_207 = arith.constant 0 : index
    %c0_208 = arith.constant 0 : index
    %177 = vector.load %arg8[%c2_205, %c0_206, %c0_207, %c0_208] : memref<3x3x128x256xbf16, #tpu.memory_space<vmem>>, vector<1x1x128x256xbf16>
    %178 = vector.shape_cast %177 : vector<1x1x128x256xbf16> to vector<128x256xbf16>
    %cst_209 = arith.constant dense<0.000000e+00> : vector<24x256xf32>
    %179 = tpu.matmul %176, %178, %cst_209 {dimension_numbers = #tpu.dot_dimension_numbers<[1], [0], [0], [1], [0, 0, 1, 1], [], []>} : vector<24x128xbf16>, vector<128x256xbf16>, vector<24x256xf32> -> vector<24x256xf32>
    %180 = arith.addf %175, %179 : vector<24x256xf32>
    %c13 = arith.constant 13 : index
    %c0_210 = arith.constant 0 : index
    %181 = vector.load %arg16[%c13, %c0_210] : memref<44x128xbf16, #tpu.memory_space<vmem>>, vector<24x128xbf16>
    %c2_211 = arith.constant 2 : index
    %c1_212 = arith.constant 1 : index
    %c0_213 = arith.constant 0 : index
    %c0_214 = arith.constant 0 : index
    %182 = vector.load %arg8[%c2_211, %c1_212, %c0_213, %c0_214] : memref<3x3x128x256xbf16, #tpu.memory_space<vmem>>, vector<1x1x128x256xbf16>
    %183 = vector.shape_cast %182 : vector<1x1x128x256xbf16> to vector<128x256xbf16>
    %cst_215 = arith.constant dense<0.000000e+00> : vector<24x256xf32>
    %184 = tpu.matmul %181, %183, %cst_215 {dimension_numbers = #tpu.dot_dimension_numbers<[1], [0], [0], [1], [0, 0, 1, 1], [], []>} : vector<24x128xbf16>, vector<128x256xbf16>, vector<24x256xf32> -> vector<24x256xf32>
    %185 = arith.addf %180, %184 : vector<24x256xf32>
    %c14 = arith.constant 14 : index
    %c0_216 = arith.constant 0 : index
    %186 = vector.load %arg16[%c14, %c0_216] : memref<44x128xbf16, #tpu.memory_space<vmem>>, vector<24x128xbf16>
    %c2_217 = arith.constant 2 : index
    %c2_218 = arith.constant 2 : index
    %c0_219 = arith.constant 0 : index
    %c0_220 = arith.constant 0 : index
    %187 = vector.load %arg8[%c2_217, %c2_218, %c0_219, %c0_220] : memref<3x3x128x256xbf16, #tpu.memory_space<vmem>>, vector<1x1x128x256xbf16>
    %188 = vector.shape_cast %187 : vector<1x1x128x256xbf16> to vector<128x256xbf16>
    %cst_221 = arith.constant dense<0.000000e+00> : vector<24x256xf32>
    %189 = tpu.matmul %186, %188, %cst_221 {dimension_numbers = #tpu.dot_dimension_numbers<[1], [0], [0], [1], [0, 0, 1, 1], [], []>} : vector<24x128xbf16>, vector<128x256xbf16>, vector<24x256xf32> -> vector<24x256xf32>
    %190 = arith.addf %185, %189 : vector<24x256xf32>
    %c0_222 = arith.constant 0 : index
    %c0_223 = arith.constant 0 : index
    %191 = vector.load %arg9[%c0_222, %c0_223] : memref<1x256xf32, #tpu.memory_space<vmem>>, vector<1x256xf32>
    %192 = vector.broadcast %191 : vector<1x256xf32> to vector<24x256xf32>
    %193 = arith.addf %190, %192 : vector<24x256xf32>
    %cst_224 = arith.constant 0.000000e+00 : f32
    %194 = vector.broadcast %cst_224 : f32 to vector<24x256xf32>
    %195 = arith.maximumf %193, %194 : vector<24x256xf32>
    %c0_225 = arith.constant 0 : index
    %c0_226 = arith.constant 0 : index
    %c0_227 = arith.constant 0 : index
    %196 = vector.load %arg10[%c0_225, %c0_226, %c0_227] : memref<4x24x24xf32, #tpu.memory_space<vmem>>, vector<1x24x24xf32>
    %197 = vector.shape_cast %196 : vector<1x24x24xf32> to vector<24x24xf32>
    %cst_228 = arith.constant dense<0.000000e+00> : vector<24x256xf32>
    %198 = tpu.matmul %197, %195, %cst_228 {dimension_numbers = #tpu.dot_dimension_numbers<[1], [0], [0], [1], [0, 0, 1, 1], [], []>} : vector<24x24xf32>, vector<24x256xf32>, vector<24x256xf32> -> vector<24x256xf32>
    %c1_229 = arith.constant 1 : index
    %c0_230 = arith.constant 0 : index
    %c0_231 = arith.constant 0 : index
    %199 = vector.load %arg10[%c1_229, %c0_230, %c0_231] : memref<4x24x24xf32, #tpu.memory_space<vmem>>, vector<1x24x24xf32>
    %200 = vector.shape_cast %199 : vector<1x24x24xf32> to vector<24x24xf32>
    %cst_232 = arith.constant dense<0.000000e+00> : vector<24x256xf32>
    %201 = tpu.matmul %200, %195, %cst_232 {dimension_numbers = #tpu.dot_dimension_numbers<[1], [0], [0], [1], [0, 0, 1, 1], [], []>} : vector<24x24xf32>, vector<24x256xf32>, vector<24x256xf32> -> vector<24x256xf32>
    %202 = arith.maximumf %198, %201 : vector<24x256xf32>
    %c2_233 = arith.constant 2 : index
    %c0_234 = arith.constant 0 : index
    %c0_235 = arith.constant 0 : index
    %203 = vector.load %arg10[%c2_233, %c0_234, %c0_235] : memref<4x24x24xf32, #tpu.memory_space<vmem>>, vector<1x24x24xf32>
    %204 = vector.shape_cast %203 : vector<1x24x24xf32> to vector<24x24xf32>
    %cst_236 = arith.constant dense<0.000000e+00> : vector<24x256xf32>
    %205 = tpu.matmul %204, %195, %cst_236 {dimension_numbers = #tpu.dot_dimension_numbers<[1], [0], [0], [1], [0, 0, 1, 1], [], []>} : vector<24x24xf32>, vector<24x256xf32>, vector<24x256xf32> -> vector<24x256xf32>
    %206 = arith.maximumf %202, %205 : vector<24x256xf32>
    %c3_237 = arith.constant 3 : index
    %c0_238 = arith.constant 0 : index
    %c0_239 = arith.constant 0 : index
    %207 = vector.load %arg10[%c3_237, %c0_238, %c0_239] : memref<4x24x24xf32, #tpu.memory_space<vmem>>, vector<1x24x24xf32>
    %208 = vector.shape_cast %207 : vector<1x24x24xf32> to vector<24x24xf32>
    %cst_240 = arith.constant dense<0.000000e+00> : vector<24x256xf32>
    %209 = tpu.matmul %208, %195, %cst_240 {dimension_numbers = #tpu.dot_dimension_numbers<[1], [0], [0], [1], [0, 0, 1, 1], [], []>} : vector<24x24xf32>, vector<24x256xf32>, vector<24x256xf32> -> vector<24x256xf32>
    %210 = arith.maximumf %206, %209 : vector<24x256xf32>
    %211 = arith.truncf %210 : vector<24x256xf32> to vector<24x256xbf16>
    %c0_241 = arith.constant 0 : index
    %c0_242 = arith.constant 0 : index
    %212 = vector.load %arg17[%c0_241, %c0_242] : memref<24x256xbf16, #tpu.memory_space<vmem>>, vector<24x256xbf16>
    tpu.vector_store %arg17[%c0_241, %c0_242], %211 {strides = array<i32>} : memref<24x256xbf16, #tpu.memory_space<vmem>>, vector<24x256xbf16>,
    %cst_243 = arith.constant 0.000000e+00 : f32
    %213 = vector.broadcast %cst_243 : f32 to vector<8x256xf32>
    %c0_244 = arith.constant 0 : index
    %c0_245 = arith.constant 0 : index
    %214 = vector.load %arg17[%c0_244, %c0_245] : memref<24x256xbf16, #tpu.memory_space<vmem>>, vector<8x256xbf16>
    %c0_246 = arith.constant 0 : index
    %c0_247 = arith.constant 0 : index
    %c0_248 = arith.constant 0 : index
    %c0_249 = arith.constant 0 : index
    %215 = vector.load %arg11[%c0_246, %c0_247, %c0_248, %c0_249] : memref<3x3x256x256xbf16, #tpu.memory_space<vmem>>, vector<1x1x256x256xbf16>
    %216 = vector.shape_cast %215 : vector<1x1x256x256xbf16> to vector<256x256xbf16>
    %cst_250 = arith.constant dense<0.000000e+00> : vector<8x256xf32>
    %217 = tpu.matmul %214, %216, %cst_250 {dimension_numbers = #tpu.dot_dimension_numbers<[1], [0], [0], [1], [0, 0, 1, 1], [], []>} : vector<8x256xbf16>, vector<256x256xbf16>, vector<8x256xf32> -> vector<8x256xf32>
    %218 = arith.addf %213, %217 : vector<8x256xf32>
    %c1_251 = arith.constant 1 : index
    %c0_252 = arith.constant 0 : index
    %219 = vector.load %arg17[%c1_251, %c0_252] : memref<24x256xbf16, #tpu.memory_space<vmem>>, vector<8x256xbf16>
    %c0_253 = arith.constant 0 : index
    %c1_254 = arith.constant 1 : index
    %c0_255 = arith.constant 0 : index
    %c0_256 = arith.constant 0 : index
    %220 = vector.load %arg11[%c0_253, %c1_254, %c0_255, %c0_256] : memref<3x3x256x256xbf16, #tpu.memory_space<vmem>>, vector<1x1x256x256xbf16>
    %221 = vector.shape_cast %220 : vector<1x1x256x256xbf16> to vector<256x256xbf16>
    %cst_257 = arith.constant dense<0.000000e+00> : vector<8x256xf32>
    %222 = tpu.matmul %219, %221, %cst_257 {dimension_numbers = #tpu.dot_dimension_numbers<[1], [0], [0], [1], [0, 0, 1, 1], [], []>} : vector<8x256xbf16>, vector<256x256xbf16>, vector<8x256xf32> -> vector<8x256xf32>
    %223 = arith.addf %218, %222 : vector<8x256xf32>
    %c2_258 = arith.constant 2 : index
    %c0_259 = arith.constant 0 : index
    %224 = vector.load %arg17[%c2_258, %c0_259] : memref<24x256xbf16, #tpu.memory_space<vmem>>, vector<8x256xbf16>
    %c0_260 = arith.constant 0 : index
    %c2_261 = arith.constant 2 : index
    %c0_262 = arith.constant 0 : index
    %c0_263 = arith.constant 0 : index
    %225 = vector.load %arg11[%c0_260, %c2_261, %c0_262, %c0_263] : memref<3x3x256x256xbf16, #tpu.memory_space<vmem>>, vector<1x1x256x256xbf16>
    %226 = vector.shape_cast %225 : vector<1x1x256x256xbf16> to vector<256x256xbf16>
    %cst_264 = arith.constant dense<0.000000e+00> : vector<8x256xf32>
    %227 = tpu.matmul %224, %226, %cst_264 {dimension_numbers = #tpu.dot_dimension_numbers<[1], [0], [0], [1], [0, 0, 1, 1], [], []>} : vector<8x256xbf16>, vector<256x256xbf16>, vector<8x256xf32> -> vector<8x256xf32>
    %228 = arith.addf %223, %227 : vector<8x256xf32>
    %c4 = arith.constant 4 : index
    %c0_265 = arith.constant 0 : index
    %229 = vector.load %arg17[%c4, %c0_265] : memref<24x256xbf16, #tpu.memory_space<vmem>>, vector<8x256xbf16>
    %c1_266 = arith.constant 1 : index
    %c0_267 = arith.constant 0 : index
    %c0_268 = arith.constant 0 : index
    %c0_269 = arith.constant 0 : index
    %230 = vector.load %arg11[%c1_266, %c0_267, %c0_268, %c0_269] : memref<3x3x256x256xbf16, #tpu.memory_space<vmem>>, vector<1x1x256x256xbf16>
    %231 = vector.shape_cast %230 : vector<1x1x256x256xbf16> to vector<256x256xbf16>
    %cst_270 = arith.constant dense<0.000000e+00> : vector<8x256xf32>
    %232 = tpu.matmul %229, %231, %cst_270 {dimension_numbers = #tpu.dot_dimension_numbers<[1], [0], [0], [1], [0, 0, 1, 1], [], []>} : vector<8x256xbf16>, vector<256x256xbf16>, vector<8x256xf32> -> vector<8x256xf32>
    %233 = arith.addf %228, %232 : vector<8x256xf32>
    %c5 = arith.constant 5 : index
    %c0_271 = arith.constant 0 : index
    %234 = vector.load %arg17[%c5, %c0_271] : memref<24x256xbf16, #tpu.memory_space<vmem>>, vector<8x256xbf16>
    %c1_272 = arith.constant 1 : index
    %c1_273 = arith.constant 1 : index
    %c0_274 = arith.constant 0 : index
    %c0_275 = arith.constant 0 : index
    %235 = vector.load %arg11[%c1_272, %c1_273, %c0_274, %c0_275] : memref<3x3x256x256xbf16, #tpu.memory_space<vmem>>, vector<1x1x256x256xbf16>
    %236 = vector.shape_cast %235 : vector<1x1x256x256xbf16> to vector<256x256xbf16>
    %cst_276 = arith.constant dense<0.000000e+00> : vector<8x256xf32>
    %237 = tpu.matmul %234, %236, %cst_276 {dimension_numbers = #tpu.dot_dimension_numbers<[1], [0], [0], [1], [0, 0, 1, 1], [], []>} : vector<8x256xbf16>, vector<256x256xbf16>, vector<8x256xf32> -> vector<8x256xf32>
    %238 = arith.addf %233, %237 : vector<8x256xf32>
    %c6_277 = arith.constant 6 : index
    %c0_278 = arith.constant 0 : index
    %239 = vector.load %arg17[%c6_277, %c0_278] : memref<24x256xbf16, #tpu.memory_space<vmem>>, vector<8x256xbf16>
    %c1_279 = arith.constant 1 : index
    %c2_280 = arith.constant 2 : index
    %c0_281 = arith.constant 0 : index
    %c0_282 = arith.constant 0 : index
    %240 = vector.load %arg11[%c1_279, %c2_280, %c0_281, %c0_282] : memref<3x3x256x256xbf16, #tpu.memory_space<vmem>>, vector<1x1x256x256xbf16>
    %241 = vector.shape_cast %240 : vector<1x1x256x256xbf16> to vector<256x256xbf16>
    %cst_283 = arith.constant dense<0.000000e+00> : vector<8x256xf32>
    %242 = tpu.matmul %239, %241, %cst_283 {dimension_numbers = #tpu.dot_dimension_numbers<[1], [0], [0], [1], [0, 0, 1, 1], [], []>} : vector<8x256xbf16>, vector<256x256xbf16>, vector<8x256xf32> -> vector<8x256xf32>
    %243 = arith.addf %238, %242 : vector<8x256xf32>
    %c8_284 = arith.constant 8 : index
    %c0_285 = arith.constant 0 : index
    %244 = vector.load %arg17[%c8_284, %c0_285] : memref<24x256xbf16, #tpu.memory_space<vmem>>, vector<8x256xbf16>
    %c2_286 = arith.constant 2 : index
    %c0_287 = arith.constant 0 : index
    %c0_288 = arith.constant 0 : index
    %c0_289 = arith.constant 0 : index
    %245 = vector.load %arg11[%c2_286, %c0_287, %c0_288, %c0_289] : memref<3x3x256x256xbf16, #tpu.memory_space<vmem>>, vector<1x1x256x256xbf16>
    %246 = vector.shape_cast %245 : vector<1x1x256x256xbf16> to vector<256x256xbf16>
    %cst_290 = arith.constant dense<0.000000e+00> : vector<8x256xf32>
    %247 = tpu.matmul %244, %246, %cst_290 {dimension_numbers = #tpu.dot_dimension_numbers<[1], [0], [0], [1], [0, 0, 1, 1], [], []>} : vector<8x256xbf16>, vector<256x256xbf16>, vector<8x256xf32> -> vector<8x256xf32>
    %248 = arith.addf %243, %247 : vector<8x256xf32>
    %c9 = arith.constant 9 : index
    %c0_291 = arith.constant 0 : index
    %249 = vector.load %arg17[%c9, %c0_291] : memref<24x256xbf16, #tpu.memory_space<vmem>>, vector<8x256xbf16>
    %c2_292 = arith.constant 2 : index
    %c1_293 = arith.constant 1 : index
    %c0_294 = arith.constant 0 : index
    %c0_295 = arith.constant 0 : index
    %250 = vector.load %arg11[%c2_292, %c1_293, %c0_294, %c0_295] : memref<3x3x256x256xbf16, #tpu.memory_space<vmem>>, vector<1x1x256x256xbf16>
    %251 = vector.shape_cast %250 : vector<1x1x256x256xbf16> to vector<256x256xbf16>
    %cst_296 = arith.constant dense<0.000000e+00> : vector<8x256xf32>
    %252 = tpu.matmul %249, %251, %cst_296 {dimension_numbers = #tpu.dot_dimension_numbers<[1], [0], [0], [1], [0, 0, 1, 1], [], []>} : vector<8x256xbf16>, vector<256x256xbf16>, vector<8x256xf32> -> vector<8x256xf32>
    %253 = arith.addf %248, %252 : vector<8x256xf32>
    %c10_297 = arith.constant 10 : index
    %c0_298 = arith.constant 0 : index
    %254 = vector.load %arg17[%c10_297, %c0_298] : memref<24x256xbf16, #tpu.memory_space<vmem>>, vector<8x256xbf16>
    %c2_299 = arith.constant 2 : index
    %c2_300 = arith.constant 2 : index
    %c0_301 = arith.constant 0 : index
    %c0_302 = arith.constant 0 : index
    %255 = vector.load %arg11[%c2_299, %c2_300, %c0_301, %c0_302] : memref<3x3x256x256xbf16, #tpu.memory_space<vmem>>, vector<1x1x256x256xbf16>
    %256 = vector.shape_cast %255 : vector<1x1x256x256xbf16> to vector<256x256xbf16>
    %cst_303 = arith.constant dense<0.000000e+00> : vector<8x256xf32>
    %257 = tpu.matmul %254, %256, %cst_303 {dimension_numbers = #tpu.dot_dimension_numbers<[1], [0], [0], [1], [0, 0, 1, 1], [], []>} : vector<8x256xbf16>, vector<256x256xbf16>, vector<8x256xf32> -> vector<8x256xf32>
    %258 = arith.addf %253, %257 : vector<8x256xf32>
    %c0_304 = arith.constant 0 : index
    %c0_305 = arith.constant 0 : index
    %259 = vector.load %arg12[%c0_304, %c0_305] : memref<1x256xf32, #tpu.memory_space<vmem>>, vector<1x256xf32>
    %260 = vector.broadcast %259 : vector<1x256xf32> to vector<8x256xf32>
    %261 = arith.addf %258, %260 : vector<8x256xf32>
    %cst_306 = arith.constant 0.000000e+00 : f32
    %262 = vector.broadcast %cst_306 : f32 to vector<8x256xf32>
    %263 = arith.maximumf %261, %262 : vector<8x256xf32>
    %c0_307 = arith.constant 0 : index
    %c0_308 = arith.constant 0 : index
    %c0_309 = arith.constant 0 : index
    %264 = vector.load %arg13[%c0_307, %c0_308, %c0_309] : memref<4x1x8xf32, #tpu.memory_space<vmem>>, vector<1x1x8xf32>
    %265 = vector.shape_cast %264 : vector<1x1x8xf32> to vector<1x8xf32>
    %cst_310 = arith.constant dense<0.000000e+00> : vector<1x256xf32>
    %266 = tpu.matmul %265, %263, %cst_310 {dimension_numbers = #tpu.dot_dimension_numbers<[1], [0], [0], [1], [0, 0, 1, 1], [], []>} : vector<1x8xf32>, vector<8x256xf32>, vector<1x256xf32> -> vector<1x256xf32>
    %c1_311 = arith.constant 1 : index
    %c0_312 = arith.constant 0 : index
    %c0_313 = arith.constant 0 : index
    %267 = vector.load %arg13[%c1_311, %c0_312, %c0_313] : memref<4x1x8xf32, #tpu.memory_space<vmem>>, vector<1x1x8xf32>
    %268 = vector.shape_cast %267 : vector<1x1x8xf32> to vector<1x8xf32>
    %cst_314 = arith.constant dense<0.000000e+00> : vector<1x256xf32>
    %269 = tpu.matmul %268, %263, %cst_314 {dimension_numbers = #tpu.dot_dimension_numbers<[1], [0], [0], [1], [0, 0, 1, 1], [], []>} : vector<1x8xf32>, vector<8x256xf32>, vector<1x256xf32> -> vector<1x256xf32>
    %270 = arith.maximumf %266, %269 : vector<1x256xf32>
    %c2_315 = arith.constant 2 : index
    %c0_316 = arith.constant 0 : index
    %c0_317 = arith.constant 0 : index
    %271 = vector.load %arg13[%c2_315, %c0_316, %c0_317] : memref<4x1x8xf32, #tpu.memory_space<vmem>>, vector<1x1x8xf32>
    %272 = vector.shape_cast %271 : vector<1x1x8xf32> to vector<1x8xf32>
    %cst_318 = arith.constant dense<0.000000e+00> : vector<1x256xf32>
    %273 = tpu.matmul %272, %263, %cst_318 {dimension_numbers = #tpu.dot_dimension_numbers<[1], [0], [0], [1], [0, 0, 1, 1], [], []>} : vector<1x8xf32>, vector<8x256xf32>, vector<1x256xf32> -> vector<1x256xf32>
    %274 = arith.maximumf %270, %273 : vector<1x256xf32>
    %c3_319 = arith.constant 3 : index
    %c0_320 = arith.constant 0 : index
    %c0_321 = arith.constant 0 : index
    %275 = vector.load %arg13[%c3_319, %c0_320, %c0_321] : memref<4x1x8xf32, #tpu.memory_space<vmem>>, vector<1x1x8xf32>
    %276 = vector.shape_cast %275 : vector<1x1x8xf32> to vector<1x8xf32>
    %cst_322 = arith.constant dense<0.000000e+00> : vector<1x256xf32>
    %277 = tpu.matmul %276, %263, %cst_322 {dimension_numbers = #tpu.dot_dimension_numbers<[1], [0], [0], [1], [0, 0, 1, 1], [], []>} : vector<1x8xf32>, vector<8x256xf32>, vector<1x256xf32> -> vector<1x256xf32>
    %278 = arith.maximumf %274, %277 : vector<1x256xf32>
    %c0_323 = arith.constant 0 : index
    %c0_324 = arith.constant 0 : index
    %c0_325 = arith.constant 0 : index
    %279 = vector.load %arg14[%c0_323, %c0_324, %c0_325] : memref<1x1x256xf32, #tpu.memory_space<vmem>>, vector<1x1x256xf32>
    %280 = vector.shape_cast %279 : vector<1x1x256xf32> to vector<1x256xf32>
    %281 = vector.shape_cast %278 : vector<1x256xf32> to vector<1x1x256xf32>
    tpu.vector_store %arg14[%c0_323, %c0_324, %c0_325], %281 {strides = array<i32>} : memref<1x1x256xf32, #tpu.memory_space<vmem>>, vector<1x1x256xf32>,
    return
  }
  func.func @transform_0(%arg0: i32) -> (i32, i32, i32) {
    %c0_i32 = arith.constant 0 : i32
    %c0_i32_0 = arith.constant 0 : i32
    %c0_i32_1 = arith.constant 0 : i32
    return %arg0, %c0_i32, %c0_i32_0 : i32, i32, i32
  }
  func.func @transform_1(%arg0: i32) -> (i32, i32, i32, i32) {
    %c0_i32 = arith.constant 0 : i32
    %c0_i32_0 = arith.constant 0 : i32
    %c0_i32_1 = arith.constant 0 : i32
    %c0_i32_2 = arith.constant 0 : i32
    %c0_i32_3 = arith.constant 0 : i32
    return %c0_i32, %c0_i32_0, %c0_i32_1, %c0_i32_2 : i32, i32, i32, i32
  }
  func.func @transform_2(%arg0: i32) -> (i32, i32) {
    %c0_i32 = arith.constant 0 : i32
    %c0_i32_0 = arith.constant 0 : i32
    %c0_i32_1 = arith.constant 0 : i32
    return %c0_i32, %c0_i32_0 : i32, i32
  }
  func.func @transform_3(%arg0: i32) -> (i32, i32, i32) {
    %c0_i32 = arith.constant 0 : i32
    %c0_i32_0 = arith.constant 0 : i32
    %c0_i32_1 = arith.constant 0 : i32
    %c0_i32_2 = arith.constant 0 : i32
    return %c0_i32, %c0_i32_0, %c0_i32_1 : i32, i32, i32
  }
  func.func @transform_4(%arg0: i32) -> (i32, i32, i32, i32) {
    %c0_i32 = arith.constant 0 : i32
    %c0_i32_0 = arith.constant 0 : i32
    %c0_i32_1 = arith.constant 0 : i32
    %c0_i32_2 = arith.constant 0 : i32
    %c0_i32_3 = arith.constant 0 : i32
    return %c0_i32, %c0_i32_0, %c0_i32_1, %c0_i32_2 : i32, i32, i32, i32
  }
  func.func @transform_5(%arg0: i32) -> (i32, i32) {
    %c0_i32 = arith.constant 0 : i32
    %c0_i32_0 = arith.constant 0 : i32
    %c0_i32_1 = arith.constant 0 : i32
    return %c0_i32, %c0_i32_0 : i32, i32
  }
  func.func @transform_6(%arg0: i32) -> (i32, i32, i32) {
    %c0_i32 = arith.constant 0 : i32
    %c0_i32_0 = arith.constant 0 : i32
    %c0_i32_1 = arith.constant 0 : i32
    %c0_i32_2 = arith.constant 0 : i32
    return %c0_i32, %c0_i32_0, %c0_i32_1 : i32, i32, i32
  }
  func.func @transform_7(%arg0: i32) -> (i32, i32, i32, i32) {
    %c0_i32 = arith.constant 0 : i32
    %c0_i32_0 = arith.constant 0 : i32
    %c0_i32_1 = arith.constant 0 : i32
    %c0_i32_2 = arith.constant 0 : i32
    %c0_i32_3 = arith.constant 0 : i32
    return %c0_i32, %c0_i32_0, %c0_i32_1, %c0_i32_2 : i32, i32, i32, i32
  }
  func.func @transform_8(%arg0: i32) -> (i32, i32) {
    %c0_i32 = arith.constant 0 : i32
    %c0_i32_0 = arith.constant 0 : i32
    %c0_i32_1 = arith.constant 0 : i32
    return %c0_i32, %c0_i32_0 : i32, i32
  }
  func.func @transform_9(%arg0: i32) -> (i32, i32, i32) {
    %c0_i32 = arith.constant 0 : i32
    %c0_i32_0 = arith.constant 0 : i32
    %c0_i32_1 = arith.constant 0 : i32
    %c0_i32_2 = arith.constant 0 : i32
    return %c0_i32, %c0_i32_0, %c0_i32_1 : i32, i32, i32
  }
  func.func @transform_10(%arg0: i32) -> (i32, i32, i32, i32) {
    %c0_i32 = arith.constant 0 : i32
    %c0_i32_0 = arith.constant 0 : i32
    %c0_i32_1 = arith.constant 0 : i32
    %c0_i32_2 = arith.constant 0 : i32
    %c0_i32_3 = arith.constant 0 : i32
    return %c0_i32, %c0_i32_0, %c0_i32_1, %c0_i32_2 : i32, i32, i32, i32
  }
  func.func @transform_11(%arg0: i32) -> (i32, i32) {
    %c0_i32 = arith.constant 0 : i32
    %c0_i32_0 = arith.constant 0 : i32
    %c0_i32_1 = arith.constant 0 : i32
    return %c0_i32, %c0_i32_0 : i32, i32
  }
  func.func @transform_12(%arg0: i32) -> (i32, i32, i32) {
    %c0_i32 = arith.constant 0 : i32
    %c0_i32_0 = arith.constant 0 : i32
    %c0_i32_1 = arith.constant 0 : i32
    %c0_i32_2 = arith.constant 0 : i32
    return %c0_i32, %c0_i32_0, %c0_i32_1 : i32, i32, i32
  }
  func.func @transform_13(%arg0: i32) -> (i32, i32, i32) {
    %c0_i32 = arith.constant 0 : i32
    %c0_i32_0 = arith.constant 0 : i32
    %c0_i32_1 = arith.constant 0 : i32
    return %arg0, %c0_i32, %c0_i32_0 : i32, i32, i32
  }
}

</mosaic_0001>

<bundles_post_ra>
// kernel: tpu_custom_call.1
= control target key start
LH: loop header
LB: loop body
LE: loop exit
PB: predicated region body
PF: predicated region fallthrough
CT: control target
= control target key end

     0   :  { %s20903_s0 = inlined_call_operand.vmem [shape: bf16[2,332,8], index: 0, kind: input, shape index: {}]   ;;  %s20904_s1 = inlined_call_operand.vmem [shape: bf16[3,3,8,64], index: 1, kind: input, shape index: {}]   ;;  %s20905_s2 = inlined_call_operand.vmem [shape: f32[1,64], index: 2, kind: input, shape index: {}]   ;;  %s20906_s3 = inlined_call_operand.vmem [shape: f32[4,108,288], index: 3, kind: input, shape index: {}]   ;;  %s20907_s4 = inlined_call_operand.vmem [shape: bf16[3,3,64,128], index: 4, kind: input, shape index: {}]   ;;  %s20908_s5 = inlined_call_operand.vmem [shape: f32[1,128], index: 5, kind: input, shape index: {}]   ;;  %s20909_s6 = inlined_call_operand.vmem [shape: f32[4,44,80], index: 6, kind: input, shape index: {}]   ;;  %s20910_s7 = inlined_call_operand.hbm [shape: bf16[3,3,128,256], index: 7, kind: input, shape index: {}]   ;;  %s20911_s8 = inlined_call_operand.vmem [shape: f32[1,256], index: 8, kind: input, shape index: {}]   ;;  %s20912_s9 = inlined_call_operand.vmem [shape: f32[4,24,24], index: 9, kind: input, shape index: {}]   ;;  %s20913_s10 = inlined_call_operand.vmem [shape: bf16[3,3,256,256], index: 10, kind: input, shape index: {}]   ;;  %s20914_s11 = inlined_call_operand.vmem [shape: f32[1,256], index: 11, kind: input, shape index: {}]   ;;  %s20915_s12 = inlined_call_operand.vmem [shape: f32[4,1,8], index: 12, kind: input, shape index: {}]   ;;  %s20916_s13 = inlined_call_operand.hbm [shape: f32[2,1,256], index: 13, kind: output, shape index: {}]  }
   0x1   :  { %20934 = sst [smem:[#allocation110_spill]] %s20903_s0 }
   0x2   :  { %20935 = sst [smem:[#allocation111_spill]] %s20904_s1 }
   0x3   :  { %18 = vsyncpa [#allocation6], 0 }
   0x4   :  { %19 = vsyncpa [#allocation7], 0 }
   0x5   :  { %21 = vsyncpa [#allocation7 + $0x1], 0  ;;  %s16231_s25 = smov 0   ;;  %s16233_s26 = smov 0  }
   0x6   :  { %s16235_s27 = smov 0   ;;  %s16237_s28 = smov 0  }
   0x7 LB: > { %20936 = sst [smem:[#allocation11_spill]] %s16147_s27  ;;  %s16252_s29 = sadd.s32 4294967295, %s16151_s28   ;;  %s16151_s28 = sphi %s16237_s28, %s21228_s28   ;;  %s16147_s27 = sphi %s16235_s27, %s21225_s27   ;;  %s16143_s26 = sphi %s16233_s26, %s21227_s26   ;;  %s16139_s25 = sphi %s16231_s25, %s21226_s25  }
   0x8   : > { %s12209_s30 = sadd.s32 4294967294, %s16151_s28   ;;  %s16256_s14 = sadd.s32 1, %s16151_s28  }
   0x9   : > { %s312_s15 = sadd.s32 1, %s16147_s27  ;;  %s309_s16 = ssub.s32 %s16151_s28, %s16256_s14 }
   0xa   : > { %p322_p0 = scmp.ne.s32.totalorder %s16147_s27, %s16143_s26  ;;  %p310_p1 = scmp.eq.s32.totalorder %s309_s16, 0 }
   0xb   : > { %p323_p2 = scmp.eq.s32.totalorder %s16252_s29, 1  ;;  %p328_p3 = scmp.ne.s32.totalorder %s16143_s26, %s16139_s25 }
   0xc   : > { %p329_p4 = scmp.eq.s32.totalorder %s12209_s30, 1  ;;  %p12210_p7 = scmp.ge.s32.totalorder %s16151_s28, 1 }
   0xd   : > { %s16267_s17 = scalar_select %p310_p1, %s16147_s27, %s312_s15  }
   0xe   : > { %p16269_p5 = por %p323_p2, %p322_p0  ;;  %p16273_p6 = por %p329_p4, %p328_p3 }
   0xf   : > { %20937 = sst [smem:[#allocation12_spill]] %s16267_s17  ;;  %p336_p8 = scmp.lt.s32.totalorder %s16151_s28, 3 }
  0x10   : > { %s20939_s19 = scalar_select %p16273_p6, 1, 0 }
  0x11   : > { %p15219_p9 = scmp.eq.s32.totalorder %s16252_s29, 0  ;;  %p16280_p10 = pnand %p12210_p7, %p336_p8 }
  0x12   : > { %s16153_s21 = smov [#allocation5]  }
  0x13   : > { %s366_s22 = sshll.u32 %s16153_s21, 4  ;;  %p15211_p11 = pneg %p16280_p10  ;;  %s367_s22 = int_to_ptr.vmem [resolvable:$true] %s366_s22 }
  0x14   : > { %s16072_s23 = scalar_lea.vmem %s367_s22, 18432  ;;  %p16080_p3 = scmp.lt.s32.totalorder %s367_s22, %s367_s22 }
  0x15   : > { %p15212_p12 = pnand %p15219_p9, %p15211_p11  ;;  %p16073_p0 = scmp.ne.s32.totalorder %s367_s22, %s16072_s23 }
  0x16   : > { %p16081_p4 = scmp.lt.s32.totalorder %s16072_s23, %s16072_s23 }
  0x17   : > { %p16063_p13 = pneg %p15212_p12 }
  0x18   : > { %p16082_p6 = por %p16081_p4, %p16080_p3 }
  0x19   : > { %p16075_p1 = pnand %p16073_p0, %p16063_p13 }
  0x1b   : > { %p16076_p2 = pneg %p16075_p1 }
  0x1d   : > { %p16083_p7 = pnand %p16082_p6, %p16076_p2 }
  0x1f   : > { %16086 = shalt.err (!%p16083_p7)
}
  0x20   : > { %s16154_s24 = smov 128   ;;  %s16155_s30 = smov 8  }
  0x21   : > { %15214 = dma.hbm_to_vmem [thread:$0]  (!%p15212_p12), %s20910_s7, 18432, %s367_s22, [#allocation6], %s16154_s24, %s16154_s24, %s16155_s30  }
  0x22   : > { %405 = sbr.rel (%p16280_p10) target bundleno = 2974 (0xb9e), region = 72 }
  0x27   : > { %16130 = dma.done.wait (%p15219_p9), [#allocation6], 18432  }
  0x28   : > { %16132 = vsyncadd (%p15219_p9), [#allocation6], 4294948864  ;;  %p449_p8 = scmp.lt.s32.totalorder %s16252_s29, 1  ;;  %vm792_vm0 = vcmask 1043456   ;;  %s20941_s0 = sld [smem:[#allocation110_spill]]  ;;  %vm737_vm1 = vcmask 64512  }
  0x29   : > { %s20942_s1 = sld [smem:[#allocation111_spill]]  ;;  %vm588_vm2 = vsmask.f32 7424  ;;  %vm1195_vm3 = vcmask 1046528   ;;  %vm1948_vm4 = vsmask.f32 6400 }
  0x2a   : > { %s450_s21 = scalar_select %p449_p8, %s16252_s29, 1  ;;  %vm2395_vm5 = vcmask 1045504   ;;  %vm3148_vm6 = vsmask.f32 5376  ;;  %vm3595_vm7 = vcmask 1044480   ;;  %vm4024_vm8 = vcmask 261120  }
  0x2b   : > { %vm16157_vm9 = vmmov 0   ;;  %vm5500_vm10 = vcmask 519168   ;;  %vm5640_vm11 = vcmask 523264   ;;  %vm7045_vm12 = vcmask 654336   ;;  %s16160_s16 = smov [#allocation8]  }
  0x2c   : > { %s15204_s23 = smul.u32 168, %s450_s21  ;;  %vm8247_vm13 = vsmask.f32 4352  ;;  %vm9102_vm14 = vcmask 195584   ;;  %s446_s21 = sand.u32 1, %s16143_s26  }
  0x2d   : > { %s12124_s27 = scalar_lea.sflag [#allocation7], %s446_s21 }
  0x2e   : > { %s16302_s15 = scalar_lea.vmem %s20941_s0, %s15204_s23  ;;  %s12215_s23 = sshll.u32 %s446_s21, 1 }
  0x2f   : > { %v12217_v0 = vld [vmem:[%s20942_s1 + $0x4] sm:$0xf]  ;;  %v491_v1 = vld [vmem:[%s20942_s1] sm:$0xf]  ;;  %v16320_v7 = vld [vmem:[%s16302_s15 + $0x8] sm:$0xff]   ;;  %s448_s20 = scalar_lea.vmem [#allocation8], %s12215_s23 }
  0x30   : > { %v455_v2 = vld [vmem:[%s16302_s15] sm:$0xf]  ;;  %15195 = vmatprep.subr.msk.bf16.mxu0 %vm792_vm0, %v12217_v0  ;;  %15196 = vmatprep.subr.msk.bf16.mxu1 %vm792_vm0, %v491_v1  ;;  %v794_v3 = vsel %vm792_vm0, %v12217_v0, 0  ;;  %v1010_v4 = vsel %vm792_vm0, %v491_v1, 0  ;;  %v16316_v5 = vld [vmem:[%s16302_s15 + $0x4] sm:$0xf] }
  0x31   : > { %14338 = vmatpush3.bf16.msra.mxu0 %v794_v3  ;;  %14376 = vmatpush3.bf16.msra.mxu1 %v1010_v4  ;;  %v12218_v6 = vcombine.low %v455_v2, %v16316_v5  ;;  %v16323_v8 = vld [vmem:[%s16302_s15 + $0x10] sm:$0xff]   ;;  %v597_v11 = vshll.u32 %v16320_v7, 16  ;;  %v601_v12 = vshrl.u32 %v16320_v7, 16  ;;  %v16332_v14 = vld [vmem:[%s16302_s15 + $0x18] sm:$0xff]   ;;  %v16336_v16 = vld [vmem:[%s16302_s15 + $0x20] sm:$0xff]   ;;  %s12138_s22 = sshll.u32 %s448_s20, 4  ;;  %s12139_s22 = int_to_ptr.vmem [resolvable:$true] %s12138_s22 }
  0x32   : > { %v605_v13 = vshll.u32 %v16323_v8, 16  ;;  %v609_v15 = vshrl.u32 %v16323_v8, 16  ;;  %v613_v20 = vshll.u32 %v16332_v14, 16  ;;  %v621_v23 = vshll.u32 %v16336_v16, 16  ;;  %v16343_v24 = vld [vmem:[%s16302_s15 + $0x28] sm:$0xff]   ;;  %v16354_v34 = vld [vmem:[%s16302_s15 + $0x30] sm:$0xff]  }
  0x33   : > { %v590_v9 = vshrl.u32 %v12218_v6, 16  ;;  %v592_v10 = vshll.u32 %v12218_v6, 16  ;;  %14377 = vmatprep.mubr.msk.bf16.mxu1 %vm737_vm1, %v12218_v6  ;;  %v599_v18 = vrot.slane %v597_v11, 1  ;;  %v617_v27 = vshrl.u32 %v16332_v14, 16  ;;  %v16362_v38 = vld [vmem:[%s16302_s15 + $0x38] sm:$0xff]   ;;  %v16366_v40 = vld [vmem:[%s16302_s15 + $0x40] sm:$0xff]  }
  0x34   : > { %14378 = vmatmul.mubr.msk.bf16.vlgmr.msra.gmra.mxu1 %vm737_vm1, %v16320_v7  ;;  %v607_v19 = vrot.slane %v605_v13, 1  ;;  %v615_v26 = vrot.slane %v613_v20, 1  ;;  %v625_v30 = vshrl.u32 %v16336_v16, 16  ;;  %v629_v31 = vshll.u32 %v16343_v24, 16  ;;  %v16371_v43 = vld [vmem:[%s16302_s15 + $0x48] sm:$0xff]   ;;  %v16374_v44 = vld [vmem:[%s16302_s15 + $0x50] sm:$0xff]  }
  0x35   : > { %v594_v17 = vrot.slane %v592_v10, 1  ;;  %14381 = vmatprep.mubr.msk.bf16.mxu1 %vm737_vm1, %v16323_v8  ;;  %v603_v22 = vor.u32 %v601_v12, %v599_v18  ;;  %v623_v33 = vrot.slane %v621_v23, 1  ;;  %v637_v39 = vshll.u32 %v16354_v34, 16  ;;  %v12273_v45 = vld [vmem:[%s20942_s1 + $0x8] sm:$0xf]  ;;  %v16383_v49 = vld [vmem:[%s16302_s15 + $0x58] sm:$0xff]  }
  0x36   : > { %v611_v25 = vor.u32 %v609_v15, %v607_v19  ;;  %v619_v35 = vor.u32 %v617_v27, %v615_v26  ;;  %v631_v37 = vrot.slane %v629_v31, 1  ;;  %v633_v42 = vshrl.u32 %v16343_v24, 16  ;;  %15197 = vmatprep.subr.msk.bf16.mxu0 %vm792_vm0, %v12273_v45  ;;  %v16399_v60 = vld [vmem:[%s16302_s15 + $0x60] sm:$0xff]   ;;  %v16402_v61 = vld [vmem:[%s16302_s15 + $0x68] sm:$0xff]   ;;  %v16416_v13 = vld [vmem:[%s16302_s15 + $0x78] sm:$0xff]   ;;  %s16087_s17 = scalar_lea.vmem %s12139_s22, 32 }
  0x37   : > { %v595_v21 = vor.u32 %v594_v17, %v590_v9  ;;  %v608_v29 = vsel %vm588_vm2, %v603_v22, %v607_v19  ;;  %v627_v36 = vor.u32 %v625_v30, %v623_v33  ;;  %v641_v47 = vshrl.u32 %v16354_v34, 16  ;;  %v16410_v9 = vld [vmem:[%s16302_s15 + $0x70] sm:$0xff]   ;;  %v12293_v15 = vld [vmem:[%s20942_s1 + $0xc] sm:$0xf]  ;;  %v1189_v17 = vld [vmem:[%s16302_s15] sm:$0xe]  ;;  %p16088_p6 = scmp.ne.s32.totalorder %s12139_s22, %s16087_s17 }
  0x38   : > { %v616_v32 = vsel %vm588_vm2, %v611_v25, %v615_v26  ;;  %v624_v41 = vsel %vm588_vm2, %v619_v35, %v623_v33  ;;  %v645_v48 = vshll.u32 %v16362_v38, 16  ;;  %v1288_v50 = vsel %vm792_vm0, %v12273_v45, 0  ;;  %15198 = vmatprep.subr.msk.bf16.mxu1 %vm792_vm0, %v12293_v15  ;;  %v16441_v30 = vld [vmem:[%s16302_s15 + $0x88] sm:$0xff]  }
  0x39   : > { %v600_v28 = vsel %vm588_vm2, %v595_v21, %v599_v18  ;;  %v632_v46 = vsel %vm588_vm2, %v627_v36, %v631_v37  ;;  %v639_v51 = vrot.slane %v637_v39, 1  ;;  %v653_v52 = vshll.u32 %v16366_v40, 16  ;;  %p16089_p9 = pnand %p16088_p6, %p16269_p5 }
  0x3a   : > { %14339 = vmatprep.mubr.msk.bf16.mxu0 %vm737_vm1, %v600_v28  ;;  %v635_v53 = vor.u32 %v633_v42, %v631_v37  ;;  %v661_v54 = vshll.u32 %v16371_v43, 16  ;;  %v669_v55 = vshll.u32 %v16374_v44, 16  ;;  %v647_v57 = vrot.slane %v645_v48, 1 }
  0x3b   : > { %14340 = vmatmul.mubr.msk.bf16.vlgmr.msra.gmra.mxu0 %vm737_vm1, %v608_v29  ;;  %v643_v56 = vor.u32 %v641_v47, %v639_v51  ;;  %v649_v58 = vshrl.u32 %v16362_v38, 16  ;;  %v677_v59 = vshll.u32 %v16383_v49, 16  ;;  %v655_v62 = vrot.slane %v653_v52, 1  ;;  %p16090_p10 = pneg %p16089_p9 }
  0x3c   : > { %14343 = vmatprep.mubr.msk.bf16.mxu0 %vm737_vm1, %v616_v32  ;;  %14382 = vmatmul.mubr.msk.bf16.gmra.mxu1 %vm737_vm1, %v16332_v14  ;;  %v657_v63 = vshrl.u32 %v16366_v40, 16  ;;  %v665_v0 = vshrl.u32 %v16371_v43, 16  ;;  %v673_v1 = vshrl.u32 %v16374_v44, 16  ;;  %v640_v2 = vsel %vm588_vm2, %v635_v53, %v639_v51  ;;  %v1503_v53 = vld [vmem:[%s16302_s15 + $0x8] sm:$0xe] }
  0x3d   : > { %14385 = vmatprep.mubr.msk.bf16.mxu1 %vm737_vm1, %v16336_v16  ;;  %14414 = vmatpush3.bf16.msra.mxu0 %v1288_v50  ;;  %v663_v3 = vrot.slane %v661_v54, 1  ;;  %v671_v4 = vrot.slane %v669_v55, 1  ;;  %v681_v6 = vshrl.u32 %v16383_v49, 16  ;;  %v648_v10 = vsel %vm588_vm2, %v643_v56, %v647_v57  ;;  %v16486_v56 = vld [vmem:[%s16302_s15 + $0xc] sm:$0xf] }
  0x3e   : > { %v651_v11 = vor.u32 %v649_v58, %v647_v57  ;;  %v16413_v12 = vrot.slane %v677_v59, 1  ;;  %v685_v18 = vshll.u32 %v16399_v60, 16  ;;  %v693_v19 = vshll.u32 %v16402_v61, 16 }
  0x3f   : > { %v12274_v20 = vcombine.low %v1189_v17, %v16316_v5  ;;  %v1197_v21 = vrot.slane %v16320_v7, 1  ;;  %v659_v22 = vor.u32 %v657_v63, %v655_v62  ;;  %v689_v23 = vshrl.u32 %v16399_v60, 16 }
  0x40   : > { %v1727_v25 = vsel %vm792_vm0, %v12293_v15, 0  ;;  %v697_v26 = vshrl.u32 %v16402_v61, 16  ;;  %v701_v27 = vshll.u32 %v16410_v9, 16  ;;  %v1199_v7 = vrot.slane %v16323_v8, 1 }
  0x41   : > { %v1196_v5 = vrot.slane %v12274_v20, 1  ;;  %v656_v28 = vsel %vm588_vm2, %v651_v11, %v655_v62  ;;  %v709_v29 = vshll.u32 %v16416_v13, 16  ;;  %14452 = vmatpush3.bf16.msra.mxu1 %v1727_v25  ;;  %v1201_v31 = vrot.slane %v16332_v14, 1  ;;  %v16460_v14 = vld [vmem:[%s16302_s15 + $0x90] ss:$0 sps:$4 sm:$0x11]  }
  0x42   : > { %v1203_v32 = vrot.slane %v16336_v16, 1  ;;  %v16445_v33 = vrot.slane %v685_v18, 1  ;;  %v16447_v35 = vrot.slane %v693_v19, 1  ;;  %v16453_v36 = vsel %vm1195_vm3, %v1197_v21, %v1199_v7  ;;  %v16518_v11 = vld [vmem:[%s16302_s15 + $0x10] sm:$0xff]   ;;  %v16529_v20 = vld [vmem:[%s16302_s15 + $0x18] sm:$0xff]  }
  0x43   : > { %14344 = vmatmul.mubr.msk.bf16.gmra.mxu0 %vm737_vm1, %v624_v41  ;;  %v16450_v8 = vsel %vm1195_vm3, %v1196_v5, %v1197_v21  ;;  %v667_v37 = vor.u32 %v665_v0, %v663_v3  ;;  %v705_v39 = vshrl.u32 %v16410_v9, 16  ;;  %v16457_v41 = vld [vmem:[%s16302_s15 + $0x80] sm:$0xff]   ;;  %v16463_v16 = vsel %vm1195_vm3, %v1199_v7, %v1201_v31 }
  0x44   : > { %14347 = vmatprep.mubr.msk.bf16.mxu0 %vm737_vm1, %v632_v46  ;;  %14386 = vmatmul.mubr.msk.bf16.gmra.mxu1 %vm737_vm1, %v16343_v24  ;;  %v16466_v42 = vsel %vm1195_vm3, %v1201_v31, %v1203_v32  ;;  %v16468_v45 = vrot.slane %v701_v27, 1  ;;  %v713_v46 = vshrl.u32 %v16416_v13, 16  ;;  %v1205_v47 = vrot.slane %v16343_v24, 1  ;;  %v16537_v27 = vld [vmem:[%s16302_s15 + $0x20] sm:$0xff]  }
  0x45   : > { %14389 = vmatprep.mubr.msk.bf16.mxu1 %vm737_vm1, %v16354_v34  ;;  %v1207_v48 = vrot.slane %v16354_v34, 1  ;;  %v664_v50 = vsel %vm588_vm2, %v659_v22, %v663_v3  ;;  %v16474_v51 = vrot.slane %v709_v29, 1  ;;  %v725_v52 = vshll.u32 %v16441_v30, 16 }
  0x46   : > { %v16479_v54 = vsel %vm1195_vm3, %v1203_v32, %v1205_v47  ;;  %v1209_v24 = vrot.slane %v16362_v38, 1  ;;  %v1211_v34 = vrot.slane %v16366_v40, 1  ;;  %v672_v57 = vsel %vm588_vm2, %v667_v37, %v671_v4 }
  0x47   : > { %v16482_v55 = vsel %vm1195_vm3, %v1205_v47, %v1207_v48  ;;  %v675_v58 = vor.u32 %v673_v1, %v671_v4  ;;  %v717_v59 = vshll.u32 %v16457_v41, 16  ;;  %v1213_v62 = vrot.slane %v16371_v43, 1 }
  0x48   : > { %v16501_v63 = vsel %vm1195_vm3, %v1207_v48, %v1209_v24  ;;  %v16504_v0 = vsel %vm1195_vm3, %v1209_v24, %v1211_v34  ;;  %v683_v1 = vor.u32 %v681_v6, %v16413_v12  ;;  %v1215_v3 = vrot.slane %v16374_v44, 1  ;;  %v12331_v6 = vld [vmem:[%s20942_s1 + $0x10] sm:$0xf] }
  0x49   : > { %v727_v4 = vrot.slane %v725_v52, 1  ;;  %v1217_v15 = vrot.slane %v16383_v49, 1  ;;  %v1219_v17 = vrot.slane %v16399_v60, 1  ;;  %v680_v18 = vsel %vm588_vm2, %v675_v58, %v16413_v12  ;;  %15199 = vmatprep.subr.msk.bf16.mxu0 %vm792_vm0, %v12331_v6 }
  0x4a   : > { %v691_v19 = vor.u32 %v689_v23, %v16445_v33  ;;  %v16532_v21 = vsel %vm1195_vm3, %v1213_v62, %v1215_v3  ;;  %v699_v22 = vor.u32 %v697_v26, %v16447_v35  ;;  %v707_v23 = vor.u32 %v705_v39, %v16468_v45  ;;  %v16556_v39 = vld [vmem:[%s16302_s15 + $0x28] sm:$0xff]  }
  0x4b   : > { %14348 = vmatmul.mubr.msk.bf16.gmra.mxu0 %vm737_vm1, %v640_v2  ;;  %v16511_v2 = vsel %vm1195_vm3, %v1211_v34, %v1213_v62  ;;  %v16540_v5 = vsel %vm1195_vm3, %v1215_v3, %v1217_v15  ;;  %v16543_v12 = vsel %vm1195_vm3, %v1217_v15, %v1219_v17  ;;  %v715_v7 = vor.u32 %v713_v46, %v16474_v51  ;;  %v16578_v34 = vld [vmem:[%s16302_s15 + $0x30] sm:$0xff]  }
  0x4c   : > { %14351 = vmatprep.mubr.msk.bf16.mxu0 %vm737_vm1, %v648_v10  ;;  %14390 = vmatmul.mubr.msk.bf16.gmra.mxu1 %vm737_vm1, %v16362_v38  ;;  %v721_v38 = vshrl.u32 %v16457_v41, 16  ;;  %v16515_v10 = vcombine.low %v1503_v53, %v16486_v56  ;;  %v1223_v29 = vrot.slane %v16410_v9, 1  ;;  %v1636_v37 = vrot.slane %v16518_v11, 1  ;;  %v12351_v15 = vld [vmem:[%s20942_s1 + $0x14] sm:$0xf] }
  0x4d   : > { %14393 = vmatprep.mubr.msk.bf16.mxu1 %vm737_vm1, %v16366_v40  ;;  %v733_v40 = vshll.u32 %v16460_v14, 16  ;;  %v1225_v48 = vrot.slane %v16416_v13, 1  ;;  %v688_v52 = vsel %vm588_vm2, %v683_v1, %v16445_v33  ;;  %v696_v53 = vsel %vm588_vm2, %v691_v19, %v16447_v35  ;;  %15200 = vmatprep.subr.msk.bf16.mxu1 %vm792_vm0, %v12351_v15 }
  0x4e   : > { %v1635_v32 = vrot.slane %v16515_v10, 1  ;;  %v1638_v24 = vrot.slane %v16529_v20, 1  ;;  %v1640_v58 = vrot.slane %v16537_v27, 1  ;;  %v1950_v1 = vshrl.u32 %v16515_v10, 16 }
  0x4f   : > { %v735_v25 = vrot.slane %v733_v40, 1  ;;  %v16588_v35 = vsel %vm1195_vm3, %v1223_v29, %v1225_v48  ;;  %v20918_v40 = vrot.slane %v16556_v39, 1 }
  0x50   : > { %v1952_v19 = vrot.slane %v1950_v1, 1  ;;  %v1988_v1 = vshll.u32 %v16556_v39, 16 }
  0x53   : > { %14352 = vmatmul.mubr.msk.bf16.gmra.mxu0 %vm737_vm1, %v656_v28  ;;  %v1221_v28 = vrot.slane %v16402_v61, 1 }
  0x54   : > { %14355 = vmatprep.mubr.msk.bf16.mxu0 %vm737_vm1, %v664_v50  ;;  %14394 = vmatmul.mubr.msk.bf16.gmra.mxu1 %vm737_vm1, %v16371_v43  ;;  %v729_v43 = vshrl.u32 %v16441_v30, 16  ;;  %v1227_v50 = vrot.slane %v16457_v41, 1 }
  0x55   : > { %14397 = vmatprep.mubr.msk.bf16.mxu1 %vm737_vm1, %v16374_v44  ;;  %v719_v44 = vrot.slane %v717_v59, 1  ;;  %v16559_v46 = vsel %vm1195_vm3, %v1219_v17, %v1221_v28  ;;  %v16562_v47 = vsel %vm1195_vm3, %v1221_v28, %v1223_v29  ;;  %v1229_v59 = vrot.slane %v16441_v30, 1  ;;  %v2389_v17 = vld [vmem:[%s16302_s15 + $0x8] sm:$0xc] }
  0x56   : > { %v731_v31 = vor.u32 %v729_v43, %v727_v4  ;;  %v16608_v43 = vsel %vm1195_vm3, %v1636_v37, %v1638_v24  ;;  %v1967_v28 = vshrl.u32 %v16529_v20, 16  ;;  %v1970_v29 = vshll.u32 %v16529_v20, 16 }
  0x57   : > { %v723_v26 = vor.u32 %v721_v38, %v719_v44  ;;  %v16585_v33 = vsel %vm588_vm2, %v715_v7, %v719_v44  ;;  %v16603_v38 = vsel %vm1195_vm3, %v1635_v32, %v1636_v37  ;;  %v1953_v44 = vshll.u32 %v16515_v10, 16 }
  0x58   : > { %v16600_v62 = vsel %vm588_vm2, %v731_v31, %v735_v25  ;;  %v1958_v25 = vshrl.u32 %v16518_v11, 16  ;;  %v16633_v7 = vsel %vm792_vm0, %v12351_v15, 0  ;;  %v16641_v10 = vsel %vm1195_vm3, %v1640_v58, %v20918_v40 }
  0x59   : > { %v12352_v32 = vcombine.low %v2389_v17, %v16486_v56  ;;  %v1969_v37 = vrot.slane %v1967_v28, 1  ;;  %v1985_v56 = vshrl.u32 %v16556_v39, 16  ;;  %v2401_v28 = vrot.slane %v16537_v27, 2 }
  0x5b   : > { %14356 = vmatmul.mubr.msk.bf16.gmra.mxu0 %vm737_vm1, %v672_v57  ;;  %v16582_v57 = vsel %vm588_vm2, %v707_v23, %v16474_v51  ;;  %v1231_v51 = vrot.slane %v16460_v14, 1  ;;  %v1961_v23 = vshll.u32 %v16518_v11, 16 }
  0x5c   : > { %14359 = vmatprep.mubr.msk.bf16.mxu0 %vm737_vm1, %v680_v18  ;;  %14398 = vmatmul.mubr.msk.bf16.gmra.mxu1 %vm737_vm1, %v16383_v49  ;;  %v16574_v49 = vsel %vm588_vm2, %v699_v22, %v16468_v45  ;;  %v16594_v45 = vsel %vm588_vm2, %v723_v26, %v727_v4  ;;  %v16612_v4 = vsel %vm1195_vm3, %v1227_v50, %v1229_v59  ;;  %v16622_v18 = vsel %vm792_vm0, %v12331_v6, 0 }
  0x5d   : > { %14401 = vmatprep.mubr.msk.bf16.mxu1 %vm737_vm1, %v16399_v60  ;;  %v16591_v60 = vsel %vm1195_vm3, %v1225_v48, %v1227_v50  ;;  %v16615_v14 = vsel %vm1195_vm3, %v1229_v59, %v1231_v51  ;;  %v16628_v22 = vsel %vm1195_vm3, %v1638_v24, %v1640_v58  ;;  %v1955_v6 = vrot.slane %v1953_v44, 2  ;;  %v16652_v59 = vld [vmem:[%s16302_s15 + $0x38] sm:$0xff]  }
  0x5e   : > { %v1960_v26 = vrot.slane %v1958_v25, 1  ;;  %v1963_v31 = vrot.slane %v1961_v23, 2  ;;  %v1972_v48 = vrot.slane %v1970_v29, 2  ;;  %v2397_v50 = vrot.slane %v16518_v11, 2 }
  0x5f   : > { %v2399_v24 = vrot.slane %v16529_v20, 2  ;;  %v1976_v58 = vshrl.u32 %v16537_v27, 16  ;;  %v1979_v51 = vshll.u32 %v16537_v27, 16  ;;  %v1987_v25 = vrot.slane %v1985_v56, 1  ;;  %v16702_v56 = vld [vmem:[%s16302_s15 + $0x50] sm:$0xff]  }
  0x60   : > { %v1990_v23 = vrot.slane %v1988_v1, 2  ;;  %v2403_v29 = vrot.slane %v16556_v39, 2  ;;  %v2006_v27 = vshll.u32 %v16652_v59, 16  ;;  %v2030_v40 = vshrl.u32 %v16702_v56, 16 }
  0x61   : > { %v16664_v20 = vsel %vm2395_vm5, %v2397_v50, %v2399_v24  ;;  %v1978_v17 = vrot.slane %v1976_v58, 1  ;;  %v1981_v44 = vrot.slane %v1979_v51, 2 }
  0x62   : > { %v2008_v51 = vrot.slane %v2006_v27, 2  ;;  %v2032_v3 = vrot.slane %v2030_v40, 1  ;;  %v16764_v40 = vld [vmem:[%s16302_s15 + $0x78] sm:$0xff]  }
  0x63   : > { %14360 = vmatmul.mubr.msk.bf16.gmra.mxu0 %vm737_vm1, %v688_v52  ;;  %v1964_v52 = vor.u32 %v1963_v31, %v1960_v26  ;;  %v1994_v26 = vshrl.u32 %v16578_v34, 16  ;;  %v1997_v31 = vshll.u32 %v16578_v34, 16 }
  0x64   : > { %14363 = vmatprep.mubr.msk.bf16.mxu0 %vm737_vm1, %v696_v53  ;;  %14402 = vmatmul.mubr.msk.bf16.gmra.mxu1 %vm737_vm1, %v16402_v61  ;;  %v1956_v61 = vor.u32 %v1955_v6, %v1952_v19  ;;  %v2396_v53 = vrot.slane %v12352_v32, 2  ;;  %v16672_v6 = vld [vmem:[%s16302_s15 + $0x40] sm:$0xff]   ;;  %v16683_v32 = vld [vmem:[%s16302_s15 + $0x48] sm:$0xff]  }
  0x65   : > { %14405 = vmatprep.mubr.msk.bf16.mxu1 %vm737_vm1, %v16410_v9  ;;  %v1973_v9 = vor.u32 %v1972_v48, %v1969_v37  ;;  %v2003_v37 = vshrl.u32 %v16652_v59, 16  ;;  %v16690_v48 = vsel %vm2395_vm5, %v2399_v24, %v2401_v28  ;;  %v2407_v24 = vrot.slane %v16652_v59, 2 }
  0x66   : > { %v16658_v15 = vsel %vm1948_vm4, %v1956_v61, %v1964_v52  ;;  %v16661_v11 = vsel %vm2395_vm5, %v2396_v53, %v2397_v50  ;;  %v1991_v61 = vor.u32 %v1990_v23, %v1987_v25  ;;  %v1996_v50 = vrot.slane %v1994_v26, 1 }
  0x67   : > { %v16667_v19 = vsel %vm1948_vm4, %v1964_v52, %v1973_v9  ;;  %v2005_v58 = vrot.slane %v2003_v37, 1  ;;  %v2021_v23 = vshrl.u32 %v16683_v32, 16 }
  0x69   : > { %v2009_v25 = vor.u32 %v2008_v51, %v2005_v58  ;;  %v16728_v51 = vld [vmem:[%s16302_s15 + $0x60] sm:$0xff]  }
  0x6b   : > { %14364 = vmatmul.mubr.msk.bf16.gmra.mxu0 %vm737_vm1, %v16574_v49  ;;  %v1982_v49 = vor.u32 %v1981_v44, %v1978_v17  ;;  %v2012_v17 = vshrl.u32 %v16672_v6, 16  ;;  %v16708_v44 = vld [vmem:[%s16302_s15 + $0x58] sm:$0xff]  }
  0x6c   : > { %14367 = vmatprep.mubr.msk.bf16.mxu0 %vm737_vm1, %v16582_v57  ;;  %14406 = vmatmul.mubr.msk.bf16.gmra.mxu1 %vm737_vm1, %v16416_v13  ;;  %v16693_v57 = vsel %vm2395_vm5, %v2401_v28, %v2403_v29  ;;  %v1999_v13 = vrot.slane %v1997_v31, 2  ;;  %v2024_v28 = vshll.u32 %v16683_v32, 16 }
  0x6d   : > { %14409 = vmatprep.mubr.msk.bf16.mxu1 %vm737_vm1, %v16457_v41  ;;  %v16696_v52 = vsel %vm1948_vm4, %v1973_v9, %v1982_v49  ;;  %v16699_v53 = vsel %vm1948_vm4, %v1982_v49, %v1991_v61  ;;  %v2405_v41 = vrot.slane %v16578_v34, 2  ;;  %v2015_v9 = vshll.u32 %v16672_v6, 16 }
  0x6e   : > { %v2000_v1 = vor.u32 %v1999_v13, %v1996_v50  ;;  %v2014_v37 = vrot.slane %v2012_v17, 1  ;;  %v2023_v13 = vrot.slane %v2021_v23, 1  ;;  %v2026_v58 = vrot.slane %v2024_v28, 2 }
  0x6f   : > { %v16717_v31 = vsel %vm2395_vm5, %v2403_v29, %v2405_v41  ;;  %v16720_v49 = vsel %vm2395_vm5, %v2405_v41, %v2407_v24  ;;  %v2017_v50 = vrot.slane %v2015_v9, 2  ;;  %v2411_v29 = vrot.slane %v16683_v32, 2 }
  0x70   : > { %v16714_v26 = vsel %vm1948_vm4, %v1991_v61, %v2000_v1  ;;  %20943 = vst [vmem:[#allocation13_spill] sm:$0xff] %v16720_v49  ;;  %v16723_v27 = vsel %vm1948_vm4, %v2000_v1, %v2009_v25  ;;  %v2409_v61 = vrot.slane %v16672_v6, 2  ;;  %v2033_v41 = vshll.u32 %v16702_v56, 16  ;;  %v16739_v1 = vld [vmem:[%s16302_s15 + $0x68] sm:$0xff]  }
  0x71   : > { %20944 = vst [vmem:[#allocation14_spill] sm:$0xff] %v16723_v27  ;;  %v2027_v17 = vor.u32 %v2026_v58, %v2023_v13  ;;  %v2039_v9 = vshrl.u32 %v16708_v44, 16  ;;  %v2042_v23 = vshll.u32 %v16708_v44, 16  ;;  %v16758_v58 = vld [vmem:[%s16302_s15 + $0x70] sm:$0xff]  }
  0x72   : > { %v16746_v28 = vsel %vm2395_vm5, %v2407_v24, %v2409_v61  ;;  %v2415_v24 = vrot.slane %v16708_v44, 2 }
  0x73   : > { %14368 = vmatmul.mubr.msk.bf16.gmra.mxu0 %vm737_vm1, %v16585_v33  ;;  %v2018_v33 = vor.u32 %v2017_v50, %v2014_v37  ;;  %v2041_v50 = vrot.slane %v2039_v9, 1  ;;  %v2044_v13 = vrot.slane %v2042_v23, 2  ;;  %v2060_v9 = vshll.u32 %v16739_v1, 16 }
  0x74   : > { %14371 = vmatprep.mubr.msk.bf16.mxu0 %vm737_vm1, %v16594_v45  ;;  %14410 = vmatmul.mubr.msk.bf16.gmra.mxu1 %vm737_vm1, %v16441_v30  ;;  %v16749_v45 = vsel %vm2395_vm5, %v2409_v61, %v2411_v29  ;;  %v2035_v30 = vrot.slane %v2033_v41, 2  ;;  %v2048_v61 = vshrl.u32 %v16728_v51, 16 }
  0x75   : > { %14453 = vmatprep.mubr.msk.bf16.mxu1 %vm737_vm1, %v16603_v38  ;;  %20945 = vst [vmem:[#allocation15_spill] sm:$0xff] %v16749_v45  ;;  %v16752_v27 = vsel %vm1948_vm4, %v2009_v25, %v2018_v33  ;;  %v16755_v37 = vsel %vm1948_vm4, %v2018_v33, %v2027_v17  ;;  %v2413_v38 = vrot.slane %v16702_v56, 2  ;;  %v2045_v41 = vor.u32 %v2044_v13, %v2041_v50 }
  0x76   : > { %20946 = vst [vmem:[#allocation16_spill] sm:$0xff] %v16752_v27  ;;  %20947 = vst [vmem:[#allocation17_spill] sm:$0xff] %v16755_v37  ;;  %v2036_v49 = vor.u32 %v2035_v30, %v2032_v3  ;;  %v2051_v25 = vshll.u32 %v16728_v51, 16  ;;  %v2057_v33 = vshrl.u32 %v16739_v1, 16  ;;  %v2050_v37 = vrot.slane %v2048_v61, 1 }
  0x77   : > { %v16773_v3 = vsel %vm2395_vm5, %v2411_v29, %v2413_v38  ;;  %v16776_v30 = vsel %vm2395_vm5, %v2413_v38, %v2415_v24  ;;  %v2062_v27 = vrot.slane %v2060_v9, 2  ;;  %v2417_v38 = vrot.slane %v16728_v51, 2 }
  0x78   : > { %v16770_v23 = vsel %vm1948_vm4, %v2027_v17, %v2036_v49  ;;  %20949 = vst [vmem:[#allocation19_spill] sm:$0xff] %v16773_v3  ;;  %20950 = vst [vmem:[#allocation20_spill] sm:$0xff] %v16776_v30  ;;  %v16779_v45 = vsel %vm1948_vm4, %v2036_v49, %v2045_v41  ;;  %v2053_v50 = vrot.slane %v2051_v25, 2  ;;  %v2059_v13 = vrot.slane %v2057_v33, 1  ;;  %v16789_v3 = vld [vmem:[%s16302_s15 + $0x80] sm:$0xff]  }
  0x79   : > { %20948 = vst [vmem:[#allocation18_spill] sm:$0xff] %v16770_v23  ;;  %20951 = vst [vmem:[#allocation21_spill] sm:$0xff] %v16779_v45  ;;  %v20952_v17 = vrot.slane %v16578_v34, 1  ;;  %v20953_v23 = vrot.slane %v16556_v39, 1  ;;  %v2419_v61 = vrot.slane %v16739_v1, 2  ;;  %v2066_v49 = vshrl.u32 %v16758_v58, 16 }
  0x7a   : > { %v2054_v39 = vor.u32 %v2053_v50, %v2050_v37  ;;  %v2063_v25 = vor.u32 %v2062_v27, %v2059_v13  ;;  %v2069_v33 = vshll.u32 %v16758_v58, 16  ;;  %v2075_v9 = vshrl.u32 %v16764_v40, 16 }
  0x7b   : > { %14372 = vmatmul.mubr.msk.bf16.gmra.mxu0 %vm737_vm1, %v16600_v62  ;;  %v1645_v29 = vsel %vm1195_vm3, %v20953_v23, %v20952_v17  ;;  %v16799_v62 = vld [vmem:[%s16302_s15 + $0x88] sm:$0xff]   ;;  %v16807_v23 = vsel %vm2395_vm5, %v2415_v24, %v2417_v38  ;;  %v2078_v17 = vshll.u32 %v16764_v40, 16  ;;  %v2421_v24 = vrot.slane %v16758_v58, 2 }
  0x7c   : > { %14415 = vmatprep.mubr.msk.bf16.mxu0 %vm737_vm1, %v16450_v8  ;;  %14454 = vmatmul.mubr.msk.bf16.vlgmr.msra.gmra.mxu1 %vm737_vm1, %v16608_v43  ;;  %20954 = vst [vmem:[#allocation22_spill] sm:$0xff] %v16807_v23  ;;  %v16810_v8 = vsel %vm2395_vm5, %v2417_v38, %v2419_v61  ;;  %v2068_v43 = vrot.slane %v2066_v49, 1  ;;  %v16814_v27 = vsel %vm1948_vm4, %v2045_v41, %v2054_v39  ;;  %v2071_v50 = vrot.slane %v2069_v33, 2 }
  0x7d   : > { %14457 = vmatprep.mubr.msk.bf16.mxu1 %vm737_vm1, %v16628_v22  ;;  %14528 = vmatpush3.bf16.msra.mxu1 %v16633_v7  ;;  %20955 = vst [vmem:[#allocation23_spill] sm:$0xff] %v16810_v8  ;;  %20956 = vst [vmem:[#allocation24_spill] sm:$0xff] %v16814_v27  ;;  %v16817_v37 = vsel %vm1948_vm4, %v2054_v39, %v2063_v25  ;;  %v2077_v13 = vrot.slane %v2075_v9, 1  ;;  %v16820_v22 = vld [vmem:[%s16302_s15 + $0x90] sm:$0xff]   ;;  %v2080_v7 = vrot.slane %v2078_v17, 2  ;;  %v2423_v45 = vrot.slane %v16764_v40, 2 }
  0x7e   : > { %20957 = vst [vmem:[#allocation25_spill] sm:$0xff] %v16817_v37  ;;  %v2084_v38 = vshrl.u32 %v16789_v3, 16  ;;  %v2072_v49 = vor.u32 %v2071_v50, %v2068_v43  ;;  %v2087_v8 = vshll.u32 %v16789_v3, 16  ;;  %v2093_v41 = vshrl.u32 %v16799_v62, 16  ;;  %v16837_v37 = vld [vmem:[%s20942_s1 + $0x18] sm:$0xf] }
  0x7f   : > { %v2096_v27 = vshll.u32 %v16799_v62, 16  ;;  %v2081_v39 = vor.u32 %v2080_v7, %v2077_v13  ;;  %v16829_v33 = vsel %vm2395_vm5, %v2419_v61, %v2421_v24  ;;  %v16832_v9 = vsel %vm2395_vm5, %v2421_v24, %v2423_v45 }
  0x80   : > { %v2086_v17 = vrot.slane %v2084_v38, 1  ;;  %v16840_v43 = vsel %vm1948_vm4, %v2063_v25, %v2072_v49  ;;  %v2089_v50 = vrot.slane %v2087_v8, 2  ;;  %v2095_v23 = vrot.slane %v2093_v41, 1 }
  0x81   : > { %v2098_v30 = vrot.slane %v2096_v27, 2  ;;  %v16845_v61 = vsel %vm1948_vm4, %v2072_v49, %v2081_v39  ;;  %v2425_v13 = vrot.slane %v16789_v3, 2  ;;  %v2427_v7 = vrot.slane %v16799_v62, 2 }
  0x82   : > { %v2102_v24 = vshrl.u32 %v16820_v22, 16  ;;  %v2090_v25 = vor.u32 %v2089_v50, %v2086_v17  ;;  %v2105_v27 = vshll.u32 %v16820_v22, 16  ;;  %v1648_v41 = vrot.slane %v16672_v6, 1 }
  0x83   : > { %14416 = vmatmul.mubr.msk.bf16.vlgmr.msra.gmra.mxu0 %vm737_vm1, %v16453_v36  ;;  %v2099_v8 = vor.u32 %v2098_v30, %v2095_v23  ;;  %v1646_v36 = vrot.slane %v16652_v59, 1  ;;  %v16859_v38 = vsel %vm2395_vm5, %v2423_v45, %v2425_v13  ;;  %v16862_v49 = vsel %vm2395_vm5, %v2425_v13, %v2427_v7 }
  0x84   : > { %14419 = vmatprep.mubr.msk.bf16.mxu0 %vm737_vm1, %v16463_v16  ;;  %14458 = vmatmul.mubr.msk.bf16.gmra.mxu1 %vm737_vm1, %v16641_v10  ;;  %v2104_v16 = vrot.slane %v2102_v24, 1  ;;  %v16868_v10 = vsel %vm1948_vm4, %v2081_v39, %v2090_v25  ;;  %v2107_v59 = vrot.slane %v2105_v27, 2  ;;  %v20958_v45 = vrot.slane %v16578_v34, 1  ;;  %v15301_v27 = vld [vmem:[%s16302_s15 + $0x98] ss:$0 sps:$4 sm:$0x33]  }
  0x85   : > { %14461 = vmatprep.mubr.msk.bf16.mxu1 %vm737_vm1, %v1645_v29  ;;  %14490 = vmatpush3.bf16.msra.mxu0 %v16622_v18  ;;  %v16871_v30 = vsel %vm1948_vm4, %v2090_v25, %v2099_v8  ;;  %v2429_v23 = vrot.slane %v16820_v22, 2  ;;  %v1649_v6 = vsel %vm1195_vm3, %v1646_v36, %v1648_v41  ;;  %v1650_v34 = vrot.slane %v16683_v32, 1 }
  0x86   : > { %15201 = vmatprep.subr.msk.bf16.mxu0 %vm792_vm0, %v16837_v37  ;;  %v16873_v18 = vor.u32 %v2107_v59, %v2104_v16  ;;  %v1647_v29 = vsel %vm1195_vm3, %v20958_v45, %v1646_v36  ;;  %v1652_v50 = vrot.slane %v16702_v56, 1  ;;  %v1656_v32 = vrot.slane %v16728_v51, 1  ;;  %v20971_v36 = vld [vmem:[#allocation25_spill] sm:$0xff] }
  0x87   : > { %v16889_v39 = vsel %vm2395_vm5, %v2427_v7, %v2429_v23  ;;  %v1651_v13 = vsel %vm1195_vm3, %v1648_v41, %v1650_v34 }
  0x88   : > { %v16882_v17 = vsel %vm1948_vm4, %v2099_v8, %v16873_v18  ;;  %v1653_v7 = vsel %vm1195_vm3, %v1650_v34, %v1652_v50 }
  0x8b   : > { %14420 = vmatmul.mubr.msk.bf16.gmra.mxu0 %vm737_vm1, %v16466_v42  ;;  %v12409_v42 = vld [vmem:[%s20942_s1 + $0x1c] sm:$0xf] }
  0x8c   : > { %14423 = vmatprep.mubr.msk.bf16.mxu0 %vm737_vm1, %v16479_v54  ;;  %14462 = vmatmul.mubr.msk.bf16.gmra.mxu1 %vm737_vm1, %v1647_v29  ;;  %v1654_v54 = vrot.slane %v16708_v44, 1 }
  0x8d   : > { %14465 = vmatprep.mubr.msk.bf16.mxu1 %vm737_vm1, %v1649_v6  ;;  %15202 = vmatprep.subr.msk.bf16.mxu1 %vm792_vm0, %v12409_v42  ;;  %v17037_v6 = vld [vmem:[%s16302_s15 + $0x20] sm:$0xff]  }
  0x8e   : > { %v1655_v56 = vsel %vm1195_vm3, %v1652_v50, %v1654_v54  ;;  %v1657_v24 = vsel %vm1195_vm3, %v1654_v54, %v1656_v32  ;;  %v17040_v50 = vld [vmem:[%s16302_s15 + $0x28] sm:$0xff]  }
  0x93   : > { %14424 = vmatmul.mubr.msk.bf16.gmra.mxu0 %vm737_vm1, %v16482_v55  ;;  %v1658_v55 = vrot.slane %v16739_v1, 1 }
  0x94   : > { %14427 = vmatprep.mubr.msk.bf16.mxu0 %vm737_vm1, %v16501_v63  ;;  %14466 = vmatmul.mubr.msk.bf16.gmra.mxu1 %vm737_vm1, %v1651_v13  ;;  %v1660_v63 = vrot.slane %v16758_v58, 1 }
  0x95   : > { %14469 = vmatprep.mubr.msk.bf16.mxu1 %vm737_vm1, %v1653_v7  ;;  %v1659_v44 = vsel %vm1195_vm3, %v1656_v32, %v1658_v55  ;;  %v2114_v32 = vshll.u32 %v15301_v27, 16 }
  0x96   : > { %v1661_v51 = vsel %vm1195_vm3, %v1658_v55, %v1660_v63 }
  0x9b   : > { %14428 = vmatmul.mubr.msk.bf16.gmra.mxu0 %vm737_vm1, %v16504_v0  ;;  %v1662_v0 = vrot.slane %v16764_v40, 1  ;;  %v15299_v40 = vld [vmem:[%s16302_s15 + $0x98] ss:$0 sps:$4 sm:$0x11]  }
  0x9c   : > { %14431 = vmatprep.mubr.msk.bf16.mxu0 %vm737_vm1, %v16511_v2  ;;  %14470 = vmatmul.mubr.msk.bf16.gmra.mxu1 %vm737_vm1, %v1655_v56  ;;  %v1664_v2 = vrot.slane %v16789_v3, 1 }
  0x9d   : > { %14473 = vmatprep.mubr.msk.bf16.mxu1 %vm737_vm1, %v1657_v24  ;;  %v1663_v1 = vsel %vm1195_vm3, %v1660_v63, %v1662_v0 }
  0x9e   : > { %v1665_v58 = vsel %vm1195_vm3, %v1662_v0, %v1664_v2  ;;  %v3170_v0 = vshll.u32 %v17037_v6, 16 }
  0xa3   : > { %14432 = vmatmul.mubr.msk.bf16.gmra.mxu0 %vm737_vm1, %v16532_v21  ;;  %v1666_v21 = vrot.slane %v16799_v62, 1  ;;  %v2704_v62 = vld [vmem:[%s16302_s15 + $0x14] sm:$0xf] }
  0xa4   : > { %14435 = vmatprep.mubr.msk.bf16.mxu0 %vm737_vm1, %v16540_v5  ;;  %14474 = vmatmul.mubr.msk.bf16.gmra.mxu1 %vm737_vm1, %v1659_v44  ;;  %v1668_v5 = vrot.slane %v16820_v22, 1  ;;  %v2431_v44 = vrot.slane %v15301_v27, 2 }
  0xa5   : > { %14477 = vmatprep.mubr.msk.bf16.mxu1 %vm737_vm1, %v1661_v51  ;;  %v1667_v3 = vsel %vm1195_vm3, %v1664_v2, %v1666_v21 }
  0xa6   : > { %v1669_v25 = vsel %vm1195_vm3, %v1666_v21, %v1668_v5  ;;  %v3179_v21 = vshll.u32 %v17040_v50, 16 }
  0xab   : > { %14436 = vmatmul.mubr.msk.bf16.gmra.mxu0 %vm737_vm1, %v16543_v12  ;;  %v1670_v12 = vrot.slane %v15299_v40, 1  ;;  %v2116_v40 = vrot.slane %v2114_v32, 2 }
  0xac   : > { %14439 = vmatprep.mubr.msk.bf16.mxu0 %vm737_vm1, %v16559_v46  ;;  %14478 = vmatmul.mubr.msk.bf16.gmra.mxu1 %vm737_vm1, %v1663_v1 }
  0xad   : > { %14481 = vmatprep.mubr.msk.bf16.mxu1 %vm737_vm1, %v1665_v58  ;;  %v1671_v46 = vsel %vm1195_vm3, %v1668_v5, %v1670_v12  ;;  %v17057_v58 = vld [vmem:[%s16302_s15 + $0x30] sm:$0xff]  }
  0xb3   : > { %14440 = vmatmul.mubr.msk.bf16.gmra.mxu0 %vm737_vm1, %v16562_v47  ;;  %v3374_v47 = vsel %vm792_vm0, %v12409_v42, 0 }
  0xb4   : > { %14443 = vmatprep.mubr.msk.bf16.mxu0 %vm737_vm1, %v16588_v35  ;;  %14482 = vmatmul.mubr.msk.bf16.gmra.mxu1 %vm737_vm1, %v1667_v3  ;;  %v2927_v35 = vsel %vm792_vm0, %v16837_v37, 0  ;;  %v17019_v37 = vld [vmem:[%s16302_s15 + $0x18] sm:$0xff]  }
  0xb5   : > { %14485 = vmatprep.mubr.msk.bf16.mxu1 %vm737_vm1, %v1669_v25  ;;  %v3158_v45 = vshrl.u32 %v17019_v37, 16  ;;  %v3161_v29 = vshll.u32 %v17019_v37, 16 }
  0xb7   : > { %v3160_v7 = vrot.slane %v3158_v45, 2 }
  0xbb   : > { %14444 = vmatmul.mubr.msk.bf16.gmra.mxu0 %vm737_vm1, %v16591_v60  ;;  %v16974_v60 = vld [vmem:[%s20942_s1 + $0x20] sm:$0xf] }
  0xbc   : > { %14447 = vmatprep.mubr.msk.bf16.mxu0 %vm737_vm1, %v16612_v4  ;;  %14486 = vmatmul.mubr.msk.bf16.gmra.mxu1 %vm737_vm1, %v1671_v46  ;;  %v20959_v4 = vld [vmem:[#allocation13_spill] sm:$0xff]  ;;  %v2432_v46 = vsel %vm2395_vm5, %v2429_v23, %v2431_v44 }
  0xbd   : > { %14529 = vmatprep.mubr.msk.bf16.mxu1 %vm737_vm1, %v16661_v11  ;;  %v20962_v11 = vld [vmem:[#allocation15_spill] sm:$0xff] }
  0xc3   : > { %14448 = vmatmul.mubr.msk.bf16.gmra.mxu0 %vm737_vm1, %v16615_v14  ;;  %v20960_v14 = vld [vmem:[#allocation14_spill] sm:$0xff] }
  0xc4   : > { %14491 = vmatprep.mubr.msk.bf16.mxu0 %vm737_vm1, %v16658_v15  ;;  %14530 = vmatmul.mubr.msk.bf16.vlgmr.msra.gmra.mxu1 %vm737_vm1, %v16664_v20  ;;  %v20961_v15 = vld [vmem:[#allocation16_spill] sm:$0xff]  ;;  %v20963_v20 = vld [vmem:[#allocation19_spill] sm:$0xff] }
  0xc5   : > { %14533 = vmatprep.mubr.msk.bf16.mxu1 %vm737_vm1, %v16690_v48  ;;  %14604 = vmatpush3.bf16.msra.mxu1 %v3374_v47  ;;  %v20965_v48 = vld [vmem:[#allocation18_spill] sm:$0xff] }
  0xcb   : > { %14492 = vmatmul.mubr.msk.bf16.vlgmr.msra.gmra.mxu0 %vm737_vm1, %v16667_v19  ;;  %v20964_v19 = vld [vmem:[#allocation17_spill] sm:$0xff] }
  0xcc   : > { %14495 = vmatprep.mubr.msk.bf16.mxu0 %vm737_vm1, %v16696_v52  ;;  %14534 = vmatmul.mubr.msk.bf16.gmra.mxu1 %vm737_vm1, %v16693_v57  ;;  %v20966_v57 = vld [vmem:[#allocation20_spill] sm:$0xff]  ;;  %v20967_v52 = vld [vmem:[#allocation22_spill] sm:$0xff] }
  0xcd   : > { %14537 = vmatprep.mubr.msk.bf16.mxu1 %vm737_vm1, %v16717_v31  ;;  %14566 = vmatpush3.bf16.msra.mxu0 %v2927_v35  ;;  %v20970_v31 = vld [vmem:[#allocation23_spill] sm:$0xff]  ;;  %v3172_v35 = vrot.slane %v3170_v0, 3 }
  0xce   : > { %15203 = vmatprep.subr.msk.bf16.mxu0 %vm792_vm0, %v16974_v60 }
  0xd3   : > { %14496 = vmatmul.mubr.msk.bf16.gmra.mxu0 %vm737_vm1, %v16699_v53  ;;  %v20968_v53 = vld [vmem:[#allocation21_spill] sm:$0xff] }
  0xd4   : > { %14499 = vmatprep.mubr.msk.bf16.mxu0 %vm737_vm1, %v16714_v26  ;;  %14538 = vmatmul.mubr.msk.bf16.gmra.mxu1 %vm737_vm1, %v20959_v4  ;;  %v20969_v26 = vld [vmem:[#allocation24_spill] sm:$0xff] }
  0xd5   : > { %14541 = vmatprep.mubr.msk.bf16.mxu1 %vm737_vm1, %v16746_v28  ;;  %v2703_v28 = vld [vmem:[%s16302_s15 + $0x10] sm:$0xc] }
  0xd6   : > { %v17021_v8 = vcombine.low %v2703_v28, %v2704_v62 }
  0xd8   : > { %v3153_v41 = vshll.u32 %v17021_v8, 16  ;;  %v2835_v23 = vrot.slane %v17021_v8, 2 }
  0xdb   : > { %14500 = vmatmul.mubr.msk.bf16.gmra.mxu0 %vm737_vm1, %v20960_v14 }
  0xdc   : > { %14503 = vmatprep.mubr.msk.bf16.mxu0 %vm737_vm1, %v20961_v15  ;;  %14542 = vmatmul.mubr.msk.bf16.gmra.mxu1 %vm737_vm1, %v20962_v11 }
  0xdd   : > { %14545 = vmatprep.mubr.msk.bf16.mxu1 %vm737_vm1, %v20963_v20  ;;  %v3181_v20 = vrot.slane %v3179_v21, 3 }
  0xe3   : > { %14504 = vmatmul.mubr.msk.bf16.gmra.mxu0 %vm737_vm1, %v20964_v19 }
  0xe4   : > { %14507 = vmatprep.mubr.msk.bf16.mxu0 %vm737_vm1, %v20965_v48  ;;  %14546 = vmatmul.mubr.msk.bf16.gmra.mxu1 %vm737_vm1, %v20966_v57 }
  0xe5   : > { %14549 = vmatprep.mubr.msk.bf16.mxu1 %vm737_vm1, %v20967_v52  ;;  %v2836_v52 = vrot.slane %v17019_v37, 2 }
  0xeb   : > { %14508 = vmatmul.mubr.msk.bf16.gmra.mxu0 %vm737_vm1, %v20968_v53  ;;  %v3185_v53 = vshrl.u32 %v17057_v58, 16 }
  0xec   : > { %14511 = vmatprep.mubr.msk.bf16.mxu0 %vm737_vm1, %v20969_v26  ;;  %14550 = vmatmul.mubr.msk.bf16.gmra.mxu1 %vm737_vm1, %v20970_v31  ;;  %v3188_v31 = vshll.u32 %v17057_v58, 16 }
  0xed   : > { %14553 = vmatprep.mubr.msk.bf16.mxu1 %vm737_vm1, %v16829_v33  ;;  %v3150_v33 = vshrl.u32 %v17021_v8, 16  ;;  %v3187_v45 = vrot.slane %v3185_v53, 2 }
  0xef   : > { %v3152_v42 = vrot.slane %v3150_v33, 2 }
  0xf3   : > { %14512 = vmatmul.mubr.msk.bf16.gmra.mxu0 %vm737_vm1, %v20971_v36 }
  0xf4   : > { %14515 = vmatprep.mubr.msk.bf16.mxu0 %vm737_vm1, %v16840_v43  ;;  %v14379_v16 = vpop.f32.mrf.mxu1  ;;  %14554 = vmatmul.mubr.msk.bf16.gmra.mxu1 %vm737_vm1, %v16832_v9  ;;  %v2111_v43 = vshrl.u32 %v15301_v27, 16  ;;  %v3155_v9 = vrot.slane %v3153_v41, 3 }
  0xf5   : > { %14557 = vmatprep.mubr.msk.bf16.mxu1 %vm737_vm1, %v16859_v38  ;;  %v3163_v38 = vrot.slane %v3161_v29, 3  ;;  %v17097_v29 = vld [vmem:[%s16302_s15 + $0x48] sm:$0xff]  }
  0xf6   : > { %v1046_v59 = vpop.f32.mrf.mxu1  ;;  %v2113_v55 = vrot.slane %v2111_v43, 1  ;;  %v3156_v51 = vor.u32 %v3155_v9, %v3152_v42  ;;  %v3190_v42 = vrot.slane %v3188_v31, 3  ;;  %v3212_v21 = vshrl.u32 %v17097_v29, 16 }
  0xf7   : > { %v2842_v31 = vrot.slane %v17057_v58, 2 }
  0xf8   : > { %v14380_v34 = vpop.f32.mrf.mxu1  ;;  %v2117_v48 = vor.u32 %v2116_v40, %v2113_v55  ;;  %v2838_v55 = vrot.slane %v17037_v6, 2  ;;  %v17118_v40 = vld [vmem:[%s16302_s15 + $0x50] sm:$0xff]  }
  0xfa   : > { %v1049_v13 = vpop.f32.mrf.mxu1  ;;  %v2118_v33 = vsel %vm1948_vm4, %v16873_v18, %v2117_v48 }
  0xfb   : > { %v14341_v54 = vpop.f32.mrf.mxu0  ;;  %14516 = vmatmul.mubr.msk.bf16.gmra.mxu0 %vm737_vm1, %v16845_v61  ;;  %v3167_v61 = vshrl.u32 %v17037_v6, 16  ;;  %v3215_v6 = vshll.u32 %v17097_v29, 16 }
  0xfc   : > { %v17044_v56 = vadd.f32 %v14379_v16, %v14341_v54  ;;  %14519 = vmatprep.mubr.msk.bf16.mxu0 %vm737_vm1, %v16868_v10  ;;  %v14383_v24 = vpop.f32.mrf.mxu1  ;;  %14558 = vmatmul.mubr.msk.bf16.gmra.mxu1 %vm737_vm1, %v16862_v49  ;;  %v3164_v10 = vor.u32 %v3163_v38, %v3160_v7  ;;  %v3176_v49 = vshrl.u32 %v17040_v50, 16  ;;  %v17089_v16 = vld [vmem:[%s16302_s15 + $0x40] sm:$0xff]  }
  0xfd   : > { %v830_v63 = vpop.f32.mrf.mxu0  ;;  %14561 = vmatprep.mubr.msk.bf16.mxu1 %vm737_vm1, %v16889_v39  ;;  %v17062_v39 = vld [vmem:[%s16302_s15 + $0x38] sm:$0xff]   ;;  %v3169_v47 = vrot.slane %v3167_v61, 2  ;;  %v3203_v0 = vshrl.u32 %v17089_v16, 16 }
  0xfe   : > { %v17054_v2 = vadd.f32 %v1046_v59, %v830_v63  ;;  %v1062_v1 = vpop.f32.mrf.mxu1  ;;  %v3165_v15 = vsel %vm3148_vm6, %v3156_v51, %v3164_v10  ;;  %v3178_v11 = vrot.slane %v3176_v49, 2  ;;  %v3194_v28 = vshrl.u32 %v17062_v39, 16 }
  0xff   : > { %v14342_v5 = vpop.f32.mrf.mxu0  ;;  %v2837_v59 = vsel %vm2395_vm5, %v2835_v23, %v2836_v52  ;;  %v2840_v63 = vrot.slane %v17040_v50, 2  ;;  %v3191_v51 = vor.u32 %v3190_v42, %v3187_v45  ;;  %v3217_v23 = vrot.slane %v3215_v6, 3 }
 0x100   : > { %v17064_v3 = vadd.f32 %v14380_v34, %v14342_v5  ;;  %v14384_v25 = vpop.f32.mrf.mxu1  ;;  %v3182_v36 = vor.u32 %v3181_v20, %v3178_v11  ;;  %v3196_v9 = vrot.slane %v3194_v28, 2  ;;  %v3205_v11 = vrot.slane %v3203_v0, 2 }
 0x101   : > { %v833_v12 = vpop.f32.mrf.mxu0  ;;  %v2843_v42 = vsel %vm2395_vm5, %v2840_v63, %v2842_v31 }
 0x102   : > { %v17069_v4 = vadd.f32 %v1049_v13, %v833_v12  ;;  %v1065_v14 = vpop.f32.mrf.mxu1 }
 0x103   : > { %v14345_v19 = vpop.f32.mrf.mxu0  ;;  %14520 = vmatmul.mubr.msk.bf16.gmra.mxu0 %vm737_vm1, %v16871_v30  ;;  %v3173_v30 = vor.u32 %v3172_v35, %v3169_v47  ;;  %v17125_v47 = vld [vmem:[%s16302_s15 + $0x58] sm:$0xff]  }
 0x104   : > { %v17074_v57 = vadd.f32 %v14383_v24, %v14345_v19  ;;  %14523 = vmatprep.mubr.msk.bf16.mxu0 %vm737_vm1, %v16882_v17  ;;  %v14387_v22 = vpop.f32.mrf.mxu1  ;;  %14562 = vmatmul.mubr.msk.bf16.gmra.mxu1 %vm737_vm1, %v2432_v46  ;;  %v3197_v17 = vshll.u32 %v17062_v39, 16  ;;  %v2841_v46 = vsel %vm2395_vm5, %v2838_v55, %v2840_v63  ;;  %v3230_v58 = vshrl.u32 %v17125_v47, 16 }
 0x105   : > { %v846_v26 = vpop.f32.mrf.mxu0  ;;  %14605 = vmatprep.mubr.msk.bf16.mxu1 %vm737_vm1, %v3165_v15  ;;  %v3174_v43 = vsel %vm3148_vm6, %v3164_v10, %v3173_v30  ;;  %v3183_v54 = vsel %vm3148_vm6, %v3173_v30, %v3182_v36 }
 0x106   : > { %v17086_v62 = vadd.f32 %v1062_v1, %v846_v26  ;;  %v1078_v27 = vpop.f32.mrf.mxu1  ;;  %v3199_v13 = vrot.slane %v3197_v17, 3  ;;  %v3206_v1 = vshll.u32 %v17089_v16, 16  ;;  %v2844_v17 = vrot.slane %v17062_v39, 2 }
 0x107   : > { %v14346_v8 = vpop.f32.mrf.mxu0 }
 0x108   : > { %v17091_v37 = vadd.f32 %v14384_v25, %v14346_v8  ;;  %v14388_v41 = vpop.f32.mrf.mxu1  ;;  %v3200_v61 = vor.u32 %v3199_v13, %v3196_v9  ;;  %v2839_v25 = vsel %vm2395_vm5, %v2836_v52, %v2838_v55  ;;  %v3208_v20 = vrot.slane %v3206_v1, 3  ;;  %v17154_v13 = vld [vmem:[%s16302_s15 + $0x68] sm:$0xff]  }
 0x109   : > { %v849_v34 = vpop.f32.mrf.mxu0  ;;  %v3688_v52 = vsel %vm792_vm0, %v16974_v60, 0  ;;  %20973 = vst [vmem:[#allocation14_spill] sm:$0xff] %v17154_v13  ;;  %v3232_v1 = vrot.slane %v3230_v58, 2 }
 0x10a   : > { %v17100_v7 = vadd.f32 %v1065_v14, %v849_v34  ;;  %v1081_v38 = vpop.f32.mrf.mxu1  ;;  %v3192_v14 = vsel %vm3148_vm6, %v3182_v36, %v3191_v51  ;;  %v3201_v15 = vsel %vm3148_vm6, %v3191_v51, %v3200_v61  ;;  %v3209_v60 = vor.u32 %v3208_v20, %v3205_v11  ;;  %v17148_v34 = vld [vmem:[%s16302_s15 + $0x60] sm:$0xff]  }
 0x10b   : > { %v14349_v32 = vpop.f32.mrf.mxu0  ;;  %14524 = vmatmul.mubr.msk.bf16.gmra.mxu0 %vm737_vm1, %v2118_v33  ;;  %v3224_v36 = vshll.u32 %v17118_v40, 16  ;;  %20972 = vst [vmem:[#allocation13_spill] sm:$0xff] %v17148_v34  ;;  %v3248_v20 = vshrl.u32 %v17154_v13, 16 }
 0x10c   : > { %v17104_v18 = vadd.f32 %v14387_v22, %v14349_v32  ;;  %14567 = vmatprep.mubr.msk.bf16.mxu0 %vm737_vm1, %v2837_v59  ;;  %v14391_v24 = vpop.f32.mrf.mxu1  ;;  %14606 = vmatmul.mubr.msk.bf16.vlgmr.msra.gmra.mxu1 %vm737_vm1, %v3174_v43  ;;  %v3214_v22 = vrot.slane %v3212_v21, 2  ;;  %v3233_v59 = vshll.u32 %v17125_v47, 16  ;;  %v3210_v32 = vsel %vm3148_vm6, %v3200_v61, %v3209_v60 }
 0x10d   : > { %v862_v44 = vpop.f32.mrf.mxu0  ;;  %14609 = vmatprep.mubr.msk.bf16.mxu1 %vm737_vm1, %v3183_v54  ;;  %v2845_v54 = vsel %vm2395_vm5, %v2842_v31, %v2844_v17  ;;  %v3226_v55 = vrot.slane %v3224_v36, 3  ;;  %v2846_v61 = vrot.slane %v17089_v16, 2  ;;  %v17182_v31 = vld [vmem:[%s16302_s15 + $0x78] sm:$0xff]  }
 0x10e   : > { %v17113_v10 = vadd.f32 %v1078_v27, %v862_v44  ;;  %v1094_v49 = vpop.f32.mrf.mxu1  ;;  %v3221_v27 = vshrl.u32 %v17118_v40, 16  ;;  %20974 = vst [vmem:[#allocation16_spill] sm:$0xff] %v17182_v31 }
 0x10f   : > { %v14350_v5 = vpop.f32.mrf.mxu0 }
 0x110   : > { %v17120_v50 = vadd.f32 %v14388_v41, %v14350_v5  ;;  %v14392_v12 = vpop.f32.mrf.mxu1  ;;  %v3218_v41 = vor.u32 %v3217_v23, %v3214_v22  ;;  %v17176_v23 = vld [vmem:[%s16302_s15 + $0x70] sm:$0xff]  }
 0x111   : > { %v865_v35 = vpop.f32.mrf.mxu0 }
 0x112   : > { %v17129_v19 = vadd.f32 %v1081_v38, %v865_v35  ;;  %v1097_v48 = vpop.f32.mrf.mxu1  ;;  %v3219_v0 = vsel %vm3148_vm6, %v3209_v60, %v3218_v41  ;;  %v3242_v35 = vshll.u32 %v17148_v34, 16 }
 0x113   : > { %v14353_v53 = vpop.f32.mrf.mxu0  ;;  %14568 = vmatmul.mubr.msk.bf16.vlgmr.msra.gmra.mxu0 %vm737_vm1, %v2839_v25  ;;  %v2848_v25 = vrot.slane %v17097_v29, 2 }
 0x114   : > { %v17134_v26 = vadd.f32 %v14391_v24, %v14353_v53  ;;  %14571 = vmatprep.mubr.msk.bf16.mxu0 %vm737_vm1, %v2841_v46  ;;  %v14395_v30 = vpop.f32.mrf.mxu1  ;;  %14610 = vmatmul.mubr.msk.bf16.gmra.mxu1 %vm737_vm1, %v3192_v14  ;;  %v3223_v24 = vrot.slane %v3221_v27, 2  ;;  %v3239_v46 = vshrl.u32 %v17148_v34, 16  ;;  %v2847_v53 = vsel %vm2395_vm5, %v2844_v17, %v2846_v61 }
 0x115   : > { %v878_v28 = vpop.f32.mrf.mxu0  ;;  %14613 = vmatprep.mubr.msk.bf16.mxu1 %vm737_vm1, %v3201_v15  ;;  %14642 = vmatpush3.bf16.msra.mxu0 %v3688_v52  ;;  %v2849_v60 = vsel %vm2395_vm5, %v2846_v61, %v2848_v25  ;;  %v3269_v61 = vshll.u32 %v17182_v31, 16 }
 0x116   : > { %v17143_v8 = vadd.f32 %v1094_v49, %v878_v28  ;;  %v1110_v33 = vpop.f32.mrf.mxu1  ;;  %v3235_v49 = vrot.slane %v3233_v59, 3  ;;  %v3241_v36 = vrot.slane %v3239_v46, 2 }
 0x117   : > { %v14354_v45 = vpop.f32.mrf.mxu0 }
 0x118   : > { %v17150_v43 = vadd.f32 %v14392_v12, %v14354_v45  ;;  %v14396_v9 = vpop.f32.mrf.mxu1  ;;  %v3227_v12 = vor.u32 %v3226_v55, %v3223_v24  ;;  %v3236_v11 = vor.u32 %v3235_v49, %v3232_v1  ;;  %v2852_v24 = vrot.slane %v17125_v47, 2 }
 0x119   : > { %v881_v38 = vpop.f32.mrf.mxu0 }
 0x11a   : > { %v17158_v44 = vadd.f32 %v1097_v48, %v881_v38  ;;  %v1113_v51 = vpop.f32.mrf.mxu1  ;;  %v3251_v48 = vshll.u32 %v17154_v13, 16  ;;  %v3228_v27 = vsel %vm3148_vm6, %v3218_v41, %v3227_v12  ;;  %v3237_v45 = vsel %vm3148_vm6, %v3227_v12, %v3236_v11  ;;  %v17204_v12 = vld [vmem:[%s16302_s15 + $0x80] sm:$0xff]  }
 0x11b   : > { %v14357_v21 = vpop.f32.mrf.mxu0  ;;  %14572 = vmatmul.mubr.msk.bf16.gmra.mxu0 %vm737_vm1, %v2843_v42  ;;  %v3250_v42 = vrot.slane %v3248_v20, 2  ;;  %v2850_v41 = vrot.slane %v17118_v40, 2 }
 0x11c   : > { %v17162_v63 = vadd.f32 %v14395_v30, %v14357_v21  ;;  %14575 = vmatprep.mubr.msk.bf16.mxu0 %vm737_vm1, %v2845_v54  ;;  %v14399_v6 = vpop.f32.mrf.mxu1  ;;  %14614 = vmatmul.mubr.msk.bf16.gmra.mxu1 %vm737_vm1, %v3210_v32 }
 0x11d   : > { %v894_v5 = vpop.f32.mrf.mxu0  ;;  %14617 = vmatprep.mubr.msk.bf16.mxu1 %vm737_vm1, %v3219_v0  ;;  %v3260_v0 = vshll.u32 %v17176_v23, 16 }
 0x11e   : > { %v17171_v14 = vadd.f32 %v1110_v33, %v894_v5  ;;  %v1126_v15 = vpop.f32.mrf.mxu1  ;;  %v3244_v33 = vrot.slane %v3242_v35, 3  ;;  %v2851_v35 = vsel %vm2395_vm5, %v2848_v25, %v2850_v41 }
 0x11f   : > { %v14358_v22 = vpop.f32.mrf.mxu0 }
 0x120   : > { %v17178_v52 = vadd.f32 %v14396_v9, %v14358_v22  ;;  %v14400_v30 = vpop.f32.mrf.mxu1  ;;  %v3253_v9 = vrot.slane %v3251_v48, 3  ;;  %v3245_v55 = vor.u32 %v3244_v33, %v3241_v36  ;;  %v17210_v48 = vld [vmem:[%s16302_s15 + $0x88] sm:$0xff]  }
 0x121   : > { %v897_v28 = vpop.f32.mrf.mxu0 }
 0x122   : > { %v17186_v58 = vadd.f32 %v1113_v51, %v897_v28  ;;  %v1129_v59 = vpop.f32.mrf.mxu1  ;;  %v3257_v51 = vshrl.u32 %v17176_v23, 16  ;;  %v3254_v21 = vor.u32 %v3253_v9, %v3250_v42 }
 0x123   : > { %v14361_v38 = vpop.f32.mrf.mxu0  ;;  %14576 = vmatmul.mubr.msk.bf16.gmra.mxu0 %vm737_vm1, %v2847_v53  ;;  %v3246_v53 = vsel %vm3148_vm6, %v3236_v11, %v3245_v55  ;;  %v2854_v11 = vrot.slane %v17148_v34, 2  ;;  %v17243_v34 = vld [vmem:[%s16302_s15 + $0x98] sm:$0xff]  }
 0x124   : > { %v17190_v17 = vadd.f32 %v14399_v6, %v14361_v38  ;;  %14579 = vmatprep.mubr.msk.bf16.mxu0 %vm737_vm1, %v2849_v60  ;;  %v14403_v54 = vpop.f32.mrf.mxu1  ;;  %14618 = vmatmul.mubr.msk.bf16.gmra.mxu1 %vm737_vm1, %v3228_v27  ;;  %v3266_v6 = vshrl.u32 %v17182_v31, 16  ;;  %v3259_v28 = vrot.slane %v3257_v51, 2  ;;  %v3262_v60 = vrot.slane %v3260_v0, 3 }
 0x125   : > { %v910_v32 = vpop.f32.mrf.mxu0  ;;  %14621 = vmatprep.mubr.msk.bf16.mxu1 %vm737_vm1, %v3237_v45  ;;  %v3255_v33 = vsel %vm3148_vm6, %v3245_v55, %v3254_v21  ;;  %v2856_v38 = vrot.slane %v17154_v13, 2  ;;  %v3278_v55 = vshll.u32 %v17204_v12, 16 }
 0x126   : > { %v17199_v1 = vadd.f32 %v1126_v15, %v910_v32  ;;  %v1142_v49 = vpop.f32.mrf.mxu1  ;;  %v2853_v15 = vsel %vm2395_vm5, %v2850_v41, %v2852_v24  ;;  %v3268_v45 = vrot.slane %v3266_v6, 2  ;;  %v3263_v41 = vor.u32 %v3262_v60, %v3259_v28 }
 0x127   : > { %v14362_v5 = vpop.f32.mrf.mxu0  ;;  %v3275_v32 = vshrl.u32 %v17204_v12, 16  ;;  %v3284_v6 = vshrl.u32 %v17210_v48, 16  ;;  %v2857_v60 = vsel %vm2395_vm5, %v2854_v11, %v2856_v38 }
 0x128   : > { %v17206_v46 = vadd.f32 %v14400_v30, %v14362_v5  ;;  %v14404_v20 = vpop.f32.mrf.mxu1  ;;  %v3271_v30 = vrot.slane %v3269_v61, 3  ;;  %v3287_v61 = vshll.u32 %v17210_v48, 16 }
 0x129   : > { %v913_v22 = vpop.f32.mrf.mxu0 }
 0x12a   : > { %v17214_v27 = vadd.f32 %v1129_v59, %v913_v22  ;;  %v1145_v36 = vpop.f32.mrf.mxu1  ;;  %v3272_v0 = vor.u32 %v3271_v30, %v3268_v45  ;;  %v3280_v45 = vrot.slane %v3278_v55, 3  ;;  %v3289_v13 = vrot.slane %v3287_v61, 3 }
 0x12b   : > { %v14365_v42 = vpop.f32.mrf.mxu0  ;;  %14580 = vmatmul.mubr.msk.bf16.gmra.mxu0 %vm737_vm1, %v2851_v35  ;;  %v17232_v35 = vld [vmem:[%s16302_s15 + $0x90] sm:$0xff]  }
 0x12c   : > { %v17218_v25 = vadd.f32 %v14403_v54, %v14365_v42  ;;  %14583 = vmatprep.mubr.msk.bf16.mxu0 %vm737_vm1, %v2853_v15  ;;  %v14407_v9 = vpop.f32.mrf.mxu1  ;;  %14622 = vmatmul.mubr.msk.bf16.gmra.mxu1 %vm737_vm1, %v3246_v53  ;;  %v2855_v15 = vsel %vm2395_vm5, %v2852_v24, %v2854_v11  ;;  %v3293_v55 = vshrl.u32 %v17232_v35, 16 }
 0x12d   : > { %v926_v59 = vpop.f32.mrf.mxu0  ;;  %14625 = vmatprep.mubr.msk.bf16.mxu1 %vm737_vm1, %v3255_v33  ;;  %v3277_v33 = vrot.slane %v3275_v32, 2  ;;  %v2860_v32 = vrot.slane %v17182_v31, 2 }
 0x12e   : > { %v17227_v54 = vadd.f32 %v1142_v49, %v926_v59  ;;  %v1158_v51 = vpop.f32.mrf.mxu1  ;;  %v3264_v49 = vsel %vm3148_vm6, %v3254_v21, %v3263_v41  ;;  %v3273_v59 = vsel %vm3148_vm6, %v3263_v41, %v3272_v0  ;;  %v2858_v21 = vrot.slane %v17176_v23, 2 }
 0x12f   : > { %v14366_v5 = vpop.f32.mrf.mxu0  ;;  %v3281_v41 = vor.u32 %v3280_v45, %v3277_v33 }
 0x130   : > { %20975 = vst [vmem:[#allocation15_spill] sm:$0xff] %v17227_v54  ;;  %v17234_v22 = vadd.f32 %v14404_v20, %v14366_v5  ;;  %v14408_v53 = vpop.f32.mrf.mxu1  ;;  %v3286_v54 = vrot.slane %v3284_v6, 2  ;;  %v3296_v6 = vshll.u32 %v17232_v35, 16 }
 0x131   : > { %v929_v28 = vpop.f32.mrf.mxu0  ;;  %v3282_v31 = vsel %vm3148_vm6, %v3272_v0, %v3281_v41  ;;  %v2862_v0 = vrot.slane %v17204_v12, 2 }
 0x132   : > { %v17239_v30 = vadd.f32 %v1145_v36, %v929_v28  ;;  %v1161_v42 = vpop.f32.mrf.mxu1  ;;  %v3290_v5 = vor.u32 %v3289_v13, %v3286_v54  ;;  %v3305_v28 = vshll.u32 %v17243_v34, 16 }
 0x133   : > { %v14369_v20 = vpop.f32.mrf.mxu0  ;;  %14584 = vmatmul.mubr.msk.bf16.gmra.mxu0 %vm737_vm1, %v2855_v15  ;;  %v3302_v15 = vshrl.u32 %v17243_v34, 16 }
 0x134   : > { %v17246_v24 = vadd.f32 %v14407_v9, %v14369_v20  ;;  %14587 = vmatprep.mubr.msk.bf16.mxu0 %vm737_vm1, %v2857_v60  ;;  %v14411_v11 = vpop.f32.mrf.mxu1  ;;  %14626 = vmatmul.mubr.msk.bf16.gmra.mxu1 %vm737_vm1, %v3264_v49  ;;  %v2861_v20 = vsel %vm2395_vm5, %v2858_v21, %v2860_v32 }
 0x135   : > { %v942_v36 = vpop.f32.mrf.mxu0  ;;  %14629 = vmatprep.mubr.msk.bf16.mxu1 %vm737_vm1, %v3273_v59  ;;  %v2859_v59 = vsel %vm2395_vm5, %v2856_v38, %v2858_v21 }
 0x136   : > { %v17255_v9 = vadd.f32 %v1158_v51, %v942_v36  ;;  %v17257_v61 = vpop.f32.mrf.mxu1  ;;  %v3295_v51 = vrot.slane %v3293_v55, 2  ;;  %v3298_v36 = vrot.slane %v3296_v6, 3  ;;  %v2864_v55 = vrot.slane %v17210_v48, 2 }
 0x137   : > { %20977 = vst [vmem:[#allocation17_spill] sm:$0xff] %v17257_v61  ;;  %v14370_v60 = vpop.f32.mrf.mxu0  ;;  %v3291_v61 = vsel %vm3148_vm6, %v3281_v41, %v3290_v5 }
 0x138   : > { %20976 = vst [vmem:[#allocation19_spill] sm:$0xff] %v17255_v9  ;;  %v17261_v49 = vadd.f32 %v14408_v53, %v14370_v60  ;;  %v14412_v33 = vpop.f32.mrf.mxu1  ;;  %v17267_v9 = vld [vmem:[%s16302_s15 + $0xa0] ss:$0 sps:$4 sm:$0x77]   ;;  %v3304_v53 = vrot.slane %v3302_v15, 2  ;;  %v3307_v60 = vrot.slane %v3305_v28, 3  ;;  %v3299_v41 = vor.u32 %v3298_v36, %v3295_v51 }
 0x139   : > { %v945_v45 = vpop.f32.mrf.mxu0  ;;  %20979 = vst [vmem:[#allocation20_spill] sm:$0xff] %v17267_v9  ;;  %v3311_v6 = vshrl.u32 %v17267_v9, 16  ;;  %v3314_v15 = vshll.u32 %v17267_v9, 16 }
 0x13a   : > { %20978 = vst [vmem:[#allocation18_spill] sm:$0xff] %v17261_v49  ;;  %v17269_v13 = vadd.f32 %v1161_v42, %v945_v45  ;;  %v17271_v54 = vpop.f32.mrf.mxu1  ;;  %v3308_v28 = vor.u32 %v3307_v60, %v3304_v53  ;;  %v2863_v45 = vsel %vm2395_vm5, %v2860_v32, %v2862_v0  ;;  %v2866_v32 = vrot.slane %v17232_v35, 2 }
 0x13b   : > { %20980 = vst [vmem:[#allocation22_spill] sm:$0xff] %v17271_v54  ;;  %v14373_v49 = vpop.f32.mrf.mxu0  ;;  %14588 = vmatmul.mubr.msk.bf16.gmra.mxu0 %vm737_vm1, %v2859_v59  ;;  %v2865_v54 = vsel %vm2395_vm5, %v2862_v0, %v2864_v55  ;;  %v3313_v51 = vrot.slane %v3311_v6, 2  ;;  %v3316_v36 = vrot.slane %v3314_v15, 3  ;;  %v2868_v0 = vrot.slane %v17243_v34, 2 }
 0x13c   : > { %v17275_v38 = vadd.f32 %v14411_v11, %v14373_v49  ;;  %14591 = vmatprep.mubr.msk.bf16.mxu0 %vm737_vm1, %v2861_v20  ;;  %v14455_v21 = vpop.f32.mrf.mxu1  ;;  %14630 = vmatmul.mubr.msk.bf16.gmra.mxu1 %vm737_vm1, %v3282_v31 }
 0x13d   : > { %v17280_v42 = vpop.f32.mrf.mxu0  ;;  %14633 = vmatprep.mubr.msk.bf16.mxu1 %vm737_vm1, %v3291_v61  ;;  %v3300_v61 = vsel %vm3148_vm6, %v3290_v5, %v3299_v41  ;;  %v2869_v9 = vsel %vm2395_vm5, %v2866_v32, %v2868_v0 }
 0x13e   : > { %20981 = vst [vmem:[#allocation21_spill] sm:$0xff] %v17280_v42  ;;  %v17286_v11 = vpop.f32.mrf.mxu1 }
 0x13f   : > { %20982 = vst [vmem:[#allocation24_spill] sm:$0xff] %v17286_v11  ;;  %v14374_v49 = vpop.f32.mrf.mxu0  ;;  %v3309_v11 = vsel %vm3148_vm6, %v3299_v41, %v3308_v28  ;;  %v3317_v41 = vor.u32 %v3316_v36, %v3313_v51 }
 0x140   : > { %v17288_v59 = vadd.f32 %v14412_v33, %v14374_v49  ;;  %v14456_v31 = vpop.f32.mrf.mxu1 }
 0x141   : > { %v17291_v20 = vpop.f32.mrf.mxu0 }
 0x142   : > { %20983 = vst [vmem:[#allocation23_spill] sm:$0xff] %v17291_v20  ;;  %v17295_v42 = vpop.f32.mrf.mxu1 }
 0x143   : > { %20984 = vst [vmem:[#allocation25_spill] sm:$0xff] %v17295_v42  ;;  %v14417_v53 = vpop.f32.mrf.mxu0  ;;  %14592 = vmatmul.mubr.msk.bf16.gmra.mxu0 %vm737_vm1, %v2863_v45  ;;  %v15320_v42 = vld [vmem:[%s16302_s15 + $0xa0] ss:$0 sps:$4 sm:$0x33]  }
 0x144   : > { %v1469_v33 = vadd.f32 %v14417_v53, %v17044_v56  ;;  %14595 = vmatprep.mubr.msk.bf16.mxu0 %vm737_vm1, %v2865_v54  ;;  %v14459_v60 = vpop.f32.mrf.mxu1  ;;  %14634 = vmatmul.mubr.msk.bf16.gmra.mxu1 %vm737_vm1, %v3300_v61  ;;  %v3589_v54 = vld [vmem:[%s16302_s15 + $0x10] sm:$0x8]  ;;  %v2867_v61 = vsel %vm2395_vm5, %v2864_v55, %v2866_v32  ;;  %v2870_v32 = vrot.slane %v15320_v42, 2 }
 0x145   : > { %v1324_v5 = vpop.f32.mrf.mxu0  ;;  %14637 = vmatprep.mubr.msk.bf16.mxu1 %vm737_vm1, %v3309_v11  ;;  %v3318_v11 = vsel %vm3148_vm6, %v3308_v28, %v3317_v41 }
 0x146   : > { %v17306_v6 = vadd.f32 %v1324_v5, %v17054_v2  ;;  %v17308_v15 = vadd.f32 %v14455_v21, %v1469_v33  ;;  %v17310_v56 = vpop.f32.mrf.mxu1  ;;  %v16054_v2 = vld [vmem:[%s16302_s15 + $0x14] sm:$0xf]  ;;  %v2871_v42 = vsel %vm2395_vm5, %v2868_v0, %v2870_v32 }
 0x147   : > { %v14418_v49 = vpop.f32.mrf.mxu0  ;;  %v12430_v51 = vcombine.low %v3589_v54, %v16054_v2  ;;  %v16055_v54 = vld [vmem:[%s16302_s15 + $0x18] sm:$0xff]  }
 0x148   : > { %v1470_v45 = vadd.f32 %v14418_v49, %v17064_v3  ;;  %v14460_v53 = vpop.f32.mrf.mxu1 }
 0x149   : > { %v1327_v20 = vpop.f32.mrf.mxu0  ;;  %v3596_v41 = vrot.slane %v12430_v51, 3 }
 0x14a   : > { %v17320_v21 = vadd.f32 %v1327_v20, %v17069_v4  ;;  %v17322_v36 = vadd.f32 %v14456_v31, %v1470_v45  ;;  %v17324_v33 = vpop.f32.mrf.mxu1  ;;  %v3597_v4 = vrot.slane %v16055_v54, 3 }
 0x14b   : > { %v14421_v3 = vpop.f32.mrf.mxu0  ;;  %14596 = vmatmul.mubr.msk.bf16.gmra.mxu0 %vm737_vm1, %v2867_v61 }
 0x14c   : > { %v1473_v55 = vadd.f32 %v14421_v3, %v17074_v57  ;;  %14599 = vmatprep.mubr.msk.bf16.mxu0 %vm737_vm1, %v2869_v9  ;;  %v14463_v5 = vpop.f32.mrf.mxu1  ;;  %14638 = vmatmul.mubr.msk.bf16.gmra.mxu1 %vm737_vm1, %v3318_v11  ;;  %v3598_v11 = vsel %vm3595_vm7, %v3596_v41, %v3597_v4 }
 0x14d   : > { %v1340_v28 = vpop.f32.mrf.mxu0 }
 0x14e   : > { %v17332_v31 = vadd.f32 %v1340_v28, %v17086_v62  ;;  %v17334_v20 = vadd.f32 %v14459_v60, %v1473_v55  ;;  %v17336_v49 = vpop.f32.mrf.mxu1  ;;  %v16057_v28 = vld [vmem:[%s16302_s15 + $0x28] sm:$0xff]  }
 0x14f   : > { %v14422_v57 = vpop.f32.mrf.mxu0  ;;  %v3601_v41 = vrot.slane %v16057_v28, 3 }
 0x150   : > { %v1474_v9 = vadd.f32 %v14422_v57, %v17091_v37  ;;  %v14464_v45 = vpop.f32.mrf.mxu1  ;;  %v16056_v37 = vld [vmem:[%s16302_s15 + $0x20] sm:$0xff]  }
 0x151   : > { %v1343_v61 = vpop.f32.mrf.mxu0  ;;  %v3599_v0 = vrot.slane %v16056_v37, 3 }
 0x152   : > { %v17342_v2 = vadd.f32 %v1343_v61, %v17100_v7  ;;  %v17344_v62 = vadd.f32 %v14460_v53, %v1474_v9  ;;  %v17346_v60 = vpop.f32.mrf.mxu1 }
 0x153   : > { %v14425_v51 = vpop.f32.mrf.mxu0  ;;  %14600 = vmatmul.mubr.msk.bf16.gmra.mxu0 %vm737_vm1, %v2871_v42 }
 0x154   : > { %v1477_v3 = vadd.f32 %v14425_v51, %v17104_v18  ;;  %14643 = vmatprep.mubr.msk.bf16.mxu0 %vm737_vm1, %v3598_v11  ;;  %v14467_v55 = vpop.f32.mrf.mxu1  ;;  %v3600_v18 = vsel %vm3595_vm7, %v3597_v4, %v3599_v0  ;;  %v3602_v11 = vsel %vm3595_vm7, %v3599_v0, %v3601_v41  ;;  %v3605_v0 = vrot.slane %v17062_v39, 3 }
 0x155   : > { %v1356_v32 = vpop.f32.mrf.mxu0 }
 0x156   : > { %v17354_v7 = vadd.f32 %v1356_v32, %v17113_v10  ;;  %v17356_v53 = vadd.f32 %v14463_v5, %v1477_v3  ;;  %v17358_v54 = vpop.f32.mrf.mxu1 }
 0x157   : > { %v14426_v57 = vpop.f32.mrf.mxu0 }
 0x158   : > { %v1478_v9 = vadd.f32 %v14426_v57, %v17120_v50  ;;  %v14468_v42 = vpop.f32.mrf.mxu1  ;;  %v16058_v50 = vld [vmem:[%s16302_s15 + $0x30] sm:$0xff]   ;;  %s13641_s15 = sshll.u32 %s16252_s29, 5  ;;  %s16091_s29 = sshll.u32 %s16160_s16, 4  ;;  %s16092_s29 = int_to_ptr.vmem [resolvable:$false] %s16091_s29 }
 0x159   : > { %v1359_v61 = vpop.f32.mrf.mxu0  ;;  %v3603_v4 = vrot.slane %v16058_v50, 3  ;;  %s12136_s30 = scalar_lea.hbm %s20916_s13, %s13641_s15  ;;  %s16093_s23 = scalar_lea.vmem %s16092_s29, 64 }
 0x15a   : > { %v17364_v51 = vadd.f32 %v1359_v61, %v17129_v19  ;;  %v17366_v37 = vadd.f32 %v14464_v45, %v1478_v9  ;;  %v17368_v10 = vpop.f32.mrf.mxu1  ;;  %p16094_p11 = scmp.lt.s32.totalorder %s12139_s22, %s16092_s29  ;;  %p16095_p12 = scmp.lt.s32.totalorder %s16093_s23, %s16087_s17 }
 0x15b   : > { %v14429_v5 = vpop.f32.mrf.mxu0  ;;  %14644 = vmatmul.mubr.msk.bf16.vlgmr.msra.gmra.mxu0 %vm737_vm1, %v3600_v18 }
 0x15c   : > { %v1481_v3 = vadd.f32 %v14429_v5, %v17134_v26  ;;  %14647 = vmatprep.mubr.msk.bf16.mxu0 %vm737_vm1, %v3602_v11  ;;  %v14471_v32 = vpop.f32.mrf.mxu1  ;;  %v3604_v26 = vsel %vm3595_vm7, %v3601_v41, %v3603_v4  ;;  %v3606_v5 = vsel %vm3595_vm7, %v3603_v4, %v3605_v0  ;;  %v3609_v4 = vrot.slane %v17097_v29, 3  ;;  %p16096_p13 = por %p16095_p12, %p16094_p11 }
 0x15d   : > { %v1372_v28 = vpop.f32.mrf.mxu0 }
 0x15e   : > { %v17376_v19 = vadd.f32 %v1372_v28, %v17143_v8  ;;  %v17378_v45 = vadd.f32 %v14467_v55, %v1481_v3  ;;  %v17380_v57 = vpop.f32.mrf.mxu1  ;;  %p16097_p0 = pnand %p16096_p13, %p16090_p10 }
 0x15f   : > { %v14430_v9 = vpop.f32.mrf.mxu0 }
 0x160   : > { %v1482_v18 = vadd.f32 %v14430_v9, %v17150_v43  ;;  %v14472_v61 = vpop.f32.mrf.mxu1  ;;  %v3607_v43 = vrot.slane %v17089_v16, 3 }
 0x161   : > { %v1375_v11 = vpop.f32.mrf.mxu0 }
 0x162   : > { %v17386_v50 = vadd.f32 %v1375_v11, %v17158_v44  ;;  %v17388_v39 = vadd.f32 %v14468_v42, %v1482_v18  ;;  %v17390_v8 = vpop.f32.mrf.mxu1  ;;  %v3610_v16 = vsel %vm3595_vm7, %v3607_v43, %v3609_v4 }
 0x163   : > { %v14433_v55 = vpop.f32.mrf.mxu0  ;;  %14648 = vmatmul.mubr.msk.bf16.gmra.mxu0 %vm737_vm1, %v3604_v26 }
 0x164   : > { %v1485_v3 = vadd.f32 %v14433_v55, %v17162_v63  ;;  %14651 = vmatprep.mubr.msk.bf16.mxu0 %vm737_vm1, %v3606_v5  ;;  %v14475_v41 = vpop.f32.mrf.mxu1  ;;  %v3608_v63 = vsel %vm3595_vm7, %v3605_v0, %v3607_v43  ;;  %v3613_v43 = vrot.slane %v17125_v47, 3 }
 0x165   : > { %v1388_v28 = vpop.f32.mrf.mxu0 }
 0x166   : > { %v17398_v44 = vadd.f32 %v1388_v28, %v17171_v14  ;;  %v17400_v42 = vadd.f32 %v14471_v32, %v1485_v3  ;;  %v17402_v9 = vpop.f32.mrf.mxu1 }
 0x167   : > { %v14434_v18 = vpop.f32.mrf.mxu0 }
 0x168   : > { %v1486_v26 = vadd.f32 %v14434_v18, %v17178_v52  ;;  %v14476_v11 = vpop.f32.mrf.mxu1  ;;  %v3611_v52 = vrot.slane %v17118_v40, 3 }
 0x169   : > { %v1391_v5 = vpop.f32.mrf.mxu0 }
 0x16a   : > { %v17408_v55 = vadd.f32 %v1391_v5, %v17186_v58  ;;  %v17410_v29 = vadd.f32 %v14472_v61, %v1486_v26  ;;  %v17412_v14 = vpop.f32.mrf.mxu1  ;;  %v3614_v40 = vsel %vm3595_vm7, %v3611_v52, %v3613_v43 }
 0x16b   : > { %20985 = vst [vmem:[#allocation26_spill] sm:$0xff] %v17412_v14  ;;  %v14437_v32 = vpop.f32.mrf.mxu0  ;;  %14652 = vmatmul.mubr.msk.bf16.gmra.mxu0 %vm737_vm1, %v3608_v63  ;;  %v20991_v14 = vld [vmem:[#allocation15_spill] sm:$0xff] }
 0x16c   : > { %v1489_v3 = vadd.f32 %v14437_v32, %v17190_v17  ;;  %14655 = vmatprep.mubr.msk.bf16.mxu0 %vm737_vm1, %v3610_v16  ;;  %v14479_v0 = vpop.f32.mrf.mxu1  ;;  %v3612_v17 = vsel %vm3595_vm7, %v3609_v4, %v3611_v52 }
 0x16d   : > { %v1404_v28 = vpop.f32.mrf.mxu0 }
 0x16e   : > { %v17420_v58 = vadd.f32 %v1404_v28, %v17199_v1  ;;  %v17422_v61 = vadd.f32 %v14475_v41, %v1489_v3  ;;  %v17424_v18 = vpop.f32.mrf.mxu1 }
 0x16f   : > { %20986 = vst [vmem:[#allocation27_spill] sm:$0xff] %v17424_v18  ;;  %v14438_v26 = vpop.f32.mrf.mxu0  ;;  %v20990_v18 = vld [vmem:[#allocation14_spill] sm:$0xff] }
 0x170   : > { %v1490_v63 = vadd.f32 %v14438_v26, %v17206_v46  ;;  %v14480_v5 = vpop.f32.mrf.mxu1  ;;  %v20989_v46 = vld [vmem:[#allocation13_spill] sm:$0xff]  ;;  %v3617_v52 = vrot.slane %v20990_v18, 3 }
 0x171   : > { %v1407_v16 = vpop.f32.mrf.mxu0  ;;  %v3615_v4 = vrot.slane %v20989_v46, 3 }
 0x172   : > { %v17430_v32 = vadd.f32 %v1407_v16, %v17214_v27  ;;  %v17432_v47 = vadd.f32 %v14476_v11, %v1490_v63  ;;  %v17434_v1 = vpop.f32.mrf.mxu1 }
 0x173   : > { %20988 = vst [vmem:[#allocation29_spill] sm:$0xff] %v17434_v1  ;;  %v14441_v41 = vpop.f32.mrf.mxu0  ;;  %14656 = vmatmul.mubr.msk.bf16.gmra.mxu0 %vm737_vm1, %v3612_v17  ;;  %v3618_v46 = vsel %vm3595_vm7, %v3615_v4, %v3617_v52 }
 0x174   : > { %20987 = vst [vmem:[#allocation28_spill] sm:$0xff] %v17430_v32  ;;  %v1493_v3 = vadd.f32 %v14441_v41, %v17218_v25  ;;  %14659 = vmatprep.mubr.msk.bf16.mxu0 %vm737_vm1, %v3614_v40  ;;  %v14483_v28 = vpop.f32.mrf.mxu1  ;;  %v3616_v25 = vsel %vm3595_vm7, %v3613_v43, %v3615_v4 }
 0x175   : > { %v1420_v26 = vpop.f32.mrf.mxu0 }
 0x176   : > { %v17442_v27 = vadd.f32 %v1420_v26, %v20991_v14  ;;  %v17444_v11 = vadd.f32 %v14479_v0, %v1493_v3  ;;  %v17446_v63 = vpop.f32.mrf.mxu1 }
 0x177   : > { %v14442_v16 = vpop.f32.mrf.mxu0 }
 0x178   : > { %20992 = vst [vmem:[#allocation13_spill] sm:$0xff] %v17442_v27  ;;  %v1494_v17 = vadd.f32 %v14442_v16, %v17234_v22  ;;  %v14484_v41 = vpop.f32.mrf.mxu1  ;;  %v3619_v22 = vrot.slane %v17176_v23, 3  ;;  %v20994_v16 = vld [vmem:[#allocation16_spill] sm:$0xff]  ;;  %v20995_v27 = vld [vmem:[#allocation19_spill] sm:$0xff] }
 0x179   : > { %v1423_v40 = vpop.f32.mrf.mxu0  ;;  %v3621_v4 = vrot.slane %v20994_v16, 3 }
 0x17a   : > { %v17452_v1 = vadd.f32 %v1423_v40, %v17239_v30  ;;  %v17454_v18 = vadd.f32 %v14480_v5, %v1494_v17  ;;  %v17456_v14 = vpop.f32.mrf.mxu1 }
 0x17b   : > { %v14445_v0 = vpop.f32.mrf.mxu0  ;;  %14660 = vmatmul.mubr.msk.bf16.gmra.mxu0 %vm737_vm1, %v3616_v25  ;;  %v3622_v23 = vsel %vm3595_vm7, %v3619_v22, %v3621_v4 }
 0x17c   : > { %20993 = vst [vmem:[#allocation14_spill] sm:$0xff] %v17452_v1  ;;  %v1497_v3 = vadd.f32 %v14445_v0, %v17246_v24  ;;  %14663 = vmatprep.mubr.msk.bf16.mxu0 %vm737_vm1, %v3618_v46  ;;  %v14487_v43 = vpop.f32.mrf.mxu1  ;;  %v20997_v1 = vld [vmem:[#allocation18_spill] sm:$0xff]  ;;  %v3620_v24 = vsel %vm3595_vm7, %v3617_v52, %v3619_v22  ;;  %v3625_v22 = vrot.slane %v17210_v48, 3 }
 0x17d   : > { %v1436_v26 = vpop.f32.mrf.mxu0 }
 0x17e   : > { %v17464_v30 = vadd.f32 %v1436_v26, %v20995_v27  ;;  %v17466_v5 = vadd.f32 %v14483_v28, %v1497_v3  ;;  %v17468_v17 = vpop.f32.mrf.mxu1 }
 0x17f   : > { %20996 = vst [vmem:[#allocation15_spill] sm:$0xff] %v17468_v17  ;;  %v14446_v40 = vpop.f32.mrf.mxu0 }
 0x180   : > { %v1498_v25 = vadd.f32 %v14446_v40, %v20997_v1  ;;  %v14488_v0 = vpop.f32.mrf.mxu1  ;;  %v3623_v1 = vrot.slane %v17204_v12, 3 }
 0x181   : > { %v1439_v46 = vpop.f32.mrf.mxu0 }
 0x182   : > { %v17474_v32 = vadd.f32 %v1439_v46, %v17269_v13  ;;  %v17476_v16 = vadd.f32 %v14484_v41, %v1498_v25  ;;  %v17478_v27 = vpop.f32.mrf.mxu1 }
 0x183   : > { %20998 = vst [vmem:[#allocation16_spill] sm:$0xff] %v17478_v27  ;;  %v14449_v28 = vpop.f32.mrf.mxu0  ;;  %14664 = vmatmul.mubr.msk.bf16.gmra.mxu0 %vm737_vm1, %v3620_v24  ;;  %v3624_v24 = vsel %vm3595_vm7, %v3621_v4, %v3623_v1 }
 0x184   : > { %v1501_v3 = vadd.f32 %v14449_v28, %v17275_v38  ;;  %14667 = vmatprep.mubr.msk.bf16.mxu0 %vm737_vm1, %v3622_v23  ;;  %v14531_v52 = vpop.f32.mrf.mxu1  ;;  %v3626_v23 = vsel %vm3595_vm7, %v3623_v1, %v3625_v22 }
 0x185   : > { %v17484_v26 = vpop.f32.mrf.mxu0 }
 0x186   : > { %v17487_v13 = vadd.f32 %v14487_v43, %v1501_v3  ;;  %v17489_v41 = vpop.f32.mrf.mxu1  ;;  %v3629_v3 = vrot.slane %v17243_v34, 3 }
 0x187   : > { %20999 = vst [vmem:[#allocation19_spill] sm:$0xff] %v17489_v41  ;;  %v14450_v40 = vpop.f32.mrf.mxu0 }
 0x188   : > { %v1502_v25 = vadd.f32 %v14450_v40, %v17288_v59  ;;  %v14532_v46 = vpop.f32.mrf.mxu1  ;;  %v3627_v59 = vrot.slane %v17232_v35, 3 }
 0x189   : > { %v17493_v38 = vpop.f32.mrf.mxu0 }
 0x18a   : > { %v17496_v12 = vadd.f32 %v14488_v0, %v1502_v25  ;;  %v17498_v28 = vpop.f32.mrf.mxu1 }
 0x18b   : > { %21000 = vst [vmem:[#allocation18_spill] sm:$0xff] %v17498_v28  ;;  %v14493_v27 = vpop.f32.mrf.mxu0  ;;  %14668 = vmatmul.mubr.msk.bf16.gmra.mxu0 %vm737_vm1, %v3624_v24  ;;  %v3628_v24 = vsel %vm3595_vm7, %v3625_v22, %v3627_v59 }
 0x18c   : > { %v2355_v48 = vadd.f32 %v14493_v27, %v17308_v15  ;;  %14671 = vmatprep.mubr.msk.bf16.mxu0 %vm737_vm1, %v3626_v23  ;;  %v14535_v43 = vpop.f32.mrf.mxu1  ;;  %v3630_v27 = vsel %vm3595_vm7, %v3627_v59, %v3629_v3 }
 0x18d   : > { %v17504_v4 = vpop.f32.mrf.mxu0 }
 0x18e   : > { %v17507_v40 = vadd.f32 %v14531_v52, %v2355_v48  ;;  %v17509_v0 = vpop.f32.mrf.mxu1  ;;  %v21002_v52 = vld [vmem:[#allocation20_spill] sm:$0xff] }
 0x18f   : > { %v14494_v1 = vpop.f32.mrf.mxu0 }
 0x190   : > { %v2356_v25 = vadd.f32 %v14494_v1, %v17322_v36  ;;  %v14536_v28 = vpop.f32.mrf.mxu1  ;;  %v3631_v36 = vrot.slane %v21002_v52, 3 }
 0x191   : > { %v17513_v15 = vpop.f32.mrf.mxu0 }
 0x192   : > { %v17516_v35 = vadd.f32 %v14532_v46, %v2356_v25  ;;  %v17518_v23 = vpop.f32.mrf.mxu1  ;;  %v3632_v25 = vsel %vm3595_vm7, %v3629_v3, %v3631_v36 }
 0x193   : > { %21001 = vst [vmem:[#allocation30_spill] sm:$0xff] %v17518_v23  ;;  %v14497_v41 = vpop.f32.mrf.mxu0  ;;  %14672 = vmatmul.mubr.msk.bf16.gmra.mxu0 %vm737_vm1, %v3628_v24 }
 0x194   : > { %v2359_v34 = vadd.f32 %v14497_v41, %v17334_v20  ;;  %14675 = vmatprep.mubr.msk.bf16.mxu0 %vm737_vm1, %v3630_v27  ;;  %v14539_v48 = vpop.f32.mrf.mxu1 }
 0x195   : > { %v17524_v22 = vpop.f32.mrf.mxu0 }
 0x196   : > { %v17526_v1 = vadd.f32 %v14535_v43, %v2359_v34  ;;  %v17528_v17 = vpop.f32.mrf.mxu1 }
 0x197   : > { %21003 = vst [vmem:[#allocation20_spill] sm:$0xff] %v17528_v17  ;;  %v14498_v46 = vpop.f32.mrf.mxu0 }
 0x198   : > { %v2360_v59 = vadd.f32 %v14498_v46, %v17344_v62  ;;  %v14540_v23 = vpop.f32.mrf.mxu1 }
 0x199   : > { %v17532_v24 = vpop.f32.mrf.mxu0 }
 0x19a   : > { %21004 = vst [vmem:[#allocation31_spill] sm:$0xff] %v17532_v24  ;;  %v17534_v20 = vadd.f32 %v14536_v28, %v2360_v59  ;;  %v17536_v41 = vpop.f32.mrf.mxu1 }
 0x19b   : > { %21005 = vst [vmem:[#allocation32_spill] sm:$0xff] %v17536_v41  ;;  %v14501_v27 = vpop.f32.mrf.mxu0  ;;  %14676 = vmatmul.mubr.msk.bf16.gmra.mxu0 %vm737_vm1, %v3632_v25 }
 0x19c   : > { %v2363_v43 = vadd.f32 %v14501_v27, %v17356_v53  ;;  %v14543_v34 = vpop.f32.mrf.mxu1 }
 0x19d   : > { %v17540_v52 = vpop.f32.mrf.mxu0 }
 0x19e   : > { %21006 = vst [vmem:[#allocation33_spill] sm:$0xff] %v17540_v52  ;;  %v17542_v17 = vadd.f32 %v14539_v48, %v2363_v43  ;;  %v17544_v62 = vpop.f32.mrf.mxu1 }
 0x19f   : > { %21007 = vst [vmem:[#allocation34_spill] sm:$0xff] %v17544_v62  ;;  %v14502_v3 = vpop.f32.mrf.mxu0 }
 0x1a0   : > { %v2364_v36 = vadd.f32 %v14502_v3, %v17366_v37  ;;  %v14544_v46 = vpop.f32.mrf.mxu1 }
 0x1a1   : > { %v17547_v28 = vpop.f32.mrf.mxu0 }
 0x1a2   : > { %21008 = vst [vmem:[#allocation35_spill] sm:$0xff] %v17547_v28  ;;  %v17549_v59 = vadd.f32 %v14540_v23, %v2364_v36  ;;  %v17551_v41 = vpop.f32.mrf.mxu1 }
 0x1a3   : > { %21009 = vst [vmem:[#allocation36_spill] sm:$0xff] %v17551_v41  ;;  %v14505_v25 = vpop.f32.mrf.mxu0 }
 0x1a4   : > { %v2367_v53 = vadd.f32 %v14505_v25, %v17378_v45  ;;  %v14547_v27 = vpop.f32.mrf.mxu1 }
 0x1a5   : > { %v17554_v24 = vpop.f32.mrf.mxu0 }
 0x1a6   : > { %21010 = vst [vmem:[#allocation37_spill] sm:$0xff] %v17554_v24  ;;  %v17556_v48 = vadd.f32 %v14543_v34, %v2367_v53  ;;  %v17558_v43 = vpop.f32.mrf.mxu1 }
 0x1a7   : > { %21011 = vst [vmem:[#allocation38_spill] sm:$0xff] %v17558_v43  ;;  %v14506_v62 = vpop.f32.mrf.mxu0 }
 0x1a8   : > { %v2368_v37 = vadd.f32 %v14506_v62, %v17388_v39  ;;  %v14548_v3 = vpop.f32.mrf.mxu1 }
 0x1a9   : > { %v17561_v52 = vpop.f32.mrf.mxu0 }
 0x1aa   : > { %21012 = vst [vmem:[#allocation39_spill] sm:$0xff] %v17561_v52  ;;  %v17563_v23 = vadd.f32 %v14544_v46, %v2368_v37  ;;  %v17565_v36 = vpop.f32.mrf.mxu1 }
 0x1ab   : > { %21013 = vst [vmem:[#allocation40_spill] sm:$0xff] %v17565_v36  ;;  %v14509_v41 = vpop.f32.mrf.mxu0 }
 0x1ac   : > { %v2371_v45 = vadd.f32 %v14509_v41, %v17400_v42  ;;  %v14551_v25 = vpop.f32.mrf.mxu1 }
 0x1ad   : > { %v17568_v28 = vpop.f32.mrf.mxu0 }
 0x1ae   : > { %21014 = vst [vmem:[#allocation41_spill] sm:$0xff] %v17568_v28  ;;  %v17570_v34 = vadd.f32 %v14547_v27, %v2371_v45  ;;  %v17572_v53 = vpop.f32.mrf.mxu1 }
 0x1af   : > { %21015 = vst [vmem:[#allocation42_spill] sm:$0xff] %v17572_v53  ;;  %v14510_v43 = vpop.f32.mrf.mxu0 }
 0x1b0   : > { %v2372_v39 = vadd.f32 %v14510_v43, %v17410_v29  ;;  %v14552_v62 = vpop.f32.mrf.mxu1 }
 0x1b1   : > { %v17575_v24 = vpop.f32.mrf.mxu0 }
 0x1b2   : > { %21016 = vst [vmem:[#allocation43_spill] sm:$0xff] %v17575_v24  ;;  %v17577_v46 = vadd.f32 %v14548_v3, %v2372_v39  ;;  %v17579_v37 = vpop.f32.mrf.mxu1 }
 0x1b3   : > { %21017 = vst [vmem:[#allocation44_spill] sm:$0xff] %v17579_v37  ;;  %v14513_v36 = vpop.f32.mrf.mxu0 }
 0x1b4   : > { %v2375_v42 = vadd.f32 %v14513_v36, %v17422_v61  ;;  %v14555_v41 = vpop.f32.mrf.mxu1 }
 0x1b5   : > { %v17582_v52 = vpop.f32.mrf.mxu0 }
 0x1b6   : > { %21018 = vst [vmem:[#allocation45_spill] sm:$0xff] %v17582_v52  ;;  %v17584_v27 = vadd.f32 %v14551_v25, %v2375_v42  ;;  %v17586_v45 = vpop.f32.mrf.mxu1 }
 0x1b7   : > { %21019 = vst [vmem:[#allocation46_spill] sm:$0xff] %v17586_v45  ;;  %v14514_v53 = vpop.f32.mrf.mxu0 }
 0x1b8   : > { %v2376_v29 = vadd.f32 %v14514_v53, %v17432_v47  ;;  %v14556_v43 = vpop.f32.mrf.mxu1 }
 0x1b9   : > { %v17589_v28 = vpop.f32.mrf.mxu0 }
 0x1ba   : > { %21020 = vst [vmem:[#allocation47_spill] sm:$0xff] %v17589_v28  ;;  %v17591_v3 = vadd.f32 %v14552_v62, %v2376_v29  ;;  %v17593_v39 = vpop.f32.mrf.mxu1 }
 0x1bb   : > { %21021 = vst [vmem:[#allocation48_spill] sm:$0xff] %v17593_v39  ;;  %v14517_v37 = vpop.f32.mrf.mxu0 }
 0x1bc   : > { %v2379_v61 = vadd.f32 %v14517_v37, %v17444_v11  ;;  %v14559_v36 = vpop.f32.mrf.mxu1 }
 0x1bd   : > { %v17596_v24 = vpop.f32.mrf.mxu0 }
 0x1be   : > { %21022 = vst [vmem:[#allocation49_spill] sm:$0xff] %v17596_v24  ;;  %v17598_v25 = vadd.f32 %v14555_v41, %v2379_v61  ;;  %v17600_v42 = vpop.f32.mrf.mxu1 }
 0x1bf   : > { %21023 = vst [vmem:[#allocation50_spill] sm:$0xff] %v17600_v42  ;;  %v14518_v45 = vpop.f32.mrf.mxu0 }
 0x1c0   : > { %v2380_v47 = vadd.f32 %v14518_v45, %v17454_v18  ;;  %v14560_v53 = vpop.f32.mrf.mxu1 }
 0x1c1   : > { %v17603_v52 = vpop.f32.mrf.mxu0 }
 0x1c2   : > { %21024 = vst [vmem:[#allocation51_spill] sm:$0xff] %v17603_v52  ;;  %v17605_v62 = vadd.f32 %v14556_v43, %v2380_v47  ;;  %v17607_v29 = vpop.f32.mrf.mxu1 }
 0x1c3   : > { %21025 = vst [vmem:[#allocation52_spill] sm:$0xff] %v17607_v29  ;;  %v14521_v39 = vpop.f32.mrf.mxu0 }
 0x1c4   : > { %v2383_v11 = vadd.f32 %v14521_v39, %v17466_v5  ;;  %v14563_v37 = vpop.f32.mrf.mxu1 }
 0x1c5   : > { %v17610_v28 = vpop.f32.mrf.mxu0 }
 0x1c6   : > { %21026 = vst [vmem:[#allocation53_spill] sm:$0xff] %v17610_v28  ;;  %v17612_v41 = vadd.f32 %v14559_v36, %v2383_v11  ;;  %v17614_v61 = vpop.f32.mrf.mxu1 }
 0x1c7   : > { %21027 = vst [vmem:[#allocation54_spill] sm:$0xff] %v17614_v61  ;;  %v14522_v42 = vpop.f32.mrf.mxu0 }
 0x1c8   : > { %v2384_v18 = vadd.f32 %v14522_v42, %v17476_v16  ;;  %v14564_v45 = vpop.f32.mrf.mxu1 }
 0x1c9   : > { %v17617_v24 = vpop.f32.mrf.mxu0 }
 0x1ca   : > { %21028 = vst [vmem:[#allocation55_spill] sm:$0xff] %v17617_v24  ;;  %v17619_v43 = vadd.f32 %v14560_v53, %v2384_v18  ;;  %v17621_v47 = vpop.f32.mrf.mxu1 }
 0x1cb   : > { %21029 = vst [vmem:[#allocation56_spill] sm:$0xff] %v17621_v47  ;;  %v14525_v29 = vpop.f32.mrf.mxu0 }
 0x1cc   : > { %v2387_v5 = vadd.f32 %v14525_v29, %v17487_v13  ;;  %v14607_v39 = vpop.f32.mrf.mxu1 }
 0x1cd   : > { %v17624_v52 = vpop.f32.mrf.mxu0 }
 0x1ce   : > { %21030 = vst [vmem:[#allocation57_spill] sm:$0xff] %v17624_v52  ;;  %v17626_v36 = vadd.f32 %v14563_v37, %v2387_v5  ;;  %v17628_v11 = vpop.f32.mrf.mxu1 }
 0x1cf   : > { %21031 = vst [vmem:[#allocation58_spill] sm:$0xff] %v17628_v11  ;;  %v14526_v61 = vpop.f32.mrf.mxu0 }
 0x1d0   : > { %v2388_v16 = vadd.f32 %v14526_v61, %v17496_v12  ;;  %v14608_v42 = vpop.f32.mrf.mxu1 }
 0x1d1   : > { %v17631_v28 = vpop.f32.mrf.mxu0 }
 0x1d2   : > { %21032 = vst [vmem:[#allocation59_spill] sm:$0xff] %v17631_v28  ;;  %v17633_v53 = vadd.f32 %v14564_v45, %v2388_v16  ;;  %v17635_v47 = vpop.f32.mrf.mxu1 }
 0x1d3   : > { %v14569_v18 = vpop.f32.mrf.mxu0  ;;  %21033 = vst [vmem:[#allocation60_spill] sm:$0xff] %v17635_v47 }
 0x1d4   : > { %v3108_v13 = vadd.f32 %v14569_v18, %v17507_v40  ;;  %v14611_v5 = vpop.f32.mrf.mxu1 }
 0x1d5   : > { %v17638_v29 = vpop.f32.mrf.mxu0 }
 0x1d6   : > { %21034 = vst [vmem:[#allocation61_spill] sm:$0xff] %v17638_v29  ;;  %v17640_v52 = vadd.f32 %v14607_v39, %v3108_v13  ;;  %v17647_v45 = vpop.f32.mrf.mxu1 }
 0x1d7   : > { %v14570_v37 = vpop.f32.mrf.mxu0 }
 0x1d8   : > { %v3109_v11 = vadd.f32 %v14570_v37, %v17516_v35  ;;  %v14612_v39 = vpop.f32.mrf.mxu1 }
 0x1d9   : > { %v17643_v24 = vpop.f32.mrf.mxu0 }
 0x1da   : > { %21035 = vst [vmem:[#allocation62_spill] sm:$0xff] %v17643_v24  ;;  %v17645_v12 = vadd.f32 %v14608_v42, %v3109_v11 }
 0x1db   : > { %v14573_v61 = vpop.f32.mrf.mxu0 }
 0x1dc   : > { %v3112_v16 = vadd.f32 %v14573_v61, %v17526_v1 }
 0x1dd   : > { %v17650_v47 = vpop.f32.mrf.mxu0 }
 0x1de   : > { %v17652_v40 = vadd.f32 %v14611_v5, %v3112_v16 }
 0x1df   : > { %v14574_v18 = vpop.f32.mrf.mxu0 }
 0x1e0   : > { %v3113_v13 = vadd.f32 %v14574_v18, %v17534_v20 }
 0x1e1   : > { %v17655_v29 = vpop.f32.mrf.mxu0 }
 0x1e2   : > { %v17657_v35 = vadd.f32 %v14612_v39, %v3113_v13 }
 0x1e3   : > { %v14577_v37 = vpop.f32.mrf.mxu0 }
 0x1e4   : > { %v17660_v11 = vadd.f32 %v14577_v37, %v17542_v17 }
 0x1e5   : > { %v17662_v42 = vpop.f32.mrf.mxu0 }
 0x1e7   : > { %v14578_v24 = vpop.f32.mrf.mxu0 }
 0x1e8   : > { %v17665_v1 = vadd.f32 %v14578_v24, %v17549_v59  ;;  %v17682_v24 = vpop.f32.mrf.mxu1 }
 0x1e9   : > { %v17667_v5 = vpop.f32.mrf.mxu0  ;;  %21038 = vst [vmem:[#allocation65_spill] sm:$0xff] %v17682_v24 }
 0x1ea   : > { %21036 = vst [vmem:[#allocation63_spill] sm:$0xff] %v17665_v1 }
 0x1eb   : > { %v14581_v61 = vpop.f32.mrf.mxu0 }
 0x1ec   : > { %v17670_v16 = vadd.f32 %v14581_v61, %v17556_v48  ;;  %v17689_v61 = vpop.f32.mrf.mxu1 }
 0x1ed   : > { %v17672_v20 = vpop.f32.mrf.mxu0 }
 0x1ef   : > { %v14582_v18 = vpop.f32.mrf.mxu0 }
 0x1f0   : > { %v17675_v39 = vadd.f32 %v14582_v18, %v17563_v23 }
 0x1f1   : > { %v17677_v17 = vpop.f32.mrf.mxu0 }
 0x1f3   : > { %v14585_v13 = vpop.f32.mrf.mxu0 }
 0x1f4   : > { %v17680_v37 = vadd.f32 %v14585_v13, %v17570_v34  ;;  %v3983_v34 = vld [vmem:[%s20906_s3 + $0x8] sm:$0xff]  ;;  %v12465_v13 = vld [vmem:[%s20906_s3 + $0x158] sm:$0xff] }
 0x1f5   : > { %v17684_v59 = vpop.f32.mrf.mxu0  ;;  %4131 = vmatprep.mubr.f32.mxu1 %v3983_v34  ;;  %4486 = vmatprep.mubr.f32.mxu0 %v12465_v13 }
 0x1f6   : > { %21037 = vst [vmem:[#allocation64_spill] sm:$0xff] %v17680_v37  ;;  %21039 = vst [vmem:[#allocation66_spill] sm:$0xff] %v17684_v59  ;;  %v17702_v37 = vpop.f32.mrf.mxu1 }
 0x1f7   : > { %v14586_v28 = vpop.f32.mrf.mxu0  ;;  %21043 = vst [vmem:[#allocation70_spill] sm:$0xff] %v17702_v37 }
 0x1f8   : > { %v17687_v48 = vadd.f32 %v14586_v28, %v17577_v46 }
 0x1f9   : > { %v17691_v1 = vpop.f32.mrf.mxu0 }
 0x1fa   : > { %21040 = vst [vmem:[#allocation67_spill] sm:$0xff] %v17687_v48  ;;  %21041 = vst [vmem:[#allocation68_spill] sm:$0xff] %v17691_v1 }
 0x1fb   : > { %v14589_v23 = vpop.f32.mrf.mxu0 }
 0x1fc   : > { %v17694_v18 = vadd.f32 %v14589_v23, %v17584_v27  ;;  %v17709_v27 = vpop.f32.mrf.mxu1 }
 0x1fd   : > { %v17704_v28 = vpop.f32.mrf.mxu0  ;;  %21046 = vst [vmem:[#allocation73_spill] sm:$0xff] %v17709_v27  ;;  %v1910_v27 = vadd.f32 %v17310_v56, %v17332_v31 }
 0x1fe   : > { %21042 = vst [vmem:[#allocation69_spill] sm:$0xff] %v17694_v18  ;;  %21044 = vst [vmem:[#allocation71_spill] sm:$0xff] %v17704_v28  ;;  %v17716_v24 = vpop.f32.mrf.mxu1 }
 0x1ff   : > { %v14590_v46 = vpop.f32.mrf.mxu0  ;;  %21049 = vst [vmem:[#allocation76_spill] sm:$0xff] %v17716_v24 }
 0x200   : > { %v17707_v59 = vadd.f32 %v14590_v46, %v17591_v3  ;;  %v17723_v13 = vpop.f32.mrf.mxu1 }
 0x201   : > { %v17711_v23 = vpop.f32.mrf.mxu0 }
 0x202   : > { %21045 = vst [vmem:[#allocation72_spill] sm:$0xff] %v17707_v59  ;;  %21047 = vst [vmem:[#allocation74_spill] sm:$0xff] %v17711_v23  ;;  %v17730_v59 = vpop.f32.mrf.mxu1 }
 0x203   : > { %v14593_v48 = vpop.f32.mrf.mxu0  ;;  %21053 = vst [vmem:[#allocation80_spill] sm:$0xff] %v17730_v59 }
 0x204   : > { %v17714_v1 = vadd.f32 %v14593_v48, %v17598_v25  ;;  %v17737_v24 = vpop.f32.mrf.mxu1 }
 0x205   : > { %v17718_v18 = vpop.f32.mrf.mxu0 }
 0x206   : > { %21048 = vst [vmem:[#allocation75_spill] sm:$0xff] %v17714_v1  ;;  %21050 = vst [vmem:[#allocation77_spill] sm:$0xff] %v17718_v18  ;;  %v17744_v18 = vpop.f32.mrf.mxu1 }
 0x207   : > { %v14594_v37 = vpop.f32.mrf.mxu0 }
 0x208   : > { %v17721_v34 = vadd.f32 %v14594_v37, %v17605_v62 }
 0x209   : > { %v17725_v3 = vpop.f32.mrf.mxu0 }
 0x20a   : > { %21051 = vst [vmem:[#allocation78_spill] sm:$0xff] %v17721_v34  ;;  %21052 = vst [vmem:[#allocation79_spill] sm:$0xff] %v17725_v3  ;;  %v2357_v3 = vadd.f32 %v17524_v22, %v1910_v27 }
 0x20b   : > { %v14597_v46 = vpop.f32.mrf.mxu0 }
 0x20c   : > { %v17728_v28 = vadd.f32 %v14597_v46, %v17612_v41 }
 0x20d   : > { %v17732_v25 = vpop.f32.mrf.mxu0 }
 0x20f   : > { %v14598_v48 = vpop.f32.mrf.mxu0 }
 0x210   : > { %v17735_v23 = vadd.f32 %v14598_v48, %v17619_v43  ;;  %v17753_v43 = vpop.f32.mrf.mxu1 }
 0x211   : > { %v17739_v62 = vpop.f32.mrf.mxu0  ;;  %21057 = vst [vmem:[#allocation84_spill] sm:$0xff] %v17753_v43 }
 0x213   : > { %v14601_v37 = vpop.f32.mrf.mxu0 }
 0x214   : > { %v17742_v1 = vadd.f32 %v14601_v37, %v17626_v36  ;;  %v17761_v37 = vpop.f32.mrf.mxu1 }
 0x215   : > { %v17746_v41 = vpop.f32.mrf.mxu0  ;;  %21060 = vst [vmem:[#allocation87_spill] sm:$0xff] %v17761_v37 }
 0x216   : > { %21054 = vst [vmem:[#allocation81_spill] sm:$0xff] %v17742_v1  ;;  %21055 = vst [vmem:[#allocation82_spill] sm:$0xff] %v17746_v41  ;;  %v2671_v1 = vadd.f32 %v17509_v0, %v2357_v3 }
 0x217   : > { %v14602_v46 = vpop.f32.mrf.mxu0 }
 0x218   : > { %v17751_v34 = vadd.f32 %v14602_v46, %v17633_v53  ;;  %v3110_v31 = vadd.f32 %v17650_v47, %v2671_v1  ;;  %v17770_v46 = vpop.f32.mrf.mxu1 }
 0x219   : > { %v17755_v48 = vpop.f32.mrf.mxu0  ;;  %21063 = vst [vmem:[#allocation90_spill] sm:$0xff] %v17770_v46 }
 0x21a   : > { %21056 = vst [vmem:[#allocation83_spill] sm:$0xff] %v17751_v34  ;;  %21058 = vst [vmem:[#allocation85_spill] sm:$0xff] %v17755_v48  ;;  %v17778_v27 = vpop.f32.mrf.mxu1 }
 0x21b   : > { %v14645_v59 = vpop.f32.mrf.mxu0  ;;  %21066 = vst [vmem:[#allocation93_spill] sm:$0xff] %v17778_v27 }
 0x21c   : > { %v17759_v36 = vadd.f32 %v14645_v59, %v17640_v52  ;;  %v3557_v52 = vadd.f32 %v17647_v45, %v3110_v31 }
 0x21d   : > { %v17763_v41 = vpop.f32.mrf.mxu0 }
 0x21e   : > { %21059 = vst [vmem:[#allocation86_spill] sm:$0xff] %v17759_v36  ;;  %21061 = vst [vmem:[#allocation88_spill] sm:$0xff] %v17763_v41 }
 0x21f   : > { %v14646_v56 = vpop.f32.mrf.mxu0 }
 0x220   : > { %v17768_v53 = vadd.f32 %v14646_v56, %v17645_v12  ;;  %v17785_v12 = vpop.f32.mrf.mxu1 }
 0x221   : > { %v17772_v48 = vpop.f32.mrf.mxu0  ;;  %21069 = vst [vmem:[#allocation96_spill] sm:$0xff] %v17785_v12 }
 0x222   : > { %21062 = vst [vmem:[#allocation89_spill] sm:$0xff] %v17768_v53  ;;  %21064 = vst [vmem:[#allocation91_spill] sm:$0xff] %v17772_v48  ;;  %v17791_v36 = vpop.f32.mrf.mxu1 }
 0x223   : > { %v14649_v22 = vpop.f32.mrf.mxu0  ;;  %21071 = vst [vmem:[#allocation98_spill] sm:$0xff] %v17791_v36  ;;  %v21083_v36 = vld [vmem:[#allocation21_spill] sm:$0xff] }
 0x224   : > { %v17776_v59 = vadd.f32 %v14649_v22, %v17652_v40  ;;  %v17797_v31 = vpop.f32.mrf.mxu1 }
 0x225   : > { %v3740_v41 = vpop.f32.mrf.mxu0  ;;  %21073 = vst [vmem:[#allocation100_spill] sm:$0xff] %v17797_v31  ;;  %v21087_v31 = vld [vmem:[#allocation22_spill] sm:$0xff] }
 0x226   : > { %21065 = vst [vmem:[#allocation92_spill] sm:$0xff] %v17776_v59  ;;  %v17780_v0 = vadd.f32 %v3740_v41, %v3557_v52 }
 0x227   : > { %v14650_v3 = vpop.f32.mrf.mxu0 }
 0x228   : > { %21067 = vst [vmem:[#allocation94_spill] sm:$0xff] %v17780_v0  ;;  %v17783_v47 = vadd.f32 %v14650_v3, %v17657_v35  ;;  %v17803_v35 = vpop.f32.mrf.mxu1 }
 0x229   : > { %v17787_v1 = vpop.f32.mrf.mxu0  ;;  %21075 = vst [vmem:[#allocation102_spill] sm:$0xff] %v17803_v35  ;;  %v21084_v35 = vld [vmem:[#allocation17_spill] sm:$0xff] }
 0x22a   : > { %21068 = vst [vmem:[#allocation95_spill] sm:$0xff] %v17783_v47  ;;  %21070 = vst [vmem:[#allocation97_spill] sm:$0xff] %v17787_v1  ;;  %v17809_v34 = vpop.f32.mrf.mxu1  ;;  %v1175_v12 = vadd.f32 %v21084_v35, %v21083_v36  ;;  %v1915_v36 = vadd.f32 %v17346_v60, %v17364_v51  ;;  %v1918_v35 = vadd.f32 %v17358_v54, %v17376_v19 }
 0x22b   : > { %v17789_v56 = vpop.f32.mrf.mxu0  ;;  %v1934_v60 = vadd.f32 %v17446_v63, %v17464_v30  ;;  %v21096_v30 = vld [vmem:[#allocation13_spill] sm:$0xff] }
 0x22c   : > { %v17815_v37 = vpop.f32.mrf.mxu1 }
 0x22d   : > { %v17793_v45 = vpop.f32.mrf.mxu0  ;;  %21077 = vst [vmem:[#allocation104_spill] sm:$0xff] %v17815_v37  ;;  %v21089_v37 = vld [vmem:[#allocation25_spill] sm:$0xff] }
 0x22e   : > { %21072 = vst [vmem:[#allocation99_spill] sm:$0xff] %v17793_v45  ;;  %v17821_v43 = vpop.f32.mrf.mxu1  ;;  %v21086_v45 = vld [vmem:[#allocation23_spill] sm:$0xff] }
 0x22f   : > { %v17795_v40 = vpop.f32.mrf.mxu0 }
 0x230   : > { %v17827_v1 = vpop.f32.mrf.mxu1 }
 0x231   : > { %v17799_v41 = vpop.f32.mrf.mxu0 }
 0x232   : > { %21074 = vst [vmem:[#allocation101_spill] sm:$0xff] %v17799_v41 }
 0x233   : > { %v17801_v22 = vpop.f32.mrf.mxu0 }
 0x235   : > { %v17805_v52 = vpop.f32.mrf.mxu0 }
 0x237   : > { %v17807_v3 = vpop.f32.mrf.mxu0 }
 0x239   : > { %v17811_v48 = vpop.f32.mrf.mxu0 }
 0x23b   : > { %v17813_v53 = vpop.f32.mrf.mxu0 }
 0x23c   : > { %21076 = vst [vmem:[#allocation103_spill] sm:$0xff] %v17813_v53 }
 0x23d   : > { %v17817_v0 = vpop.f32.mrf.mxu0 }
 0x23e   : > { %21078 = vst [vmem:[#allocation105_spill] sm:$0xff] %v17817_v0  ;;  %v1178_v0 = vadd.f32 %v21087_v31, %v21086_v45  ;;  %v1919_v45 = vadd.f32 %v17368_v10, %v17386_v50  ;;  %v14635_v31 = vpop.f32.mrf.mxu1 }
 0x23f   : > { %v17819_v27 = vpop.f32.mrf.mxu0 }
 0x240   : > { %21079 = vst [vmem:[#allocation106_spill] sm:$0xff] %v17819_v27  ;;  %v21088_v27 = vld [vmem:[#allocation24_spill] sm:$0xff]  ;;  %v1500_v54 = vadd.f32 %v17493_v38, %v1178_v0  ;;  %v3522_v0 = vpop.f32.mrf.mxu1 }
 0x241   : > { %v17823_v59 = vpop.f32.mrf.mxu0  ;;  %v1906_v41 = vadd.f32 %v21088_v27, %v17306_v6  ;;  %v21099_v27 = vld [vmem:[#allocation39_spill] sm:$0xff] }
 0x242   : > { %21080 = vst [vmem:[#allocation107_spill] sm:$0xff] %v17823_v59  ;;  %v1907_v59 = vadd.f32 %v21089_v37, %v17320_v21  ;;  %v1922_v21 = vadd.f32 %v17380_v57, %v17398_v44  ;;  %v21091_v57 = vld [vmem:[#allocation31_spill] sm:$0xff] }
 0x243   : > { %v17825_v46 = vpop.f32.mrf.mxu0  ;;  %v2353_v51 = vadd.f32 %v17504_v4, %v1906_v41  ;;  %v21097_v37 = vld [vmem:[#allocation27_spill] sm:$0xff]  ;;  %v2366_v4 = vadd.f32 %v21099_v27, %v1919_v45  ;;  %v21109_v45 = vld [vmem:[#allocation45_spill] sm:$0xff] }
 0x244   : > { %21081 = vst [vmem:[#allocation108_spill] sm:$0xff] %v17825_v46  ;;  %v1911_v46 = vadd.f32 %v17324_v33, %v17342_v2  ;;  %v1923_v33 = vadd.f32 %v17390_v8, %v17408_v55  ;;  %v1499_v2 = vadd.f32 %v17484_v26, %v1175_v12  ;;  %v2354_v19 = vadd.f32 %v17513_v15, %v1907_v59  ;;  %v21092_v8 = vld [vmem:[#allocation33_spill] sm:$0xff]  ;;  %v21095_v26 = vld [vmem:[#allocation26_spill] sm:$0xff]  ;;  %v21102_v41 = vld [vmem:[#allocation15_spill] sm:$0xff] }
 0x245   : > { %v17829_v47 = vpop.f32.mrf.mxu0  ;;  %v21100_v15 = vld [vmem:[#allocation14_spill] sm:$0xff]  ;;  %v21101_v59 = vld [vmem:[#allocation29_spill] sm:$0xff] }
 0x246   : > { %21082 = vst [vmem:[#allocation109_spill] sm:$0xff] %v17829_v47  ;;  %v1914_v47 = vadd.f32 %v17336_v49, %v17354_v7  ;;  %v1926_v49 = vadd.f32 %v17402_v9, %v17420_v58  ;;  %v1935_v7 = vadd.f32 %v17456_v14, %v17474_v32  ;;  %v2358_v50 = vadd.f32 %v21091_v57, %v1911_v46  ;;  %v21093_v9 = vld [vmem:[#allocation35_spill] sm:$0xff]  ;;  %v21094_v58 = vld [vmem:[#allocation28_spill] sm:$0xff]  ;;  %v21098_v14 = vld [vmem:[#allocation37_spill] sm:$0xff] }
 0x247   : > { %v17833_v53 = vpop.f32.mrf.mxu0  ;;  %v2362_v55 = vadd.f32 %v21093_v9, %v1915_v36  ;;  %v1927_v63 = vadd.f32 %v21095_v26, %v21094_v58  ;;  %v1930_v32 = vadd.f32 %v21097_v37, %v21096_v30  ;;  %v2365_v38 = vadd.f32 %v21098_v14, %v1918_v35  ;;  %v21104_v36 = vld [vmem:[#allocation53_spill] sm:$0xff]  ;;  %v21106_v58 = vld [vmem:[#allocation16_spill] sm:$0xff]  ;;  %v21107_v30 = vld [vmem:[#allocation19_spill] sm:$0xff] }
 0x248   : > { %21085 = vst [vmem:[#allocation21_spill] sm:$0xff] %v17833_v53  ;;  %v2361_v44 = vadd.f32 %v21092_v8, %v1914_v47  ;;  %v1931_v46 = vadd.f32 %v21101_v59, %v21100_v15  ;;  %v17883_v47 = vadd.f32 %v21102_v41, %v1499_v2  ;;  %v2381_v57 = vadd.f32 %v21104_v36, %v1934_v60  ;;  %v21105_v8 = vld [vmem:[#allocation55_spill] sm:$0xff]  ;;  %v21111_v53 = vld [vmem:[#allocation18_spill] sm:$0xff]  ;;  %v21113_v41 = vld [vmem:[#allocation20_spill] sm:$0xff] }
 0x249   : > { %v17851_v6 = vpop.f32.mrf.mxu0  ;;  %v2382_v9 = vadd.f32 %v21105_v8, %v1935_v7  ;;  %v17888_v26 = vadd.f32 %v21106_v58, %v1500_v54  ;;  %v17891_v35 = vadd.f32 %v21107_v30, %v2353_v51  ;;  %v2373_v37 = vadd.f32 %v21109_v45, %v1926_v49  ;;  %v21110_v14 = vld [vmem:[#allocation47_spill] sm:$0xff]  ;;  %v21112_v2 = vld [vmem:[#allocation30_spill] sm:$0xff]  ;;  %v21114_v36 = vld [vmem:[#allocation32_spill] sm:$0xff]  ;;  %v14636_v45 = vpop.f32.mrf.mxu1 }
 0x24a   : > { %21090 = vst [vmem:[#allocation17_spill] sm:$0xff] %v17851_v6  ;;  %21103 = vst [vmem:[#allocation23_spill] sm:$0xff] %v17883_v47  ;;  %v2374_v27 = vadd.f32 %v21110_v14, %v1927_v63  ;;  %v17896_v15 = vadd.f32 %v21111_v53, %v2354_v19  ;;  %v2672_v59 = vadd.f32 %v21112_v2, %v2358_v50  ;;  %v21115_v8 = vld [vmem:[#allocation34_spill] sm:$0xff]  ;;  %v21116_v58 = vld [vmem:[#allocation36_spill] sm:$0xff] }
 0x24b   : > { %v17866_v10 = vpop.f32.mrf.mxu0  ;;  %21108 = vst [vmem:[#allocation22_spill] sm:$0xff] %v17891_v35  ;;  %v2675_v60 = vadd.f32 %v21113_v41, %v2361_v44  ;;  %v2676_v7 = vadd.f32 %v21114_v36, %v2362_v55  ;;  %v2679_v54 = vadd.f32 %v21115_v8, %v2365_v38  ;;  %v2680_v47 = vadd.f32 %v21116_v58, %v2366_v4  ;;  %v21117_v51 = vld [vmem:[#allocation49_spill] sm:$0xff]  ;;  %v21118_v35 = vld [vmem:[#allocation51_spill] sm:$0xff]  ;;  %v21121_v44 = vld [vmem:[#allocation50_spill] sm:$0xff] }
 0x24c   : > { %v2377_v30 = vadd.f32 %v21117_v51, %v1930_v32  ;;  %v2378_v49 = vadd.f32 %v21118_v35, %v1931_v46  ;;  %v21119_v14 = vld [vmem:[#allocation41_spill] sm:$0xff]  ;;  %v21120_v19 = vld [vmem:[#allocation43_spill] sm:$0xff]  ;;  %v2695_v2 = vadd.f32 %v21121_v44, %v2381_v57  ;;  %v21122_v55 = vld [vmem:[#allocation52_spill] sm:$0xff]  ;;  %v3568_v35 = vadd.f32 %v17737_v24, %v17675_v39 }
 0x24d   : > { %v17878_v12 = vpop.f32.mrf.mxu0  ;;  %v17908_v53 = vadd.f32 %v21119_v14, %v1922_v21  ;;  %v17911_v50 = vadd.f32 %v21120_v19, %v1923_v33  ;;  %v2696_v41 = vadd.f32 %v21122_v55, %v2382_v9  ;;  %v21123_v38 = vld [vmem:[#allocation42_spill] sm:$0xff]  ;;  %v21124_v4 = vld [vmem:[#allocation44_spill] sm:$0xff]  ;;  %v3119_v46 = vadd.f32 %v17677_v17, %v2680_v47  ;;  %v3525_v17 = vpop.f32.mrf.mxu1  ;;  %v21130_v44 = vld [vmem:[#allocation63_spill] sm:$0xff] }
 0x24e   : > { %v17916_v36 = vadd.f32 %v21123_v38, %v2373_v37  ;;  %v17919_v32 = vadd.f32 %v21124_v4, %v2374_v27  ;;  %v3118_v8 = vadd.f32 %v17672_v20, %v2679_v54  ;;  %v3134_v33 = vadd.f32 %v17732_v25, %v2695_v2  ;;  %v21125_v58 = vld [vmem:[#allocation46_spill] sm:$0xff]  ;;  %v21126_v51 = vld [vmem:[#allocation48_spill] sm:$0xff]  ;;  %v21131_v2 = vld [vmem:[#allocation73_spill] sm:$0xff] }
 0x24f   : > { %v14670_v6 = vpop.f32.mrf.mxu0  ;;  %v3583_v57 = vadd.f32 %v14635_v31, %v17728_v28  ;;  %v3135_v9 = vadd.f32 %v17739_v62, %v2696_v41  ;;  %v2691_v37 = vadd.f32 %v21125_v58, %v2377_v30  ;;  %v2692_v14 = vadd.f32 %v21126_v51, %v2378_v49  ;;  %v21132_v41 = vld [vmem:[#allocation77_spill] sm:$0xff] }
 0x250   : > { %v3567_v27 = vadd.f32 %v17723_v13, %v17670_v16  ;;  %v3882_v47 = vadd.f32 %v17807_v3, %v3568_v35  ;;  %v17934_v24 = vadd.f32 %v17655_v29, %v2672_v59  ;;  %v3114_v20 = vadd.f32 %v17662_v42, %v2675_v60  ;;  %v21127_v3 = vld [vmem:[#allocation80_spill] sm:$0xff]  ;;  %v17947_v42 = vld [vmem:[%s20905_s2] ss:$0 sm:$0xff] }
 0x251   : > { %v17905_v63 = vpop.f32.mrf.mxu0  ;;  %v3584_v28 = vadd.f32 %v14636_v45, %v17735_v23  ;;  %v3563_v62 = vadd.f32 %v17689_v61, %v17660_v11  ;;  %v3115_v31 = vadd.f32 %v17667_v5, %v2676_v7  ;;  %v3566_v54 = vadd.f32 %v17744_v18, %v3119_v46  ;;  %v21128_v59 = vld [vmem:[#allocation79_spill] sm:$0xff]  ;;  %v21129_v11 = vld [vmem:[#allocation78_spill] sm:$0xff] }
 0x252   : > { %v3881_v16 = vadd.f32 %v17801_v22, %v3567_v27  ;;  %v3565_v30 = vadd.f32 %v21127_v3, %v3118_v8  ;;  %v3581_v49 = vadd.f32 %v3522_v0, %v3134_v33  ;;  %v3582_v29 = vadd.f32 %v3525_v17, %v3135_v9  ;;  %v21133_v46 = vld [vmem:[#allocation75_spill] sm:$0xff]  ;;  %v21134_v33 = vld [vmem:[#allocation70_spill] sm:$0xff] }
 0x253   : > { %v14673_v21 = vpop.f32.mrf.mxu0  ;;  %v3131_v60 = vadd.f32 %v21128_v59, %v2692_v14  ;;  %v3580_v5 = vadd.f32 %v17821_v43, %v21129_v11  ;;  %v3925_v61 = vadd.f32 %v17947_v42, %v3882_v47  ;;  %v3880_v18 = vadd.f32 %v17811_v48, %v3566_v54 }
 0x254   : > { %v3897_v25 = vadd.f32 %v14673_v21, %v3583_v57  ;;  %v3564_v55 = vadd.f32 %v21131_v2, %v21130_v44  ;;  %v3130_v38 = vadd.f32 %v21132_v41, %v2691_v37  ;;  %v3924_v4 = vadd.f32 %v17947_v42, %v3881_v16  ;;  %v21147_v44 = vld [vmem:[#allocation40_spill] sm:$0xff] }
 0x255   : > { %v3836_v39 = vpop.f32.mrf.mxu0  ;;  %v3879_v43 = vadd.f32 %v17805_v52, %v3565_v30  ;;  %v3579_v35 = vadd.f32 %v17809_v34, %v21133_v46  ;;  %v3894_v48 = vadd.f32 %v14670_v6, %v3580_v5  ;;  %v3561_v57 = vadd.f32 %v21134_v33, %v3114_v20  ;;  %v21135_v6 = vld [vmem:[#allocation76_spill] sm:$0xff] }
 0x256   : > { %v3940_v7 = vadd.f32 %v17947_v42, %v3897_v25  ;;  %v3895_v0 = vadd.f32 %v3836_v39, %v3581_v49  ;;  %v3878_v9 = vadd.f32 %v17795_v40, %v3564_v55  ;;  %v17968_v58 = vmax.f32 %v3925_v61, 0.0  ;;  %v21144_v61 = vld [vmem:[#allocation96_spill] sm:$0xff] }
 0x257   : > { %v14674_v13 = vpop.f32.mrf.mxu0  ;;  %v3923_v37 = vadd.f32 %v17947_v42, %v3880_v18  ;;  %v3578_v51 = vadd.f32 %v17827_v1, %v3131_v60  ;;  %v3893_v52 = vadd.f32 %v17866_v10, %v3579_v35  ;;  %v3562_v27 = vadd.f32 %v21135_v6, %v3115_v31  ;;  %v21136_v1 = vld [vmem:[#allocation104_spill] sm:$0xff]  ;;  %v21138_v31 = vld [vmem:[#allocation101_spill] sm:$0xff]  ;;  %v21142_v60 = vld [vmem:[#allocation99_spill] sm:$0xff] }
 0x258   : > { %v3898_v23 = vadd.f32 %v14674_v13, %v3584_v28  ;;  %v17973_v14 = vmax.f32 %v3940_v7, 0.0  ;;  %v3938_v34 = vadd.f32 %v17947_v42, %v3895_v0  ;;  %v3877_v40 = vadd.f32 %v17789_v56, %v3563_v62  ;;  %v21137_v56 = vld [vmem:[#allocation74_spill] sm:$0xff]  ;;  %v21140_v13 = vld [vmem:[#allocation100_spill] sm:$0xff]  ;;  %v21153_v6 = vld [vmem:[#allocation17_spill] sm:$0xff] }
 0x259   : > { %v3839_v22 = vpop.f32.mrf.mxu0  ;;  %v17980_v17 = vmax.f32 %v3924_v4, 0.0  ;;  %v3922_v47 = vadd.f32 %v17947_v42, %v3879_v43  ;;  %v3577_v10 = vadd.f32 %v21136_v1, %v3130_v38  ;;  %v3937_v39 = vadd.f32 %v17947_v42, %v3894_v48  ;;  %v21148_v38 = vld [vmem:[#allocation102_spill] sm:$0xff]  ;;  %v21149_v43 = vld [vmem:[#allocation108_spill] sm:$0xff] }
 0x25a   : > { %v3941_v45 = vadd.f32 %v17947_v42, %v3898_v23  ;;  %v3896_v19 = vadd.f32 %v3839_v22, %v3582_v29  ;;  %v3892_v20 = vadd.f32 %v17905_v63, %v3578_v51  ;;  %v3127_v25 = vadd.f32 %v21137_v56, %v17919_v32  ;;  %v21139_v63 = vld [vmem:[#allocation72_spill] sm:$0xff]  ;;  %v21141_v32 = vld [vmem:[#allocation71_spill] sm:$0xff]  ;;  %v21145_v22 = vld [vmem:[#allocation21_spill] sm:$0xff] }
 0x25b   : > { %v3921_v62 = vadd.f32 %v17947_v42, %v3878_v9  ;;  %v3876_v54 = vadd.f32 %v21138_v31, %v3562_v27  ;;  %v17996_v16 = vmax.f32 %v3923_v37, 0.0  ;;  %v3576_v3 = vadd.f32 %v21140_v13, %v21139_v63  ;;  %v21152_v51 = vld [vmem:[#allocation98_spill] sm:$0xff]  ;;  %v18064_v56 = vpop.f32.mrf.mxu0  ;;  %v21159_v63 = vld [vmem:[#allocation109_spill] sm:$0xff] }
 0x25c   : > { %v17963_v21 = vmax.f32 %v3941_v45, 0.0  ;;  %v3939_v8 = vadd.f32 %v17947_v42, %v3896_v19  ;;  %v3936_v30 = vadd.f32 %v17947_v42, %v3893_v52  ;;  %v3891_v49 = vadd.f32 %v17878_v12, %v3577_v10  ;;  %v21143_v12 = vld [vmem:[#allocation69_spill] sm:$0xff] }
 0x25d   : > { %v18004_v29 = vmax.f32 %v3938_v34, 0.0  ;;  %v3126_v23 = vadd.f32 %v21141_v32, %v17916_v36  ;;  %v3920_v59 = vadd.f32 %v17947_v42, %v3877_v40  ;;  %v3875_v11 = vadd.f32 %v21142_v60, %v3561_v57  ;;  %v21146_v36 = vld [vmem:[#allocation38_spill] sm:$0xff]  ;;  %v18044_v57 = vpop.f32.mrf.mxu1  ;;  %v21156_v10 = vld [vmem:[#allocation97_spill] sm:$0xff]  ;;  %v21162_v60 = vld [vmem:[#allocation92_spill] sm:$0xff] }
 0x25e   : > { %13824 = vmatprep.subr.mxu1 %v17963_v21  ;;  %13916 = vmatprep.subr.mxu0 %v17963_v21  ;;  %v17988_v28 = vmax.f32 %v3939_v8, 0.0  ;;  %v18012_v5 = vmax.f32 %v3922_v47, 0.0  ;;  %v3575_v18 = vadd.f32 %v21144_v61, %v21143_v12  ;;  %v3890_v7 = vadd.f32 %v21145_v22, %v3576_v3  ;;  %v21151_v8 = vld [vmem:[#allocation65_spill] sm:$0xff]  ;;  %v21155_v47 = vld [vmem:[#allocation95_spill] sm:$0xff]  ;;  %v21161_v32 = vld [vmem:[#allocation66_spill] sm:$0xff] }
 0x25f   : > { %13825 = vmatpush3.msra.mxu1 %v17968_v58  ;;  %13917 = vmatpush3.msra.mxu0 %v17968_v58  ;;  %v18019_v0 = vmax.f32 %v3937_v39, 0.0  ;;  %v3935_v45 = vadd.f32 %v17947_v42, %v3892_v20  ;;  %v2683_v19 = vadd.f32 %v21146_v36, %v17908_v53  ;;  %v2684_v2 = vadd.f32 %v21147_v44, %v17911_v50  ;;  %v21150_v53 = vld [vmem:[#allocation59_spill] sm:$0xff]  ;;  %v21163_v61 = vld [vmem:[#allocation64_spill] sm:$0xff]  ;;  %v21167_v44 = vld [vmem:[#allocation57_spill] sm:$0xff] }
 0x260   : > { %13826 = vmatprep.subr.mxu1 %v17973_v14  ;;  %13918 = vmatprep.subr.mxu0 %v17973_v14  ;;  %v18028_v55 = vmax.f32 %v3921_v62, 0.0  ;;  %v3919_v41 = vadd.f32 %v17947_v42, %v3876_v54  ;;  %v3574_v4 = vadd.f32 %v21148_v38, %v3127_v25  ;;  %v3889_v46 = vadd.f32 %v21149_v43, %v3575_v18  ;;  %v21157_v25 = vld [vmem:[#allocation67_spill] sm:$0xff]  ;;  %v21158_v62 = vld [vmem:[#allocation90_spill] sm:$0xff]  ;;  %v21164_v18 = vld [vmem:[#allocation84_spill] sm:$0xff] }
 0x261   : > { %13827 = vmatpush3.msra.mxu1 %v17980_v17  ;;  %13919 = vmatpush3.msra.mxu0 %v17980_v17  ;;  %v18035_v35 = vmax.f32 %v3936_v30, 0.0  ;;  %v3934_v48 = vadd.f32 %v17947_v42, %v3891_v49  ;;  %v2386_v50 = vadd.f32 %v21150_v53, %v17888_v26  ;;  %v3558_v33 = vadd.f32 %v21151_v8, %v17934_v24  ;;  %v21154_v24 = vld [vmem:[#allocation68_spill] sm:$0xff]  ;;  %v21160_v30 = vld [vmem:[#allocation62_spill] sm:$0xff]  ;;  %v21169_v38 = vld [vmem:[#allocation61_spill] sm:$0xff] }
 0x262   : > { %13828 = vmatprep.subr.mxu1 %v17988_v28  ;;  %13920 = vmatprep.subr.mxu0 %v17988_v28  ;;  %v18046_v9 = vmax.f32 %v3920_v59, 0.0  ;;  %v3918_v37 = vadd.f32 %v17947_v42, %v3875_v11  ;;  %v3573_v52 = vadd.f32 %v21152_v51, %v3126_v23  ;;  %v3933_v34 = vadd.f32 %v17947_v42, %v3890_v7  ;;  %v18079_v59 = vpop.f32.mrf.mxu1  ;;  %v21165_v7 = vld [vmem:[#allocation106_spill] sm:$0xff]  ;;  %v21170_v53 = vld [vmem:[#allocation93_spill] sm:$0xff] }
 0x263   : > { %13829 = vmatpush3.msra.mxu1 %v17996_v16  ;;  %13921 = vmatpush3.msra.mxu0 %v17996_v16  ;;  %v3888_v27 = vadd.f32 %v21153_v6, %v3574_v4  ;;  %v18054_v26 = vmax.f32 %v3935_v45, 0.0  ;;  %v3123_v40 = vadd.f32 %v21154_v24, %v2684_v2  ;;  %v3917_v1 = vadd.f32 %v17947_v42, %v21155_v47 }
 0x264   : > { %13830 = vmatprep.subr.mxu1 %v18004_v29  ;;  %13922 = vmatprep.subr.mxu0 %v18004_v29  ;;  %v3872_v39 = vadd.f32 %v21156_v10, %v3558_v33  ;;  %v18062_v20 = vmax.f32 %v3919_v41, 0.0  ;;  %v3572_v31 = vadd.f32 %v21158_v62, %v21157_v25  ;;  %v3932_v54 = vadd.f32 %v17947_v42, %v3889_v46  ;;  %v21168_v41 = vld [vmem:[#allocation22_spill] sm:$0xff]  ;;  %v21171_v33 = vld [vmem:[#allocation103_spill] sm:$0xff]  ;;  %v14640_v47 = vpop.f32.mrf.mxu1 }
 0x265   : > { %13831 = vmatpush3.msra.mxu1 %v18012_v5  ;;  %13923 = vmatpush3.msra.mxu0 %v18012_v5  ;;  %v3887_v13 = vadd.f32 %v21159_v63, %v3573_v52  ;;  %v18072_v3 = vmax.f32 %v3934_v48, 0.0  ;;  %v3107_v49 = vadd.f32 %v21160_v30, %v17896_v15  ;;  %v3122_v23 = vadd.f32 %v21161_v32, %v2683_v19  ;;  %v21166_v19 = vld [vmem:[#allocation23_spill] sm:$0xff]  ;;  %v18102_v48 = vpop.f32.mrf.mxu0  ;;  %v21174_v10 = vld [vmem:[#allocation94_spill] sm:$0xff]  ;;  %v21178_v30 = vld [vmem:[#allocation89_spill] sm:$0xff] }
 0x266   : > { %13832 = vmatprep.subr.mxu1 %v18019_v0  ;;  %13924 = vmatprep.subr.mxu0 %v18019_v0  ;;  %v3916_v11 = vadd.f32 %v17947_v42, %v21162_v60  ;;  %v18083_v12 = vmax.f32 %v3918_v37, 0.0  ;;  %v3571_v22 = vadd.f32 %v21164_v18, %v21163_v61  ;;  %v3886_v45 = vadd.f32 %v21165_v7, %v3572_v31  ;;  %v21176_v31 = vld [vmem:[#allocation107_spill] sm:$0xff]  ;;  %v21181_v7 = vld [vmem:[#allocation105_spill] sm:$0xff] }
 0x267   : > { %13833 = vmatpush3.msra.mxu1 %v18028_v55  ;;  %13925 = vmatpush3.msra.mxu0 %v18028_v55  ;;  %v18090_v36 = vmax.f32 %v3933_v34, 0.0  ;;  %v3931_v15 = vadd.f32 %v17947_v42, %v3888_v27  ;;  %v2385_v2 = vadd.f32 %v21167_v44, %v21166_v19  ;;  %v3106_v4 = vadd.f32 %v21169_v38, %v21168_v41  ;;  %v21172_v34 = vld [vmem:[#allocation56_spill] sm:$0xff]  ;;  %v21179_v32 = vld [vmem:[#allocation91_spill] sm:$0xff]  ;;  %v21182_v19 = vld [vmem:[#allocation86_spill] sm:$0xff] }
 0x268   : > { %13834 = vmatprep.subr.mxu1 %v18035_v35  ;;  %13926 = vmatprep.subr.mxu0 %v18035_v35  ;;  %v18099_v43 = vmax.f32 %v3917_v1, 0.0  ;;  %v3915_v46 = vadd.f32 %v17947_v42, %v3872_v39  ;;  %v3570_v8 = vadd.f32 %v21170_v53, %v3123_v40  ;;  %v3885_v37 = vadd.f32 %v21171_v33, %v3571_v22  ;;  %v21173_v27 = vld [vmem:[#allocation60_spill] sm:$0xff]  ;;  %v21175_v39 = vld [vmem:[#allocation87_spill] sm:$0xff] }
 0x269   : > { %13835 = vmatpush3.msra.mxu1 %v18046_v9  ;;  %13927 = vmatpush3.msra.mxu0 %v18046_v9  ;;  %v18108_v51 = vmax.f32 %v3932_v54, 0.0  ;;  %v3930_v52 = vadd.f32 %v17947_v42, %v3887_v13  ;;  %v2700_v6 = vadd.f32 %v21172_v34, %v2386_v50  ;;  %v3554_v24 = vadd.f32 %v21173_v27, %v3107_v49  ;;  %v21177_v50 = vld [vmem:[#allocation58_spill] sm:$0xff]  ;;  %v21180_v61 = vld [vmem:[#allocation83_spill] sm:$0xff]  ;;  %v21183_v41 = vld [vmem:[#allocation88_spill] sm:$0xff] }
 0x26a   : > { %13836 = vmatprep.subr.mxu1 %v18054_v26  ;;  %13928 = vmatprep.subr.mxu0 %v18054_v26  ;;  %v18115_v1 = vmax.f32 %v3916_v11, 0.0  ;;  %v3914_v40 = vadd.f32 %v17947_v42, %v21174_v10  ;;  %v3569_v25 = vadd.f32 %v21175_v39, %v3122_v23  ;;  %v3929_v62 = vadd.f32 %v17947_v42, %v3886_v45  ;;  %v14678_v23 = vpop.f32.mrf.mxu0  ;;  %v21186_v27 = vld [vmem:[#allocation81_spill] sm:$0xff] }
 0x26b   : > { %13837 = vmatpush3.msra.mxu1 %v18062_v20  ;;  %13929 = vmatpush3.msra.mxu0 %v18062_v20  ;;  %v3884_v54 = vadd.f32 %v21176_v31, %v3570_v8  ;;  %v18124_v63 = vmax.f32 %v3931_v15, 0.0  ;;  %v3553_v13 = vadd.f32 %v21177_v50, %v3106_v4  ;;  %v3913_v49 = vadd.f32 %v17947_v42, %v21178_v30 }
 0x26c   : > { %13838 = vmatprep.subr.mxu1 %v18072_v3  ;;  %13930 = vmatprep.subr.mxu0 %v18072_v3  ;;  %v3868_v60 = vadd.f32 %v21179_v32, %v3554_v24  ;;  %v18132_v11 = vmax.f32 %v3915_v46, 0.0  ;;  %v3588_v18 = vadd.f32 %v14640_v47, %v21180_v61  ;;  %v3928_v22 = vadd.f32 %v17947_v42, %v3885_v37  ;;  %v21184_v46 = vld [vmem:[#allocation85_spill] sm:$0xff]  ;;  %v3541_v47 = vpop.f32.mrf.mxu1 }
 0x26d   : > { %13839 = vmatpush3.msra.mxu1 %v18083_v12  ;;  %13931 = vmatpush3.msra.mxu0 %v18083_v12  ;;  %v3883_v45 = vadd.f32 %v21181_v7, %v3569_v25  ;;  %v18139_v15 = vmax.f32 %v3930_v52, 0.0  ;;  %v3912_v44 = vadd.f32 %v17947_v42, %v21182_v19  ;;  %v3867_v38 = vadd.f32 %v21183_v41, %v3553_v13  ;;  %v21185_v52 = vld [vmem:[#allocation54_spill] sm:$0xff] }
 0x26e   : > { %13840 = vmatprep.subr.mxu1 %v18090_v36  ;;  %13932 = vmatprep.subr.mxu0 %v18090_v36  ;;  %v18146_v4 = vmax.f32 %v3914_v40, 0.0  ;;  %v3139_v53 = vadd.f32 %v21184_v46, %v2700_v6  ;;  %v18151_v8 = vmax.f32 %v3929_v62, 0.0  ;;  %v3927_v33 = vadd.f32 %v17947_v42, %v3884_v54  ;;  %v3855_v54 = vpop.f32.mrf.mxu0 }
 0x26f   : > { %13841 = vmatpush3.msra.mxu1 %v18099_v43  ;;  %13933 = vmatpush3.msra.mxu0 %v18099_v43  ;;  %v3902_v37 = vadd.f32 %v14678_v23, %v3588_v18  ;;  %v2699_v34 = vadd.f32 %v21185_v52, %v2385_v2  ;;  %v3587_v24 = vadd.f32 %v18044_v57, %v21186_v27  ;;  %v18159_v10 = vmax.f32 %v3913_v49, 0.0  ;;  %v21187_v2 = vld [vmem:[#allocation82_spill] sm:$0xff]  ;;  %v3982_v18 = vld [vmem:[%s20906_s3] sm:$0xff] }
 0x270   : > { %13842 = vmatprep.subr.mxu1 %v18108_v51  ;;  %13934 = vmatprep.subr.mxu0 %v18108_v51  ;;  %v3911_v40 = vadd.f32 %v17947_v42, %v3868_v60  ;;  %v18164_v6 = vmax.f32 %v3928_v22, 0.0  ;;  %v3926_v39 = vadd.f32 %v17947_v42, %v3883_v45  ;;  %v18170_v57 = vmax.f32 %v3912_v44, 0.0  ;;  %v3986_v44 = vld [vmem:[%s20906_s3 + $0x20] sm:$0xff]  ;;  %v3988_v52 = vld [vmem:[%s20906_s3 + $0x30] sm:$0xff] }
 0x271   : > { %13843 = vmatpush3.msra.mxu1 %v18115_v1  ;;  %13935 = vmatpush3.msra.mxu0 %v18115_v1  ;;  %v3138_v25 = vadd.f32 %v21187_v2, %v2699_v34  ;;  %v3910_v62 = vadd.f32 %v17947_v42, %v3867_v38  ;;  %v3901_v31 = vadd.f32 %v18064_v56, %v3587_v24  ;;  %v18176_v13 = vmax.f32 %v3927_v33, 0.0  ;;  %v3985_v38 = vld [vmem:[%s20906_s3 + $0x18] sm:$0xff]  ;;  %v12470_v34 = vld [vmem:[%s20906_s3 + $0x180] sm:$0xff]  ;;  %v3992_v27 = vld [vmem:[%s20906_s3 + $0x50] sm:$0xff] }
 0x272   : > { %13844 = vmatprep.subr.mxu1 %v18124_v63  ;;  %13936 = vmatprep.subr.mxu0 %v18124_v63  ;;  %v3586_v50 = vadd.f32 %v3541_v47, %v3139_v53  ;;  %v3945_v30 = vadd.f32 %v17947_v42, %v3902_v37  ;;  %v18181_v49 = vmax.f32 %v3911_v40, 0.0  ;;  %v18185_v56 = vmax.f32 %v3926_v39, 0.0  ;;  %v12467_v53 = vld [vmem:[%s20906_s3 + $0x168] sm:$0xff]  ;;  %v3989_v33 = vld [vmem:[%s20906_s3 + $0x38] sm:$0xff]  ;;  %v12474_v24 = vld [vmem:[%s20906_s3 + $0x1a0] sm:$0xff] }
 0x273   : > { %13845 = vmatpush3.msra.mxu1 %v18132_v11  ;;  %13937 = vmatpush3.msra.mxu0 %v18132_v11  ;;  %v3585_v60 = vadd.f32 %v18079_v59, %v3138_v25  ;;  %v18190_v23 = vmax.f32 %v3910_v62, 0.0  ;;  %v3944_v61 = vadd.f32 %v17947_v42, %v3901_v31  ;;  %v12464_v59 = vld [vmem:[%s20906_s3 + $0x150] sm:$0xff]  ;;  %v12471_v37 = vld [vmem:[%s20906_s3 + $0x188] sm:$0xff]  ;;  %v12473_v40 = vld [vmem:[%s20906_s3 + $0x198] sm:$0xff] }
 0x274   : > { %13846 = vmatprep.subr.mxu1 %v18139_v15  ;;  %13938 = vmatprep.subr.mxu0 %v18139_v15  ;;  %v3900_v32 = vadd.f32 %v3855_v54, %v3586_v50  ;;  %v18198_v22 = vmax.f32 %v3945_v30, 0.0  ;;  %v3991_v47 = vld [vmem:[%s20906_s3 + $0x48] sm:$0xff]  ;;  %v12477_v2 = vld [vmem:[%s20906_s3 + $0x1b8] sm:$0xff]  ;;  %v3994_v25 = vld [vmem:[%s20906_s3 + $0x60] sm:$0xff] }
 0x275   : > { %13847 = vmatpush3.msra.mxu1 %v18146_v4  ;;  %13939 = vmatpush3.msra.mxu0 %v18146_v4  ;;  %v3899_v7 = vadd.f32 %v18102_v48, %v3585_v60  ;;  %v18210_v19 = vmax.f32 %v3944_v61, 0.0  ;;  %v12468_v48 = vld [vmem:[%s20906_s3 + $0x170] sm:$0xff]  ;;  %v3995_v39 = vld [vmem:[%s20906_s3 + $0x68] sm:$0xff]  ;;  %v3998_v31 = vld [vmem:[%s20906_s3 + $0x80] sm:$0xff] }
 0x276   : > { %13848 = vmatprep.subr.mxu1 %v18151_v8  ;;  %13940 = vmatprep.subr.mxu0 %v18151_v8  ;;  %v3943_v45 = vadd.f32 %v17947_v42, %v3900_v32  ;;  %v12476_v62 = vld [vmem:[%s20906_s3 + $0x1b0] sm:$0xff]  ;;  %v3997_v50 = vld [vmem:[%s20906_s3 + $0x78] sm:$0xff]  ;;  %v12479_v30 = vld [vmem:[%s20906_s3 + $0x1c8] sm:$0xff] }
 0x277   : > { %13849 = vmatpush3.msra.mxu1 %v18159_v10  ;;  %13941 = vmatpush3.msra.mxu0 %v18159_v10  ;;  %v3942_v41 = vadd.f32 %v17947_v42, %v3899_v7  ;;  %v12480_v54 = vld [vmem:[%s20906_s3 + $0x1d0] sm:$0xff]  ;;  %v4001_v32 = vld [vmem:[%s20906_s3 + $0x98] sm:$0xff]  ;;  %v12483_v60 = vld [vmem:[%s20906_s3 + $0x1e8] sm:$0xff] }
 0x278   : > { %13850 = vmatprep.subr.mxu1 %v18164_v6  ;;  %13942 = vmatprep.subr.mxu0 %v18164_v6  ;;  %v18227_v46 = vmax.f32 %v3943_v45, 0.0  ;;  %v4000_v61 = vld [vmem:[%s20906_s3 + $0x90] sm:$0xff]  ;;  %v12486_v7 = vld [vmem:[%s20906_s3 + $0x200] sm:$0xff]  ;;  %v4003_v45 = vld [vmem:[%s20906_s3 + $0xa8] sm:$0xff] }
 0x279   : > { %13851 = vmatpush3.msra.mxu1 %v18170_v57  ;;  %13943 = vmatpush3.msra.mxu0 %v18170_v57  ;;  %v18235_v42 = vmax.f32 %v3942_v41, 0.0  ;;  %v12489_v41 = vld [vmem:[%s20906_s3 + $0x218] sm:$0xff] }
 0x27a   : > { %13852 = vmatprep.subr.mxu1 %v18176_v13  ;;  %13944 = vmatprep.subr.mxu0 %v18176_v13 }
 0x27b   : > { %13853 = vmatpush3.msra.mxu1 %v18181_v49  ;;  %13945 = vmatpush3.msra.mxu0 %v18181_v49 }
 0x27c   : > { %13854 = vmatprep.subr.mxu1 %v18185_v56  ;;  %13946 = vmatprep.subr.mxu0 %v18185_v56 }
 0x27d   : > { %13855 = vmatpush3.msra.mxu1 %v18190_v23  ;;  %13947 = vmatpush3.msra.mxu0 %v18190_v23 }
 0x27e   : > { %4132 = vmatmul.mubr.f32.vlgmr.msra.gmra.mxu1 %v3982_v18  ;;  %14679 = vmatprep.subr.mxu1 %v18198_v22  ;;  %v12482_v18 = vld [vmem:[%s20906_s3 + $0x1e0] sm:$0xff] }
 0x27f   : > { %4487 = vmatmul.mubr.f32.vlgmr.msra.gmra.mxu0 %v12464_v59  ;;  %14008 = vmatprep.subr.mxu0 %v17963_v21  ;;  %v4004_v59 = vld [vmem:[%s20906_s3 + $0xb0] sm:$0xff] }
 0x280   : > { %14680 = vmatpush3.msra.mxu1 %v18198_v22  ;;  %14009 = vmatpush3.msra.mxu0 %v17968_v58 }
 0x281   : > { %14681 = vmatprep.subr.mxu1 %v18210_v19  ;;  %14010 = vmatprep.subr.mxu0 %v17973_v14 }
 0x282   : > { %4136 = vmatprep.mubr.f32.mxu1 %v3986_v44  ;;  %14682 = vmatpush3.msra.mxu1 %v18210_v19  ;;  %v12485_v44 = vld [vmem:[%s20906_s3 + $0x1f8] sm:$0xff] }
 0x283   : > { %4491 = vmatprep.mubr.f32.mxu0 %v12468_v48  ;;  %14011 = vmatpush3.msra.mxu0 %v17980_v17  ;;  %v4007_v48 = vld [vmem:[%s20906_s3 + $0xc8] sm:$0xff] }
 0x284   : > { %4137 = vmatmul.mubr.f32.gmra.mxu1 %v3985_v38  ;;  %14683 = vmatprep.subr.mxu1 %v18227_v46  ;;  %v4006_v38 = vld [vmem:[%s20906_s3 + $0xc0] sm:$0xff] }
 0x285   : > { %4492 = vmatmul.mubr.f32.gmra.mxu0 %v12467_v53  ;;  %14012 = vmatprep.subr.mxu0 %v17988_v28  ;;  %v12488_v53 = vld [vmem:[%s20906_s3 + $0x210] sm:$0xff] }
 0x286   : > { %14684 = vmatpush3.msra.mxu1 %v18227_v46  ;;  %14013 = vmatpush3.msra.mxu0 %v17996_v16 }
 0x287   : > { %14685 = vmatprep.subr.mxu1 %v18235_v42  ;;  %14014 = vmatprep.subr.mxu0 %v18004_v29 }
 0x288   : > { %4141 = vmatprep.mubr.f32.mxu1 %v3989_v33  ;;  %14686 = vmatpush3.msra.mxu1 %v18235_v42  ;;  %v4010_v33 = vld [vmem:[%s20906_s3 + $0xe0] sm:$0xff] }
 0x289   : > { %4496 = vmatprep.mubr.f32.mxu0 %v12471_v37  ;;  %14015 = vmatpush3.msra.mxu0 %v18012_v5  ;;  %v12492_v37 = vld [vmem:[%s20906_s3 + $0x230] sm:$0xff] }
 0x28a   : > { %4142 = vmatmul.mubr.f32.gmra.mxu1 %v3988_v52  ;;  %4497 = vmatmul.mubr.f32.gmra.mxu0 %v12470_v34  ;;  %v4009_v52 = vld [vmem:[%s20906_s3 + $0xd8] sm:$0xff]  ;;  %v12491_v34 = vld [vmem:[%s20906_s3 + $0x228] sm:$0xff] }
 0x28b   : > { %14708 = vmatprep.subr.mxu1 %v18198_v22  ;;  %14016 = vmatprep.subr.mxu0 %v18019_v0 }
 0x28c   : > { %14017 = vmatpush3.msra.mxu0 %v18028_v55  ;;  %4146 = vmatprep.mubr.f32.mxu1 %v3992_v27  ;;  %v4013_v27 = vld [vmem:[%s20906_s3 + $0xf8] sm:$0xff] }
 0x28d   : > { %14018 = vmatprep.subr.mxu0 %v18035_v35  ;;  %4501 = vmatprep.mubr.f32.mxu0 %v12474_v24  ;;  %v12495_v24 = vld [vmem:[%s20906_s3 + $0x248] sm:$0xff] }
 0x28e   : > { %14019 = vmatpush3.msra.mxu0 %v18046_v9  ;;  %4147 = vmatmul.mubr.f32.gmra.mxu1 %v3991_v47  ;;  %v4012_v47 = vld [vmem:[%s20906_s3 + $0xf0] sm:$0xff] }
 0x28f   : > { %4502 = vmatmul.mubr.f32.gmra.mxu0 %v12473_v40  ;;  %14020 = vmatprep.subr.mxu0 %v18054_v26  ;;  %v12494_v40 = vld [vmem:[%s20906_s3 + $0x240] sm:$0xff] }
 0x290   : > { %14021 = vmatpush3.msra.mxu0 %v18062_v20  ;;  %4151 = vmatprep.mubr.f32.mxu1 %v3995_v39  ;;  %v4016_v39 = vld [vmem:[%s20906_s3 + $0x110] sm:$0xff] }
 0x291   : > { %14022 = vmatprep.subr.mxu0 %v18072_v3  ;;  %4506 = vmatprep.mubr.f32.mxu0 %v12477_v2  ;;  %v12498_v2 = vld [vmem:[%s20906_s3 + $0x260] sm:$0xff] }
 0x292   : > { %14023 = vmatpush3.msra.mxu0 %v18083_v12  ;;  %4152 = vmatmul.mubr.f32.gmra.mxu1 %v3994_v25  ;;  %v4015_v25 = vld [vmem:[%s20906_s3 + $0x108] sm:$0xff] }
 0x293   : > { %4507 = vmatmul.mubr.f32.gmra.mxu0 %v12476_v62  ;;  %14024 = vmatprep.subr.mxu0 %v18090_v36  ;;  %v12497_v62 = vld [vmem:[%s20906_s3 + $0x258] sm:$0xff] }
 0x294   : > { %14025 = vmatpush3.msra.mxu0 %v18099_v43  ;;  %4156 = vmatprep.mubr.f32.mxu1 %v3998_v31  ;;  %v4019_v31 = vld [vmem:[%s20906_s3 + $0x128] sm:$0xff] }
 0x295   : > { %14026 = vmatprep.subr.mxu0 %v18108_v51  ;;  %4511 = vmatprep.mubr.f32.mxu0 %v12480_v54  ;;  %v12501_v54 = vld [vmem:[%s20906_s3 + $0x278] sm:$0xff] }
 0x296   : > { %14027 = vmatpush3.msra.mxu0 %v18115_v1  ;;  %4157 = vmatmul.mubr.f32.gmra.mxu1 %v3997_v50  ;;  %v4018_v50 = vld [vmem:[%s20906_s3 + $0x120] sm:$0xff] }
 0x297   : > { %4512 = vmatmul.mubr.f32.gmra.mxu0 %v12479_v30  ;;  %14028 = vmatprep.subr.mxu0 %v18124_v63  ;;  %v12500_v30 = vld [vmem:[%s20906_s3 + $0x270] sm:$0xff] }
 0x298   : > { %14029 = vmatpush3.msra.mxu0 %v18132_v11  ;;  %4161 = vmatprep.mubr.f32.mxu1 %v4001_v32  ;;  %v4022_v32 = vld [vmem:[%s20906_s3 + $0x140] sm:$0xf] }
 0x299   : > { %14030 = vmatprep.subr.mxu0 %v18139_v15  ;;  %4516 = vmatprep.mubr.f32.mxu0 %v12483_v60  ;;  %v12504_v60 = vld [vmem:[%s20906_s3 + $0x290] sm:$0xf] }
 0x29a   : > { %14031 = vmatpush3.msra.mxu0 %v18146_v4  ;;  %4162 = vmatmul.mubr.f32.gmra.mxu1 %v4000_v61  ;;  %v4021_v61 = vld [vmem:[%s20906_s3 + $0x138] sm:$0xf] }
 0x29b   : > { %4517 = vmatmul.mubr.f32.gmra.mxu0 %v12482_v18  ;;  %14032 = vmatprep.subr.mxu0 %v18151_v8  ;;  %v12503_v18 = vld [vmem:[%s20906_s3 + $0x288] sm:$0xf] }
 0x29c   : > { %14033 = vmatpush3.msra.mxu0 %v18159_v10  ;;  %4166 = vmatprep.mubr.f32.mxu1 %v4004_v59  ;;  %v3984_v59 = vld [vmem:[%s20906_s3 + $0x10] sm:$0xff] }
 0x29d   : > { %14034 = vmatprep.subr.mxu0 %v18164_v6  ;;  %4521 = vmatprep.mubr.f32.mxu0 %v12486_v7  ;;  %v12521_v7 = vld [vmem:[%s20906_s3 + $0x2a8] sm:$0xff] }
 0x29e   : > { %14035 = vmatpush3.msra.mxu0 %v18170_v57  ;;  %4167 = vmatmul.mubr.f32.gmra.mxu1 %v4003_v45  ;;  %v3987_v45 = vld [vmem:[%s20906_s3 + $0x28] sm:$0xff] }
 0x29f   : > { %4522 = vmatmul.mubr.f32.gmra.mxu0 %v12485_v44  ;;  %14036 = vmatprep.subr.mxu0 %v18176_v13  ;;  %v12520_v44 = vld [vmem:[%s20906_s3 + $0x2a0] sm:$0xff] }
 0x2a0   : > { %14037 = vmatpush3.msra.mxu0 %v18181_v49  ;;  %4171 = vmatprep.mubr.f32.mxu1 %v4007_v48  ;;  %v3990_v48 = vld [vmem:[%s20906_s3 + $0x40] sm:$0xff] }
 0x2a1   : > { %14038 = vmatprep.subr.mxu0 %v18185_v56  ;;  %4526 = vmatprep.mubr.f32.mxu0 %v12489_v41  ;;  %v12524_v41 = vld [vmem:[%s20906_s3 + $0x2c0] sm:$0xff] }
 0x2a2   : > { %14039 = vmatpush3.msra.mxu0 %v18190_v23  ;;  %4172 = vmatmul.mubr.f32.gmra.mxu1 %v4006_v38  ;;  %v3993_v38 = vld [vmem:[%s20906_s3 + $0x58] sm:$0xff] }
 0x2a3   : > { %4527 = vmatmul.mubr.f32.gmra.mxu0 %v12488_v53  ;;  %14737 = vmatprep.subr.mxu0 %v18198_v22  ;;  %v12523_v53 = vld [vmem:[%s20906_s3 + $0x2b8] sm:$0xff] }
 0x2a4   : > { %4176 = vmatprep.mubr.f32.mxu1 %v4010_v33  ;;  %4531 = vmatprep.mubr.f32.mxu0 %v12492_v37  ;;  %v3996_v33 = vld [vmem:[%s20906_s3 + $0x70] sm:$0xff]  ;;  %v12527_v37 = vld [vmem:[%s20906_s3 + $0x2d8] sm:$0xff] }
 0x2a6   : > { %4177 = vmatmul.mubr.f32.gmra.mxu1 %v4009_v52  ;;  %v3999_v52 = vld [vmem:[%s20906_s3 + $0x88] sm:$0xff] }
 0x2a7   : > { %4532 = vmatmul.mubr.f32.gmra.mxu0 %v12491_v34  ;;  %4181 = vmatprep.mubr.f32.mxu1 %v4013_v27  ;;  %v12526_v34 = vld [vmem:[%s20906_s3 + $0x2d0] sm:$0xff]  ;;  %v4002_v27 = vld [vmem:[%s20906_s3 + $0xa0] sm:$0xff] }
 0x2a8   : > { %4536 = vmatprep.mubr.f32.mxu0 %v12495_v24  ;;  %v12530_v24 = vld [vmem:[%s20906_s3 + $0x2f0] sm:$0xff] }
 0x2aa   : > { %4182 = vmatmul.mubr.f32.gmra.mxu1 %v4012_v47  ;;  %v4005_v47 = vld [vmem:[%s20906_s3 + $0xb8] sm:$0xff] }
 0x2ab   : > { %4537 = vmatmul.mubr.f32.gmra.mxu0 %v12494_v40  ;;  %4186 = vmatprep.mubr.f32.mxu1 %v4016_v39  ;;  %v12529_v40 = vld [vmem:[%s20906_s3 + $0x2e8] sm:$0xff]  ;;  %v4008_v39 = vld [vmem:[%s20906_s3 + $0xd0] sm:$0xff] }
 0x2ac   : > { %4541 = vmatprep.mubr.f32.mxu0 %v12498_v2  ;;  %v4011_v2 = vld [vmem:[%s20906_s3 + $0xe8] sm:$0xff] }
 0x2ae   : > { %4187 = vmatmul.mubr.f32.gmra.mxu1 %v4015_v25  ;;  %v12532_v25 = vld [vmem:[%s20906_s3 + $0x300] sm:$0xff] }
 0x2af   : > { %4542 = vmatmul.mubr.f32.gmra.mxu0 %v12497_v62  ;;  %4191 = vmatprep.mubr.f32.mxu1 %v4019_v31  ;;  %v4014_v62 = vld [vmem:[%s20906_s3 + $0x100] sm:$0xff]  ;;  %v12522_v31 = vld [vmem:[%s20906_s3 + $0x2b0] sm:$0xff] }
 0x2b0   : > { %4546 = vmatprep.mubr.f32.mxu0 %v12501_v54  ;;  %v4017_v54 = vld [vmem:[%s20906_s3 + $0x118] sm:$0xff] }
 0x2b2   : > { %4192 = vmatmul.mubr.f32.gmra.mxu1 %v4018_v50  ;;  %v12525_v50 = vld [vmem:[%s20906_s3 + $0x2c8] sm:$0xff] }
 0x2b3   : > { %4547 = vmatmul.mubr.f32.gmra.mxu0 %v12500_v30  ;;  %4196 = vmatprep.mubr.f32.mxu1 %v4022_v32  ;;  %v4020_v30 = vld [vmem:[%s20906_s3 + $0x130] sm:$0xff]  ;;  %v12528_v32 = vld [vmem:[%s20906_s3 + $0x2e0] sm:$0xff] }
 0x2b4   : > { %4551 = vmatprep.mubr.f32.mxu0 %v12504_v60  ;;  %v4023_v60 = vld [vmem:[%s20906_s3 + $0x148] sm:$0xf] }
 0x2b6   : > { %4197 = vmatmul.mubr.f32.gmra.mxu1 %v4021_v61  ;;  %v12466_v61 = vld [vmem:[%s20906_s3 + $0x160] sm:$0xff] }
 0x2b7   : > { %4552 = vmatmul.mubr.f32.gmra.mxu0 %v12503_v18  ;;  %14687 = vmatprep.mubr.msk.f32.mxu1 %vm4024_vm8, %v3984_v59  ;;  %v12531_v18 = vld [vmem:[%s20906_s3 + $0x2f8] sm:$0xff] }
 0x2b8   : > { %4855 = vmatprep.mubr.f32.mxu0 %v12521_v7  ;;  %v12469_v59 = vld [vmem:[%s20906_s3 + $0x178] sm:$0xff]  ;;  %v12472_v7 = vld [vmem:[%s20906_s3 + $0x190] sm:$0xff] }
 0x2ba   : > { %14688 = vmatmul.mubr.msk.f32.vlgmr.msra.gmra.mxu1 %vm4024_vm8, %v3987_v45  ;;  %v12475_v45 = vld [vmem:[%s20906_s3 + $0x1a8] sm:$0xff] }
 0x2bb   : > { %14709 = vmatpush3.msra.mxu1 %v18198_v22  ;;  %4856 = vmatmul.mubr.f32.vlgmr.msra.gmra.mxu0 %v12520_v44  ;;  %v12586_v44 = vld [vmem:[%s20906_s3 + $0x440] sm:$0xff] }
 0x2bc   : > { %14738 = vmatpush3.msra.mxu0 %v18198_v22  ;;  %14710 = vmatprep.subr.mxu1 %v18210_v19 }
 0x2bd   : > { %14739 = vmatprep.subr.mxu0 %v18210_v19  ;;  %14711 = vmatpush3.msra.mxu1 %v18210_v19 }
 0x2be   : > { %14740 = vmatpush3.msra.mxu0 %v18210_v19  ;;  %14690 = vmatprep.mubr.msk.f32.mxu1 %vm4024_vm8, %v3990_v48  ;;  %v12585_v48 = vld [vmem:[%s20906_s3 + $0x438] sm:$0xff] }
 0x2bf   : > { %14712 = vmatprep.subr.mxu1 %v18227_v46  ;;  %4860 = vmatprep.mubr.f32.mxu0 %v12524_v41  ;;  %v12547_v41 = vld [vmem:[%s20906_s3 + $0x378] sm:$0xff] }
 0x2c0   : > { %14741 = vmatprep.subr.mxu0 %v18227_v46  ;;  %14691 = vmatmul.mubr.msk.f32.gmra.mxu1 %vm4024_vm8, %v3993_v38  ;;  %v12589_v38 = vld [vmem:[%s20906_s3 + $0x458] sm:$0xff] }
 0x2c1   : > { %14713 = vmatpush3.msra.mxu1 %v18227_v46  ;;  %4861 = vmatmul.mubr.f32.gmra.mxu0 %v12523_v53  ;;  %v12551_v53 = vld [vmem:[%s20906_s3 + $0x398] sm:$0xff] }
 0x2c2   : > { %14742 = vmatpush3.msra.mxu0 %v18227_v46  ;;  %14714 = vmatprep.subr.mxu1 %v18235_v42 }
 0x2c3   : > { %14743 = vmatprep.subr.mxu0 %v18235_v42  ;;  %14715 = vmatpush3.msra.mxu1 %v18235_v42 }
 0x2c4   : > { %14744 = vmatpush3.msra.mxu0 %v18235_v42  ;;  %14693 = vmatprep.mubr.msk.f32.mxu1 %vm4024_vm8, %v3996_v33  ;;  %v12588_v33 = vld [vmem:[%s20906_s3 + $0x450] sm:$0xff] }
 0x2c5   : > { %15163 = vmatprep.subr.mxu1 %v17963_v21  ;;  %4865 = vmatprep.mubr.f32.mxu0 %v12527_v37  ;;  %v12550_v37 = vld [vmem:[%s20906_s3 + $0x390] sm:$0xff] }
 0x2c6   : > { %14100 = vmatprep.subr.mxu0 %v17963_v21  ;;  %14694 = vmatmul.mubr.msk.f32.gmra.mxu1 %vm4024_vm8, %v3999_v52  ;;  %v12533_v21 = vld [vmem:[%s20906_s3 + $0x308] sm:$0xff]  ;;  %v12592_v52 = vld [vmem:[%s20906_s3 + $0x470] sm:$0xff] }
 0x2c7   : > { %4866 = vmatmul.mubr.f32.gmra.mxu0 %v12526_v34  ;;  %14696 = vmatprep.mubr.msk.f32.mxu1 %vm4024_vm8, %v4002_v27  ;;  %v12554_v34 = vld [vmem:[%s20906_s3 + $0x3b0] sm:$0xff]  ;;  %v12591_v27 = vld [vmem:[%s20906_s3 + $0x468] sm:$0xff] }
 0x2c8   : > { %4870 = vmatprep.mubr.f32.mxu0 %v12530_v24  ;;  %v12553_v24 = vld [vmem:[%s20906_s3 + $0x3a8] sm:$0xff] }
 0x2ca   : > { %14697 = vmatmul.mubr.msk.f32.gmra.mxu1 %vm4024_vm8, %v4005_v47  ;;  %v12595_v47 = vld [vmem:[%s20906_s3 + $0x488] sm:$0xff] }
 0x2cb   : > { %4871 = vmatmul.mubr.f32.gmra.mxu0 %v12529_v40  ;;  %14699 = vmatprep.mubr.msk.f32.mxu1 %vm4024_vm8, %v4008_v39  ;;  %v12557_v40 = vld [vmem:[%s20906_s3 + $0x3c8] sm:$0xff]  ;;  %v12594_v39 = vld [vmem:[%s20906_s3 + $0x480] sm:$0xff] }
 0x2cc   : > { %4875 = vmatprep.mubr.f32.mxu0 %v12533_v21  ;;  %v12556_v21 = vld [vmem:[%s20906_s3 + $0x3c0] sm:$0xff] }
 0x2ce   : > { %14700 = vmatmul.mubr.msk.f32.gmra.mxu1 %vm4024_vm8, %v4011_v2  ;;  %v12598_v2 = vld [vmem:[%s20906_s3 + $0x4a0] sm:$0xff] }
 0x2cf   : > { %4876 = vmatmul.mubr.f32.gmra.mxu0 %v12532_v25  ;;  %14702 = vmatprep.mubr.msk.f32.mxu1 %vm4024_vm8, %v4014_v62  ;;  %v12560_v25 = vld [vmem:[%s20906_s3 + $0x3e0] sm:$0xf]  ;;  %v12597_v62 = vld [vmem:[%s20906_s3 + $0x498] sm:$0xff] }
 0x2d0   : > { %14745 = vmatprep.mubr.msk.f32.mxu0 %vm4024_vm8, %v12522_v31  ;;  %v12559_v31 = vld [vmem:[%s20906_s3 + $0x3d8] sm:$0xf] }
 0x2d2   : > { %14703 = vmatmul.mubr.msk.f32.gmra.mxu1 %vm4024_vm8, %v4017_v54  ;;  %v12601_v54 = vld [vmem:[%s20906_s3 + $0x4b8] sm:$0xff] }
 0x2d3   : > { %14746 = vmatmul.mubr.msk.f32.vlgmr.msra.gmra.mxu0 %vm4024_vm8, %v12525_v50  ;;  %14705 = vmatprep.mubr.msk.f32.mxu1 %vm4024_vm8, %v4020_v30  ;;  %v12578_v50 = vld [vmem:[%s20906_s3 + $0x400] sm:$0xff]  ;;  %v12600_v30 = vld [vmem:[%s20906_s3 + $0x4b0] sm:$0xff] }
 0x2d4   : > { %14101 = vmatpush3.msra.mxu0 %v17968_v58  ;;  %14748 = vmatprep.mubr.msk.f32.mxu0 %vm4024_vm8, %v12528_v32  ;;  %v12581_v32 = vld [vmem:[%s20906_s3 + $0x418] sm:$0xff] }
 0x2d5   : > { %14102 = vmatprep.subr.mxu0 %v17973_v14 }
 0x2d6   : > { %14103 = vmatpush3.msra.mxu0 %v17980_v17  ;;  %14706 = vmatmul.mubr.msk.f32.gmra.mxu1 %vm4024_vm8, %v4023_v60  ;;  %v12604_v60 = vld [vmem:[%s20906_s3 + $0x4d0] sm:$0xff] }
 0x2d7   : > { %14104 = vmatprep.subr.mxu0 %v17988_v28  ;;  %14716 = vmatprep.mubr.msk.f32.mxu1 %vm4024_vm8, %v12466_v61  ;;  %v12584_v61 = vld [vmem:[%s20906_s3 + $0x430] sm:$0xff] }
 0x2d8   : > { %14105 = vmatpush3.msra.mxu0 %v17996_v16 }
 0x2d9   : > { %14106 = vmatprep.subr.mxu0 %v18004_v29  ;;  %14749 = vmatmul.mubr.msk.f32.gmra.mxu0 %vm4024_vm8, %v12531_v18  ;;  %v12603_v18 = vld [vmem:[%s20906_s3 + $0x4c8] sm:$0xff] }
 0x2da   : > { %14107 = vmatpush3.msra.mxu0 %v18012_v5  ;;  %14717 = vmatmul.mubr.msk.f32.vlgmr.msra.gmra.mxu1 %vm4024_vm8, %v12469_v59  ;;  %v12587_v59 = vld [vmem:[%s20906_s3 + $0x448] sm:$0xff] }
 0x2db   : > { %14108 = vmatprep.subr.mxu0 %v18019_v0  ;;  %15179 = vmatpush3.msra.mxu1 %v17968_v58  ;;  %v12478_v58 = vld [vmem:[%s20906_s3 + $0x1c0] sm:$0xff] }
 0x2dc   : > { %14109 = vmatpush3.msra.mxu0 %v18028_v55  ;;  %15164 = vmatprep.subr.mxu1 %v17973_v14  ;;  %v12481_v14 = vld [vmem:[%s20906_s3 + $0x1d8] sm:$0xff] }
 0x2dd   : > { %14110 = vmatprep.subr.mxu0 %v18035_v35  ;;  %15180 = vmatpush3.msra.mxu1 %v17980_v17  ;;  %v12534_v17 = vld [vmem:[%s20906_s3 + $0x310] sm:$0xff] }
 0x2de   : > { %14111 = vmatpush3.msra.mxu0 %v18046_v9  ;;  %14719 = vmatprep.mubr.msk.f32.mxu1 %vm4024_vm8, %v12472_v7  ;;  %v12607_v7 = vld [vmem:[%s20906_s3 + $0x4e8] sm:$0xff] }
 0x2df   : > { %15165 = vmatprep.subr.mxu1 %v17988_v28  ;;  %14112 = vmatprep.subr.mxu0 %v18054_v26  ;;  %v12537_v28 = vld [vmem:[%s20906_s3 + $0x328] sm:$0xff] }
 0x2e0   : > { %14720 = vmatmul.mubr.msk.f32.gmra.mxu1 %vm4024_vm8, %v12475_v45  ;;  %14113 = vmatpush3.msra.mxu0 %v18062_v20  ;;  %v12590_v45 = vld [vmem:[%s20906_s3 + $0x460] sm:$0xff] }
 0x2e1   : > { %15181 = vmatpush3.msra.mxu1 %v17996_v16  ;;  %14114 = vmatprep.subr.mxu0 %v18072_v3  ;;  %v12484_v16 = vld [vmem:[%s20906_s3 + $0x1f0] sm:$0xff] }
 0x2e2   : > { %15166 = vmatprep.subr.mxu1 %v18004_v29  ;;  %14115 = vmatpush3.msra.mxu0 %v18083_v12  ;;  %v12487_v29 = vld [vmem:[%s20906_s3 + $0x208] sm:$0xff] }
 0x2e3   : > { %15182 = vmatpush3.msra.mxu1 %v18012_v5  ;;  %14722 = vmatprep.mubr.msk.f32.mxu1 %vm4024_vm8, %v12478_v58  ;;  %v12490_v5 = vld [vmem:[%s20906_s3 + $0x220] sm:$0xff] }
 0x2e4   : > { %15167 = vmatprep.subr.mxu1 %v18019_v0  ;;  %14116 = vmatprep.subr.mxu0 %v18090_v36  ;;  %v12493_v0 = vld [vmem:[%s20906_s3 + $0x238] sm:$0xff]  ;;  %v12606_v58 = vld [vmem:[%s20906_s3 + $0x4e0] sm:$0xff] }
 0x2e5   : > { %14723 = vmatmul.mubr.msk.f32.gmra.mxu1 %vm4024_vm8, %v12481_v14  ;;  %14117 = vmatpush3.msra.mxu0 %v18099_v43  ;;  %v12593_v14 = vld [vmem:[%s20906_s3 + $0x478] sm:$0xff] }
 0x2e6   : > { %15183 = vmatpush3.msra.mxu1 %v18028_v55  ;;  %14751 = vmatprep.mubr.msk.f32.mxu0 %vm4024_vm8, %v12534_v17  ;;  %v12540_v55 = vld [vmem:[%s20906_s3 + $0x340] sm:$0xff] }
 0x2e7   : > { %15168 = vmatprep.subr.mxu1 %v18035_v35  ;;  %14118 = vmatprep.subr.mxu0 %v18108_v51  ;;  %v12496_v35 = vld [vmem:[%s20906_s3 + $0x250] sm:$0xff]  ;;  %v12610_v17 = vld [vmem:[%s20906_s3 + $0x500] sm:$0xff] }
 0x2e8   : > { %15184 = vmatpush3.msra.mxu1 %v18046_v9  ;;  %14752 = vmatmul.mubr.msk.f32.gmra.mxu0 %vm4024_vm8, %v12537_v28  ;;  %v12543_v9 = vld [vmem:[%s20906_s3 + $0x358] sm:$0xff]  ;;  %v12596_v28 = vld [vmem:[%s20906_s3 + $0x490] sm:$0xff] }
 0x2e9   : > { %14119 = vmatpush3.msra.mxu0 %v18115_v1  ;;  %14725 = vmatprep.mubr.msk.f32.mxu1 %vm4024_vm8, %v12484_v16  ;;  %v12609_v16 = vld [vmem:[%s20906_s3 + $0x4f8] sm:$0xff] }
 0x2ea   : > { %15169 = vmatprep.subr.mxu1 %v18054_v26  ;;  %14120 = vmatprep.subr.mxu0 %v18124_v63  ;;  %v12499_v26 = vld [vmem:[%s20906_s3 + $0x268] sm:$0xff] }
 0x2eb   : > { %14726 = vmatmul.mubr.msk.f32.gmra.mxu1 %vm4024_vm8, %v12487_v29  ;;  %14121 = vmatpush3.msra.mxu0 %v18132_v11  ;;  %v12599_v29 = vld [vmem:[%s20906_s3 + $0x4a8] sm:$0xff] }
 0x2ec   : > { %15185 = vmatpush3.msra.mxu1 %v18062_v20  ;;  %14122 = vmatprep.subr.mxu0 %v18139_v15  ;;  %v12546_v20 = vld [vmem:[%s20906_s3 + $0x370] sm:$0xff] }
 0x2ed   : > { %15170 = vmatprep.subr.mxu1 %v18072_v3  ;;  %14123 = vmatpush3.msra.mxu0 %v18146_v4  ;;  %v12502_v3 = vld [vmem:[%s20906_s3 + $0x280] sm:$0xff] }
 0x2ee   : > { %15186 = vmatpush3.msra.mxu1 %v18083_v12  ;;  %14728 = vmatprep.mubr.msk.f32.mxu1 %vm4024_vm8, %v12490_v5  ;;  %v12549_v12 = vld [vmem:[%s20906_s3 + $0x388] sm:$0xff]  ;;  %v12613_v5 = vld [vmem:[%s20906_s3 + $0x518] sm:$0xff] }
 0x2ef   : > { %15171 = vmatprep.subr.mxu1 %v18090_v36  ;;  %14124 = vmatprep.subr.mxu0 %v18151_v8  ;;  %v12505_v36 = vld [vmem:[%s20906_s3 + $0x298] sm:$0xf] }
 0x2f0   : > { %14729 = vmatmul.mubr.msk.f32.gmra.mxu1 %vm4024_vm8, %v12493_v0  ;;  %14125 = vmatpush3.msra.mxu0 %v18159_v10  ;;  %v12602_v0 = vld [vmem:[%s20906_s3 + $0x4c0] sm:$0xff] }
 0x2f1   : > { %15187 = vmatpush3.msra.mxu1 %v18099_v43  ;;  %14126 = vmatprep.subr.mxu0 %v18164_v6  ;;  %v12552_v43 = vld [vmem:[%s20906_s3 + $0x3a0] sm:$0xff] }
 0x2f2   : > { %15172 = vmatprep.subr.mxu1 %v18108_v51  ;;  %14754 = vmatprep.mubr.msk.f32.mxu0 %vm4024_vm8, %v12540_v55  ;;  %v12536_v51 = vld [vmem:[%s20906_s3 + $0x320] sm:$0xff]  ;;  %v12612_v55 = vld [vmem:[%s20906_s3 + $0x510] sm:$0xff] }
 0x2f3   : > { %15188 = vmatpush3.msra.mxu1 %v18115_v1  ;;  %14127 = vmatpush3.msra.mxu0 %v18170_v57  ;;  %v12555_v1 = vld [vmem:[%s20906_s3 + $0x3b8] sm:$0xff] }
 0x2f4   : > { %14731 = vmatprep.mubr.msk.f32.mxu1 %vm4024_vm8, %v12496_v35  ;;  %15173 = vmatprep.subr.mxu1 %v18124_v63  ;;  %v12558_v63 = vld [vmem:[%s20906_s3 + $0x3d0] sm:$0xff]  ;;  %v12605_v35 = vld [vmem:[%s20906_s3 + $0x4d8] sm:$0xff] }
 0x2f5   : > { %14755 = vmatmul.mubr.msk.f32.gmra.mxu0 %vm4024_vm8, %v12543_v9  ;;  %14128 = vmatprep.subr.mxu0 %v18176_v13  ;;  %v12616_v9 = vld [vmem:[%s20906_s3 + $0x530] sm:$0xf] }
 0x2f6   : > { %14732 = vmatmul.mubr.msk.f32.gmra.mxu1 %vm4024_vm8, %v12499_v26  ;;  %14129 = vmatpush3.msra.mxu0 %v18181_v49  ;;  %v12608_v26 = vld [vmem:[%s20906_s3 + $0x4f0] sm:$0xff] }
 0x2f7   : > { %15189 = vmatpush3.msra.mxu1 %v18132_v11  ;;  %14130 = vmatprep.subr.mxu0 %v18185_v56  ;;  %v12535_v11 = vld [vmem:[%s20906_s3 + $0x318] sm:$0xff] }
 0x2f8   : > { %15174 = vmatprep.subr.mxu1 %v18139_v15  ;;  %14757 = vmatprep.mubr.msk.f32.mxu0 %vm4024_vm8, %v12546_v20  ;;  %v12561_v15 = vld [vmem:[%s20906_s3 + $0x3e8] sm:$0xf] }
 0x2f9   : > { %15190 = vmatpush3.msra.mxu1 %v18146_v4  ;;  %14131 = vmatpush3.msra.mxu0 %v18190_v23  ;;  %v12539_v4 = vld [vmem:[%s20906_s3 + $0x338] sm:$0xff]  ;;  %v12615_v20 = vld [vmem:[%s20906_s3 + $0x528] sm:$0xf] }
 0x2fa   : > { %14734 = vmatprep.mubr.msk.f32.mxu1 %vm4024_vm8, %v12502_v3  ;;  %15175 = vmatprep.subr.mxu1 %v18151_v8  ;;  %v12577_v8 = vld [vmem:[%s20906_s3 + $0x3f8] sm:$0xff]  ;;  %v12611_v3 = vld [vmem:[%s20906_s3 + $0x508] sm:$0xff] }
 0x2fb   : > { %14758 = vmatmul.mubr.msk.f32.gmra.mxu0 %vm4024_vm8, %v12549_v12  ;;  %14735 = vmatmul.mubr.msk.f32.gmra.mxu1 %vm4024_vm8, %v12505_v36  ;;  %v12614_v12 = vld [vmem:[%s20906_s3 + $0x520] sm:$0xff]  ;;  %v12617_v36 = vld [vmem:[%s20906_s3 + $0x538] sm:$0xf] }
 0x2fc   : > { %15191 = vmatpush3.msra.mxu1 %v18159_v10  ;;  %14760 = vmatprep.mubr.msk.f32.mxu0 %vm4024_vm8, %v12552_v43  ;;  %v12576_v10 = vld [vmem:[%s20906_s3 + $0x3f0] sm:$0xff] }
 0x2fd   : > { %15176 = vmatprep.subr.mxu1 %v18164_v6  ;;  %4880 = vmatprep.mubr.f32.mxu1 %v12536_v51  ;;  %v12538_v6 = vld [vmem:[%s20906_s3 + $0x330] sm:$0xff] }
 0x2fe   : > { %15192 = vmatpush3.msra.mxu1 %v18170_v57  ;;  %v12542_v57 = vld [vmem:[%s20906_s3 + $0x350] sm:$0xff] }
 0x2ff   : > { %15177 = vmatprep.subr.mxu1 %v18176_v13  ;;  %14761 = vmatmul.mubr.msk.f32.gmra.mxu0 %vm4024_vm8, %v12555_v1  ;;  %v12580_v13 = vld [vmem:[%s20906_s3 + $0x410] sm:$0xff] }
 0x300   : > { %15193 = vmatpush3.msra.mxu1 %v18181_v49  ;;  %14763 = vmatprep.mubr.msk.f32.mxu0 %vm4024_vm8, %v12558_v63  ;;  %v12579_v49 = vld [vmem:[%s20906_s3 + $0x408] sm:$0xff] }
 0x301   : > { %15178 = vmatprep.subr.mxu1 %v18185_v56  ;;  %v12541_v56 = vld [vmem:[%s20906_s3 + $0x348] sm:$0xff] }
 0x302   : > { %15194 = vmatpush3.msra.mxu1 %v18190_v23  ;;  %v12583_v23 = vld [vmem:[%s20906_s3 + $0x428] sm:$0xff] }
 0x303   : > { %4881 = vmatmul.mubr.f32.vlgmr.msra.gmra.mxu1 %v12535_v11  ;;  %14764 = vmatmul.mubr.msk.f32.gmra.mxu0 %vm4024_vm8, %v12561_v15 }
 0x304   : > { %14766 = vmatprep.subr.mxu1 %v18198_v22  ;;  %4885 = vmatprep.mubr.f32.mxu1 %v12539_v4 }
 0x305   : > { %14767 = vmatpush3.msra.mxu1 %v18198_v22  ;;  %5224 = vmatprep.mubr.f32.mxu0 %v12577_v8  ;;  %v12545_v22 = vld [vmem:[%s20906_s3 + $0x368] sm:$0xff] }
 0x306   : > { %14768 = vmatprep.subr.mxu1 %v18210_v19 }
 0x307   : > { %14769 = vmatpush3.msra.mxu1 %v18210_v19  ;;  %5225 = vmatmul.mubr.f32.vlgmr.msra.gmra.mxu0 %v12576_v10  ;;  %v12582_v19 = vld [vmem:[%s20906_s3 + $0x420] sm:$0xff] }
 0x308   : > { %4886 = vmatmul.mubr.f32.gmra.mxu1 %v12538_v6  ;;  %14770 = vmatprep.subr.mxu1 %v18227_v46 }
 0x309   : > { %14771 = vmatpush3.msra.mxu1 %v18227_v46  ;;  %4890 = vmatprep.mubr.f32.mxu1 %v12542_v57  ;;  %v12544_v46 = vld [vmem:[%s20906_s3 + $0x360] sm:$0xff] }
 0x30a   : > { %14772 = vmatprep.subr.mxu1 %v18235_v42  ;;  %5229 = vmatprep.mubr.f32.mxu0 %v12580_v13 }
 0x30b   : > { %14773 = vmatpush3.msra.mxu1 %v18235_v42  ;;  %5230 = vmatmul.mubr.f32.gmra.mxu0 %v12579_v49  ;;  %v12548_v42 = vld [vmem:[%s20906_s3 + $0x380] sm:$0xff] }
 0x30c   : > { %4891 = vmatmul.mubr.f32.gmra.mxu1 %v12541_v56  ;;  %5234 = vmatprep.mubr.f32.mxu0 %v12583_v23 }
 0x30d   : > { %4895 = vmatprep.mubr.f32.mxu1 %v12545_v22 }
 0x30f   : > { %5235 = vmatmul.mubr.f32.gmra.mxu0 %v12582_v19 }
 0x310   : > { %4896 = vmatmul.mubr.f32.gmra.mxu1 %v12544_v46  ;;  %5239 = vmatprep.mubr.f32.mxu0 %v12586_v44 }
 0x311   : > { %4900 = vmatprep.mubr.f32.mxu1 %v12548_v42 }
 0x313   : > { %5240 = vmatmul.mubr.f32.gmra.mxu0 %v12585_v48 }
 0x314   : > { %4901 = vmatmul.mubr.f32.gmra.mxu1 %v12547_v41  ;;  %5244 = vmatprep.mubr.f32.mxu0 %v12589_v38 }
 0x315   : > { %4905 = vmatprep.mubr.f32.mxu1 %v12551_v53 }
 0x317   : > { %5245 = vmatmul.mubr.f32.gmra.mxu0 %v12588_v33 }
 0x318   : > { %4906 = vmatmul.mubr.f32.gmra.mxu1 %v12550_v37  ;;  %5249 = vmatprep.mubr.f32.mxu0 %v12592_v52 }
 0x319   : > { %4910 = vmatprep.mubr.f32.mxu1 %v12554_v34 }
 0x31b   : > { %5250 = vmatmul.mubr.f32.gmra.mxu0 %v12591_v27 }
 0x31c   : > { %4911 = vmatmul.mubr.f32.gmra.mxu1 %v12553_v24  ;;  %5254 = vmatprep.mubr.f32.mxu0 %v12595_v47 }
 0x31d   : > { %4915 = vmatprep.mubr.f32.mxu1 %v12557_v40 }
 0x31f   : > { %5255 = vmatmul.mubr.f32.gmra.mxu0 %v12594_v39 }
 0x320   : > { %4916 = vmatmul.mubr.f32.gmra.mxu1 %v12556_v21  ;;  %5259 = vmatprep.mubr.f32.mxu0 %v12598_v2 }
 0x321   : > { %4920 = vmatprep.mubr.f32.mxu1 %v12560_v25 }
 0x323   : > { %5260 = vmatmul.mubr.f32.gmra.mxu0 %v12597_v62 }
 0x324   : > { %4921 = vmatmul.mubr.f32.gmra.mxu1 %v12559_v31  ;;  %5264 = vmatprep.mubr.f32.mxu0 %v12601_v54 }
 0x325   : > { %14774 = vmatprep.mubr.msk.f32.mxu1 %vm4024_vm8, %v12578_v50 }
 0x327   : > { %5265 = vmatmul.mubr.f32.gmra.mxu0 %v12600_v30 }
 0x328   : > { %14775 = vmatmul.mubr.msk.f32.vlgmr.msra.gmra.mxu1 %vm4024_vm8, %v12581_v32  ;;  %5269 = vmatprep.mubr.f32.mxu0 %v12604_v60 }
 0x329   : > { %14777 = vmatprep.mubr.msk.f32.mxu1 %vm4024_vm8, %v12584_v61 }
 0x32b   : > { %5270 = vmatmul.mubr.f32.gmra.mxu0 %v12603_v18 }
 0x32c   : > { %14778 = vmatmul.mubr.msk.f32.gmra.mxu1 %vm4024_vm8, %v12587_v59  ;;  %5274 = vmatprep.mubr.f32.mxu0 %v12607_v7 }
 0x32d   : > { %14780 = vmatprep.mubr.msk.f32.mxu1 %vm4024_vm8, %v12590_v45 }
 0x32f   : > { %5275 = vmatmul.mubr.f32.gmra.mxu0 %v12606_v58 }
 0x330   : > { %14781 = vmatmul.mubr.msk.f32.gmra.mxu1 %vm4024_vm8, %v12593_v14  ;;  %5279 = vmatprep.mubr.f32.mxu0 %v12610_v17 }
 0x331   : > { %14783 = vmatprep.mubr.msk.f32.mxu1 %vm4024_vm8, %v12596_v28  ;;  %v15323_v28 = vld [vmem:[%s20907_s4 + $0x18] sm:$0xff]  }
 0x333   : > { %5280 = vmatmul.mubr.f32.gmra.mxu0 %v12609_v16 }
 0x334   : > { %14784 = vmatmul.mubr.msk.f32.gmra.mxu1 %vm4024_vm8, %v12599_v29  ;;  %5284 = vmatprep.mubr.f32.mxu0 %v12613_v5  ;;  %v20923_v29 = vmov 0.0  }
 0x335   : > { %14786 = vmatprep.mubr.msk.f32.mxu1 %vm4024_vm8, %v12602_v0  ;;  %14823 = vmatprep.subr.bf16.mxu0 %v20923_v29 }
 0x336   : > { %14795 = vmatprep.subr.bf16.mxu1 %v20923_v29  ;;  %14824 = vmatpush3.bf16.msra.mxu0 %v15323_v28 }
 0x337   : > { %5285 = vmatmul.mubr.f32.gmra.mxu0 %v12612_v55  ;;  %14825 = vmatprep.subr.bf16.mxu0 %v20923_v29 }
 0x338   : > { %14787 = vmatmul.mubr.msk.f32.gmra.mxu1 %vm4024_vm8, %v12605_v35  ;;  %5289 = vmatprep.mubr.f32.mxu0 %v12616_v9 }
 0x339   : > { %14789 = vmatprep.mubr.msk.f32.mxu1 %vm4024_vm8, %v12608_v26  ;;  %v15324_v26 = vld [vmem:[%s20907_s4 + $0x10] sm:$0xff]  }
 0x33a   : > { %14826 = vmatpush3.bf16.msra.mxu0 %v15324_v26 }
 0x33b   : > { %5290 = vmatmul.mubr.f32.gmra.mxu0 %v12615_v20  ;;  %14827 = vmatprep.subr.bf16.mxu0 %v20923_v29 }
 0x33c   : > { %14790 = vmatmul.mubr.msk.f32.gmra.mxu1 %vm4024_vm8, %v12611_v3  ;;  %14831 = vmatprep.mubr.msk.bf16.mxu0 %vm16157_vm9, %v20923_v29 }
 0x33d   : > { %14792 = vmatprep.mubr.msk.f32.mxu1 %vm4024_vm8, %v12614_v12 }
 0x33e   : > { %v13856_v43 = vpop.f32.mrf.mxu1 }
 0x33f   : > { %v13948_v51 = vpop.f32.mrf.mxu0 }
 0x340   : > { %14793 = vmatmul.mubr.msk.f32.gmra.mxu1 %vm4024_vm8, %v12617_v36  ;;  %v13857_v1 = vpop.f32.mrf.mxu1 }
 0x341   : > { %v18892_v63 = vadd.f32 %v13857_v1, %v13856_v43  ;;  %v13949_v11 = vpop.f32.mrf.mxu0  ;;  %v15325_v43 = vld [vmem:[%s20907_s4 + $0x8] sm:$0xff]   ;;  %14803 = vmatprep.mubr.msk.bf16.mxu1 %vm16157_vm9, %v20923_v29 }
 0x342   : > { %v18894_v15 = vadd.f32 %v13949_v11, %v13948_v51  ;;  %v15326_v51 = vld [vmem:[%s20907_s4 + $0x38] sm:$0xff]   ;;  %14828 = vmatpush3.bf16.msra.mxu0 %v15325_v43 }
 0x343   : > { %14796 = vmatpush3.bf16.msra.mxu1 %v15326_v51  ;;  %14829 = vmatprep.subr.bf16.mxu0 %v20923_v29 }
 0x344   : > { %v18896_v4 = vpop.f32.mrf.mxu1  ;;  %14797 = vmatprep.subr.bf16.mxu1 %v20923_v29 }
 0x345   : > { %v18898_v8 = vpop.f32.mrf.mxu0 }
 0x346   : > { %v18900_v10 = vpop.f32.mrf.mxu1 }
 0x347   : > { %v18902_v6 = vpop.f32.mrf.mxu0 }
 0x34a   : > { %v13862_v57 = vpop.f32.mrf.mxu1  ;;  %v13954_v13 = vpop.f32.mrf.mxu0 }
 0x34c   : > { %v13863_v49 = vpop.f32.mrf.mxu1  ;;  %v13955_v56 = vpop.f32.mrf.mxu0 }
 0x34d   : > { %v18904_v23 = vadd.f32 %v13863_v49, %v13862_v57  ;;  %v18906_v22 = vadd.f32 %v13955_v56, %v13954_v13 }
 0x34e   : > { %v18908_v19 = vpop.f32.mrf.mxu1 }
 0x34f   : > { %v18910_v46 = vpop.f32.mrf.mxu0 }
 0x350   : > { %v18912_v44 = vpop.f32.mrf.mxu1 }
 0x351   : > { %v18914_v42 = vpop.f32.mrf.mxu0  ;;  %v13867_v28 = vadd.f32 %v18912_v44, %v18908_v19 }
 0x352   : > { %v13868_v48 = vpop.f32.mrf.mxu1 }
 0x353   : > { %v13960_v41 = vpop.f32.mrf.mxu0 }
 0x354   : > { %v13869_v38 = vpop.f32.mrf.mxu1 }
 0x355   : > { %v18916_v53 = vadd.f32 %v13869_v38, %v13868_v48  ;;  %v13961_v33 = vpop.f32.mrf.mxu0  ;;  %v15327_v48 = vld [vmem:[%s20907_s4] sm:$0xff]  }
 0x356   : > { %v18918_v37 = vpop.f32.mrf.mxu1  ;;  %v18920_v52 = vadd.f32 %v13961_v33, %v13960_v41  ;;  %v15328_v41 = vld [vmem:[%s20907_s4 + $0x30] sm:$0xff]   ;;  %14830 = vmatpush3.bf16.msra.mxu0 %v15327_v48 }
 0x357   : > { %v18922_v34 = vpop.f32.mrf.mxu0  ;;  %14798 = vmatpush3.bf16.msra.mxu1 %v15328_v41  ;;  %14879 = vmatprep.subr.bf16.mxu0 %v20923_v29 }
 0x358   : > { %v18924_v27 = vpop.f32.mrf.mxu1  ;;  %14799 = vmatprep.subr.bf16.mxu1 %v20923_v29 }
 0x359   : > { %v18926_v24 = vpop.f32.mrf.mxu0 }
 0x35a   : > { %v13874_v47 = vpop.f32.mrf.mxu1 }
 0x35b   : > { %v13966_v40 = vpop.f32.mrf.mxu0 }
 0x35c   : > { %v13875_v39 = vpop.f32.mrf.mxu1 }
 0x35d   : > { %v18928_v21 = vadd.f32 %v13875_v39, %v13874_v47  ;;  %v13967_v2 = vpop.f32.mrf.mxu0  ;;  %v13861_v47 = vadd.f32 %v18900_v10, %v18896_v4 }
 0x35e   : > { %v18930_v25 = vpop.f32.mrf.mxu1  ;;  %v18932_v62 = vadd.f32 %v13967_v2, %v13966_v40  ;;  %v15330_v2 = vld [vmem:[%s20907_s4 + $0x28] sm:$0xff]  }
 0x35f   : > { %v18934_v31 = vpop.f32.mrf.mxu0  ;;  %14800 = vmatpush3.bf16.msra.mxu1 %v15330_v2 }
 0x360   : > { %v18936_v54 = vpop.f32.mrf.mxu1  ;;  %14801 = vmatprep.subr.bf16.mxu1 %v20923_v29 }
 0x361   : > { %v18938_v50 = vpop.f32.mrf.mxu0  ;;  %v13879_v19 = vadd.f32 %v18936_v54, %v18930_v25 }
 0x362   : > { %v13880_v30 = vpop.f32.mrf.mxu1 }
 0x363   : > { %v13972_v32 = vpop.f32.mrf.mxu0 }
 0x364   : > { %v13881_v60 = vpop.f32.mrf.mxu1 }
 0x365   : > { %v18940_v61 = vadd.f32 %v13881_v60, %v13880_v30  ;;  %v13973_v18 = vpop.f32.mrf.mxu0 }
 0x366   : > { %v18942_v59 = vpop.f32.mrf.mxu1  ;;  %v18944_v7 = vadd.f32 %v13973_v18, %v13972_v32 }
 0x367   : > { %v18946_v45 = vpop.f32.mrf.mxu0 }
 0x368   : > { %v18948_v58 = vpop.f32.mrf.mxu1 }
 0x369   : > { %v18950_v14 = vpop.f32.mrf.mxu0 }
 0x36a   : > { %v13886_v17 = vpop.f32.mrf.mxu1 }
 0x36b   : > { %v13978_v16 = vpop.f32.mrf.mxu0 }
 0x36c   : > { %v13887_v5 = vpop.f32.mrf.mxu1 }
 0x36d   : > { %v18957_v0 = vadd.f32 %v13887_v5, %v13886_v17  ;;  %v13979_v55 = vpop.f32.mrf.mxu0  ;;  %v15331_v17 = vld [vmem:[%s20907_s4 + $0x20] sm:$0xff]  }
 0x36e   : > { %v18960_v35 = vpop.f32.mrf.mxu1  ;;  %v18962_v9 = vadd.f32 %v13979_v55, %v13978_v16  ;;  %14802 = vmatpush3.bf16.msra.mxu1 %v15331_v17 }
 0x36f   : > { %v18967_v20 = vpop.f32.mrf.mxu0  ;;  %14851 = vmatprep.subr.bf16.mxu1 %v20923_v29 }
 0x370   : > { %v18969_v3 = vpop.f32.mrf.mxu1 }
 0x371   : > { %v18971_v12 = vpop.f32.mrf.mxu0 }
 0x372   : > { %v13892_v36 = vpop.f32.mrf.mxu1 }
 0x373   : > { %v13984_v1 = vpop.f32.mrf.mxu0 }
 0x374   : > { %v13893_v11 = vpop.f32.mrf.mxu1 }
 0x375   : > { %v18980_v57 = vadd.f32 %v13893_v11, %v13892_v36  ;;  %v13985_v13 = vpop.f32.mrf.mxu0  ;;  %v13873_v36 = vadd.f32 %v18924_v27, %v18918_v37  ;;  %v13885_v37 = vadd.f32 %v18948_v58, %v18942_v59 }
 0x376   : > { %v13895_v49 = vpop.f32.mrf.mxu1  ;;  %v18984_v56 = vadd.f32 %v13985_v13, %v13984_v1 }
 0x377   : > { %v13987_v38 = vpop.f32.mrf.mxu0 }
 0x378   : > { %v13896_v33 = vpop.f32.mrf.mxu1 }
 0x379   : > { %v13988_v40 = vpop.f32.mrf.mxu0 }
 0x37a   : > { %v14689_v39 = vpop.f32.mrf.mxu1 }
 0x37b   : > { %v4274_v30 = vadd.f32 %v14689_v39, %v13861_v47  ;;  %v14040_v32 = vpop.f32.mrf.mxu0 }
 0x37c   : > { %v4268_v4 = vpop.f32.mrf.mxu1 }
 0x37d   : > { %v4269_v10 = vadd.f32 %v18892_v63, %v4268_v4  ;;  %v14041_v60 = vpop.f32.mrf.mxu0 }
 0x37e   : > { %v14042_v18 = vadd.f32 %v14041_v60, %v14040_v32 }
 0x380   : > { %v14692_v16 = vpop.f32.mrf.mxu1 }
 0x381   : > { %v19010_v5 = vadd.f32 %v14692_v16, %v13867_v28  ;;  %v14043_v55 = vpop.f32.mrf.mxu0 }
 0x382   : > { %v4278_v26 = vpop.f32.mrf.mxu1 }
 0x383   : > { %v14044_v63 = vpop.f32.mrf.mxu0 }
 0x384   : > { %v14045_v28 = vadd.f32 %v14044_v63, %v14043_v55  ;;  %v13959_v55 = vadd.f32 %v18914_v42, %v18910_v46  ;;  %v13965_v46 = vadd.f32 %v18926_v24, %v18922_v34 }
 0x386   : > { %v14695_v43 = vpop.f32.mrf.mxu1 }
 0x387   : > { %v19015_v51 = vadd.f32 %v14695_v43, %v13873_v36  ;;  %v14046_v1 = vpop.f32.mrf.mxu0  ;;  %v13953_v43 = vadd.f32 %v18902_v6, %v18898_v8 }
 0x388   : > { %v4288_v11 = vpop.f32.mrf.mxu1 }
 0x389   : > { %v19020_v44 = vadd.f32 %v18916_v53, %v4288_v11  ;;  %v14047_v13 = vpop.f32.mrf.mxu0  ;;  %v13891_v53 = vadd.f32 %v18969_v3, %v18960_v35 }
 0x38a   : > { %v14698_v49 = vpop.f32.mrf.mxu1  ;;  %v14048_v48 = vadd.f32 %v14047_v13, %v14046_v1 }
 0x38b   : > { %v19022_v41 = vadd.f32 %v14698_v49, %v13879_v19  ;;  %v14049_v38 = vpop.f32.mrf.mxu0 }
 0x38c   : > { %v4298_v33 = vpop.f32.mrf.mxu1 }
 0x38d   : > { %v14050_v27 = vpop.f32.mrf.mxu0 }
 0x38e   : > { %v14701_v47 = vpop.f32.mrf.mxu1  ;;  %v14051_v13 = vadd.f32 %v14050_v27, %v14049_v38 }
 0x38f   : > { %v19026_v40 = vadd.f32 %v14701_v47, %v13885_v37  ;;  %v14052_v39 = vpop.f32.mrf.mxu0 }
 0x390   : > { %v4308_v2 = vpop.f32.mrf.mxu1 }
 0x391   : > { %v19031_v25 = vadd.f32 %v18940_v61, %v4308_v2  ;;  %v14053_v54 = vpop.f32.mrf.mxu0 }
 0x392   : > { %v14704_v32 = vpop.f32.mrf.mxu1  ;;  %v14054_v4 = vadd.f32 %v14053_v54, %v14052_v39 }
 0x393   : > { %21188 = vst [vmem:[#allocation24_spill] sm:$0xff] %v19031_v25  ;;  %v19033_v60 = vadd.f32 %v14704_v32, %v13891_v53  ;;  %v14747_v59 = vpop.f32.mrf.mxu0  ;;  %v4279_v32 = vadd.f32 %v18904_v23, %v4278_v26 }
 0x394   : > { %v19035_v17 = vpop.f32.mrf.mxu1  ;;  %v4998_v1 = vadd.f32 %v14747_v59, %v14045_v28 }
 0x395   : > { %21189 = vst [vmem:[#allocation25_spill] sm:$0xff] %v19033_v60  ;;  %v4992_v36 = vpop.f32.mrf.mxu0 }
 0x396   : > { %v14707_v58 = vpop.f32.mrf.mxu1  ;;  %v4993_v47 = vadd.f32 %v14042_v18, %v4992_v36 }
 0x398   : > { %v4328_v16 = vpop.f32.mrf.mxu1 }
 0x399   : > { %v19040_v35 = vadd.f32 %v18980_v57, %v4328_v16  ;;  %v14750_v19 = vpop.f32.mrf.mxu0 }
 0x39a   : > { %v14718_v61 = vpop.f32.mrf.mxu1  ;;  %v5008_v53 = vadd.f32 %v14750_v19, %v14051_v13 }
 0x39b   : > { %21190 = vst [vmem:[#allocation31_spill] sm:$0xff] %v19040_v35  ;;  %v4629_v3 = vadd.f32 %v14718_v61, %v13953_v43  ;;  %v5002_v6 = vpop.f32.mrf.mxu0  ;;  %v19073_v61 = vadd.f32 %v18928_v21, %v4298_v33 }
 0x39c   : > { %v4623_v11 = vpop.f32.mrf.mxu1  ;;  %v5003_v18 = vadd.f32 %v14048_v48, %v5002_v6 }
 0x39d   : > { %v4693_v49 = vmax.f32 %v4274_v30, %v4629_v3  ;;  %v4624_v37 = vadd.f32 %v18894_v15, %v4623_v11 }
 0x39f   : > { %v4692_v63 = vmax.f32 %v4269_v10, %v4624_v37  ;;  %v19045_v39 = vmax.f32 %v4693_v49, %v4998_v1  ;;  %v19103_v37 = vadd.f32 %v18957_v0, %v19035_v17 }
 0x3a0   : > { %v14721_v8 = vpop.f32.mrf.mxu1 }
 0x3a1   : > { %v4639_v57 = vadd.f32 %v14721_v8, %v13959_v55  ;;  %v19047_v2 = vmax.f32 %v4692_v63, %v4993_v47  ;;  %21194 = vst [vmem:[#allocation26_spill] sm:$0xff] %v19103_v37 }
 0x3a2   : > { %v4633_v54 = vpop.f32.mrf.mxu1 }
 0x3a3   : > { %v4695_v30 = vmax.f32 %v19010_v5, %v4639_v57  ;;  %v4634_v15 = vadd.f32 %v18906_v22, %v4633_v54  ;;  %v13971_v22 = vadd.f32 %v18938_v50, %v18934_v31  ;;  %v13977_v31 = vadd.f32 %v18950_v14, %v18946_v45 }
 0x3a5   : > { %v4694_v42 = vmax.f32 %v4279_v32, %v4634_v15  ;;  %v19054_v10 = vmax.f32 %v4695_v30, %v5008_v53  ;;  %v14724_v38 = vpop.f32.mrf.mxu1 }
 0x3a6   : > { %v19056_v27 = vadd.f32 %v14724_v38, %v13965_v46 }
 0x3a7   : > { %v19058_v59 = vmax.f32 %v4694_v42, %v5003_v18  ;;  %v4643_v58 = vpop.f32.mrf.mxu1 }
 0x3a8   : > { %v4644_v5 = vadd.f32 %v18920_v52, %v4643_v58  ;;  %v19063_v26 = vpop.f32.mrf.mxu0 }
 0x3aa   : > { %v4696_v34 = vmax.f32 %v19020_v44, %v4644_v5  ;;  %v5012_v24 = vpop.f32.mrf.mxu0 }
 0x3ab   : > { %v14727_v48 = vpop.f32.mrf.mxu1  ;;  %v5013_v28 = vadd.f32 %v14054_v4, %v5012_v24 }
 0x3ac   : > { %v19068_v16 = vadd.f32 %v14727_v48, %v13971_v22 }
 0x3ad   : > { %v19070_v36 = vmax.f32 %v4696_v34, %v5013_v28  ;;  %v4653_v43 = vpop.f32.mrf.mxu1 }
 0x3ae   : > { %v19078_v3 = vadd.f32 %v18932_v62, %v4653_v43  ;;  %v13983_v62 = vadd.f32 %v18971_v12, %v18967_v20 }
 0x3b0   : > { %v14730_v44 = vpop.f32.mrf.mxu1 }
 0x3b1   : > { %v19084_v4 = vadd.f32 %v14730_v44, %v13977_v31 }
 0x3b2   : > { %v4663_v1 = vpop.f32.mrf.mxu1 }
 0x3b3   : > { %21191 = vst [vmem:[#allocation33_spill] sm:$0xff] %v19084_v4  ;;  %v19089_v33 = vadd.f32 %v18944_v7, %v4663_v1 }
 0x3b5   : > { %21192 = vst [vmem:[#allocation35_spill] sm:$0xff] %v19089_v33  ;;  %v19095_v45 = vpop.f32.mrf.mxu0 }
 0x3b6   : > { %v14733_v14 = vpop.f32.mrf.mxu1 }
 0x3b7   : > { %v19097_v19 = vadd.f32 %v14733_v14, %v13983_v62  ;;  %v19099_v13 = vpop.f32.mrf.mxu0 }
 0x3b8   : > { %v4673_v49 = vpop.f32.mrf.mxu1 }
 0x3b9   : > { %21193 = vst [vmem:[#allocation28_spill] sm:$0xff] %v19097_v19  ;;  %v19108_v20 = vadd.f32 %v18962_v9, %v4673_v49 }
 0x3bb   : > { %21195 = vst [vmem:[#allocation13_spill] sm:$0xff] %v19108_v20  ;;  %v19112_v47 = vpop.f32.mrf.mxu0  ;;  %v14736_v55 = vpop.f32.mrf.mxu1 }
 0x3bd   : > { %v19114_v63 = vpop.f32.mrf.mxu0  ;;  %v4683_v8 = vpop.f32.mrf.mxu1 }
 0x3be   : > { %v19117_v6 = vadd.f32 %v18984_v56, %v4683_v8 }
 0x3bf   : > { %v19119_v0 = vpop.f32.mrf.mxu0 }
 0x3c0   : > { %21196 = vst [vmem:[#allocation27_spill] sm:$0xff] %v19117_v6  ;;  %21197 = vst [vmem:[#allocation37_spill] sm:$0xff] %v19119_v0 }
 0x3c1   : > { %v19123_v57 = vpop.f32.mrf.mxu0 }
 0x3c3   : > { %v14055_v9 = vpop.f32.mrf.mxu1  ;;  %v14765_v53 = vpop.f32.mrf.mxu0 }
 0x3c5   : > { %v14056_v54 = vpop.f32.mrf.mxu1  ;;  %v19125_v32 = vpop.f32.mrf.mxu0 }
 0x3c6   : > { %21198 = vst [vmem:[#allocation39_spill] sm:$0xff] %v19125_v32  ;;  %v14057_v35 = vadd.f32 %v14056_v54, %v14055_v9 }
 0x3c7   : > { %v14132_v30 = vpop.f32.mrf.mxu0 }
 0x3c8   : > { %v14058_v15 = vpop.f32.mrf.mxu1 }
 0x3c9   : > { %v14133_v18 = vpop.f32.mrf.mxu0 }
 0x3ca   : > { %v14059_v46 = vpop.f32.mrf.mxu1  ;;  %v14134_v37 = vadd.f32 %v14133_v18, %v14132_v30 }
 0x3cb   : > { %v14135_v42 = vpop.f32.mrf.mxu0  ;;  %v14060_v18 = vadd.f32 %v14059_v46, %v14058_v15 }
 0x3cc   : > { %v14061_v38 = vpop.f32.mrf.mxu1 }
 0x3cd   : > { %v14136_v56 = vpop.f32.mrf.mxu0 }
 0x3ce   : > { %v14062_v58 = vpop.f32.mrf.mxu1  ;;  %v14137_v23 = vadd.f32 %v14136_v56, %v14135_v42 }
 0x3cf   : > { %v14138_v5 = vpop.f32.mrf.mxu0  ;;  %v14063_v4 = vadd.f32 %v14062_v58, %v14061_v38 }
 0x3d0   : > { %v19127_v22 = vpop.f32.mrf.mxu1 }
 0x3d1   : > { %v14139_v34 = vpop.f32.mrf.mxu0 }
 0x3d2   : > { %v14065_v24 = vpop.f32.mrf.mxu1 }
 0x3d3   : > { %v14141_v48 = vpop.f32.mrf.mxu0 }
 0x3d4   : > { %v14067_v28 = vpop.f32.mrf.mxu1 }
 0x3d5   : > { %v14142_v43 = vpop.f32.mrf.mxu0 }
 0x3d6   : > { %v14068_v31 = vpop.f32.mrf.mxu1  ;;  %v14143_v19 = vadd.f32 %v14142_v43, %v14141_v48 }
 0x3d7   : > { %v14144_v44 = vpop.f32.mrf.mxu0 }
 0x3d8   : > { %v14070_v1 = vpop.f32.mrf.mxu1 }
 0x3d9   : > { %v14145_v62 = vpop.f32.mrf.mxu0 }
 0x3da   : > { %v14071_v14 = vpop.f32.mrf.mxu1 }
 0x3db   : > { %v14147_v49 = vpop.f32.mrf.mxu0 }
 0x3dc   : > { %v14073_v55 = vpop.f32.mrf.mxu1 }
 0x3dd   : > { %v14148_v8 = vpop.f32.mrf.mxu0 }
 0x3de   : > { %v14074_v53 = vpop.f32.mrf.mxu1  ;;  %v14149_v42 = vadd.f32 %v14148_v8, %v14147_v49 }
 0x3df   : > { %v14150_v17 = vpop.f32.mrf.mxu0 }
 0x3e0   : > { %v19129_v29 = vpop.f32.mrf.mxu1 }
 0x3e1   : > { %21199 = vst [vmem:[#allocation14_spill] sm:$0xff] %v19129_v29  ;;  %v14151_v12 = vpop.f32.mrf.mxu0 }
 0x3e2   : > { %v19131_v7 = vpop.f32.mrf.mxu1  ;;  %v14152_v48 = vadd.f32 %v14151_v12, %v14150_v17 }
 0x3e3   : > { %21200 = vst [vmem:[#allocation29_spill] sm:$0xff] %v19131_v7  ;;  %v14153_v11 = vpop.f32.mrf.mxu0  ;;  %v5018_v7 = vadd.f32 %v19063_v26, %v14057_v35  ;;  %v5028_v26 = vadd.f32 %v19095_v45, %v14063_v4  ;;  %v14072_v45 = vadd.f32 %v14071_v14, %v14070_v1 }
 0x3e4   : > { %v14079_v21 = vpop.f32.mrf.mxu1 }
 0x3e5   : > { %v14154_v50 = vpop.f32.mrf.mxu0  ;;  %v14140_v21 = vadd.f32 %v14139_v34, %v14138_v5  ;;  %v14066_v5 = vadd.f32 %v14065_v24, %v19127_v22 }
 0x3e6   : > { %v14080_v52 = vpop.f32.mrf.mxu1 }
 0x3e7   : > { %v19133_v6 = vpop.f32.mrf.mxu0  ;;  %v5033_v24 = vadd.f32 %v14066_v5, %v19114_v63  ;;  %v21206_v63 = vld [vmem:[#allocation37_spill] sm:$0xff] }
 0x3e8   : > { %v14776_v20 = vpop.f32.mrf.mxu1 }
 0x3e9   : > { %v5367_v60 = vadd.f32 %v14776_v20, %v14137_v23  ;;  %v14157_v32 = vpop.f32.mrf.mxu0  ;;  %v14069_v23 = vadd.f32 %v14068_v31, %v14067_v28  ;;  %v5043_v31 = vadd.f32 %v14072_v45, %v19123_v57  ;;  %v21207_v57 = vld [vmem:[#allocation14_spill] sm:$0xff]  ;;  %v21217_v45 = vld [vmem:[#allocation13_spill] sm:$0xff] }
 0x3ea   : > { %v5361_v33 = vpop.f32.mrf.mxu1  ;;  %v14158_v14 = vadd.f32 %v14157_v32, %v19133_v6 }
 0x3eb   : > { %v5431_v25 = vmax.f32 %v19045_v39, %v5367_v60  ;;  %v5362_v29 = vadd.f32 %v14134_v37, %v5361_v33  ;;  %v14159_v0 = vpop.f32.mrf.mxu0  ;;  %v14146_v37 = vadd.f32 %v14145_v62, %v14144_v44  ;;  %v5038_v4 = vadd.f32 %v19112_v47, %v14069_v23  ;;  %v21210_v23 = vld [vmem:[#allocation35_spill] sm:$0xff] }
 0x3ec   : > { %v14779_v52 = vpop.f32.mrf.mxu1  ;;  %v21203_v44 = vmax.f32 %v19073_v61, %v19078_v3 }
 0x3ed   : > { %v13619_v56 = vpack.c.bf16 %v5431_v25, %v5431_v25  ;;  %v5430_v9 = vmax.f32 %v19047_v2, %v5362_v29  ;;  %v5377_v54 = vadd.f32 %v14779_v52, %v14143_v19  ;;  %v14160_v30 = vpop.f32.mrf.mxu0  ;;  %v21201_v25 = vmax.f32 %v19015_v51, %v19056_v27 }
 0x3ee   : > { %v5371_v20 = vpop.f32.mrf.mxu1  ;;  %v14155_v2 = vadd.f32 %v14154_v50, %v14153_v11 }
 0x3ef   : > { %5502 = vst.msk [vmem:[#allocation2 + $0x4] sm:$0xf] %vm5500_vm10, %v13619_v56  ;;  %v13618_v60 = vpack.c.bf16 %v5430_v9, %v5430_v9  ;;  %v5433_v39 = vmax.f32 %v19054_v10, %v5377_v54  ;;  %v5372_v33 = vadd.f32 %v14140_v21, %v5371_v20  ;;  %v14162_v35 = vpop.f32.mrf.mxu0  ;;  %v5066_v38 = vmax.f32 %v21201_v25, %v5018_v7  ;;  %v21208_v21 = vld [vmem:[#allocation29_spill] sm:$0xff] }
 0x3f0   : > { %v14782_v29 = vpop.f32.mrf.mxu1  ;;  %v5023_v10 = vadd.f32 %v14060_v18, %v19099_v13  ;;  %v14075_v7 = vadd.f32 %v14074_v53, %v14073_v55  ;;  %v14161_v13 = vadd.f32 %v14160_v30, %v14159_v0  ;;  %v14078_v52 = vadd.f32 %v21208_v21, %v21207_v57  ;;  %v21209_v18 = vld [vmem:[#allocation24_spill] sm:$0xff] }
 0x3f1   : > { %5501 = vst.msk [vmem:[#allocation2] sm:$0xf] %vm5500_vm10, %v13618_v60  ;;  %v13621_v19 = vpack.c.bf16 %v5433_v39, %v5433_v39  ;;  %v5432_v15 = vmax.f32 %v19058_v59, %v5372_v33  ;;  %v5387_v46 = vadd.f32 %v14782_v29, %v14149_v42  ;;  %v14163_v58 = vpop.f32.mrf.mxu0  ;;  %v21202_v59 = vmax.f32 %v19022_v41, %v19068_v16  ;;  %v21204_v16 = vld [vmem:[#allocation33_spill] sm:$0xff]  ;;  %v21212_v29 = vld [vmem:[#allocation39_spill] sm:$0xff] }
 0x3f2   : > { %v5381_v34 = vpop.f32.mrf.mxu1  ;;  %v5067_v1 = vmax.f32 %v21203_v44, %v5023_v10  ;;  %v21205_v62 = vmax.f32 %v19026_v40, %v21204_v16  ;;  %v5048_v53 = vadd.f32 %v21206_v63, %v14075_v7  ;;  %v15335_v40 = vld [vmem:[%s20907_s4 + $0x78] sm:$0xff]   ;;  %v21211_v20 = vmax.f32 %v21209_v18, %v21210_v23 }
 0x3f3   : > { %5504 = vst.msk [vmem:[#allocation2 + $0xc] sm:$0xf] %vm5500_vm10, %v13621_v19  ;;  %v13620_v51 = vpack.c.bf16 %v5432_v15, %v5432_v15  ;;  %v5435_v27 = vmax.f32 %v5066_v38, %v5387_v46  ;;  %v5382_v50 = vadd.f32 %v14146_v37, %v5381_v34  ;;  %v14165_v11 = vpop.f32.mrf.mxu0  ;;  %v5068_v28 = vmax.f32 %v21202_v59, %v5028_v26  ;;  %v21213_v19 = vld [vmem:[#allocation25_spill] sm:$0xff]  ;;  %v21214_v15 = vld [vmem:[#allocation28_spill] sm:$0xff] }
 0x3f4   : > { %v14785_v43 = vpop.f32.mrf.mxu1  ;;  %v5070_v0 = vmax.f32 %v21205_v62, %v5038_v4  ;;  %v5069_v60 = vmax.f32 %v21211_v20, %v5033_v24  ;;  %v14164_v33 = vadd.f32 %v14163_v58, %v14162_v35  ;;  %v21215_v46 = vmax.f32 %v21213_v19, %v21214_v15  ;;  %v21216_v4 = vld [vmem:[#allocation26_spill] sm:$0xff]  ;;  %v15346_v20 = vld [vmem:[%s20907_s4 + $0x40] sm:$0xff]  }
 0x3f5   : > { %5503 = vst.msk [vmem:[#allocation2 + $0x8] sm:$0xf] %vm5500_vm10, %v13620_v51  ;;  %v13623_v47 = vpack.c.bf16 %v5435_v27, %v5435_v27  ;;  %v5434_v22 = vmax.f32 %v19070_v36, %v5382_v50  ;;  %v5397_v12 = vadd.f32 %v14785_v43, %v14155_v2  ;;  %v14166_v17 = vpop.f32.mrf.mxu0  ;;  %v5053_v2 = vadd.f32 %v14078_v52, %v21212_v29  ;;  %v15336_v27 = vld [vmem:[%s20907_s4 + $0x70] sm:$0xff]  }
 0x3f6   : > { %v5391_v41 = vpop.f32.mrf.mxu1  ;;  %v14167_v61 = vadd.f32 %v14166_v17, %v14165_v11  ;;  %v19168_v56 = vld [vmem:[#allocation2 + $0x4] sm:$0xf]  ;;  %v5072_v10 = vmax.f32 %v21215_v46, %v5048_v53  ;;  %v21218_v34 = vmax.f32 %v21216_v4, %v21217_v45  ;;  %v21219_v35 = vmov 0.0  }
 0x3f7   : > { %5506 = vst.msk [vmem:[#allocation2 + $0x14] sm:$0xf] %vm5500_vm10, %v13623_v47  ;;  %v13622_v36 = vpack.c.bf16 %v5434_v22, %v5434_v22  ;;  %v5437_v49 = vmax.f32 %v5068_v28, %v5397_v12  ;;  %v5392_v55 = vadd.f32 %v14152_v48, %v5391_v41  ;;  %v14168_v8 = vpop.f32.mrf.mxu0  ;;  %v5982_v4 = vld [vmem:[#allocation2 + $0x4] sm:$0xe] }
 0x3f8   : > { %v14788_v3 = vpop.f32.mrf.mxu1  ;;  %v5516_v42 = vld [vmem:[#allocation2] sm:$0xf]  ;;  %v5071_v48 = vmax.f32 %v21218_v34, %v5043_v31 }
 0x3f9   : > { %5505 = vst.msk [vmem:[#allocation2 + $0x10] sm:$0xf] %vm5500_vm10, %v13622_v36  ;;  %v13625_v6 = vpack.c.bf16 %v5437_v49, %v5437_v49  ;;  %v5436_v32 = vmax.f32 %v5067_v1, %v5392_v55  ;;  %v5407_v9 = vadd.f32 %v14788_v3, %v14161_v13  ;;  %v14169_v54 = vpop.f32.mrf.mxu0  ;;  %v12654_v30 = vcombine.low %v5516_v42, %v19168_v56  ;;  %v21220_v36 = vld [vmem:[#allocation31_spill] sm:$0xff] }
 0x3fa   : > { %v5401_v39 = vpop.f32.mrf.mxu1  ;;  %v14170_v22 = vadd.f32 %v14169_v54, %v14168_v8  ;;  %v21221_v49 = vld [vmem:[#allocation27_spill] sm:$0xff] }
 0x3fb   : > { %5508 = vst.msk [vmem:[#allocation2 + $0x1c] sm:$0xf] %vm5500_vm10, %v13625_v6  ;;  %v13624_v26 = vpack.c.bf16 %v5436_v32, %v5436_v32  ;;  %v5439_v37 = vmax.f32 %v5070_v0, %v5407_v9  ;;  %v5402_v25 = vadd.f32 %v14158_v14, %v5401_v39  ;;  %14832 = vmatmul.mubr.msk.bf16.vlgmr.msra.gmra.mxu0 %vm5640_vm11, %v12654_v30  ;;  %v14171_v38 = vpop.f32.mrf.mxu0  ;;  %v5575_v51 = vshll.u32 %v12654_v30, 16  ;;  %v15338_v0 = vld [vmem:[%s20907_s4 + $0x68] sm:$0xff]   ;;  %v15339_v14 = vld [vmem:[%s20907_s4 + $0x58] sm:$0xff]   ;;  %v15340_v42 = vld [vmem:[%s20907_s4 + $0x60] sm:$0xff]  }
 0x3fc   : > { %v14791_v5 = vpop.f32.mrf.mxu1  ;;  %14835 = vmatprep.mubr.msk.bf16.mxu0 %vm16157_vm9, %v21219_v35  ;;  %v19189_v58 = vld [vmem:[#allocation2 + $0x8] sm:$0xff]   ;;  %14880 = vmatpush3.bf16.msra.mxu0 %v15335_v40  ;;  %v5573_v43 = vshrl.u32 %v12654_v30, 16  ;;  %v21222_v55 = vmax.f32 %v21220_v36, %v21221_v49  ;;  %v15341_v40 = vld [vmem:[%s20907_s4 + $0x50] sm:$0xff]  }
 0x3fd   : > { %5507 = vst.msk [vmem:[#allocation2 + $0x18] sm:$0xf] %vm5500_vm10, %v13624_v26  ;;  %v13627_v50 = vpack.c.bf16 %v5439_v37, %v5439_v37  ;;  %v5438_v11 = vmax.f32 %v5069_v60, %v5402_v25  ;;  %v5417_v7 = vadd.f32 %v14791_v5, %v14167_v61  ;;  %v14172_v59 = vpop.f32.mrf.mxu0  ;;  %14881 = vmatprep.subr.bf16.mxu0 %v21219_v35  ;;  %v5577_v13 = vrot.slane %v5575_v51, 1  ;;  %v15345_v30 = vld [vmem:[%s20907_s4 + $0x48] sm:$0xff]  }
 0x3fe   : > { %v5411_v28 = vpop.f32.mrf.mxu1  ;;  %v5580_v47 = vshll.u32 %v19189_v58, 16  ;;  %v5073_v8 = vmax.f32 %v21222_v55, %v5053_v2  ;;  %v5584_v3 = vshrl.u32 %v19189_v58, 16  ;;  %v19268_v15 = vld [vmem:[#allocation2 + $0x8] sm:$0xf] }
 0x3ff   : > { %5510 = vst.msk [vmem:[#allocation2 + $0x24] sm:$0xf] %vm5500_vm10, %v13627_v50  ;;  %v13626_v12 = vpack.c.bf16 %v5438_v11, %v5438_v11  ;;  %v5441_v17 = vmax.f32 %v5072_v10, %v5417_v7  ;;  %v5412_v24 = vadd.f32 %v14164_v33, %v5411_v28  ;;  %v5578_v44 = vor.u32 %v5577_v13, %v5573_v43  ;;  %v5836_v11 = vld [vmem:[#allocation2] sm:$0xe]  ;;  %v15350_v7 = vld [vmem:[%s20907_s4 + $0xb8] sm:$0xff]  }
 0x400   : > { %v14794_v31 = vpop.f32.mrf.mxu1  ;;  %v5582_v1 = vrot.slane %v5580_v47, 1  ;;  %v19198_v41 = vld [vmem:[#allocation2 + $0x10] sm:$0xff]   ;;  %14882 = vmatpush3.bf16.msra.mxu0 %v15336_v27  ;;  %v19282_v45 = vcombine.low %v5982_v4, %v19268_v15  ;;  %v12686_v13 = vcombine.low %v5836_v11, %v19168_v56  ;;  %v15354_v56 = vld [vmem:[%s20907_s4 + $0x98] sm:$0xff]  }
 0x401   : > { %5509 = vst.msk [vmem:[#allocation2 + $0x20] sm:$0xf] %vm5500_vm10, %v13626_v12  ;;  %v13629_v16 = vpack.c.bf16 %v5441_v17, %v5441_v17  ;;  %v5440_v62 = vmax.f32 %v5071_v48, %v5412_v24  ;;  %14883 = vmatprep.subr.bf16.mxu0 %v21219_v35  ;;  %v5588_v57 = vshll.u32 %v19198_v41, 16  ;;  %v5592_v60 = vshrl.u32 %v19198_v41, 16  ;;  %v19271_v10 = vld [vmem:[#allocation2 + $0xc] sm:$0xff]   ;;  %v15364_v4 = vld [vmem:[%s20907_s4 + $0xd8] sm:$0xff]  }
 0x402   : > { %v5421_v63 = vpop.f32.mrf.mxu1  ;;  %v5583_v53 = vsel %vm588_vm2, %v5578_v44, %v5582_v1  ;;  %v5586_v54 = vor.u32 %v5584_v3, %v5582_v1  ;;  %v6031_v34 = vrot.slane %v19271_v10, 1  ;;  %v6030_v27 = vrot.slane %v19282_v45, 1  ;;  %v15351_v47 = vld [vmem:[%s20907_s4 + $0xb0] sm:$0xff]   ;;  %v15353_v24 = vld [vmem:[%s20907_s4 + $0xa8] sm:$0xff]  }
 0x403   : > { %5512 = vst.msk [vmem:[#allocation2 + $0x2c] sm:$0xf] %vm5500_vm10, %v13629_v16  ;;  %v13628_v21 = vpack.c.bf16 %v5440_v62, %v5440_v62  ;;  %v5422_v52 = vadd.f32 %v14170_v22, %v5421_v63  ;;  %14836 = vmatmul.mubr.msk.bf16.gmra.mxu0 %vm5640_vm11, %v19189_v58  ;;  %14804 = vmatmul.mubr.msk.bf16.vlgmr.msra.gmra.mxu1 %vm5640_vm11, %v5583_v53  ;;  %v5590_v6 = vrot.slane %v5588_v57, 1  ;;  %v5850_v12 = vrot.slane %v19189_v58, 1  ;;  %v15355_v58 = vld [vmem:[%s20907_s4 + $0xa0] sm:$0xff]   ;;  %v15356_v16 = vld [vmem:[%s20907_s4 + $0x90] sm:$0xff]  }
 0x404   : > { %14839 = vmatprep.mubr.msk.bf16.mxu0 %vm16157_vm9, %v21219_v35  ;;  %14807 = vmatprep.mubr.msk.bf16.mxu1 %vm16157_vm9, %v21219_v35  ;;  %v19229_v32 = vld [vmem:[#allocation2 + $0x18] sm:$0xff]   ;;  %v6032_v59 = vsel %vm1195_vm3, %v6030_v27, %v6031_v34  ;;  %v5849_v17 = vrot.slane %v12686_v13, 1  ;;  %v15365_v27 = vld [vmem:[%s20907_s4 + $0xe0] sm:$0xff]  }
 0x405   : > { %5511 = vst.msk [vmem:[#allocation2 + $0x28] sm:$0xf] %vm5500_vm10, %v13628_v21  ;;  %v5442_v61 = vmax.f32 %v5073_v8, %v5422_v52  ;;  %14884 = vmatpush3.bf16.msra.mxu0 %v15338_v0  ;;  %14852 = vmatpush3.bf16.msra.mxu1 %v15339_v14  ;;  %v5591_v18 = vsel %vm588_vm2, %v5586_v54, %v5590_v6  ;;  %v5596_v23 = vshll.u32 %v19229_v32, 16  ;;  %v5600_v38 = vshrl.u32 %v19229_v32, 16  ;;  %v19292_v43 = vld [vmem:[#allocation2 + $0x14] sm:$0xff]   ;;  %v15358_v14 = vld [vmem:[%s20907_s4 + $0x88] sm:$0xff]  }
 0x406   : > { %14885 = vmatprep.subr.bf16.mxu0 %v21219_v35  ;;  %14853 = vmatprep.subr.bf16.mxu1 %v21219_v35  ;;  %v5594_v26 = vor.u32 %v5592_v60, %v5590_v6  ;;  %v6033_v22 = vrot.slane %v19292_v43, 1  ;;  %v5851_v44 = vsel %vm1195_vm3, %v5849_v17, %v5850_v12  ;;  %v5852_v0 = vrot.slane %v19198_v41, 1  ;;  %v15360_v60 = vld [vmem:[%s20907_s4 + $0xf8] sm:$0xff]   ;;  %v15370_v17 = vld [vmem:[%s20907_s4 + $0xc0] sm:$0xff]  }
 0x407   : > { %v13630_v9 = vpack.c.bf16 %v5442_v61, %v5442_v61  ;;  %v5598_v39 = vrot.slane %v5596_v23, 1  ;;  %v5854_v63 = vrot.slane %v19229_v32, 1  ;;  %v6185_v54 = vshrl.u32 %v19271_v10, 16 }
 0x408   : > { %v19252_v33 = vld [vmem:[#allocation2 + $0x20] sm:$0xff]   ;;  %v6034_v31 = vsel %vm1195_vm3, %v6031_v34, %v6033_v22  ;;  %v5853_v49 = vsel %vm1195_vm3, %v5850_v12, %v5852_v0  ;;  %v6177_v23 = vshrl.u32 %v19282_v45, 16 }
 0x409   : > { %5513 = vst.msk [vmem:[#allocation2 + $0x30] sm:$0xf] %vm5500_vm10, %v13630_v9  ;;  %14886 = vmatpush3.bf16.msra.mxu0 %v15340_v42  ;;  %14854 = vmatpush3.bf16.msra.mxu1 %v15341_v40  ;;  %v5599_v37 = vsel %vm588_vm2, %v5594_v26, %v5598_v39  ;;  %v5604_v25 = vshll.u32 %v19252_v33, 16  ;;  %v5602_v19 = vor.u32 %v5600_v38, %v5598_v39  ;;  %v5608_v48 = vshrl.u32 %v19252_v33, 16  ;;  %v19315_v1 = vld [vmem:[#allocation2 + $0x1c] sm:$0xff]  }
 0x40a   : > { %14855 = vmatprep.subr.bf16.mxu1 %v21219_v35  ;;  %14935 = vmatprep.subr.bf16.mxu0 %v21219_v35  ;;  %v6035_v62 = vrot.slane %v19315_v1, 1  ;;  %v5855_v57 = vsel %vm1195_vm3, %v5852_v0, %v5854_v63  ;;  %v15352_v21 = vld [vmem:[#allocation2 + $0x2c] ss:$0 sps:$4 sm:$0x11]   ;;  %v5856_v52 = vrot.slane %v19252_v33, 1  ;;  %v6187_v26 = vrot.slane %v6185_v54, 1 }
 0x40b   : > { %14840 = vmatmul.mubr.msk.bf16.gmra.mxu0 %vm5640_vm11, %v19198_v41  ;;  %14808 = vmatmul.mubr.msk.bf16.gmra.mxu1 %vm5640_vm11, %v5591_v18  ;;  %v5606_v29 = vrot.slane %v5604_v25, 1  ;;  %v15359_v41 = vld [vmem:[%s20907_s4 + $0x80] sm:$0xff]   ;;  %v6039_v61 = vrot.slane %v15352_v21, 1  ;;  %v6179_v25 = vrot.slane %v6177_v23, 1  ;;  %v6369_v11 = vrot.slane %v19315_v1, 2 }
 0x40c   : > { %14843 = vmatprep.mubr.msk.bf16.mxu0 %vm16157_vm9, %v21219_v35  ;;  %14811 = vmatprep.mubr.msk.bf16.mxu1 %vm16157_vm9, %v21219_v35  ;;  %v19266_v2 = vld [vmem:[#allocation2 + $0x28] ss:$0 sps:$4 sm:$0x11]   ;;  %v6036_v36 = vsel %vm1195_vm3, %v6033_v22, %v6035_v62  ;;  %v5857_v42 = vsel %vm1195_vm3, %v5854_v63, %v5856_v52  ;;  %v6351_v40 = vld [vmem:[#allocation2 + $0x4] sm:$0xc] }
 0x40d   : > { %14856 = vmatpush3.bf16.msra.mxu1 %v15345_v30  ;;  %v5607_v46 = vsel %vm588_vm2, %v5602_v19, %v5606_v29  ;;  %v5612_v5 = vshll.u32 %v19266_v2, 16  ;;  %v5610_v50 = vor.u32 %v5608_v48, %v5606_v29  ;;  %v19339_v55 = vld [vmem:[#allocation2 + $0x24] sm:$0xff]   ;;  %v12745_v6 = vcombine.low %v6351_v40, %v19268_v15  ;;  %v15361_v29 = vld [vmem:[%s20907_s4 + $0xf0] sm:$0xff]  }
 0x40e   : > { %14857 = vmatprep.subr.bf16.mxu1 %v21219_v35  ;;  %v6037_v8 = vrot.slane %v19339_v55, 1  ;;  %v5858_v9 = vrot.slane %v19266_v2, 1  ;;  %v6188_v30 = vshll.u32 %v19271_v10, 16  ;;  %v6367_v2 = vrot.slane %v19292_v43, 2 }
 0x40f   : > { %v5614_v51 = vrot.slane %v5612_v5, 1  ;;  %v6364_v18 = vrot.slane %v12745_v6, 2  ;;  %v6194_v15 = vshrl.u32 %v19292_v43, 16  ;;  %v15363_v5 = vld [vmem:[%s20907_s4 + $0xe8] sm:$0xff]  }
 0x410   : > { %v6038_v53 = vsel %vm1195_vm3, %v6035_v62, %v6037_v8  ;;  %v6040_v3 = vsel %vm1195_vm3, %v6037_v8, %v6039_v61  ;;  %v6370_v13 = vsel %vm2395_vm5, %v6367_v2, %v6369_v11 }
 0x411   : > { %14858 = vmatpush3.bf16.msra.mxu1 %v15346_v20  ;;  %v5615_v28 = vsel %vm588_vm2, %v5610_v50, %v5614_v51  ;;  %v6180_v20 = vshll.u32 %v19282_v45, 16  ;;  %v6196_v48 = vrot.slane %v6194_v15, 1  ;;  %v15366_v50 = vld [vmem:[%s20907_s4 + $0xd0] sm:$0xff]  }
 0x412   : > { %14907 = vmatprep.subr.bf16.mxu1 %v21219_v35 }
 0x413   : > { %14844 = vmatmul.mubr.msk.bf16.gmra.mxu0 %vm5640_vm11, %v19229_v32  ;;  %14812 = vmatmul.mubr.msk.bf16.gmra.mxu1 %vm5640_vm11, %v5599_v37  ;;  %v6365_v32 = vrot.slane %v19271_v10, 2  ;;  %v6190_v37 = vrot.slane %v6188_v30, 2  ;;  %v6182_v38 = vrot.slane %v6180_v20, 2 }
 0x414   : > { %14847 = vmatprep.mubr.msk.bf16.mxu0 %vm16157_vm9, %v21219_v35  ;;  %14815 = vmatprep.mubr.msk.bf16.mxu1 %vm16157_vm9, %v21219_v35 }
 0x415   : > { %v6366_v39 = vsel %vm2395_vm5, %v6364_v18, %v6365_v32  ;;  %v6191_v19 = vor.u32 %v6190_v37, %v6187_v26  ;;  %v6183_v10 = vor.u32 %v6182_v38, %v6179_v25  ;;  %v6368_v45 = vsel %vm2395_vm5, %v6365_v32, %v6367_v2  ;;  %v19461_v32 = vld [vmem:[#allocation2 + $0x18] sm:$0xff]  }
 0x416   : > { %v6709_v20 = vshrl.u32 %v19461_v32, 16 }
 0x417   : > { %v6192_v34 = vsel %vm1948_vm4, %v6183_v10, %v6191_v19 }
 0x418   : > { %v6711_v25 = vrot.slane %v6709_v20, 2 }
 0x41b   : > { %14848 = vmatmul.mubr.msk.bf16.gmra.mxu0 %vm5640_vm11, %v19252_v33  ;;  %14816 = vmatmul.mubr.msk.bf16.gmra.mxu1 %vm5640_vm11, %v5607_v46  ;;  %v5859_v33 = vsel %vm1195_vm3, %v5856_v52, %v5858_v9  ;;  %v6197_v46 = vshll.u32 %v19292_v43, 16  ;;  %v15369_v43 = vld [vmem:[%s20907_s4 + $0xc8] sm:$0xff]  }
 0x41c   : > { %14887 = vmatprep.mubr.msk.bf16.mxu0 %vm16157_vm9, %v21219_v35  ;;  %14819 = vmatprep.mubr.msk.bf16.mxu1 %vm16157_vm9, %v21219_v35 }
 0x41d   : > { %v6199_v51 = vrot.slane %v6197_v46, 2 }
 0x423   : > { %14888 = vmatmul.mubr.msk.bf16.vlgmr.msra.gmra.mxu0 %vm5640_vm11, %v6032_v59  ;;  %14820 = vmatmul.mubr.msk.bf16.gmra.mxu1 %vm5640_vm11, %v5615_v28  ;;  %v6203_v59 = vshrl.u32 %v19315_v1, 16  ;;  %v6206_v28 = vshll.u32 %v19315_v1, 16  ;;  %v6497_v1 = vld [vmem:[#allocation2 + $0x8] sm:$0xc] }
 0x424   : > { %14891 = vmatprep.mubr.msk.bf16.mxu0 %vm16157_vm9, %v21219_v35  ;;  %14859 = vmatprep.mubr.msk.bf16.mxu1 %vm16157_vm9, %v21219_v35 }
 0x425   : > { %14936 = vmatpush3.bf16.msra.mxu0 %v15350_v7  ;;  %v6200_v7 = vor.u32 %v6199_v51, %v6196_v48  ;;  %v6205_v22 = vrot.slane %v6203_v59, 1  ;;  %v6208_v12 = vrot.slane %v6206_v28, 2  ;;  %v19489_v51 = vld [vmem:[#allocation2 + $0x28] sm:$0xff]  }
 0x426   : > { %14937 = vmatprep.subr.bf16.mxu0 %v21219_v35  ;;  %v6730_v59 = vshll.u32 %v19489_v51, 16  ;;  %v15378_v28 = vld [vmem:[%s20907_s4 + $0x108] sm:$0xff]  }
 0x429   : > { %14938 = vmatpush3.bf16.msra.mxu0 %v15351_v47  ;;  %v6201_v47 = vsel %vm1948_vm4, %v6191_v19, %v6200_v7 }
 0x42a   : > { %14939 = vmatprep.subr.bf16.mxu0 %v21219_v35 }
 0x42b   : > { %14892 = vmatmul.mubr.msk.bf16.gmra.mxu0 %vm5640_vm11, %v6034_v31  ;;  %14860 = vmatmul.mubr.msk.bf16.vlgmr.msra.gmra.mxu1 %vm5640_vm11, %v5851_v44  ;;  %v6212_v31 = vshrl.u32 %v19339_v55, 16  ;;  %v6215_v44 = vshll.u32 %v19339_v55, 16 }
 0x42c   : > { %14895 = vmatprep.mubr.msk.bf16.mxu0 %vm16157_vm9, %v21219_v35  ;;  %14863 = vmatprep.mubr.msk.bf16.mxu1 %vm16157_vm9, %v21219_v35 }
 0x42d   : > { %14940 = vmatpush3.bf16.msra.mxu0 %v15353_v24  ;;  %14908 = vmatpush3.bf16.msra.mxu1 %v15354_v56  ;;  %v6371_v24 = vrot.slane %v19339_v55, 2  ;;  %v6209_v56 = vor.u32 %v6208_v12, %v6205_v22  ;;  %v6214_v62 = vrot.slane %v6212_v31, 1  ;;  %v6217_v0 = vrot.slane %v6215_v44, 2  ;;  %v15374_v12 = vld [vmem:[#allocation2 + $0x30] ss:$0 sps:$4 sm:$0x77]  }
 0x42e   : > { %14941 = vmatprep.subr.bf16.mxu0 %v21219_v35  ;;  %14909 = vmatprep.subr.bf16.mxu1 %v21219_v35  ;;  %v6732_v22 = vrot.slane %v6730_v59, 3  ;;  %v6736_v31 = vshrl.u32 %v15374_v12, 16  ;;  %v6739_v44 = vshll.u32 %v15374_v12, 16 }
 0x431   : > { %14942 = vmatpush3.bf16.msra.mxu0 %v15355_v58  ;;  %14910 = vmatpush3.bf16.msra.mxu1 %v15356_v16  ;;  %v6372_v58 = vsel %vm2395_vm5, %v6369_v11, %v6371_v24  ;;  %v6210_v16 = vsel %vm1948_vm4, %v6200_v7, %v6209_v56  ;;  %v6548_v11 = vrot.slane %v19461_v32, 2  ;;  %v6727_v7 = vshrl.u32 %v19489_v51, 16 }
 0x432   : > { %14911 = vmatprep.subr.bf16.mxu1 %v21219_v35  ;;  %14991 = vmatprep.subr.bf16.mxu0 %v21219_v35 }
 0x433   : > { %14896 = vmatmul.mubr.msk.bf16.gmra.mxu0 %vm5640_vm11, %v6036_v36  ;;  %14864 = vmatmul.mubr.msk.bf16.gmra.mxu1 %vm5640_vm11, %v5853_v49  ;;  %v15362_v36 = vld [vmem:[#allocation2 + $0x2c] ss:$0 sps:$4 sm:$0x33]  }
 0x434   : > { %14899 = vmatprep.mubr.msk.bf16.mxu0 %vm16157_vm9, %v21219_v35  ;;  %14867 = vmatprep.mubr.msk.bf16.mxu1 %vm16157_vm9, %v21219_v35  ;;  %v19450_v49 = vld [vmem:[#allocation2 + $0xc] sm:$0xf]  ;;  %v6221_v52 = vshrl.u32 %v15362_v36, 16  ;;  %v6224_v61 = vshll.u32 %v15362_v36, 16 }
 0x435   : > { %14912 = vmatpush3.bf16.msra.mxu1 %v15358_v14  ;;  %v19445_v14 = vld [vmem:[#allocation2 + $0x10] sm:$0xff]   ;;  %v12763_v55 = vcombine.low %v6497_v1, %v19450_v49 }
 0x436   : > { %14913 = vmatprep.subr.bf16.mxu1 %v21219_v35  ;;  %v6700_v8 = vshrl.u32 %v19445_v14, 16  ;;  %v6703_v63 = vshll.u32 %v19445_v14, 16  ;;  %v6223_v30 = vrot.slane %v6221_v52, 1  ;;  %v6226_v18 = vrot.slane %v6224_v61, 2 }
 0x437   : > { %v6695_v21 = vshll.u32 %v12763_v55, 16  ;;  %v6546_v19 = vrot.slane %v19445_v14, 2  ;;  %v6545_v10 = vrot.slane %v12763_v55, 2  ;;  %v6880_v52 = vrot.slane %v19445_v14, 3 }
 0x438   : > { %v6702_v40 = vrot.slane %v6700_v8, 2  ;;  %v6705_v6 = vrot.slane %v6703_v63, 3  ;;  %v15377_v8 = vld [vmem:[#allocation2 + $0x30] ss:$0 sps:$4 sm:$0x33]  }
 0x439   : > { %14914 = vmatpush3.bf16.msra.mxu1 %v15359_v41  ;;  %v6218_v41 = vor.u32 %v6217_v0, %v6214_v62  ;;  %v6697_v54 = vrot.slane %v6695_v21, 3  ;;  %v6741_v62 = vrot.slane %v6739_v44, 3  ;;  %v6554_v63 = vrot.slane %v15377_v8, 2 }
 0x43a   : > { %14963 = vmatprep.subr.bf16.mxu1 %v21219_v35  ;;  %v6706_v23 = vor.u32 %v6705_v6, %v6702_v40  ;;  %v6886_v6 = vrot.slane %v19489_v51, 3 }
 0x43b   : > { %14900 = vmatmul.mubr.msk.bf16.gmra.mxu0 %vm5640_vm11, %v6038_v53  ;;  %14868 = vmatmul.mubr.msk.bf16.gmra.mxu1 %vm5640_vm11, %v5855_v57  ;;  %v6373_v53 = vrot.slane %v15362_v36, 2  ;;  %v6692_v57 = vshrl.u32 %v12763_v55, 16  ;;  %v6552_v36 = vrot.slane %v19489_v51, 2 }
 0x43c   : > { %14903 = vmatprep.mubr.msk.bf16.mxu0 %vm16157_vm9, %v21219_v35  ;;  %14871 = vmatprep.mubr.msk.bf16.mxu1 %vm16157_vm9, %v21219_v35 }
 0x43d   : > { %v6694_v9 = vrot.slane %v6692_v57, 2  ;;  %v6555_v57 = vsel %vm2395_vm5, %v6552_v36, %v6554_v63 }
 0x443   : > { %14904 = vmatmul.mubr.msk.bf16.gmra.mxu0 %vm5640_vm11, %v6040_v3  ;;  %14872 = vmatmul.mubr.msk.bf16.gmra.mxu1 %vm5640_vm11, %v5857_v42  ;;  %v6374_v3 = vsel %vm2395_vm5, %v6371_v24, %v6373_v53  ;;  %v6219_v42 = vsel %vm1948_vm4, %v6209_v56, %v6218_v41  ;;  %v6866_v53 = vld [vmem:[#allocation2 + $0x8] sm:$0x8] }
 0x444   : > { %14943 = vmatprep.mubr.msk.bf16.mxu0 %vm16157_vm9, %v21219_v35  ;;  %14875 = vmatprep.mubr.msk.bf16.mxu1 %vm16157_vm9, %v21219_v35  ;;  %v12804_v21 = vcombine.low %v6866_v53, %v19450_v49 }
 0x446   : > { %v6879_v61 = vrot.slane %v12804_v21, 3 }
 0x44b   : > { %14944 = vmatmul.mubr.msk.bf16.vlgmr.msra.gmra.mxu0 %vm5640_vm11, %v6366_v39  ;;  %14876 = vmatmul.mubr.msk.bf16.gmra.mxu1 %vm5640_vm11, %v5859_v33  ;;  %v6698_v39 = vor.u32 %v6697_v54, %v6694_v9  ;;  %v6227_v33 = vor.u32 %v6226_v18, %v6223_v30  ;;  %v6888_v30 = vrot.slane %v15374_v12, 3 }
 0x44c   : > { %14947 = vmatprep.mubr.msk.bf16.mxu0 %vm16157_vm9, %v21219_v35  ;;  %14915 = vmatprep.mubr.msk.bf16.mxu1 %vm16157_vm9, %v21219_v35 }
 0x44d   : > { %14992 = vmatpush3.bf16.msra.mxu0 %v15360_v60  ;;  %v6712_v60 = vshll.u32 %v19461_v32, 16  ;;  %v6707_v26 = vsel %vm3148_vm6, %v6698_v39, %v6706_v23  ;;  %v6228_v37 = vsel %vm1948_vm4, %v6218_v41, %v6227_v33  ;;  %v6889_v20 = vsel %vm3595_vm7, %v6886_v6, %v6888_v30 }
 0x44e   : > { %14993 = vmatprep.subr.bf16.mxu0 %v21219_v35 }
 0x44f   : > { %v6714_v38 = vrot.slane %v6712_v60, 3 }
 0x451   : > { %14994 = vmatpush3.bf16.msra.mxu0 %v15361_v29  ;;  %v19473_v29 = vld [vmem:[#allocation2 + $0x20] sm:$0xff]   ;;  %v6715_v2 = vor.u32 %v6714_v38, %v6711_v25 }
 0x452   : > { %14995 = vmatprep.subr.bf16.mxu0 %v21219_v35  ;;  %v6718_v15 = vshrl.u32 %v19473_v29, 16  ;;  %v6721_v46 = vshll.u32 %v19473_v29, 16  ;;  %v6550_v56 = vrot.slane %v19473_v29, 2  ;;  %v6884_v49 = vrot.slane %v19473_v29, 3 }
 0x453   : > { %14948 = vmatmul.mubr.msk.bf16.gmra.mxu0 %vm5640_vm11, %v6368_v45  ;;  %14916 = vmatmul.mubr.msk.bf16.vlgmr.msra.gmra.mxu1 %vm5640_vm11, %v6192_v34  ;;  %v6547_v45 = vsel %vm2395_vm5, %v6545_v10, %v6546_v19 }
 0x454   : > { %14951 = vmatprep.mubr.msk.bf16.mxu0 %vm16157_vm9, %v21219_v35  ;;  %14919 = vmatprep.mubr.msk.bf16.mxu1 %vm16157_vm9, %v21219_v35  ;;  %v6720_v34 = vrot.slane %v6718_v15, 2  ;;  %v6723_v48 = vrot.slane %v6721_v46, 3  ;;  %v6553_v41 = vsel %vm2395_vm5, %v6550_v56, %v6552_v36 }
 0x455   : > { %14996 = vmatpush3.bf16.msra.mxu0 %v15363_v5  ;;  %14964 = vmatpush3.bf16.msra.mxu1 %v15364_v4  ;;  %v15375_v5 = vld [vmem:[%s20907_s4 + $0x118] sm:$0xff]   ;;  %v6716_v4 = vsel %vm3148_vm6, %v6706_v23, %v6715_v2 }
 0x456   : > { %14997 = vmatprep.subr.bf16.mxu0 %v21219_v35  ;;  %14965 = vmatprep.subr.bf16.mxu1 %v21219_v35 }
 0x459   : > { %14998 = vmatpush3.bf16.msra.mxu0 %v15365_v27  ;;  %14966 = vmatpush3.bf16.msra.mxu1 %v15366_v50  ;;  %v15376_v27 = vld [vmem:[%s20907_s4 + $0x110] sm:$0xff]   ;;  %v6724_v50 = vor.u32 %v6723_v48, %v6720_v34 }
 0x45a   : > { %14967 = vmatprep.subr.bf16.mxu1 %v21219_v35 }
 0x45b   : > { %14952 = vmatmul.mubr.msk.bf16.gmra.mxu0 %vm5640_vm11, %v6370_v13  ;;  %14920 = vmatmul.mubr.msk.bf16.gmra.mxu1 %vm5640_vm11, %v6201_v47  ;;  %v6549_v13 = vsel %vm2395_vm5, %v6546_v19, %v6548_v11  ;;  %v6729_v47 = vrot.slane %v6727_v7, 2 }
 0x45c   : > { %14955 = vmatprep.mubr.msk.bf16.mxu0 %vm16157_vm9, %v21219_v35  ;;  %14923 = vmatprep.mubr.msk.bf16.mxu1 %vm16157_vm9, %v21219_v35 }
 0x45d   : > { %14968 = vmatpush3.bf16.msra.mxu1 %v15369_v43  ;;  %v6725_v43 = vsel %vm3148_vm6, %v6715_v2, %v6724_v50  ;;  %v6733_v24 = vor.u32 %v6732_v22, %v6729_v47 }
 0x45e   : > { %14969 = vmatprep.subr.bf16.mxu1 %v21219_v35 }
 0x45f   : > { %v6734_v1 = vsel %vm3148_vm6, %v6724_v50, %v6733_v24 }
 0x461   : > { %14970 = vmatpush3.bf16.msra.mxu1 %v15370_v17  ;;  %v15379_v17 = vld [vmem:[%s20907_s4 + $0x100] sm:$0xff]  }
 0x462   : > { %15019 = vmatprep.subr.bf16.mxu1 %v21219_v35 }
 0x463   : > { %14956 = vmatmul.mubr.msk.bf16.gmra.mxu0 %vm5640_vm11, %v6372_v58  ;;  %14924 = vmatmul.mubr.msk.bf16.gmra.mxu1 %vm5640_vm11, %v6210_v16  ;;  %v6551_v58 = vsel %vm2395_vm5, %v6548_v11, %v6550_v56  ;;  %v6738_v16 = vrot.slane %v6736_v31, 2 }
 0x464   : > { %14959 = vmatprep.mubr.msk.bf16.mxu0 %vm16157_vm9, %v21219_v35  ;;  %14927 = vmatprep.mubr.msk.bf16.mxu1 %vm16157_vm9, %v21219_v35 }
 0x465   : > { %v6742_v0 = vor.u32 %v6741_v62, %v6738_v16 }
 0x467   : > { %v6743_v55 = vsel %vm3148_vm6, %v6733_v24, %v6742_v0 }
 0x46b   : > { %14960 = vmatmul.mubr.msk.bf16.gmra.mxu0 %vm5640_vm11, %v6374_v3  ;;  %14928 = vmatmul.mubr.msk.bf16.gmra.mxu1 %vm5640_vm11, %v6219_v42  ;;  %v6881_v3 = vsel %vm3595_vm7, %v6879_v61, %v6880_v52  ;;  %v6882_v42 = vrot.slane %v19461_v32, 3  ;;  %v6887_v32 = vsel %vm3595_vm7, %v6884_v49, %v6886_v6 }
 0x46c   : > { %14999 = vmatprep.mubr.msk.bf16.mxu0 %vm16157_vm9, %v21219_v35  ;;  %14931 = vmatprep.mubr.msk.bf16.mxu1 %vm16157_vm9, %v21219_v35 }
 0x46d   : > { %v6883_v40 = vsel %vm3595_vm7, %v6880_v52, %v6882_v42  ;;  %v6885_v14 = vsel %vm3595_vm7, %v6882_v42, %v6884_v49 }
 0x473   : > { %15000 = vmatmul.mubr.msk.bf16.vlgmr.msra.gmra.mxu0 %vm5640_vm11, %v6707_v26  ;;  %14932 = vmatmul.mubr.msk.bf16.gmra.mxu1 %vm5640_vm11, %v6228_v37 }
 0x474   : > { %15003 = vmatprep.mubr.msk.bf16.mxu0 %vm16157_vm9, %v21219_v35  ;;  %14971 = vmatprep.mubr.msk.bf16.mxu1 %vm16157_vm9, %v21219_v35 }
 0x47b   : > { %15004 = vmatmul.mubr.msk.bf16.gmra.mxu0 %vm5640_vm11, %v6716_v4  ;;  %14972 = vmatmul.mubr.msk.bf16.vlgmr.msra.gmra.mxu1 %vm5640_vm11, %v6547_v45 }
 0x47c   : > { %15007 = vmatprep.mubr.msk.bf16.mxu0 %vm16157_vm9, %v21219_v35  ;;  %14975 = vmatprep.mubr.msk.bf16.mxu1 %vm16157_vm9, %v21219_v35 }
 0x47d   : > { %15020 = vmatpush3.bf16.msra.mxu1 %v15375_v5 }
 0x47e   : > { %15021 = vmatprep.subr.bf16.mxu1 %v21219_v35 }
 0x481   : > { %15022 = vmatpush3.bf16.msra.mxu1 %v15376_v27 }
 0x482   : > { %15023 = vmatprep.subr.bf16.mxu1 %v21219_v35 }
 0x483   : > { %15008 = vmatmul.mubr.msk.bf16.gmra.mxu0 %vm5640_vm11, %v6725_v43  ;;  %14976 = vmatmul.mubr.msk.bf16.gmra.mxu1 %vm5640_vm11, %v6549_v13 }
 0x484   : > { %15011 = vmatprep.mubr.msk.bf16.mxu0 %vm16157_vm9, %v21219_v35  ;;  %14979 = vmatprep.mubr.msk.bf16.mxu1 %vm16157_vm9, %v21219_v35 }
 0x485   : > { %15024 = vmatpush3.bf16.msra.mxu1 %v15378_v28 }
 0x486   : > { %15025 = vmatprep.subr.bf16.mxu1 %v21219_v35 }
 0x489   : > { %15026 = vmatpush3.bf16.msra.mxu1 %v15379_v17 }
 0x48b   : > { %15012 = vmatmul.mubr.msk.bf16.gmra.mxu0 %vm5640_vm11, %v6734_v1  ;;  %14980 = vmatmul.mubr.msk.bf16.gmra.mxu1 %vm5640_vm11, %v6551_v58 }
 0x48c   : > { %15015 = vmatprep.mubr.msk.bf16.mxu0 %vm16157_vm9, %v21219_v35  ;;  %14983 = vmatprep.mubr.msk.bf16.mxu1 %vm16157_vm9, %v21219_v35 }
 0x493   : > { %15016 = vmatmul.mubr.msk.bf16.gmra.mxu0 %vm5640_vm11, %v6743_v55  ;;  %14984 = vmatmul.mubr.msk.bf16.gmra.mxu1 %vm5640_vm11, %v6553_v41 }
 0x494   : > { %14987 = vmatprep.mubr.msk.bf16.mxu1 %vm16157_vm9, %v21219_v35 }
 0x49b   : > { %14988 = vmatmul.mubr.msk.bf16.gmra.mxu1 %vm5640_vm11, %v6555_v57 }
 0x49c   : > { %15027 = vmatprep.mubr.msk.bf16.mxu1 %vm16157_vm9, %v21219_v35 }
 0x4a3   : > { %15028 = vmatmul.mubr.msk.bf16.vlgmr.msra.gmra.mxu1 %vm5640_vm11, %v6881_v3 }
 0x4a4   : > { %15031 = vmatprep.mubr.msk.bf16.mxu1 %vm16157_vm9, %v21219_v35 }
 0x4ab   : > { %15032 = vmatmul.mubr.msk.bf16.gmra.mxu1 %vm5640_vm11, %v6883_v40 }
 0x4ac   : > { %15035 = vmatprep.mubr.msk.bf16.mxu1 %vm16157_vm9, %v21219_v35 }
 0x4b3   : > { %15036 = vmatmul.mubr.msk.bf16.gmra.mxu1 %vm5640_vm11, %v6885_v14 }
 0x4b4   : > { %15039 = vmatprep.mubr.msk.bf16.mxu1 %vm16157_vm9, %v21219_v35 }
 0x4bb   : > { %v5797_v9 = vpop.f32.mrf.mxu0  ;;  %15040 = vmatmul.mubr.msk.bf16.gmra.mxu1 %vm5640_vm11, %v6887_v32 }
 0x4bc   : > { %15043 = vmatprep.mubr.msk.bf16.mxu1 %vm16157_vm9, %v21219_v35 }
 0x4bd   : > { %v14833_v54 = vpop.f32.mrf.mxu0 }
 0x4bf   : > { %v5800_v18 = vpop.f32.mrf.mxu0 }
 0x4c1   : > { %v14834_v23 = vpop.f32.mrf.mxu0 }
 0x4c3   : > { %v5805_v60 = vpop.f32.mrf.mxu0  ;;  %v5690_v39 = vpop.f32.mrf.mxu1  ;;  %15044 = vmatmul.mubr.msk.bf16.gmra.mxu1 %vm5640_vm11, %v6889_v20 }
 0x4c4   : > { %v5798_v33 = vadd.f32 %v5797_v9, %v5690_v39 }
 0x4c5   : > { %v14837_v26 = vpop.f32.mrf.mxu0  ;;  %v14805_v37 = vpop.f32.mrf.mxu1 }
 0x4c7   : > { %v5808_v25 = vpop.f32.mrf.mxu0  ;;  %v5693_v38 = vpop.f32.mrf.mxu1 }
 0x4c8   : > { %v5801_v29 = vadd.f32 %v5800_v18, %v5693_v38 }
 0x4c9   : > { %v14838_v2 = vpop.f32.mrf.mxu0  ;;  %v14806_v19 = vpop.f32.mrf.mxu1 }
 0x4cb   : > { %v5813_v15 = vpop.f32.mrf.mxu0  ;;  %v5698_v46 = vpop.f32.mrf.mxu1 }
 0x4cc   : > { %v5806_v10 = vadd.f32 %v5805_v60, %v5698_v46 }
 0x4cd   : > { %v14841_v5 = vpop.f32.mrf.mxu0  ;;  %v14809_v4 = vpop.f32.mrf.mxu1 }
 0x4cf   : > { %v5816_v45 = vpop.f32.mrf.mxu0  ;;  %v5701_v34 = vpop.f32.mrf.mxu1 }
 0x4d0   : > { %v5809_v48 = vadd.f32 %v5808_v25, %v5701_v34 }
 0x4d1   : > { %v14842_v51 = vpop.f32.mrf.mxu0  ;;  %v14810_v27 = vpop.f32.mrf.mxu1 }
 0x4d3   : > { %v5821_v50 = vpop.f32.mrf.mxu0  ;;  %v5706_v11 = vpop.f32.mrf.mxu1 }
 0x4d4   : > { %v5814_v7 = vadd.f32 %v5813_v15, %v5706_v11 }
 0x4d5   : > { %v14845_v59 = vpop.f32.mrf.mxu0  ;;  %v14813_v28 = vpop.f32.mrf.mxu1 }
 0x4d7   : > { %v5824_v43 = vpop.f32.mrf.mxu0  ;;  %v5709_v13 = vpop.f32.mrf.mxu1 }
 0x4d8   : > { %v5817_v47 = vadd.f32 %v5816_v45, %v5709_v13 }
 0x4d9   : > { %v14846_v22 = vpop.f32.mrf.mxu0  ;;  %v14814_v12 = vpop.f32.mrf.mxu1 }
 0x4db   : > { %v5829_v17 = vpop.f32.mrf.mxu0  ;;  %v5714_v24 = vpop.f32.mrf.mxu1 }
 0x4dc   : > { %v5822_v56 = vadd.f32 %v5821_v50, %v5714_v24 }
 0x4dd   : > { %v14849_v31 = vpop.f32.mrf.mxu0  ;;  %v14817_v44 = vpop.f32.mrf.mxu1 }
 0x4df   : > { %v5832_v1 = vpop.f32.mrf.mxu0  ;;  %v5717_v58 = vpop.f32.mrf.mxu1 }
 0x4e0   : > { %v5825_v16 = vadd.f32 %v5824_v43, %v5717_v58 }
 0x4e1   : > { %v14850_v62 = vpop.f32.mrf.mxu0  ;;  %v14818_v0 = vpop.f32.mrf.mxu1 }
 0x4e3   : > { %v6114_v36 = vpop.f32.mrf.mxu0  ;;  %v5722_v55 = vpop.f32.mrf.mxu1 }
 0x4e4   : > { %v5830_v41 = vadd.f32 %v5829_v17, %v5722_v55 }
 0x4e5   : > { %v14889_v8 = vpop.f32.mrf.mxu0  ;;  %v14821_v63 = vpop.f32.mrf.mxu1 }
 0x4e7   : > { %v6117_v53 = vpop.f32.mrf.mxu0  ;;  %v5725_v57 = vpop.f32.mrf.mxu1 }
 0x4e8   : > { %v5833_v21 = vadd.f32 %v5832_v1, %v5725_v57 }
 0x4e9   : > { %v14890_v52 = vpop.f32.mrf.mxu0  ;;  %v14822_v61 = vpop.f32.mrf.mxu1 }
 0x4eb   : > { %v6122_v3 = vpop.f32.mrf.mxu0  ;;  %v5933_v42 = vpop.f32.mrf.mxu1 }
 0x4ec   : > { %v5972_v40 = vadd.f32 %v5933_v42, %v5798_v33 }
 0x4ed   : > { %v14893_v49 = vpop.f32.mrf.mxu0  ;;  %v14861_v14 = vpop.f32.mrf.mxu1 }
 0x4ee   : > { %v6153_v6 = vadd.f32 %v6114_v36, %v5972_v40 }
 0x4ef   : > { %v6125_v32 = vpop.f32.mrf.mxu0  ;;  %v5936_v9 = vpop.f32.mrf.mxu1 }
 0x4f0   : > { %v5973_v54 = vadd.f32 %v5936_v9, %v5801_v29 }
 0x4f1   : > { %v14894_v30 = vpop.f32.mrf.mxu0  ;;  %v14862_v18 = vpop.f32.mrf.mxu1 }
 0x4f2   : > { %v6154_v23 = vadd.f32 %v6117_v53, %v5973_v54 }
 0x4f3   : > { %v6130_v20 = vpop.f32.mrf.mxu0  ;;  %v5941_v60 = vpop.f32.mrf.mxu1 }
 0x4f4   : > { %v5974_v39 = vadd.f32 %v5941_v60, %v5806_v10 }
 0x4f5   : > { %v14897_v26 = vpop.f32.mrf.mxu0  ;;  %v14865_v37 = vpop.f32.mrf.mxu1 }
 0x4f6   : > { %v6155_v25 = vadd.f32 %v6122_v3, %v5974_v39 }
 0x4f7   : > { %v6133_v38 = vpop.f32.mrf.mxu0  ;;  %v5944_v2 = vpop.f32.mrf.mxu1 }
 0x4f8   : > { %v5975_v19 = vadd.f32 %v5944_v2, %v5809_v48 }
 0x4f9   : > { %v14898_v15 = vpop.f32.mrf.mxu0  ;;  %v14866_v33 = vpop.f32.mrf.mxu1 }
 0x4fa   : > { %v6156_v46 = vadd.f32 %v6125_v32, %v5975_v19  ;;  %v7039_v33 = vld [vmem:[%s20909_s6] sm:$0xff] }
 0x4fb   : > { %v6138_v5 = vpop.f32.mrf.mxu0  ;;  %v5949_v4 = vpop.f32.mrf.mxu1  ;;  %15067 = vmatprep.mubr.msk.f32.mxu0 %vm7045_vm12, %v7039_v33 }
 0x4fc   : > { %v5976_v45 = vadd.f32 %v5949_v4, %v5814_v7 }
 0x4fd   : > { %v14901_v34 = vpop.f32.mrf.mxu0  ;;  %v14869_v29 = vpop.f32.mrf.mxu1 }
 0x4fe   : > { %v6157_v51 = vadd.f32 %v6130_v20, %v5976_v45 }
 0x4ff   : > { %v6141_v27 = vpop.f32.mrf.mxu0  ;;  %v5952_v50 = vpop.f32.mrf.mxu1 }
 0x500   : > { %v5977_v11 = vadd.f32 %v5952_v50, %v5817_v47 }
 0x501   : > { %v14902_v59 = vpop.f32.mrf.mxu0  ;;  %v14870_v10 = vpop.f32.mrf.mxu1 }
 0x502   : > { %v6158_v28 = vadd.f32 %v6133_v38, %v5977_v11 }
 0x503   : > { %v6146_v43 = vpop.f32.mrf.mxu0  ;;  %v5957_v13 = vpop.f32.mrf.mxu1 }
 0x504   : > { %v5978_v22 = vadd.f32 %v5957_v13, %v5822_v56 }
 0x505   : > { %v14905_v12 = vpop.f32.mrf.mxu0  ;;  %v14873_v48 = vpop.f32.mrf.mxu1 }
 0x506   : > { %v6159_v17 = vadd.f32 %v6138_v5, %v5978_v22 }
 0x507   : > { %v6149_v24 = vpop.f32.mrf.mxu0  ;;  %v5960_v31 = vpop.f32.mrf.mxu1 }
 0x508   : > { %v5979_v44 = vadd.f32 %v5960_v31, %v5825_v16 }
 0x509   : > { %v14906_v1 = vpop.f32.mrf.mxu0  ;;  %v14874_v7 = vpop.f32.mrf.mxu1 }
 0x50a   : > { %v6160_v58 = vadd.f32 %v6141_v27, %v5979_v44 }
 0x50b   : > { %v6448_v62 = vpop.f32.mrf.mxu0  ;;  %v5965_v0 = vpop.f32.mrf.mxu1 }
 0x50c   : > { %v5980_v36 = vadd.f32 %v5965_v0, %v5830_v41 }
 0x50d   : > { %v14945_v55 = vpop.f32.mrf.mxu0  ;;  %v14877_v47 = vpop.f32.mrf.mxu1 }
 0x50e   : > { %v6161_v8 = vadd.f32 %v6146_v43, %v5980_v36 }
 0x50f   : > { %v6451_v63 = vpop.f32.mrf.mxu0  ;;  %v5968_v53 = vpop.f32.mrf.mxu1 }
 0x510   : > { %v5981_v57 = vadd.f32 %v5968_v53, %v5833_v21 }
 0x511   : > { %v14946_v52 = vpop.f32.mrf.mxu0  ;;  %v14878_v56 = vpop.f32.mrf.mxu1 }
 0x512   : > { %v6162_v61 = vadd.f32 %v6149_v24, %v5981_v57 }
 0x513   : > { %v6456_v3 = vpop.f32.mrf.mxu0  ;;  %v6302_v42 = vpop.f32.mrf.mxu1 }
 0x514   : > { %v6341_v40 = vadd.f32 %v6302_v42, %v6153_v6 }
 0x515   : > { %v14949_v49 = vpop.f32.mrf.mxu0  ;;  %v14917_v16 = vpop.f32.mrf.mxu1 }
 0x516   : > { %v6487_v14 = vadd.f32 %v6448_v62, %v6341_v40 }
 0x517   : > { %v6459_v32 = vpop.f32.mrf.mxu0  ;;  %v6305_v9 = vpop.f32.mrf.mxu1 }
 0x518   : > { %v6342_v54 = vadd.f32 %v6305_v9, %v6154_v23 }
 0x519   : > { %v14950_v30 = vpop.f32.mrf.mxu0  ;;  %v14918_v41 = vpop.f32.mrf.mxu1 }
 0x51a   : > { %v6488_v18 = vadd.f32 %v6451_v63, %v6342_v54  ;;  %v12833_v54 = vld [vmem:[%s20909_s6 + $0x60] sm:$0xff] }
 0x51b   : > { %v6464_v20 = vpop.f32.mrf.mxu0  ;;  %v6310_v60 = vpop.f32.mrf.mxu1  ;;  %15125 = vmatprep.mubr.msk.f32.mxu1 %vm7045_vm12, %v12833_v54 }
 0x51c   : > { %v6343_v39 = vadd.f32 %v6310_v60, %v6155_v25 }
 0x51d   : > { %v14953_v26 = vpop.f32.mrf.mxu0  ;;  %v14921_v21 = vpop.f32.mrf.mxu1 }
 0x51e   : > { %v6489_v37 = vadd.f32 %v6456_v3, %v6343_v39 }
 0x51f   : > { %v6467_v38 = vpop.f32.mrf.mxu0  ;;  %v6313_v2 = vpop.f32.mrf.mxu1 }
 0x520   : > { %v6344_v19 = vadd.f32 %v6313_v2, %v6156_v46 }
 0x521   : > { %v14954_v15 = vpop.f32.mrf.mxu0  ;;  %v14922_v6 = vpop.f32.mrf.mxu1 }
 0x522   : > { %v6490_v23 = vadd.f32 %v6459_v32, %v6344_v19 }
 0x523   : > { %v6472_v5 = vpop.f32.mrf.mxu0  ;;  %v6318_v4 = vpop.f32.mrf.mxu1 }
 0x524   : > { %v6345_v45 = vadd.f32 %v6318_v4, %v6157_v51 }
 0x525   : > { %v14957_v25 = vpop.f32.mrf.mxu0  ;;  %v14925_v34 = vpop.f32.mrf.mxu1 }
 0x526   : > { %v6491_v29 = vadd.f32 %v6464_v20, %v6345_v45 }
 0x527   : > { %v6475_v27 = vpop.f32.mrf.mxu0  ;;  %v6321_v50 = vpop.f32.mrf.mxu1 }
 0x528   : > { %v6346_v11 = vadd.f32 %v6321_v50, %v6158_v28 }
 0x529   : > { %v14958_v46 = vpop.f32.mrf.mxu0  ;;  %v14926_v59 = vpop.f32.mrf.mxu1 }
 0x52a   : > { %v6492_v10 = vadd.f32 %v6467_v38, %v6346_v11 }
 0x52b   : > { %v6480_v43 = vpop.f32.mrf.mxu0  ;;  %v6326_v13 = vpop.f32.mrf.mxu1 }
 0x52c   : > { %v6347_v22 = vadd.f32 %v6326_v13, %v6159_v17 }
 0x52d   : > { %v14961_v12 = vpop.f32.mrf.mxu0  ;;  %v14929_v48 = vpop.f32.mrf.mxu1 }
 0x52e   : > { %v6493_v24 = vadd.f32 %v6472_v5, %v6347_v22 }
 0x52f   : > { %v6483_v31 = vpop.f32.mrf.mxu0  ;;  %v6329_v44 = vpop.f32.mrf.mxu1 }
 0x530   : > { %v6348_v1 = vadd.f32 %v6329_v44, %v6160_v58 }
 0x531   : > { %v14962_v7 = vpop.f32.mrf.mxu0  ;;  %v14930_v51 = vpop.f32.mrf.mxu1 }
 0x532   : > { %v19567_v62 = vadd.f32 %v6475_v27, %v6348_v1 }
 0x533   : > { %v6817_v0 = vpop.f32.mrf.mxu0  ;;  %v6334_v36 = vpop.f32.mrf.mxu1 }
 0x534   : > { %v6349_v55 = vadd.f32 %v6334_v36, %v6161_v8 }
 0x535   : > { %v15001_v28 = vpop.f32.mrf.mxu0  ;;  %v14933_v47 = vpop.f32.mrf.mxu1 }
 0x536   : > { %v19569_v63 = vadd.f32 %v6480_v43, %v6349_v55 }
 0x537   : > { %v6820_v53 = vpop.f32.mrf.mxu0  ;;  %v6337_v57 = vpop.f32.mrf.mxu1 }
 0x538   : > { %v6350_v17 = vadd.f32 %v6337_v57, %v6162_v61 }
 0x539   : > { %v15002_v52 = vpop.f32.mrf.mxu0  ;;  %v14934_v56 = vpop.f32.mrf.mxu1 }
 0x53a   : > { %v19571_v3 = vadd.f32 %v6483_v31, %v6350_v17 }
 0x53b   : > { %v6825_v42 = vpop.f32.mrf.mxu0  ;;  %v6629_v58 = vpop.f32.mrf.mxu1 }
 0x53c   : > { %v6668_v40 = vadd.f32 %v6629_v58, %v6487_v14 }
 0x53d   : > { %v15005_v49 = vpop.f32.mrf.mxu0  ;;  %v14973_v16 = vpop.f32.mrf.mxu1 }
 0x53e   : > { %v19573_v32 = vadd.f32 %v6817_v0, %v6668_v40 }
 0x53f   : > { %v6828_v9 = vpop.f32.mrf.mxu0  ;;  %v6632_v8 = vpop.f32.mrf.mxu1 }
 0x540   : > { %v6669_v30 = vadd.f32 %v6632_v8, %v6488_v18 }
 0x541   : > { %v15006_v61 = vpop.f32.mrf.mxu0  ;;  %v14974_v41 = vpop.f32.mrf.mxu1 }
 0x542   : > { %v19579_v20 = vadd.f32 %v6820_v53, %v6669_v30 }
 0x543   : > { %v6833_v60 = vpop.f32.mrf.mxu0  ;;  %v6637_v39 = vpop.f32.mrf.mxu1 }
 0x544   : > { %v6670_v14 = vadd.f32 %v6637_v39, %v6489_v37 }
 0x545   : > { %v15009_v26 = vpop.f32.mrf.mxu0  ;;  %v14977_v21 = vpop.f32.mrf.mxu1 }
 0x546   : > { %v19581_v38 = vadd.f32 %v6825_v42, %v6670_v14 }
 0x547   : > { %v6836_v2 = vpop.f32.mrf.mxu0  ;;  %v6640_v19 = vpop.f32.mrf.mxu1 }
 0x548   : > { %v6671_v15 = vadd.f32 %v6640_v19, %v6490_v23 }
 0x549   : > { %v15010_v6 = vpop.f32.mrf.mxu0  ;;  %v14978_v33 = vpop.f32.mrf.mxu1 }
 0x54a   : > { %v19583_v5 = vadd.f32 %v6828_v9, %v6671_v15  ;;  %v12814_v6 = vld [vmem:[%s20908_s5] ss:$0 sm:$0xff] }
 0x54b   : > { %v6841_v18 = vpop.f32.mrf.mxu0  ;;  %v6645_v4 = vpop.f32.mrf.mxu1 }
 0x54c   : > { %v6672_v45 = vadd.f32 %v6645_v4, %v6491_v29 }
 0x54d   : > { %v15013_v25 = vpop.f32.mrf.mxu0  ;;  %v14981_v34 = vpop.f32.mrf.mxu1 }
 0x54e   : > { %v6860_v27 = vadd.f32 %v6833_v60, %v6672_v45 }
 0x54f   : > { %v6844_v50 = vpop.f32.mrf.mxu0  ;;  %v6648_v11 = vpop.f32.mrf.mxu1 }
 0x550   : > { %v6673_v37 = vadd.f32 %v6648_v11, %v6492_v10 }
 0x551   : > { %v15014_v46 = vpop.f32.mrf.mxu0  ;;  %v14982_v59 = vpop.f32.mrf.mxu1 }
 0x552   : > { %v6861_v43 = vadd.f32 %v6836_v2, %v6673_v37 }
 0x553   : > { %v6849_v13 = vpop.f32.mrf.mxu0  ;;  %v6653_v22 = vpop.f32.mrf.mxu1 }
 0x554   : > { %v6674_v12 = vadd.f32 %v6653_v22, %v6493_v24 }
 0x555   : > { %v15017_v23 = vpop.f32.mrf.mxu0  ;;  %v14985_v48 = vpop.f32.mrf.mxu1 }
 0x556   : > { %v6862_v31 = vadd.f32 %v6841_v18, %v6674_v12 }
 0x557   : > { %v6852_v44 = vpop.f32.mrf.mxu0  ;;  %v6656_v1 = vpop.f32.mrf.mxu1 }
 0x558   : > { %v6675_v30 = vadd.f32 %v6656_v1, %v19567_v62 }
 0x559   : > { %v15018_v7 = vpop.f32.mrf.mxu0  ;;  %v14986_v51 = vpop.f32.mrf.mxu1 }
 0x55a   : > { %v6863_v14 = vadd.f32 %v6844_v50, %v6675_v30  ;;  %v7040_v7 = vld [vmem:[%s20909_s6 + $0x8] sm:$0xff]  ;;  %v7041_v51 = vld [vmem:[%s20909_s6 + $0x10] sm:$0xff]  ;;  %v15383_v30 = vld [vmem:[#allocation5 + $0x74] ss:$8 sps:$4 sm:$0xff]  }
 0x55b   : > { %v6661_v29 = vpop.f32.mrf.mxu1 }
 0x55c   : > { %v6676_v8 = vadd.f32 %v6661_v29, %v19569_v63  ;;  %v12834_v29 = vld [vmem:[%s20909_s6 + $0x68] sm:$0xff] }
 0x55d   : > { %v14989_v0 = vpop.f32.mrf.mxu1 }
 0x55e   : > { %v6864_v60 = vadd.f32 %v6849_v13, %v6676_v8  ;;  %v12835_v0 = vld [vmem:[%s20909_s6 + $0x70] sm:$0xff]  ;;  %v12850_v8 = vld [vmem:[%s20909_s6 + $0xb8] sm:$0xf] }
 0x55f   : > { %v6664_v36 = vpop.f32.mrf.mxu1 }
 0x560   : > { %v6677_v61 = vadd.f32 %v6664_v36, %v19571_v3  ;;  %v7042_v36 = vld [vmem:[%s20909_s6 + $0x18] sm:$0xff] }
 0x561   : > { %v14990_v55 = vpop.f32.mrf.mxu1 }
 0x562   : > { %v6865_v21 = vadd.f32 %v6852_v44, %v6677_v61  ;;  %v7043_v55 = vld [vmem:[%s20909_s6 + $0x20] sm:$0xff]  ;;  %v15384_v61 = vld [vmem:[#allocation5 + $0x60] ss:$8 sps:$4 sm:$0xff]  }
 0x563   : > { %v19585_v28 = vpop.f32.mrf.mxu1 }
 0x565   : > { %v15029_v10 = vpop.f32.mrf.mxu1 }
 0x566   : > { %v12837_v10 = vld [vmem:[%s20909_s6 + $0x80] sm:$0xff] }
 0x567   : > { %v6966_v47 = vpop.f32.mrf.mxu1 }
 0x569   : > { %v15030_v53 = vpop.f32.mrf.mxu1 }
 0x56a   : > { %v12821_v53 = vld [vmem:[%s20909_s6 + $0x30] sm:$0xff] }
 0x56b   : > { %v6971_v57 = vpop.f32.mrf.mxu1 }
 0x56d   : > { %v15033_v17 = vpop.f32.mrf.mxu1 }
 0x56e   : > { %v12822_v17 = vld [vmem:[%s20909_s6 + $0x38] sm:$0xff] }
 0x56f   : > { %v6974_v52 = vpop.f32.mrf.mxu1 }
 0x570   : > { %v7005_v11 = vadd.f32 %v6974_v52, %v19583_v5  ;;  %v7003_v5 = vadd.f32 %v6966_v47, %v19579_v20  ;;  %v7044_v47 = vld [vmem:[%s20909_s6 + $0x28] sm:$0xf]  ;;  %v12823_v52 = vld [vmem:[%s20909_s6 + $0x40] sm:$0xff] }
 0x571   : > { %v15034_v24 = vpop.f32.mrf.mxu1 }
 0x572   : > { %v7022_v13 = vadd.f32 %v12814_v6, %v7005_v11  ;;  %v7020_v20 = vadd.f32 %v12814_v6, %v7003_v5  ;;  %v12824_v24 = vld [vmem:[%s20909_s6 + $0x48] sm:$0xff]  ;;  %v15416_v11 = vld [vmem:[#allocation5 + $0xb4] ss:$8 sps:$4 sm:$0xff]   ;;  %v16158_v5 = vmov 0  }
 0x573   : > { %v6979_v56 = vpop.f32.mrf.mxu1 }
 0x574   : > { %v7006_v25 = vadd.f32 %v6979_v56, %v6860_v27  ;;  %v7004_v27 = vadd.f32 %v6971_v57, %v19581_v38  ;;  %v7002_v38 = vadd.f32 %v19585_v28, %v19573_v32  ;;  %v19630_v48 = vmax.f32 %v7022_v13, 0.0  ;;  %v12836_v28 = vld [vmem:[%s20909_s6 + $0x78] sm:$0xff]  ;;  %v12838_v57 = vld [vmem:[%s20909_s6 + $0x88] sm:$0xf]  ;;  %v12825_v56 = vld [vmem:[%s20909_s6 + $0x50] sm:$0xff] }
 0x575   : > { %v15037_v42 = vpop.f32.mrf.mxu1  ;;  %v19642_v44 = vmax.f32 %v7020_v20, 0.0  ;;  %v15428_v13 = vld [vmem:[#allocation5 + $0x94] ss:$8 sps:$4 sm:$0xff]  }
 0x576   : > { %v7023_v59 = vadd.f32 %v12814_v6, %v7006_v25  ;;  %v7021_v12 = vadd.f32 %v12814_v6, %v7004_v27  ;;  %v7019_v32 = vadd.f32 %v12814_v6, %v7002_v38  ;;  %v12826_v42 = vld [vmem:[%s20909_s6 + $0x58] sm:$0xf]  ;;  %v15422_v27 = vld [vmem:[#allocation5 + $0xa4] ss:$8 sps:$4 sm:$0xff]  }
 0x577   : > { %v6982_v58 = vpop.f32.mrf.mxu1  ;;  %v15411_v25 = vld [vmem:[#allocation5 + $0x10] ss:$8 sps:$4 sm:$0xff]   ;;  %v15435_v38 = vld [vmem:[#allocation5 + $0x84] ss:$8 sps:$4 sm:$0xff]  }
 0x578   : > { %v7007_v62 = vadd.f32 %v6982_v58, %v6861_v43  ;;  %v19624_v23 = vmax.f32 %v7023_v59, 0.0  ;;  %v19648_v1 = vmax.f32 %v7019_v32, 0.0  ;;  %v12845_v58 = vld [vmem:[%s20909_s6 + $0x90] sm:$0xff] }
 0x579   : > { %v15038_v40 = vpop.f32.mrf.mxu1  ;;  %v15420_v59 = vld [vmem:[#allocation5 + $0xa0] ss:$8 sps:$4 sm:$0xff]  }
 0x57a   : > { %v7024_v37 = vadd.f32 %v12814_v6, %v7007_v62  ;;  %v12846_v40 = vld [vmem:[%s20909_s6 + $0x98] sm:$0xff]  ;;  %v15407_v62 = vld [vmem:[#allocation5 + $0x24] ss:$8 sps:$4 sm:$0xff]  }
 0x57b   : > { %v6987_v49 = vpop.f32.mrf.mxu1 }
 0x57c   : > { %v7008_v63 = vadd.f32 %v6987_v49, %v6862_v31  ;;  %v19616_v22 = vmax.f32 %v7024_v37, 0.0  ;;  %v19636_v31 = vmax.f32 %v7021_v12, 0.0  ;;  %v12847_v49 = vld [vmem:[%s20909_s6 + $0xa0] sm:$0xff]  ;;  %v15419_v37 = vld [vmem:[#allocation5 + $0x4] ss:$8 sps:$4 sm:$0xff]  }
 0x57d   : > { %v15041_v16 = vpop.f32.mrf.mxu1  ;;  %v15433_v12 = vld [vmem:[#allocation5 + $0x80] ss:$8 sps:$4 sm:$0xff]  }
 0x57e   : > { %v7025_v34 = vadd.f32 %v12814_v6, %v7008_v63  ;;  %v12848_v16 = vld [vmem:[%s20909_s6 + $0xa8] sm:$0xff]  ;;  %v15402_v63 = vld [vmem:[#allocation5 + $0xd0] ss:$8 sps:$4 sm:$0xff]  }
 0x57f   : > { %v6990_v9 = vpop.f32.mrf.mxu1 }
 0x580   : > { %v7009_v19 = vadd.f32 %v6990_v9, %v6863_v14  ;;  %v19609_v43 = vmax.f32 %v7025_v34, 0.0  ;;  %v12849_v9 = vld [vmem:[%s20909_s6 + $0xb0] sm:$0xff]  ;;  %v15390_v14 = vld [vmem:[#allocation5 + $0xf0] ss:$8 sps:$4 sm:$0xff]   ;;  %v15413_v34 = vld [vmem:[#allocation5 + $0x14] ss:$8 sps:$4 sm:$0xff]  }
 0x581   : > { %v15042_v54 = vpop.f32.mrf.mxu1 }
 0x582   : > { %v7026_v45 = vadd.f32 %v12814_v6, %v7009_v19  ;;  %v15381_v54 = vld [vmem:[#allocation5 + $0x70] ss:$8 sps:$4 sm:$0xff]   ;;  %v15396_v19 = vld [vmem:[#allocation5 + $0xe0] ss:$8 sps:$4 sm:$0xff]  }
 0x583   : > { %v6995_v41 = vpop.f32.mrf.mxu1 }
 0x584   : > { %v7010_v26 = vadd.f32 %v6995_v41, %v6864_v60  ;;  %v19602_v46 = vmax.f32 %v7026_v45, 0.0  ;;  %v15386_v41 = vld [vmem:[#allocation5 + $0x64] ss:$8 sps:$4 sm:$0xff]   ;;  %v15387_v60 = vld [vmem:[#allocation5 + $0x50] ss:$8 sps:$4 sm:$0xff]  }
 0x585   : > { %v15045_v39 = vpop.f32.mrf.mxu1  ;;  %v15408_v45 = vld [vmem:[#allocation5 + $0xc0] ss:$8 sps:$4 sm:$0xff]  }
 0x586   : > { %v7027_v18 = vadd.f32 %v12814_v6, %v7010_v26  ;;  %v15389_v39 = vld [vmem:[#allocation5 + $0x54] ss:$8 sps:$4 sm:$0xff]  }
 0x587   : > { %v6998_v2 = vpop.f32.mrf.mxu1  ;;  %v15392_v26 = vld [vmem:[#allocation5 + $0xf4] ss:$8 sps:$4 sm:$0xff]  }
 0x588   : > { %v7011_v15 = vadd.f32 %v6998_v2, %v6865_v21  ;;  %v19595_v50 = vmax.f32 %v7027_v18, 0.0  ;;  %v15393_v21 = vld [vmem:[#allocation5 + $0x40] ss:$8 sps:$4 sm:$0xff]   ;;  %v15395_v2 = vld [vmem:[#allocation5 + $0x44] ss:$8 sps:$4 sm:$0xff]  }
 0x589   : > { %v15046_v33 = vpop.f32.mrf.mxu1  ;;  %v15404_v18 = vld [vmem:[#allocation5 + $0xd4] ss:$8 sps:$4 sm:$0xff]  }
 0x58a   : > { %v7028_v4 = vadd.f32 %v12814_v6, %v7011_v15  ;;  %v15398_v15 = vld [vmem:[#allocation5 + $0xe4] ss:$8 sps:$4 sm:$0xff]   ;;  %v15399_v6 = vld [vmem:[#allocation5 + $0x30] ss:$8 sps:$4 sm:$0xff]   ;;  %v15401_v33 = vld [vmem:[#allocation5 + $0x34] ss:$8 sps:$4 sm:$0xff]  }
 0x58c   : > { %v19593_v3 = vmax.f32 %v7028_v4, 0.0  ;;  %v15405_v4 = vld [vmem:[#allocation5 + $0x20] ss:$8 sps:$4 sm:$0xff]  }
 0x58e   : > { %15047 = vmatprep.subr.mxu0 %v19593_v3  ;;  %15105 = vmatprep.subr.mxu1 %v19593_v3 }
 0x58f   : > { %15048 = vmatpush3.msra.mxu0 %v19593_v3  ;;  %15106 = vmatpush3.msra.mxu1 %v19593_v3 }
 0x590   : > { %15049 = vmatprep.subr.mxu0 %v19595_v50  ;;  %15107 = vmatprep.subr.mxu1 %v19595_v50 }
 0x591   : > { %15050 = vmatpush3.msra.mxu0 %v19595_v50  ;;  %15108 = vmatpush3.msra.mxu1 %v19595_v50 }
 0x592   : > { %15051 = vmatprep.subr.mxu0 %v19602_v46  ;;  %15109 = vmatprep.subr.mxu1 %v19602_v46 }
 0x593   : > { %15052 = vmatpush3.msra.mxu0 %v19602_v46  ;;  %15110 = vmatpush3.msra.mxu1 %v19602_v46 }
 0x594   : > { %15053 = vmatprep.subr.mxu0 %v19609_v43  ;;  %15111 = vmatprep.subr.mxu1 %v19609_v43 }
 0x595   : > { %15054 = vmatpush3.msra.mxu0 %v19609_v43  ;;  %15112 = vmatpush3.msra.mxu1 %v19609_v43 }
 0x596   : > { %15055 = vmatprep.subr.mxu0 %v19616_v22  ;;  %15113 = vmatprep.subr.mxu1 %v19616_v22 }
 0x597   : > { %15056 = vmatpush3.msra.mxu0 %v19616_v22  ;;  %15114 = vmatpush3.msra.mxu1 %v19616_v22 }
 0x598   : > { %15057 = vmatprep.subr.mxu0 %v19624_v23  ;;  %15115 = vmatprep.subr.mxu1 %v19624_v23 }
 0x599   : > { %15058 = vmatpush3.msra.mxu0 %v19624_v23  ;;  %15116 = vmatpush3.msra.mxu1 %v19624_v23 }
 0x59a   : > { %15059 = vmatprep.subr.mxu0 %v19630_v48  ;;  %15117 = vmatprep.subr.mxu1 %v19630_v48 }
 0x59b   : > { %15060 = vmatpush3.msra.mxu0 %v19630_v48  ;;  %15118 = vmatpush3.msra.mxu1 %v19630_v48 }
 0x59c   : > { %15061 = vmatprep.subr.mxu0 %v19636_v31  ;;  %15119 = vmatprep.subr.mxu1 %v19636_v31 }
 0x59d   : > { %15062 = vmatpush3.msra.mxu0 %v19636_v31  ;;  %15120 = vmatpush3.msra.mxu1 %v19636_v31 }
 0x59e   : > { %15063 = vmatprep.subr.mxu0 %v19642_v44  ;;  %15121 = vmatprep.subr.mxu1 %v19642_v44 }
 0x59f   : > { %15064 = vmatpush3.msra.mxu0 %v19642_v44  ;;  %15122 = vmatpush3.msra.mxu1 %v19642_v44 }
 0x5a0   : > { %15065 = vmatprep.subr.mxu0 %v19648_v1  ;;  %15123 = vmatprep.subr.mxu1 %v19648_v1 }
 0x5a1   : > { %15066 = vmatpush3.msra.mxu0 %v19648_v1  ;;  %15124 = vmatpush3.msra.mxu1 %v19648_v1 }
 0x5a2   : > { %15076 = vmatprep.subr.mxu0 %v19593_v3  ;;  %15068 = vmatmul.mubr.msk.f32.vlgmr.msra.gmra.mxu0 %vm7045_vm12, %v7040_v7 }
 0x5a3   : > { %15077 = vmatpush3.msra.mxu0 %v19593_v3  ;;  %15070 = vmatprep.mubr.msk.f32.mxu0 %vm7045_vm12, %v7041_v51 }
 0x5a4   : > { %15078 = vmatprep.subr.mxu0 %v19595_v50  ;;  %15126 = vmatmul.mubr.msk.f32.vlgmr.msra.gmra.mxu1 %vm7045_vm12, %v12834_v29 }
 0x5a5   : > { %15079 = vmatpush3.msra.mxu0 %v19595_v50  ;;  %15128 = vmatprep.mubr.msk.f32.mxu1 %vm7045_vm12, %v12835_v0 }
 0x5a6   : > { %15080 = vmatprep.subr.mxu0 %v19602_v46  ;;  %15071 = vmatmul.mubr.msk.f32.gmra.mxu0 %vm7045_vm12, %v7042_v36 }
 0x5a7   : > { %15081 = vmatpush3.msra.mxu0 %v19602_v46  ;;  %15073 = vmatprep.mubr.msk.f32.mxu0 %vm7045_vm12, %v7043_v55 }
 0x5a8   : > { %15082 = vmatprep.subr.mxu0 %v19609_v43  ;;  %15129 = vmatmul.mubr.msk.f32.gmra.mxu1 %vm7045_vm12, %v12836_v28 }
 0x5a9   : > { %15083 = vmatpush3.msra.mxu0 %v19609_v43  ;;  %15131 = vmatprep.mubr.msk.f32.mxu1 %vm7045_vm12, %v12837_v10 }
 0x5aa   : > { %15084 = vmatprep.subr.mxu0 %v19616_v22  ;;  %15074 = vmatmul.mubr.msk.f32.gmra.mxu0 %vm7045_vm12, %v7044_v47 }
 0x5ab   : > { %15085 = vmatpush3.msra.mxu0 %v19616_v22  ;;  %15096 = vmatprep.mubr.msk.f32.mxu0 %vm7045_vm12, %v12821_v53 }
 0x5ac   : > { %15086 = vmatprep.subr.mxu0 %v19624_v23  ;;  %15132 = vmatmul.mubr.msk.f32.gmra.mxu1 %vm7045_vm12, %v12838_v57 }
 0x5ad   : > { %15087 = vmatpush3.msra.mxu0 %v19624_v23  ;;  %7711 = vmatprep.subr.bf16.mxu1 %v15392_v26 }
 0x5ae   : > { %15088 = vmatprep.subr.mxu0 %v19630_v48  ;;  %7712 = vmatpush1.bf16.msra.mxu1 %v15390_v14 }
 0x5af   : > { %15089 = vmatpush3.msra.mxu0 %v19630_v48  ;;  %7713 = vmatprep.subr.bf16.mxu1 %v15398_v15 }
 0x5b0   : > { %15090 = vmatprep.subr.mxu0 %v19636_v31  ;;  %7743 = vmatprep.mubr.bf16.mxu1 %v16158_v5 }
 0x5b1   : > { %15091 = vmatpush3.msra.mxu0 %v19636_v31 }
 0x5b2   : > { %15092 = vmatprep.subr.mxu0 %v19642_v44  ;;  %7714 = vmatpush1.bf16.msra.mxu1 %v15396_v19 }
 0x5b3   : > { %15093 = vmatpush3.msra.mxu0 %v19642_v44  ;;  %7715 = vmatprep.subr.bf16.mxu1 %v15404_v18 }
 0x5b4   : > { %15094 = vmatprep.subr.mxu0 %v19648_v1 }
 0x5b5   : > { %15095 = vmatpush3.msra.mxu0 %v19648_v1 }
 0x5b6   : > { %15134 = vmatprep.subr.mxu0 %v19593_v3  ;;  %15097 = vmatmul.mubr.msk.f32.vlgmr.msra.gmra.mxu0 %vm7045_vm12, %v12822_v17 }
 0x5b7   : > { %15135 = vmatpush3.msra.mxu0 %v19593_v3  ;;  %15099 = vmatprep.mubr.msk.f32.mxu0 %vm7045_vm12, %v12823_v52  ;;  %v15410_v3 = vld [vmem:[#allocation5 + $0xc4] ss:$8 sps:$4 sm:$0xff]  }
 0x5b8   : > { %15136 = vmatprep.subr.mxu0 %v19595_v50  ;;  %7716 = vmatpush1.bf16.msra.mxu1 %v15402_v63  ;;  %v15423_v63 = vld [vmem:[#allocation5 + $0x1f0] ss:$8 sps:$4 sm:$0xff]  }
 0x5b9   : > { %15137 = vmatpush3.msra.mxu0 %v19595_v50  ;;  %7717 = vmatprep.subr.bf16.mxu1 %v15410_v3  ;;  %v15414_v50 = vld [vmem:[#allocation5 + $0xb0] ss:$8 sps:$4 sm:$0xff]  }
 0x5ba   : > { %15138 = vmatprep.subr.mxu0 %v19602_v46  ;;  %15100 = vmatmul.mubr.msk.f32.gmra.mxu0 %vm7045_vm12, %v12824_v24 }
 0x5bb   : > { %15139 = vmatpush3.msra.mxu0 %v19602_v46  ;;  %15102 = vmatprep.mubr.msk.f32.mxu0 %vm7045_vm12, %v12825_v56  ;;  %v15417_v46 = vld [vmem:[#allocation5] ss:$8 sps:$4 sm:$0xff]  }
 0x5bc   : > { %15140 = vmatprep.subr.mxu0 %v19609_v43  ;;  %7718 = vmatpush1.bf16.msra.mxu1 %v15408_v45  ;;  %v15432_v45 = vld [vmem:[#allocation5 + $0x1e4] ss:$8 sps:$4 sm:$0xff]  }
 0x5bd   : > { %15141 = vmatpush3.msra.mxu0 %v19609_v43  ;;  %7719 = vmatprep.subr.bf16.mxu1 %v15416_v11  ;;  %v15425_v43 = vld [vmem:[#allocation5 + $0x1f4] ss:$8 sps:$4 sm:$0xff]  }
 0x5be   : > { %15142 = vmatprep.subr.mxu0 %v19616_v22  ;;  %15103 = vmatmul.mubr.msk.f32.gmra.mxu0 %vm7045_vm12, %v12826_v42  ;;  %v15438_v11 = vld [vmem:[#allocation5 + $0x1d4] ss:$8 sps:$4 sm:$0xff]  }
 0x5bf   : > { %15143 = vmatpush3.msra.mxu0 %v19616_v22  ;;  %15154 = vmatprep.mubr.msk.f32.mxu0 %vm7045_vm12, %v12845_v58  ;;  %v15426_v22 = vld [vmem:[#allocation5 + $0x90] ss:$8 sps:$4 sm:$0xff]  }
 0x5c0   : > { %15144 = vmatprep.subr.mxu0 %v19624_v23  ;;  %7720 = vmatpush1.bf16.msra.mxu1 %v15414_v50 }
 0x5c1   : > { %15145 = vmatpush3.msra.mxu0 %v19624_v23  ;;  %7721 = vmatprep.subr.bf16.mxu1 %v15422_v27  ;;  %v15442_v23 = vld [vmem:[#allocation5 + $0x174] ss:$8 sps:$4 sm:$0xff]  }
 0x5c2   : > { %15146 = vmatprep.subr.mxu0 %v19630_v48 }
 0x5c3   : > { %15147 = vmatpush3.msra.mxu0 %v19630_v48 }
 0x5c4   : > { %15148 = vmatprep.subr.mxu0 %v19636_v31  ;;  %7722 = vmatpush1.bf16.msra.mxu1 %v15420_v59 }
 0x5c5   : > { %15149 = vmatpush3.msra.mxu0 %v19636_v31  ;;  %7723 = vmatprep.subr.bf16.mxu1 %v15428_v13 }
 0x5c6   : > { %15150 = vmatprep.subr.mxu0 %v19642_v44 }
 0x5c7   : > { %15151 = vmatpush3.msra.mxu0 %v19642_v44 }
 0x5c8   : > { %15152 = vmatprep.subr.mxu0 %v19648_v1  ;;  %7724 = vmatpush1.bf16.msra.mxu1 %v15426_v22  ;;  %v15440_v22 = vld [vmem:[#allocation5 + $0x170] ss:$8 sps:$4 sm:$0xff]  }
 0x5c9   : > { %15153 = vmatpush3.msra.mxu0 %v19648_v1  ;;  %7725 = vmatprep.subr.bf16.mxu1 %v15435_v38 }
 0x5ca   : > { %15155 = vmatmul.mubr.msk.f32.vlgmr.msra.gmra.mxu0 %vm7045_vm12, %v12846_v40  ;;  %7845 = vmatprep.subr.bf16.mxu0 %v15383_v30 }
 0x5cb   : > { %15157 = vmatprep.mubr.msk.f32.mxu0 %vm7045_vm12, %v12847_v49  ;;  %7846 = vmatpush1.bf16.msra.mxu0 %v15381_v54 }
 0x5cc   : > { %7847 = vmatprep.subr.bf16.mxu0 %v15386_v41  ;;  %7726 = vmatpush1.bf16.msra.mxu1 %v15433_v12 }
 0x5cd   : > { %8002 = vmatprep.subr.bf16.mxu1 %v15442_v23  ;;  %v15446_v23 = vld [vmem:[#allocation5 + $0x1c4] ss:$8 sps:$4 sm:$0xff]  }
 0x5ce   : > { %15158 = vmatmul.mubr.msk.f32.gmra.mxu0 %vm7045_vm12, %v12848_v16 }
 0x5cf   : > { %15160 = vmatprep.mubr.msk.f32.mxu0 %vm7045_vm12, %v12849_v9  ;;  %7848 = vmatpush1.bf16.msra.mxu0 %v15384_v61 }
 0x5d0   : > { %7849 = vmatprep.subr.bf16.mxu0 %v15389_v39 }
 0x5d2   : > { %15161 = vmatmul.mubr.msk.f32.gmra.mxu0 %vm7045_vm12, %v12850_v8 }
 0x5d3   : > { %7850 = vmatpush1.bf16.msra.mxu0 %v15387_v60  ;;  %7877 = vmatprep.mubr.bf16.mxu0 %v16158_v5 }
 0x5d4   : > { %7851 = vmatprep.subr.bf16.mxu0 %v15395_v2 }
 0x5d7   : > { %7852 = vmatpush1.bf16.msra.mxu0 %v15393_v21 }
 0x5d8   : > { %7853 = vmatprep.subr.bf16.mxu0 %v15401_v33 }
 0x5db   : > { %7854 = vmatpush1.bf16.msra.mxu0 %v15399_v6 }
 0x5dc   : > { %7855 = vmatprep.subr.bf16.mxu0 %v15407_v62 }
 0x5df   : > { %7856 = vmatpush1.bf16.msra.mxu0 %v15405_v4 }
 0x5e0   : > { %7857 = vmatprep.subr.bf16.mxu0 %v15413_v34 }
 0x5e3   : > { %7858 = vmatpush1.bf16.msra.mxu0 %v15411_v25  ;;  %v15430_v25 = vld [vmem:[#allocation5 + $0x1e0] ss:$8 sps:$4 sm:$0xff]  }
 0x5e4   : > { %7859 = vmatprep.subr.bf16.mxu0 %v15419_v37 }
 0x5e7   : > { %7860 = vmatpush1.bf16.msra.mxu0 %v15417_v46 }
 0x5e8   : > { %8169 = vmatprep.subr.bf16.mxu0 %v15425_v43  ;;  %v15436_v43 = vld [vmem:[#allocation5 + $0x1d0] ss:$8 sps:$4 sm:$0xff]  }
 0x662   : > { %v15069_v20 = vpop.f32.mrf.mxu0 }
 0x664   : > { %v7130_v48 = vpop.f32.mrf.mxu0  ;;  %v15127_v29 = vpop.f32.mrf.mxu1 }
 0x666   : > { %v15072_v32 = vpop.f32.mrf.mxu0  ;;  %v7376_v36 = vpop.f32.mrf.mxu1 }
 0x668   : > { %v7140_v31 = vpop.f32.mrf.mxu0  ;;  %v15130_v10 = vpop.f32.mrf.mxu1 }
 0x66a   : > { %v15075_v44 = vpop.f32.mrf.mxu0  ;;  %v7386_v17 = vpop.f32.mrf.mxu1 }
 0x66b   : > { %v15452_v44 = vld [vmem:[#allocation5 + $0x1b4] ss:$8 sps:$4 sm:$0xff]  }
 0x66c   : > { %v7150_v1 = vpop.f32.mrf.mxu0  ;;  %v15133_v49 = vpop.f32.mrf.mxu1 }
 0x66e   : > { %v7396_v39 = vpop.f32.mrf.mxu1 }
 0x676   : > { %v15098_v7 = vpop.f32.mrf.mxu0 }
 0x677   : > { %v7280_v47 = vmax.f32 %v15069_v20, %v15098_v7  ;;  %v15449_v20 = vld [vmem:[#allocation5 + $0x164] ss:$8 sps:$4 sm:$0xff]   ;;  %v15450_v7 = vld [vmem:[#allocation5 + $0x1b0] ss:$8 sps:$4 sm:$0xff]  }
 0x678   : > { %v7250_v51 = vpop.f32.mrf.mxu0 }
 0x679   : > { %v7279_v53 = vmax.f32 %v7130_v48, %v7250_v51  ;;  %v7406_v24 = vmax.f32 %v7280_v47, %v15127_v29  ;;  %v15453_v29 = vld [vmem:[#allocation5 + $0x150] ss:$8 sps:$4 sm:$0xff]   ;;  %v15464_v47 = vld [vmem:[#allocation5 + $0x194] ss:$8 sps:$4 sm:$0xff]  }
 0x67a   : > { %v15101_v0 = vpop.f32.mrf.mxu0 }
 0x67b   : > { %v7282_v56 = vmax.f32 %v15072_v32, %v15101_v0  ;;  %v7405_v42 = vmax.f32 %v7279_v53, %v7376_v36  ;;  %v15444_v32 = vld [vmem:[#allocation5 + $0x1c0] ss:$8 sps:$4 sm:$0xff]   ;;  %v15458_v0 = vld [vmem:[#allocation5 + $0x1a4] ss:$8 sps:$4 sm:$0xff]   ;;  %v15467_v53 = vld [vmem:[#allocation5 + $0x134] ss:$8 sps:$4 sm:$0xff]  }
 0x67c   : > { %v7260_v55 = vpop.f32.mrf.mxu0 }
 0x67d   : > { %v7281_v58 = vmax.f32 %v7140_v31, %v7260_v55  ;;  %v7408_v30 = vmax.f32 %v7282_v56, %v15130_v10  ;;  %v15447_v31 = vld [vmem:[#allocation5 + $0x160] ss:$8 sps:$4 sm:$0xff]   ;;  %v15461_v55 = vld [vmem:[#allocation5 + $0x144] ss:$8 sps:$4 sm:$0xff]  }
 0x67e   : > { %v15104_v28 = vpop.f32.mrf.mxu0  ;;  %v15459_v10 = vld [vmem:[#allocation5 + $0x140] ss:$8 sps:$4 sm:$0xff]  }
 0x67f   : > { %v7407_v41 = vmax.f32 %v7281_v58, %v7386_v17  ;;  %v15456_v28 = vld [vmem:[#allocation5 + $0x1a0] ss:$8 sps:$4 sm:$0xff]   ;;  %v15462_v17 = vld [vmem:[#allocation5 + $0x190] ss:$8 sps:$4 sm:$0xff]  }
 0x680   : > { %v7270_v57 = vpop.f32.mrf.mxu0 }
 0x681   : > { %v7283_v54 = vmax.f32 %v7150_v1, %v7270_v57  ;;  %v15455_v1 = vld [vmem:[#allocation5 + $0x154] ss:$8 sps:$4 sm:$0xff]  }
 0x683   : > { %v7409_v19 = vmax.f32 %v7283_v54, %v7396_v39  ;;  %v15481_v54 = vld [vmem:[#allocation5 + $0x114] ss:$8 sps:$4 sm:$0xff]  }
 0x68a   : > { %v15156_v52 = vpop.f32.mrf.mxu0 }
 0x68b   : > { %v7532_v16 = vmax.f32 %v7406_v24, %v15156_v52  ;;  %v15465_v52 = vld [vmem:[#allocation5 + $0x130] ss:$8 sps:$4 sm:$0xff]   ;;  %v15470_v24 = vld [vmem:[#allocation5 + $0x184] ss:$8 sps:$4 sm:$0xff]  }
 0x68c   : > { %v7502_v40 = vpop.f32.mrf.mxu0 }
 0x68d   : > { %v7531_v9 = vmax.f32 %v7405_v42, %v7502_v40  ;;  %v15473_v42 = vld [vmem:[#allocation5 + $0x124] ss:$8 sps:$4 sm:$0xff]   ;;  %v15468_v40 = vld [vmem:[#allocation5 + $0x180] ss:$8 sps:$4 sm:$0xff]  }
 0x68e   : > { %v15159_v8 = vpop.f32.mrf.mxu0 }
 0x68f   : > { %v13645_v61 = vpack.c.bf16 %v7532_v16, %v7531_v9  ;;  %v7534_v14 = vmax.f32 %v7408_v30, %v15159_v8  ;;  %v15471_v16 = vld [vmem:[#allocation5 + $0x120] ss:$8 sps:$4 sm:$0xff]   ;;  %v15478_v9 = vld [vmem:[#allocation5 + $0x2f4] ss:$8 sps:$4 sm:$0xff]  }
 0x690   : > { %v7512_v60 = vpop.f32.mrf.mxu0 }
 0x691   : > { %13646 = vst [vmem:[#allocation3] sm:$0xff] %v13645_v61   ;;  %v7533_v26 = vmax.f32 %v7407_v41, %v7512_v60  ;;  %v15476_v61 = vld [vmem:[#allocation5 + $0x2f0] ss:$8 sps:$4 sm:$0xff]   ;;  %v15484_v60 = vld [vmem:[#allocation5 + $0x2e4] ss:$8 sps:$4 sm:$0xff]  }
 0x692   : > { %v15162_v21 = vpop.f32.mrf.mxu0  ;;  %v15479_v41 = vld [vmem:[#allocation5 + $0x110] ss:$8 sps:$4 sm:$0xff]  }
 0x693   : > { %v13650_v2 = vpack.c.bf16 %v7534_v14, %v7533_v26  ;;  %v15487_v14 = vld [vmem:[#allocation5 + $0x104] ss:$8 sps:$4 sm:$0xff]   ;;  %v15482_v21 = vld [vmem:[#allocation5 + $0x2e0] ss:$8 sps:$4 sm:$0xff]  }
 0x694   : > { %v7522_v15 = vpop.f32.mrf.mxu0 }
 0x695   : > { %13652 = vst [vmem:[#allocation3 + $0x8] sm:$0xff] %v13650_v2   ;;  %v7535_v6 = vmax.f32 %v7409_v19, %v7522_v15  ;;  %v15485_v2 = vld [vmem:[#allocation5 + $0x100] ss:$8 sps:$4 sm:$0xff]   ;;  %v15490_v19 = vld [vmem:[#allocation5 + $0x2d4] ss:$8 sps:$4 sm:$0xff]  }
 0x697   : > { %v13636_v33 = vpack.c.bf16 %v7535_v6, %v7535_v6  ;;  %v15494_v6 = vld [vmem:[#allocation5 + $0x274] ss:$8 sps:$4 sm:$0xff]  }
 0x698   : > { %v7567_v18 = vld [vmem:[#allocation3] sm:$0xf]  ;;  %v19788_v4 = vld [vmem:[#allocation3 + $0x4] sm:$0xf] }
 0x699   : > { %7565 = vst [vmem:[#allocation3 + $0x10] sm:$0xf] %v13636_v33  ;;  %v12863_v62 = vcombine.low %v7567_v18, %v19788_v4  ;;  %v8059_v56 = vld [vmem:[#allocation3] sm:$0x8] }
 0x69a   : > { %v19807_v49 = vcombine.low %v8059_v56, %v19788_v4  ;;  %v7896_v26 = vld [vmem:[#allocation3] sm:$0xe] }
 0x69b   : > { %7878 = vmatmul.mubr.bf16.vlgmr.msra.gmra.mxu0 %v12863_v62  ;;  %v7617_v3 = vshll.u32 %v12863_v62, 16  ;;  %v7615_v27 = vshrl.u32 %v12863_v62, 16  ;;  %v12898_v15 = vcombine.low %v7896_v26, %v19788_v4  ;;  %v15492_v62 = vld [vmem:[#allocation5 + $0x270] ss:$8 sps:$4 sm:$0xff]   ;;  %v15554_v26 = vld [vmem:[#allocation5 + $0x3b4] ss:$8 sps:$4 sm:$0xff]  }
 0x69c   : > { %8170 = vmatpush1.bf16.msra.mxu0 %v15423_v63  ;;  %7887 = vmatprep.mubr.bf16.mxu0 %v16158_v5  ;;  %v19792_v34 = vld [vmem:[#allocation3 + $0x8] sm:$0xf]  ;;  %v7586_v50 = vld [vmem:[#allocation3 + $0xc] sm:$0x1]  ;;  %v8084_v30 = vrot.slane %v19807_v49, 3 }
 0x69d   : > { %8171 = vmatprep.subr.bf16.mxu0 %v15432_v45  ;;  %v19795_v37 = vcombine.low %v19792_v34, %v7586_v50  ;;  %v7619_v46 = vrot.slane %v7617_v3, 1  ;;  %v12881_v13 = vcombine.low %v19792_v34, %v19792_v34  ;;  %v8060_v57 = vld [vmem:[#allocation3 + $0xc] sm:$0x7]  ;;  %v15488_v63 = vld [vmem:[#allocation5 + $0x2d0] ss:$8 sps:$4 sm:$0xff]   ;;  %v7917_v18 = vrot.slane %v12898_v15, 1 }
 0x69e   : > { %v12916_v58 = vcombine.low %v19792_v34, %v8060_v57  ;;  %v15497_v45 = vld [vmem:[#allocation5 + $0x2c4] ss:$8 sps:$4 sm:$0xff]   ;;  %v15495_v50 = vld [vmem:[#allocation5 + $0x2c0] ss:$8 sps:$4 sm:$0xff]   ;;  %v8249_v57 = vshrl.u32 %v19807_v49, 16 }
 0x69f   : > { %v7622_v59 = vshll.u32 %v19795_v37, 16  ;;  %v7620_v38 = vor.u32 %v7619_v46, %v7615_v27  ;;  %v7626_v51 = vshrl.u32 %v19795_v37, 16  ;;  %v7918_v33 = vrot.slane %v19795_v37, 1  ;;  %v15500_v3 = vld [vmem:[#allocation5 + $0x264] ss:$8 sps:$4 sm:$0xff]  }
 0x6a0   : > { %8172 = vmatpush1.bf16.msra.mxu0 %v15430_v25  ;;  %v8085_v8 = vrot.slane %v12916_v58, 3  ;;  %v15503_v46 = vld [vmem:[#allocation5 + $0x2b4] ss:$8 sps:$4 sm:$0xff]   ;;  %v15501_v27 = vld [vmem:[#allocation5 + $0x2b0] ss:$8 sps:$4 sm:$0xff]  }
 0x6a1   : > { %8173 = vmatprep.subr.bf16.mxu0 %v15438_v11  ;;  %v7624_v12 = vrot.slane %v7622_v59, 1  ;;  %v7919_v25 = vsel %vm1195_vm3, %v7917_v18, %v7918_v33  ;;  %v15498_v11 = vld [vmem:[#allocation5 + $0x260] ss:$8 sps:$4 sm:$0xff]   ;;  %v15506_v37 = vld [vmem:[#allocation5 + $0x254] ss:$8 sps:$4 sm:$0xff]  }
 0x6a2   : > { %v8086_v39 = vsel %vm3595_vm7, %v8084_v30, %v8085_v8  ;;  %v15504_v59 = vld [vmem:[#allocation5 + $0x250] ss:$8 sps:$4 sm:$0xff]   ;;  %v15535_v58 = vld [vmem:[#allocation5 + $0x200] ss:$8 sps:$4 sm:$0xff]   ;;  %v15563_v18 = vld [vmem:[#allocation5 + $0x344] ss:$8 sps:$4 sm:$0xff]  }
 0x6a3   : > { %7888 = vmatmul.mubr.bf16.gmra.mxu0 %v12881_v13  ;;  %v7625_v48 = vsel %vm588_vm2, %v7620_v38, %v7624_v12  ;;  %v7628_v36 = vor.u32 %v7626_v51, %v7624_v12  ;;  %v15512_v13 = vld [vmem:[#allocation5 + $0x244] ss:$8 sps:$4 sm:$0xff]   ;;  %v15510_v38 = vld [vmem:[#allocation5 + $0x240] ss:$8 sps:$4 sm:$0xff]   ;;  %v15515_v12 = vld [vmem:[#allocation5 + $0x294] ss:$8 sps:$4 sm:$0xff]  }
 0x6a4   : > { %8174 = vmatpush1.bf16.msra.mxu0 %v15436_v43  ;;  %7744 = vmatmul.mubr.bf16.vlgmr.msra.gmra.mxu1 %v7625_v48  ;;  %v15509_v43 = vld [vmem:[#allocation5 + $0x2a4] ss:$8 sps:$4 sm:$0xff]   ;;  %v8226_v48 = vld [vmem:[#allocation3 + $0xc] sm:$0xf]  ;;  %v15522_v51 = vld [vmem:[#allocation5 + $0x220] ss:$8 sps:$4 sm:$0xff]  }
 0x6a5   : > { %8003 = vmatpush1.bf16.msra.mxu1 %v15440_v22  ;;  %8175 = vmatprep.subr.bf16.mxu0 %v15446_v23  ;;  %v15507_v22 = vld [vmem:[#allocation5 + $0x2a0] ss:$8 sps:$4 sm:$0xff]   ;;  %v15518_v23 = vld [vmem:[#allocation5 + $0x234] ss:$8 sps:$4 sm:$0xff]   ;;  %v15543_v30 = vld [vmem:[#allocation5 + $0x370] ss:$8 sps:$4 sm:$0xff]  }
 0x6a6   : > { %8004 = vmatprep.subr.bf16.mxu1 %v15449_v20  ;;  %7753 = vmatprep.mubr.bf16.mxu1 %v16158_v5  ;;  %v15513_v20 = vld [vmem:[#allocation5 + $0x290] ss:$8 sps:$4 sm:$0xff]  }
 0x6a7   : > { %8201 = vmatprep.mubr.bf16.mxu0 %v16158_v5  ;;  %v15555_v15 = vld [vmem:[#allocation5 + $0x350] ss:$8 sps:$4 sm:$0xff]  }
 0x6a8   : > { %8176 = vmatpush1.bf16.msra.mxu0 %v15444_v32  ;;  %v15516_v32 = vld [vmem:[#allocation5 + $0x230] ss:$8 sps:$4 sm:$0xff]  }
 0x6a9   : > { %8005 = vmatpush1.bf16.msra.mxu1 %v15447_v31  ;;  %8177 = vmatprep.subr.bf16.mxu0 %v15452_v44  ;;  %v15521_v31 = vld [vmem:[#allocation5 + $0x284] ss:$8 sps:$4 sm:$0xff]  }
 0x6aa   : > { %8006 = vmatprep.subr.bf16.mxu1 %v15455_v1  ;;  %v15524_v44 = vld [vmem:[#allocation5 + $0x224] ss:$8 sps:$4 sm:$0xff]   ;;  %v12933_v1 = vcombine.low %v19792_v34, %v8226_v48 }
 0x6ac   : > { %8178 = vmatpush1.bf16.msra.mxu0 %v15450_v7  ;;  %7754 = vmatmul.mubr.bf16.gmra.mxu1 %v7628_v36  ;;  %v15519_v7 = vld [vmem:[#allocation5 + $0x280] ss:$8 sps:$4 sm:$0xff]   ;;  %v8257_v36 = vshrl.u32 %v12933_v1, 16 }
 0x6ad   : > { %8007 = vmatpush1.bf16.msra.mxu1 %v15453_v29  ;;  %8179 = vmatprep.subr.bf16.mxu0 %v15458_v0  ;;  %v15528_v29 = vld [vmem:[#allocation5 + $0x3f4] ss:$8 sps:$4 sm:$0xff]  }
 0x6ae   : > { %8008 = vmatprep.subr.bf16.mxu1 %v15461_v55  ;;  %8034 = vmatprep.mubr.bf16.mxu1 %v16158_v5  ;;  %v15531_v0 = vld [vmem:[#allocation5 + $0x214] ss:$8 sps:$4 sm:$0xff]   ;;  %v8260_v55 = vshll.u32 %v12933_v1, 16 }
 0x6b0   : > { %8180 = vmatpush1.bf16.msra.mxu0 %v15456_v28  ;;  %v15526_v28 = vld [vmem:[#allocation5 + $0x3f0] ss:$8 sps:$4 sm:$0xff]   ;;  %v8262_v56 = vrot.slane %v8260_v55, 4  ;;  %v15583_v55 = vld [vmem:[#allocation5 + $0x304] ss:$8 sps:$4 sm:$0xff]  }
 0x6b1   : > { %8009 = vmatpush1.bf16.msra.mxu1 %v15459_v10  ;;  %8181 = vmatprep.subr.bf16.mxu0 %v15464_v47  ;;  %v12950_v10 = vcombine.low %v19788_v4, %v19792_v34  ;;  %v15529_v47 = vld [vmem:[#allocation5 + $0x210] ss:$8 sps:$4 sm:$0xff]   ;;  %v15542_v4 = vld [vmem:[#allocation5 + $0x3d4] ss:$8 sps:$4 sm:$0xff]   ;;  %v8251_v34 = vrot.slane %v8249_v57, 3 }
 0x6b2   : > { %8010 = vmatprep.subr.bf16.mxu1 %v15467_v53  ;;  %v15534_v53 = vld [vmem:[#allocation5 + $0x3e4] ss:$8 sps:$4 sm:$0xff]  }
 0x6b4   : > { %8182 = vmatpush1.bf16.msra.mxu0 %v15462_v17  ;;  %v8252_v17 = vshll.u32 %v19807_v49, 16  ;;  %v15540_v49 = vld [vmem:[#allocation5 + $0x3d0] ss:$8 sps:$4 sm:$0xff]  }
 0x6b5   : > { %8011 = vmatpush1.bf16.msra.mxu1 %v15465_v52  ;;  %8183 = vmatprep.subr.bf16.mxu0 %v15470_v24  ;;  %v15537_v52 = vld [vmem:[#allocation5 + $0x204] ss:$8 sps:$4 sm:$0xff]   ;;  %v8259_v24 = vrot.slane %v8257_v36, 3 }
 0x6b6   : > { %8012 = vmatprep.subr.bf16.mxu1 %v15473_v42  ;;  %v15532_v42 = vld [vmem:[#allocation5 + $0x3e0] ss:$8 sps:$4 sm:$0xff]  }
 0x6b8   : > { %8184 = vmatpush1.bf16.msra.mxu0 %v15468_v40  ;;  %v8254_v40 = vrot.slane %v8252_v17, 4  ;;  %v15585_v17 = vld [vmem:[#allocation5 + $0x470] ss:$8 sps:$4 sm:$0xff]  }
 0x6b9   : > { %8013 = vmatpush1.bf16.msra.mxu1 %v15471_v16  ;;  %8505 = vmatprep.subr.bf16.mxu0 %v15478_v9  ;;  %v15545_v16 = vld [vmem:[#allocation5 + $0x374] ss:$8 sps:$4 sm:$0xff]   ;;  %v8263_v9 = vor.u32 %v8262_v56, %v8259_v24  ;;  %v15588_v56 = vld [vmem:[#allocation5 + $0x460] ss:$8 sps:$4 sm:$0xff]  }
 0x6ba   : > { %8014 = vmatprep.subr.bf16.mxu1 %v15481_v54  ;;  %v8255_v54 = vor.u32 %v8254_v40, %v8251_v34  ;;  %v15594_v34 = vld [vmem:[#allocation5 + $0x440] ss:$8 sps:$4 sm:$0xff]   ;;  %v15599_v40 = vld [vmem:[#allocation5 + $0x434] ss:$8 sps:$4 sm:$0xff]  }
 0x6bb   : > { %8202 = vmatmul.mubr.bf16.vlgmr.msra.gmra.mxu0 %v8086_v39  ;;  %v15546_v39 = vld [vmem:[#allocation5 + $0x3c0] ss:$8 sps:$4 sm:$0xff]  }
 0x6bc   : > { %8506 = vmatpush1.bf16.msra.mxu0 %v15476_v61  ;;  %8211 = vmatprep.mubr.bf16.mxu0 %v16158_v5  ;;  %v15548_v61 = vld [vmem:[#allocation5 + $0x3c4] ss:$8 sps:$4 sm:$0xff]  }
 0x6bd   : > { %8015 = vmatpush1.bf16.msra.mxu1 %v15479_v41  ;;  %8507 = vmatprep.subr.bf16.mxu0 %v15484_v60  ;;  %v15551_v41 = vld [vmem:[#allocation5 + $0x364] ss:$8 sps:$4 sm:$0xff]   ;;  %v8264_v60 = vsel %vm8247_vm13, %v8255_v54, %v8263_v9  ;;  %v15603_v54 = vld [vmem:[#allocation5 + $0x410] ss:$8 sps:$4 sm:$0xff]  }
 0x6be   : > { %8016 = vmatprep.subr.bf16.mxu1 %v15487_v14  ;;  %v15549_v14 = vld [vmem:[#allocation5 + $0x360] ss:$8 sps:$4 sm:$0xff]  }
 0x6c0   : > { %8508 = vmatpush1.bf16.msra.mxu0 %v15482_v21  ;;  %v15557_v21 = vld [vmem:[#allocation5 + $0x354] ss:$8 sps:$4 sm:$0xff]  }
 0x6c1   : > { %8017 = vmatpush1.bf16.msra.mxu1 %v15485_v2  ;;  %8509 = vmatprep.subr.bf16.mxu0 %v15490_v19  ;;  %v8735_v2 = vld [vmem:[#allocation3 + $0x10] sm:$0x7]  ;;  %v15552_v19 = vld [vmem:[#allocation5 + $0x3b0] ss:$8 sps:$4 sm:$0xff]  }
 0x6c2   : > { %8347 = vmatprep.subr.bf16.mxu1 %v15494_v6  ;;  %v15560_v6 = vld [vmem:[#allocation5 + $0x3a4] ss:$8 sps:$4 sm:$0xff]  }
 0x6c3   : > { %8212 = vmatmul.mubr.bf16.gmra.mxu0 %v8085_v8  ;;  %v12951_v8 = vcombine.low %v8226_v48, %v8226_v48  ;;  %v15570_v48 = vld [vmem:[#allocation5 + $0x380] ss:$8 sps:$4 sm:$0xff]  }
 0x6c4   : > { %8035 = vmatmul.mubr.bf16.vlgmr.msra.gmra.mxu1 %v7919_v25  ;;  %8510 = vmatpush1.bf16.msra.mxu0 %v15488_v63  ;;  %v8564_v63 = vld [vmem:[#allocation3 + $0xc] sm:$0xf] }
 0x6c5   : > { %8348 = vmatpush1.bf16.msra.mxu1 %v15492_v62  ;;  %8511 = vmatprep.subr.bf16.mxu0 %v15497_v45  ;;  %v19828_v62 = vcombine.low %v8564_v63, %v8735_v2  ;;  %v8562_v45 = vld [vmem:[#allocation3 + $0x4] sm:$0xc] }
 0x6c6   : > { %8349 = vmatprep.subr.bf16.mxu1 %v15500_v3  ;;  %8044 = vmatprep.mubr.bf16.mxu1 %v16158_v5  ;;  %v15558_v3 = vld [vmem:[#allocation5 + $0x3a0] ss:$8 sps:$4 sm:$0xff]  }
 0x6c7   : > { %8537 = vmatprep.mubr.bf16.mxu0 %v16158_v5 }
 0x6c8   : > { %8512 = vmatpush1.bf16.msra.mxu0 %v15495_v50  ;;  %v15561_v50 = vld [vmem:[#allocation5 + $0x340] ss:$8 sps:$4 sm:$0xff]  }
 0x6c9   : > { %8350 = vmatpush1.bf16.msra.mxu1 %v15498_v11  ;;  %8513 = vmatprep.subr.bf16.mxu0 %v15503_v46  ;;  %v15566_v11 = vld [vmem:[#allocation5 + $0x394] ss:$8 sps:$4 sm:$0xff]  }
 0x6ca   : > { %8351 = vmatprep.subr.bf16.mxu1 %v15506_v37  ;;  %v15569_v46 = vld [vmem:[#allocation5 + $0x334] ss:$8 sps:$4 sm:$0xff]   ;;  %v8765_v37 = vshrl.u32 %v19828_v62, 16 }
 0x6cc   : > { %8045 = vmatmul.mubr.bf16.gmra.mxu1 %v7918_v33  ;;  %8514 = vmatpush1.bf16.msra.mxu0 %v15501_v27  ;;  %v19826_v33 = vld [vmem:[#allocation3 + $0x8] sm:$0xf]  ;;  %v8768_v27 = vshll.u32 %v19828_v62, 16 }
 0x6cd   : > { %8352 = vmatpush1.bf16.msra.mxu1 %v15504_v59  ;;  %8515 = vmatprep.subr.bf16.mxu0 %v15509_v43  ;;  %v12968_v25 = vcombine.low %v8562_v45, %v19826_v33  ;;  %v15564_v59 = vld [vmem:[#allocation5 + $0x390] ss:$8 sps:$4 sm:$0xff]  }
 0x6ce   : > { %8353 = vmatprep.subr.bf16.mxu1 %v15512_v13  ;;  %8379 = vmatprep.mubr.bf16.mxu1 %v16158_v5 }
 0x6cf   : > { %v8757_v43 = vshrl.u32 %v12968_v25, 16  ;;  %v8760_v13 = vshll.u32 %v12968_v25, 16  ;;  %v8593_v57 = vrot.slane %v12968_v25, 2 }
 0x6d0   : > { %8516 = vmatpush1.bf16.msra.mxu0 %v15507_v22  ;;  %v15567_v22 = vld [vmem:[#allocation5 + $0x330] ss:$8 sps:$4 sm:$0xff]  }
 0x6d1   : > { %8354 = vmatpush1.bf16.msra.mxu1 %v15510_v38  ;;  %8517 = vmatprep.subr.bf16.mxu0 %v15515_v12  ;;  %v15572_v38 = vld [vmem:[#allocation5 + $0x384] ss:$8 sps:$4 sm:$0xff]  }
 0x6d2   : > { %8355 = vmatprep.subr.bf16.mxu1 %v15518_v23  ;;  %v15575_v12 = vld [vmem:[#allocation5 + $0x324] ss:$8 sps:$4 sm:$0xff]   ;;  %v8767_v23 = vrot.slane %v8765_v37, 2 }
 0x6d4   : > { %8518 = vmatpush1.bf16.msra.mxu0 %v15513_v20  ;;  %v8770_v20 = vrot.slane %v8768_v27, 3 }
 0x6d5   : > { %8356 = vmatpush1.bf16.msra.mxu1 %v15516_v32  ;;  %8519 = vmatprep.subr.bf16.mxu0 %v15521_v31  ;;  %v8759_v32 = vrot.slane %v8757_v43, 2  ;;  %v8762_v31 = vrot.slane %v8760_v13, 3 }
 0x6d6   : > { %8357 = vmatprep.subr.bf16.mxu1 %v15524_v44  ;;  %v15573_v44 = vld [vmem:[#allocation5 + $0x320] ss:$8 sps:$4 sm:$0xff]   ;;  %v8771_v1 = vor.u32 %v8770_v20, %v8767_v23 }
 0x6d8   : > { %8520 = vmatpush1.bf16.msra.mxu0 %v15519_v7  ;;  %v15580_v7 = vld [vmem:[#allocation5 + $0x314] ss:$8 sps:$4 sm:$0xff]  }
 0x6d9   : > { %8358 = vmatpush1.bf16.msra.mxu1 %v15522_v51  ;;  %8855 = vmatprep.subr.bf16.mxu0 %v15528_v29  ;;  %v8763_v51 = vor.u32 %v8762_v31, %v8759_v32  ;;  %v8565_v29 = vld [vmem:[#allocation3 + $0x10] sm:$0x3] }
 0x6da   : > { %8359 = vmatprep.subr.bf16.mxu1 %v15531_v0  ;;  %v15578_v0 = vld [vmem:[#allocation5 + $0x310] ss:$8 sps:$4 sm:$0xff]  }
 0x6db   : > { %8538 = vmatmul.mubr.bf16.vlgmr.msra.gmra.mxu0 %v12950_v10  ;;  %v8772_v36 = vsel %vm3148_vm6, %v8763_v51, %v8771_v1  ;;  %v15581_v10 = vld [vmem:[#allocation5 + $0x300] ss:$8 sps:$4 sm:$0xff]  }
 0x6dc   : > { %8856 = vmatpush1.bf16.msra.mxu0 %v15526_v28  ;;  %8547 = vmatprep.mubr.bf16.mxu0 %v16158_v5  ;;  %v12969_v28 = vcombine.low %v8564_v63, %v8565_v29 }
 0x6dd   : > { %8360 = vmatpush1.bf16.msra.mxu1 %v15529_v47  ;;  %8857 = vmatprep.subr.bf16.mxu0 %v15534_v53  ;;  %v15587_v47 = vld [vmem:[#allocation5 + $0x474] ss:$8 sps:$4 sm:$0xff]  }
 0x6de   : > { %8361 = vmatprep.subr.bf16.mxu1 %v15537_v52  ;;  %v8594_v53 = vrot.slane %v12969_v28, 2  ;;  %v15590_v52 = vld [vmem:[#allocation5 + $0x464] ss:$8 sps:$4 sm:$0xff]  }
 0x6e0   : > { %8858 = vmatpush1.bf16.msra.mxu0 %v15532_v42  ;;  %v8595_v24 = vsel %vm2395_vm5, %v8593_v57, %v8594_v53  ;;  %v15593_v42 = vld [vmem:[#allocation5 + $0x454] ss:$8 sps:$4 sm:$0xff]  }
 0x6e1   : > { %8362 = vmatpush1.bf16.msra.mxu1 %v15535_v58  ;;  %8859 = vmatprep.subr.bf16.mxu0 %v15542_v4  ;;  %v15591_v58 = vld [vmem:[#allocation5 + $0x450] ss:$8 sps:$4 sm:$0xff]   ;;  %v15596_v4 = vld [vmem:[#allocation5 + $0x444] ss:$8 sps:$4 sm:$0xff]  }
 0x6e2   : > { %8678 = vmatprep.subr.bf16.mxu1 %v15545_v16  ;;  %v15597_v16 = vld [vmem:[#allocation5 + $0x430] ss:$8 sps:$4 sm:$0xff]  }
 0x6e3   : > { %8548 = vmatmul.mubr.bf16.gmra.mxu0 %v12951_v8  ;;  %v15605_v8 = vld [vmem:[#allocation5 + $0x414] ss:$8 sps:$4 sm:$0xff]  }
 0x6e4   : > { %8380 = vmatmul.mubr.bf16.vlgmr.msra.gmra.mxu1 %v8264_v60  ;;  %8860 = vmatpush1.bf16.msra.mxu0 %v15540_v49  ;;  %v15600_v49 = vld [vmem:[#allocation5 + $0x420] ss:$8 sps:$4 sm:$0xff]  }
 0x6e5   : > { %8679 = vmatpush1.bf16.msra.mxu1 %v15543_v30  ;;  %8861 = vmatprep.subr.bf16.mxu0 %v15548_v61  ;;  %v15608_v30 = vld [vmem:[#allocation5 + $0x404] ss:$8 sps:$4 sm:$0xff]   ;;  %v8912_v61 = vld [vmem:[#allocation3 + $0x4] sm:$0x8] }
 0x6e6   : > { %8680 = vmatprep.subr.bf16.mxu1 %v15551_v41  ;;  %8389 = vmatprep.mubr.bf16.mxu1 %v16158_v5  ;;  %v15606_v41 = vld [vmem:[#allocation5 + $0x400] ss:$8 sps:$4 sm:$0xff]   ;;  %v13003_v60 = vcombine.low %v8912_v61, %v19826_v33 }
 0x6e7   : > { %8887 = vmatprep.mubr.bf16.mxu0 %v16158_v5 }
 0x6e8   : > { %8862 = vmatpush1.bf16.msra.mxu0 %v15546_v39  ;;  %v8934_v39 = vrot.slane %v19828_v62, 3 }
 0x6e9   : > { %8681 = vmatpush1.bf16.msra.mxu1 %v15549_v14  ;;  %8863 = vmatprep.subr.bf16.mxu0 %v15554_v26  ;;  %v8933_v14 = vrot.slane %v13003_v60, 3 }
 0x6ea   : > { %8682 = vmatprep.subr.bf16.mxu1 %v15557_v21 }
 0x6eb   : > { %v8935_v26 = vsel %vm3595_vm7, %v8933_v14, %v8934_v39 }
 0x6ec   : > { %8390 = vmatmul.mubr.bf16.gmra.mxu1 %v8263_v9  ;;  %8864 = vmatpush1.bf16.msra.mxu0 %v15552_v19  ;;  %v15602_v9 = vld [vmem:[#allocation5 + $0x424] ss:$8 sps:$4 sm:$0xff]  }
 0x6ed   : > { %8683 = vmatpush1.bf16.msra.mxu1 %v15555_v15  ;;  %8865 = vmatprep.subr.bf16.mxu0 %v15560_v6 }
 0x6ee   : > { %8684 = vmatprep.subr.bf16.mxu1 %v15563_v18  ;;  %8710 = vmatprep.mubr.bf16.mxu1 %v16158_v5 }
 0x6f0   : > { %8866 = vmatpush1.bf16.msra.mxu0 %v15558_v3 }
 0x6f1   : > { %8685 = vmatpush1.bf16.msra.mxu1 %v15561_v50  ;;  %8867 = vmatprep.subr.bf16.mxu0 %v15566_v11 }
 0x6f2   : > { %8686 = vmatprep.subr.bf16.mxu1 %v15569_v46 }
 0x6f4   : > { %8868 = vmatpush1.bf16.msra.mxu0 %v15564_v59 }
 0x6f5   : > { %8687 = vmatpush1.bf16.msra.mxu1 %v15567_v22  ;;  %8869 = vmatprep.subr.bf16.mxu0 %v15572_v38 }
 0x6f6   : > { %8688 = vmatprep.subr.bf16.mxu1 %v15575_v12 }
 0x6f8   : > { %8870 = vmatpush1.bf16.msra.mxu0 %v15570_v48 }
 0x6f9   : > { %8689 = vmatpush1.bf16.msra.mxu1 %v15573_v44 }
 0x6fa   : > { %8690 = vmatprep.subr.bf16.mxu1 %v15580_v7 }
 0x6fb   : > { %8888 = vmatmul.mubr.bf16.vlgmr.msra.gmra.mxu0 %v8772_v36 }
 0x6fc   : > { %8897 = vmatprep.mubr.bf16.mxu0 %v16158_v5 }
 0x6fd   : > { %8691 = vmatpush1.bf16.msra.mxu1 %v15578_v0 }
 0x6fe   : > { %8692 = vmatprep.subr.bf16.mxu1 %v15583_v55 }
 0x701   : > { %8693 = vmatpush1.bf16.msra.mxu1 %v15581_v10 }
 0x702   : > { %9018 = vmatprep.subr.bf16.mxu1 %v15587_v47 }
 0x703   : > { %8898 = vmatmul.mubr.bf16.gmra.mxu0 %v8771_v1 }
 0x704   : > { %8711 = vmatmul.mubr.bf16.vlgmr.msra.gmra.mxu1 %v8595_v24  ;;  %9176 = vmatprep.mubr.f32.mxu0 %v21219_v35 }
 0x705   : > { %9019 = vmatpush1.bf16.msra.mxu1 %v15585_v17  ;;  %8720 = vmatprep.mubr.bf16.mxu1 %v16158_v5 }
 0x706   : > { %9020 = vmatprep.subr.bf16.mxu1 %v15590_v52 }
 0x709   : > { %9021 = vmatpush1.bf16.msra.mxu1 %v15588_v56 }
 0x70a   : > { %9022 = vmatprep.subr.bf16.mxu1 %v15593_v42 }
 0x70c   : > { %8721 = vmatmul.mubr.bf16.gmra.mxu1 %v8594_v53 }
 0x70d   : > { %9023 = vmatpush1.bf16.msra.mxu1 %v15591_v58  ;;  %9050 = vmatprep.mubr.bf16.mxu1 %v16158_v5 }
 0x70e   : > { %9024 = vmatprep.subr.bf16.mxu1 %v15596_v4 }
 0x711   : > { %9025 = vmatpush1.bf16.msra.mxu1 %v15594_v34 }
 0x712   : > { %9026 = vmatprep.subr.bf16.mxu1 %v15599_v40 }
 0x715   : > { %9027 = vmatpush1.bf16.msra.mxu1 %v15597_v16 }
 0x716   : > { %9028 = vmatprep.subr.bf16.mxu1 %v15602_v9 }
 0x719   : > { %9029 = vmatpush1.bf16.msra.mxu1 %v15600_v49 }
 0x71a   : > { %9030 = vmatprep.subr.bf16.mxu1 %v15605_v8 }
 0x71d   : > { %9031 = vmatpush1.bf16.msra.mxu1 %v15603_v54 }
 0x71e   : > { %9032 = vmatprep.subr.bf16.mxu1 %v15608_v30 }
 0x721   : > { %9033 = vmatpush1.bf16.msra.mxu1 %v15606_v41 }
 0x724   : > { %9051 = vmatmul.mubr.bf16.vlgmr.msra.gmra.mxu1 %v8935_v26 }
 0x725   : > { %9060 = vmatprep.mubr.bf16.mxu1 %v16158_v5 }
 0x72c   : > { %9061 = vmatmul.mubr.bf16.gmra.mxu1 %v8934_v39 }
 0x72d   : > { %9374 = vmatprep.mubr.f32.mxu1 %v21219_v35 }
 0x75b   : > { %v7879_v21 = vpop.f32.mrf.mxu0 }
 0x75d   : > { %v7881_v2 = vpop.f32.mrf.mxu0 }
 0x75f   : > { %v7883_v19 = vpop.f32.mrf.mxu0 }
 0x761   : > { %v7885_v15 = vpop.f32.mrf.mxu0 }
 0x763   : > { %v7889_v6 = vpop.f32.mrf.mxu0 }
 0x764   : > { %v7745_v63 = vpop.f32.mrf.mxu1 }
 0x765   : > { %v7880_v33 = vadd.f32 %v7879_v21, %v7745_v63  ;;  %v7891_v18 = vpop.f32.mrf.mxu0 }
 0x766   : > { %v7747_v45 = vpop.f32.mrf.mxu1 }
 0x767   : > { %v7882_v62 = vadd.f32 %v7881_v2, %v7747_v45  ;;  %v7893_v3 = vpop.f32.mrf.mxu0 }
 0x768   : > { %v7749_v25 = vpop.f32.mrf.mxu1 }
 0x769   : > { %v7884_v50 = vadd.f32 %v7883_v19, %v7749_v25  ;;  %v7894_v11 = vpop.f32.mrf.mxu0 }
 0x76a   : > { %v7751_v46 = vpop.f32.mrf.mxu1 }
 0x76b   : > { %v7886_v37 = vadd.f32 %v7885_v15, %v7751_v46 }
 0x76c   : > { %v7755_v5 = vpop.f32.mrf.mxu1 }
 0x76d   : > { %v7890_v27 = vadd.f32 %v7889_v6, %v7755_v5 }
 0x76e   : > { %v7757_v59 = vpop.f32.mrf.mxu1 }
 0x76f   : > { %v7892_v43 = vadd.f32 %v7891_v18, %v7757_v59 }
 0x770   : > { %v7759_v13 = vpop.f32.mrf.mxu1 }
 0x772   : > { %v7760_v22 = vpop.f32.mrf.mxu1 }
 0x77b   : > { %v8203_v38 = vpop.f32.mrf.mxu0 }
 0x77d   : > { %v8205_v12 = vpop.f32.mrf.mxu0 }
 0x77f   : > { %v8207_v23 = vpop.f32.mrf.mxu0 }
 0x781   : > { %v8209_v20 = vpop.f32.mrf.mxu0 }
 0x783   : > { %v8213_v48 = vpop.f32.mrf.mxu0 }
 0x784   : > { %v8036_v32 = vpop.f32.mrf.mxu1 }
 0x785   : > { %v8053_v31 = vadd.f32 %v8036_v32, %v7880_v33  ;;  %v8215_v44 = vpop.f32.mrf.mxu0 }
 0x786   : > { %v8038_v1 = vpop.f32.mrf.mxu1 }
 0x787   : > { %v8054_v7 = vadd.f32 %v8038_v1, %v7882_v62  ;;  %v8217_v51 = vpop.f32.mrf.mxu0  ;;  %v8220_v29 = vadd.f32 %v8203_v38, %v8053_v31 }
 0x788   : > { %v8040_v0 = vpop.f32.mrf.mxu1 }
 0x789   : > { %v8055_v36 = vadd.f32 %v8040_v0, %v7884_v50  ;;  %v8218_v55 = vpop.f32.mrf.mxu0  ;;  %v8221_v28 = vadd.f32 %v8205_v12, %v8054_v7  ;;  %v9077_v7 = vlaneseq }
 0x78a   : > { %v8042_v10 = vpop.f32.mrf.mxu1 }
 0x78b   : > { %v8056_v47 = vadd.f32 %v8042_v10, %v7886_v37  ;;  %v8222_v53 = vadd.f32 %v8207_v23, %v8055_v36  ;;  %vm12120_vm15 = vcmp.lt.s32.totalorder %v9077_v7, 256 }
 0x78c   : > { %v8046_v57 = vpop.f32.mrf.mxu1 }
 0x78d   : > { %v8057_v17 = vadd.f32 %v8046_v57, %v7890_v27  ;;  %v8223_v52 = vadd.f32 %v8209_v20, %v8056_v47 }
 0x78e   : > { %v8048_v24 = vpop.f32.mrf.mxu1 }
 0x78f   : > { %v8058_v56 = vadd.f32 %v8048_v24, %v7892_v43  ;;  %v8224_v42 = vadd.f32 %v8213_v48, %v8057_v17  ;;  %v9075_v24 = vld [vmem:[%s20911_s8] sm:$0x3] }
 0x790   : > { %v8050_v58 = vpop.f32.mrf.mxu1 }
 0x791   : > { %v8225_v4 = vadd.f32 %v8215_v44, %v8058_v56 }
 0x792   : > { %v8051_v34 = vpop.f32.mrf.mxu1 }
 0x79b   : > { %v8539_v40 = vpop.f32.mrf.mxu0 }
 0x79d   : > { %v8541_v16 = vpop.f32.mrf.mxu0 }
 0x79f   : > { %v8543_v9 = vpop.f32.mrf.mxu0 }
 0x7a1   : > { %v8545_v49 = vpop.f32.mrf.mxu0 }
 0x7a3   : > { %v8549_v8 = vpop.f32.mrf.mxu0 }
 0x7a4   : > { %v8381_v54 = vpop.f32.mrf.mxu1 }
 0x7a5   : > { %v8398_v30 = vadd.f32 %v8381_v54, %v8220_v29  ;;  %v8551_v61 = vpop.f32.mrf.mxu0  ;;  %v19846_v29 = vshrl.u32 %v9077_v7, 7 }
 0x7a6   : > { %v8383_v41 = vpop.f32.mrf.mxu1 }
 0x7a7   : > { %v8399_v60 = vadd.f32 %v8383_v41, %v8221_v28  ;;  %v8553_v39 = vpop.f32.mrf.mxu0  ;;  %v8556_v14 = vadd.f32 %v8539_v40, %v8398_v30  ;;  %v9079_v17 = vsub.s32 0, %v19846_v29  ;;  %v9083_v56 = vsub.s32 1, %v19846_v29 }
 0x7a8   : > { %v8385_v26 = vpop.f32.mrf.mxu1 }
 0x7a9   : > { %v8400_v21 = vadd.f32 %v8385_v26, %v8222_v53  ;;  %v8554_v2 = vpop.f32.mrf.mxu0  ;;  %v8557_v19 = vadd.f32 %v8541_v16, %v8399_v60  ;;  %v9080_v54 = vrot.slane %v9075_v24, %v9079_v17  ;;  %v9084_v60 = vrot.slane %v9075_v24, %v9083_v56  ;;  %v15630_v24 = vld [vmem:[%s20913_s10 + $0x34] ss:$8 sps:$4 sm:$0xff]  }
 0x7aa   : > { %v8387_v15 = vpop.f32.mrf.mxu1 }
 0x7ab   : > { %v8401_v6 = vadd.f32 %v8387_v15, %v8223_v52  ;;  %v8558_v63 = vadd.f32 %v8543_v9, %v8400_v21 }
 0x7ac   : > { %v8391_v33 = vpop.f32.mrf.mxu1 }
 0x7ad   : > { %v8402_v18 = vadd.f32 %v8391_v33, %v8224_v42  ;;  %v8559_v45 = vadd.f32 %v8545_v49, %v8401_v6 }
 0x7ae   : > { %v8393_v62 = vpop.f32.mrf.mxu1 }
 0x7af   : > { %v8403_v3 = vadd.f32 %v8393_v62, %v8225_v4  ;;  %v8560_v25 = vadd.f32 %v8549_v8, %v8402_v18 }
 0x7b0   : > { %v8395_v50 = vpop.f32.mrf.mxu1 }
 0x7b1   : > { %v8561_v11 = vadd.f32 %v8551_v61, %v8403_v3 }
 0x7b2   : > { %v8396_v46 = vpop.f32.mrf.mxu1 }
 0x7b3   : > { %v13029_v46 = vld [vmem:[%s20912_s9 + $0x30] sm:$0xff] }
 0x7bb   : > { %v8889_v37 = vpop.f32.mrf.mxu0 }
 0x7bd   : > { %v8891_v5 = vpop.f32.mrf.mxu0 }
 0x7bf   : > { %v8893_v27 = vpop.f32.mrf.mxu0 }
 0x7c1   : > { %v8895_v59 = vpop.f32.mrf.mxu0 }
 0x7c3   : > { %v8899_v43 = vpop.f32.mrf.mxu0 }
 0x7c4   : > { %v8712_v13 = vpop.f32.mrf.mxu1 }
 0x7c5   : > { %v8901_v22 = vpop.f32.mrf.mxu0  ;;  %v8729_v57 = vadd.f32 %v8712_v13, %v8556_v14  ;;  %v15627_v13 = vld [vmem:[%s20913_s10 + $0x164] ss:$8 sps:$4 sm:$0xff]  }
 0x7c6   : > { %v8714_v38 = vpop.f32.mrf.mxu1 }
 0x7c7   : > { %v8903_v12 = vpop.f32.mrf.mxu0  ;;  %v8730_v47 = vadd.f32 %v8714_v38, %v8557_v19  ;;  %v8906_v8 = vadd.f32 %v8889_v37, %v8729_v57  ;;  %v9100_v37 = vld [vmem:[%s20912_s9 + $0x8] sm:$0xff] }
 0x7c8   : > { %v8716_v23 = vpop.f32.mrf.mxu1  ;;  %v15625_v38 = vld [vmem:[%s20913_s10 + $0x160] ss:$8 sps:$4 sm:$0xff]   ;;  %v13023_v12 = vld [vmem:[%s20912_s9 + $0x18] sm:$0xff]  ;;  %v15624_v57 = vld [vmem:[%s20913_s10 + $0x44] ss:$8 sps:$4 sm:$0xff]  }
 0x7c9   : > { %v8904_v20 = vpop.f32.mrf.mxu0  ;;  %v8731_v28 = vadd.f32 %v8716_v23, %v8558_v63  ;;  %v8907_v40 = vadd.f32 %v8891_v5, %v8730_v47  ;;  %v13030_v5 = vld [vmem:[%s20912_s9 + $0x38] sm:$0xff] }
 0x7ca   : > { %v8718_v48 = vpop.f32.mrf.mxu1  ;;  %v15633_v23 = vld [vmem:[%s20913_s10 + $0x154] ss:$8 sps:$4 sm:$0xff]   ;;  %v13024_v20 = vld [vmem:[%s20912_s9 + $0x20] sm:$0xff] }
 0x7cb   : > { %v8732_v36 = vadd.f32 %v8718_v48, %v8559_v45  ;;  %v8908_v4 = vadd.f32 %v8893_v27, %v8731_v28  ;;  %v15621_v27 = vld [vmem:[%s20913_s10 + $0x174] ss:$8 sps:$4 sm:$0xff]   ;;  %v15613_v28 = vld [vmem:[%s20913_s10 + $0x60] ss:$8 sps:$4 sm:$0xff]  }
 0x7cc   : > { %v8722_v32 = vpop.f32.mrf.mxu1  ;;  %v15612_v48 = vld [vmem:[%s20913_s10 + $0x74] ss:$8 sps:$4 sm:$0xff]  }
 0x7cd   : > { %v8733_v55 = vadd.f32 %v8722_v32, %v8560_v25  ;;  %v8909_v42 = vadd.f32 %v8895_v59, %v8732_v36  ;;  %v15619_v59 = vld [vmem:[%s20913_s10 + $0x170] ss:$8 sps:$4 sm:$0xff]   ;;  %v15615_v36 = vld [vmem:[%s20913_s10 + $0x64] ss:$8 sps:$4 sm:$0xff]  }
 0x7ce   : > { %v8724_v31 = vpop.f32.mrf.mxu1  ;;  %v15631_v32 = vld [vmem:[%s20913_s10 + $0x150] ss:$8 sps:$4 sm:$0xff]  }
 0x7cf   : > { %v8734_v53 = vadd.f32 %v8724_v31, %v8561_v11  ;;  %v8910_v58 = vadd.f32 %v8899_v43, %v8733_v55  ;;  %v9099_v11 = vld [vmem:[%s20912_s9] sm:$0xff]  ;;  %v9101_v43 = vld [vmem:[%s20912_s9 + $0x10] sm:$0xff]  ;;  %v13037_v47 = vld [vmem:[%s20912_s9 + $0x58] sm:$0xff] }
 0x7d0   : > { %v8726_v44 = vpop.f32.mrf.mxu1  ;;  %v15639_v31 = vld [vmem:[%s20913_s10 + $0x144] ss:$8 sps:$4 sm:$0xff]   ;;  %v13036_v55 = vld [vmem:[%s20912_s9 + $0x50] sm:$0xff] }
 0x7d1   : > { %v8911_v49 = vadd.f32 %v8901_v22, %v8734_v53  ;;  %v13031_v22 = vld [vmem:[%s20912_s9 + $0x40] sm:$0xff]  ;;  %v13025_v44 = vld [vmem:[%s20912_s9 + $0x28] sm:$0xff]  ;;  %v15616_v53 = vld [vmem:[%s20913_s10 + $0x50] ss:$8 sps:$4 sm:$0xff]  }
 0x7d2   : > { %v8727_v1 = vpop.f32.mrf.mxu1 }
 0x7d3   : > { %v15637_v1 = vld [vmem:[%s20913_s10 + $0x140] ss:$8 sps:$4 sm:$0xff]  }
 0x7e4   : > { %v9052_v51 = vpop.f32.mrf.mxu1 }
 0x7e5   : > { %v9069_v14 = vadd.f32 %v9052_v51, %v8906_v8  ;;  %v13035_v51 = vld [vmem:[%s20912_s9 + $0x48] sm:$0xff] }
 0x7e6   : > { %v9054_v0 = vpop.f32.mrf.mxu1  ;;  %v15648_v8 = vld [vmem:[%s20913_s10 + $0x4] ss:$8 sps:$4 sm:$0xff]  }
 0x7e7   : > { %v9070_v41 = vadd.f32 %v9054_v0, %v8907_v40  ;;  %v9087_v18 = vadd.f32 %v9080_v54, %v9069_v14  ;;  %v15610_v0 = vld [vmem:[%s20913_s10 + $0x70] ss:$8 sps:$4 sm:$0xff]   ;;  %v15642_v40 = vld [vmem:[%s20913_s10 + $0x14] ss:$8 sps:$4 sm:$0xff]   ;;  %v15658_v14 = vld [vmem:[%s20913_s10 + $0xe0] ss:$8 sps:$4 sm:$0xff]  }
 0x7e8   : > { %v9056_v10 = vpop.f32.mrf.mxu1 }
 0x7e9   : > { %v9071_v30 = vadd.f32 %v9056_v10, %v8908_v4  ;;  %v9088_v63 = vadd.f32 %v9084_v60, %v9070_v41  ;;  %v9093_v50 = vmax.f32 %v9087_v18, 0.0  ;;  %v15618_v10 = vld [vmem:[%s20913_s10 + $0x54] ss:$8 sps:$4 sm:$0xff]   ;;  %v15634_v4 = vld [vmem:[%s20913_s10 + $0x20] ss:$8 sps:$4 sm:$0xff]  }
 0x7ea   : > { %v9058_v52 = vpop.f32.mrf.mxu1  ;;  %v15654_v41 = vld [vmem:[%s20913_s10 + $0xf4] ss:$8 sps:$4 sm:$0xff]   ;;  %v15672_v18 = vld [vmem:[%s20913_s10 + $0xc4] ss:$8 sps:$4 sm:$0xff]  }
 0x7eb   : > { %v9072_v16 = vadd.f32 %v9058_v52, %v8909_v42  ;;  %v9089_v15 = vadd.f32 %v9080_v54, %v9071_v30  ;;  %v9094_v25 = vmax.f32 %v9088_v63, 0.0  ;;  %v15622_v52 = vld [vmem:[%s20913_s10 + $0x40] ss:$8 sps:$4 sm:$0xff]   ;;  %v15628_v42 = vld [vmem:[%s20913_s10 + $0x30] ss:$8 sps:$4 sm:$0xff]  }
 0x7ec   : > { %v9062_v34 = vpop.f32.mrf.mxu1  ;;  %v15651_v30 = vld [vmem:[%s20913_s10 + $0x124] ss:$8 sps:$4 sm:$0xff]   ;;  %v15669_v63 = vld [vmem:[%s20913_s10 + $0x1f4] ss:$8 sps:$4 sm:$0xff]  }
 0x7ed   : > { %v9073_v9 = vadd.f32 %v9062_v34, %v8910_v58  ;;  %v9090_v2 = vadd.f32 %v9084_v60, %v9072_v16  ;;  %v9095_v3 = vmax.f32 %v9089_v15, 0.0  ;;  %v15636_v58 = vld [vmem:[%s20913_s10 + $0x24] ss:$8 sps:$4 sm:$0xff]   ;;  %v15640_v34 = vld [vmem:[%s20913_s10 + $0x10] ss:$8 sps:$4 sm:$0xff]  }
 0x7ee   : > { %v9064_v61 = vpop.f32.mrf.mxu1  ;;  %v15643_v16 = vld [vmem:[%s20913_s10 + $0x130] ss:$8 sps:$4 sm:$0xff]   ;;  %v15666_v15 = vld [vmem:[%s20913_s10 + $0xd4] ss:$8 sps:$4 sm:$0xff]  }
 0x7ef   : > { %v9074_v39 = vadd.f32 %v9064_v61, %v8911_v49  ;;  %v9091_v26 = vadd.f32 %v9080_v54, %v9073_v9  ;;  %v9096_v62 = vmax.f32 %v9090_v2, 0.0  ;;  %v15645_v9 = vld [vmem:[%s20913_s10 + $0x134] ss:$8 sps:$4 sm:$0xff]   ;;  %v15646_v49 = vld [vmem:[%s20913_s10] ss:$8 sps:$4 sm:$0xff]  }
 0x7f0   : > { %v9066_v21 = vpop.f32.mrf.mxu1  ;;  %v15649_v54 = vld [vmem:[%s20913_s10 + $0x120] ss:$8 sps:$4 sm:$0xff]   ;;  %v15652_v61 = vld [vmem:[%s20913_s10 + $0xf0] ss:$8 sps:$4 sm:$0xff]   ;;  %v15663_v2 = vld [vmem:[%s20913_s10 + $0x104] ss:$8 sps:$4 sm:$0xff]  }
 0x7f1   : > { %v9092_v19 = vadd.f32 %v9084_v60, %v9074_v39  ;;  %v9097_v45 = vmax.f32 %v9091_v26, 0.0  ;;  %v15655_v60 = vld [vmem:[%s20913_s10 + $0x110] ss:$8 sps:$4 sm:$0xff]   ;;  %v15657_v39 = vld [vmem:[%s20913_s10 + $0x114] ss:$8 sps:$4 sm:$0xff]  }
 0x7f2   : > { %v9067_v6 = vpop.f32.mrf.mxu1  ;;  %v15660_v26 = vld [vmem:[%s20913_s10 + $0xe4] ss:$8 sps:$4 sm:$0xff]   ;;  %v15661_v21 = vld [vmem:[%s20913_s10 + $0x100] ss:$8 sps:$4 sm:$0xff]  }
 0x7f3   : > { %v9098_v33 = vmax.f32 %v9092_v19, 0.0  ;;  %v15664_v19 = vld [vmem:[%s20913_s10 + $0xd0] ss:$8 sps:$4 sm:$0xff]  }
 0x7f4   : > { %v15667_v6 = vld [vmem:[%s20913_s10 + $0x1f0] ss:$8 sps:$4 sm:$0xff]  }
 0x7f5   : > { %9138 = vmatprep.subr.mxu0 %v9098_v33  ;;  %9336 = vmatprep.subr.mxu1 %v9098_v33 }
 0x7f6   : > { %9139 = vmatpush1.msra.mxu0 %v9097_v45  ;;  %9337 = vmatpush1.msra.mxu1 %v9097_v45 }
 0x7f7   : > { %9140 = vmatprep.subr.mxu0 %v9096_v62  ;;  %9338 = vmatprep.subr.mxu1 %v9096_v62 }
 0x7f8   : > { %9141 = vmatpush1.msra.mxu0 %v9095_v3  ;;  %9339 = vmatpush1.msra.mxu1 %v9095_v3 }
 0x7f9   : > { %9142 = vmatprep.subr.mxu0 %v9094_v25  ;;  %9340 = vmatprep.subr.mxu1 %v9094_v25 }
 0x7fa   : > { %9143 = vmatpush1.msra.mxu0 %v9093_v50  ;;  %9341 = vmatpush1.msra.mxu1 %v9093_v50 }
 0x7fb   : > { %13020 = vmatmul.mubr.msk.f32.vlgmr.msra.gmra.mxu0 %vm9102_vm14, %v9099_v11  ;;  %9234 = vmatprep.subr.mxu0 %v9098_v33  ;;  %v15681_v11 = vld [vmem:[%s20913_s10 + $0x1d4] ss:$8 sps:$4 sm:$0xff]  }
 0x7fc   : > { %9235 = vmatpush1.msra.mxu0 %v9097_v45  ;;  %9182 = vmatprep.mubr.f32.mxu0 %v21219_v35 }
 0x7fd   : > { %9236 = vmatprep.subr.mxu0 %v9096_v62  ;;  %13032 = vmatmul.mubr.msk.f32.vlgmr.msra.gmra.mxu1 %vm9102_vm14, %v13029_v46  ;;  %v15682_v46 = vld [vmem:[%s20913_s10 + $0xa0] ss:$8 sps:$4 sm:$0xff]  }
 0x7fe   : > { %9237 = vmatpush1.msra.mxu0 %v9095_v3  ;;  %9380 = vmatprep.mubr.f32.mxu1 %v21219_v35 }
 0x7ff   : > { %13021 = vmatmul.mubr.msk.f32.gmra.mxu0 %vm9102_vm14, %v9100_v37  ;;  %9238 = vmatprep.subr.mxu0 %v9094_v25  ;;  %v15684_v37 = vld [vmem:[%s20913_s10 + $0xa4] ss:$8 sps:$4 sm:$0xff]  }
 0x800   : > { %9239 = vmatpush1.msra.mxu0 %v9093_v50  ;;  %9188 = vmatprep.mubr.f32.mxu0 %v21219_v35 }
 0x801   : > { %9438 = vmatprep.subr.mxu0 %v9098_v33  ;;  %13033 = vmatmul.mubr.msk.f32.gmra.mxu1 %vm9102_vm14, %v13030_v5  ;;  %v15670_v33 = vld [vmem:[%s20913_s10 + $0xc0] ss:$8 sps:$4 sm:$0xff]  }
 0x802   : > { %9386 = vmatprep.mubr.f32.mxu1 %v21219_v35  ;;  %9775 = vmatprep.subr.bf16.mxu1 %v15621_v27  ;;  %v15685_v5 = vld [vmem:[%s20913_s10 + $0x1c0] ss:$8 sps:$4 sm:$0xff]   ;;  %v15687_v27 = vld [vmem:[%s20913_s10 + $0x1c4] ss:$8 sps:$4 sm:$0xff]  }
 0x803   : > { %13022 = vmatmul.mubr.msk.f32.gmra.mxu0 %vm9102_vm14, %v9101_v43  ;;  %9776 = vmatpush1.bf16.msra.mxu1 %v15619_v59  ;;  %v15688_v59 = vld [vmem:[%s20913_s10 + $0x90] ss:$8 sps:$4 sm:$0xff]   ;;  %v15690_v43 = vld [vmem:[%s20913_s10 + $0x94] ss:$8 sps:$4 sm:$0xff]  }
 0x804   : > { %9272 = vmatprep.mubr.f32.mxu0 %v21219_v35  ;;  %9777 = vmatprep.subr.bf16.mxu1 %v15627_v13  ;;  %v15693_v13 = vld [vmem:[%s20913_s10 + $0x1b4] ss:$8 sps:$4 sm:$0xff]  }
 0x805   : > { %13034 = vmatmul.mubr.msk.f32.gmra.mxu1 %vm9102_vm14, %v13031_v22  ;;  %v15696_v22 = vld [vmem:[%s20913_s10 + $0x84] ss:$8 sps:$4 sm:$0xff]  }
 0x807   : > { %13026 = vmatmul.mubr.msk.f32.vlgmr.msra.gmra.mxu0 %vm9102_vm14, %v13023_v12  ;;  %9778 = vmatpush1.bf16.msra.mxu1 %v15625_v38  ;;  %v15691_v38 = vld [vmem:[%s20913_s10 + $0x1b0] ss:$8 sps:$4 sm:$0xff]   ;;  %v15694_v12 = vld [vmem:[%s20913_s10 + $0x80] ss:$8 sps:$4 sm:$0xff]  }
 0x808   : > { %9439 = vmatpush1.msra.mxu0 %v9097_v45  ;;  %9278 = vmatprep.mubr.f32.mxu0 %v21219_v35  ;;  %v15673_v45 = vld [vmem:[%s20913_s10 + $0x1e0] ss:$8 sps:$4 sm:$0xff]  }
 0x809   : > { %9440 = vmatprep.subr.mxu0 %v9096_v62  ;;  %9779 = vmatprep.subr.bf16.mxu1 %v15633_v23  ;;  %v15675_v62 = vld [vmem:[%s20913_s10 + $0x1e4] ss:$8 sps:$4 sm:$0xff]  }
 0x80a   : > { %9441 = vmatpush1.msra.mxu0 %v9095_v3  ;;  %v15676_v3 = vld [vmem:[%s20913_s10 + $0xb0] ss:$8 sps:$4 sm:$0xff]   ;;  %v15699_v23 = vld [vmem:[%s20913_s10 + $0x1a4] ss:$8 sps:$4 sm:$0xff]  }
 0x80b   : > { %9442 = vmatprep.subr.mxu0 %v9094_v25  ;;  %13027 = vmatmul.mubr.msk.f32.gmra.mxu0 %vm9102_vm14, %v13024_v20  ;;  %v15678_v25 = vld [vmem:[%s20913_s10 + $0xb4] ss:$8 sps:$4 sm:$0xff]   ;;  %v15697_v20 = vld [vmem:[%s20913_s10 + $0x1a0] ss:$8 sps:$4 sm:$0xff]  }
 0x80c   : > { %9443 = vmatpush1.msra.mxu0 %v9093_v50  ;;  %9284 = vmatprep.mubr.f32.mxu0 %v21219_v35  ;;  %v15679_v50 = vld [vmem:[%s20913_s10 + $0x1d0] ss:$8 sps:$4 sm:$0xff]  }
 0x80d   : > { %9980 = vmatprep.subr.bf16.mxu0 %v15612_v48  ;;  %9780 = vmatpush1.bf16.msra.mxu1 %v15631_v32  ;;  %v15702_v48 = vld [vmem:[%s20913_s10 + $0x374] ss:$8 sps:$4 sm:$0xff]   ;;  %v15703_v32 = vld [vmem:[%s20913_s10 + $0x190] ss:$8 sps:$4 sm:$0xff]  }
 0x80e   : > { %9781 = vmatprep.subr.bf16.mxu1 %v15639_v31  ;;  %v15705_v31 = vld [vmem:[%s20913_s10 + $0x194] ss:$8 sps:$4 sm:$0xff]  }
 0x80f   : > { %13028 = vmatmul.mubr.msk.f32.gmra.mxu0 %vm9102_vm14, %v13025_v44  ;;  %v15711_v44 = vld [vmem:[%s20913_s10 + $0x184] ss:$8 sps:$4 sm:$0xff]  }
 0x810   : > { %9476 = vmatprep.mubr.f32.mxu0 %v21219_v35 }
 0x811   : > { %9782 = vmatpush1.bf16.msra.mxu1 %v15637_v1  ;;  %v15709_v1 = vld [vmem:[%s20913_s10 + $0x180] ss:$8 sps:$4 sm:$0xff]  }
 0x812   : > { %9783 = vmatprep.subr.bf16.mxu1 %v15645_v9 }
 0x813   : > { %13038 = vmatmul.mubr.msk.f32.vlgmr.msra.gmra.mxu0 %vm9102_vm14, %v13035_v51  ;;  %v15717_v51 = vld [vmem:[%s20913_s10 + $0x274] ss:$8 sps:$4 sm:$0xff]  }
 0x814   : > { %9482 = vmatprep.mubr.f32.mxu0 %v21219_v35  ;;  %9981 = vmatpush1.bf16.msra.mxu0 %v15610_v0 }
 0x815   : > { %9982 = vmatprep.subr.bf16.mxu0 %v15615_v36  ;;  %9784 = vmatpush1.bf16.msra.mxu1 %v15643_v16 }
 0x816   : > { %9785 = vmatprep.subr.bf16.mxu1 %v15651_v30 }
 0x817   : > { %13039 = vmatmul.mubr.msk.f32.gmra.mxu0 %vm9102_vm14, %v13036_v55 }
 0x818   : > { %9488 = vmatprep.mubr.f32.mxu0 %v21219_v35  ;;  %9983 = vmatpush1.bf16.msra.mxu0 %v15613_v28 }
 0x819   : > { %9984 = vmatprep.subr.bf16.mxu0 %v15618_v10  ;;  %9786 = vmatpush1.bf16.msra.mxu1 %v15649_v54 }
 0x81a   : > { %9787 = vmatprep.subr.bf16.mxu1 %v15657_v39 }
 0x81b   : > { %13040 = vmatmul.mubr.msk.f32.gmra.mxu0 %vm9102_vm14, %v13037_v47 }
 0x81c   : > { %9985 = vmatpush1.bf16.msra.mxu0 %v15616_v53 }
 0x81d   : > { %9986 = vmatprep.subr.bf16.mxu0 %v15624_v57  ;;  %9788 = vmatpush1.bf16.msra.mxu1 %v15655_v60 }
 0x81e   : > { %9789 = vmatprep.subr.bf16.mxu1 %v15663_v2 }
 0x820   : > { %9987 = vmatpush1.bf16.msra.mxu0 %v15622_v52 }
 0x821   : > { %9988 = vmatprep.subr.bf16.mxu0 %v15630_v24  ;;  %9790 = vmatpush1.bf16.msra.mxu1 %v15661_v21 }
 0x822   : > { %9791 = vmatprep.subr.bf16.mxu1 %v15669_v63 }
 0x824   : > { %9989 = vmatpush1.bf16.msra.mxu0 %v15628_v42 }
 0x825   : > { %9990 = vmatprep.subr.bf16.mxu0 %v15636_v58  ;;  %9792 = vmatpush2.bf16.msra.mxu1 %v15667_v6 }
 0x826   : > { %9793 = vmatprep.subr.bf16.mxu1 %v15675_v62 }
 0x828   : > { %9991 = vmatpush1.bf16.msra.mxu0 %v15634_v4 }
 0x829   : > { %9992 = vmatprep.subr.bf16.mxu0 %v15642_v40  ;;  %9794 = vmatpush2.bf16.msra.mxu1 %v15673_v45 }
 0x82a   : > { %9795 = vmatprep.subr.bf16.mxu1 %v15681_v11 }
 0x82c   : > { %9993 = vmatpush1.bf16.msra.mxu0 %v15640_v34 }
 0x82d   : > { %9994 = vmatprep.subr.bf16.mxu0 %v15648_v8  ;;  %9796 = vmatpush2.bf16.msra.mxu1 %v15679_v50  ;;  %v15700_v50 = vld [vmem:[%s20913_s10 + $0x370] ss:$8 sps:$4 sm:$0xff]  }
 0x82e   : > { %9797 = vmatprep.subr.bf16.mxu1 %v15687_v27 }
 0x830   : > { %9995 = vmatpush1.bf16.msra.mxu0 %v15646_v49 }
 0x831   : > { %9996 = vmatprep.subr.bf16.mxu0 %v15654_v41  ;;  %9798 = vmatpush2.bf16.msra.mxu1 %v15685_v5 }
 0x832   : > { %9799 = vmatprep.subr.bf16.mxu1 %v15693_v13 }
 0x834   : > { %9997 = vmatpush2.bf16.msra.mxu0 %v15652_v61 }
 0x835   : > { %9998 = vmatprep.subr.bf16.mxu0 %v15660_v26  ;;  %9800 = vmatpush2.bf16.msra.mxu1 %v15691_v38  ;;  %v15714_v38 = vld [vmem:[%s20913_s10 + $0x354] ss:$8 sps:$4 sm:$0xff]  }
 0x836   : > { %9801 = vmatprep.subr.bf16.mxu1 %v15699_v23  ;;  %v15712_v23 = vld [vmem:[%s20913_s10 + $0x350] ss:$8 sps:$4 sm:$0xff]  }
 0x838   : > { %9999 = vmatpush2.bf16.msra.mxu0 %v15658_v14 }
 0x839   : > { %10000 = vmatprep.subr.bf16.mxu0 %v15666_v15  ;;  %9802 = vmatpush2.bf16.msra.mxu1 %v15697_v20  ;;  %v15720_v20 = vld [vmem:[%s20913_s10 + $0x344] ss:$8 sps:$4 sm:$0xff]  }
 0x83a   : > { %9803 = vmatprep.subr.bf16.mxu1 %v15705_v31 }
 0x83c   : > { %10001 = vmatpush2.bf16.msra.mxu0 %v15664_v19 }
 0x83d   : > { %10002 = vmatprep.subr.bf16.mxu0 %v15672_v18  ;;  %9804 = vmatpush2.bf16.msra.mxu1 %v15703_v32 }
 0x83e   : > { %9805 = vmatprep.subr.bf16.mxu1 %v15711_v44 }
 0x840   : > { %10003 = vmatpush2.bf16.msra.mxu0 %v15670_v33 }
 0x841   : > { %10004 = vmatprep.subr.bf16.mxu0 %v15678_v25  ;;  %9806 = vmatpush2.bf16.msra.mxu1 %v15709_v1 }
 0x842   : > { %10224 = vmatprep.subr.bf16.mxu1 %v15717_v51  ;;  %v15718_v51 = vld [vmem:[%s20913_s10 + $0x340] ss:$8 sps:$4 sm:$0xff]  }
 0x844   : > { %10005 = vmatpush2.bf16.msra.mxu0 %v15676_v3 }
 0x845   : > { %10006 = vmatprep.subr.bf16.mxu0 %v15684_v37 }
 0x848   : > { %10007 = vmatpush2.bf16.msra.mxu0 %v15682_v46  ;;  %v15708_v46 = vld [vmem:[%s20913_s10 + $0x364] ss:$8 sps:$4 sm:$0xff]  }
 0x849   : > { %10008 = vmatprep.subr.bf16.mxu0 %v15690_v43 }
 0x84c   : > { %10009 = vmatpush2.bf16.msra.mxu0 %v15688_v59 }
 0x84d   : > { %10010 = vmatprep.subr.bf16.mxu0 %v15696_v22  ;;  %v15706_v22 = vld [vmem:[%s20913_s10 + $0x360] ss:$8 sps:$4 sm:$0xff]  }
 0x850   : > { %10011 = vmatpush2.bf16.msra.mxu0 %v15694_v12 }
 0x851   : > { %10474 = vmatprep.subr.bf16.mxu0 %v15702_v48 }
 0x8bb   : > { %v9178_v0 = vpop.f32.mrf.mxu0 }
 0x8bd   : > { %v9180_v36 = vpop.f32.mrf.mxu0  ;;  %v9376_v53 = vpop.f32.mrf.mxu1 }
 0x8bf   : > { %v9184_v55 = vpop.f32.mrf.mxu0  ;;  %v9378_v24 = vpop.f32.mrf.mxu1 }
 0x8c1   : > { %v9186_v28 = vpop.f32.mrf.mxu0  ;;  %v9382_v4 = vpop.f32.mrf.mxu1 }
 0x8c3   : > { %v9190_v10 = vpop.f32.mrf.mxu0  ;;  %v9384_v49 = vpop.f32.mrf.mxu1 }
 0x8c5   : > { %v9192_v47 = vpop.f32.mrf.mxu0  ;;  %v9388_v39 = vpop.f32.mrf.mxu1 }
 0x8c7   : > { %v9274_v57 = vpop.f32.mrf.mxu0  ;;  %v9390_v18 = vpop.f32.mrf.mxu1 }
 0x8c8   : > { %v9291_v40 = vmax.f32 %v9178_v0, %v9274_v57 }
 0x8c9   : > { %v9276_v52 = vpop.f32.mrf.mxu0 }
 0x8ca   : > { %v9292_v16 = vmax.f32 %v9180_v36, %v9276_v52  ;;  %v9393_v61 = vmax.f32 %v9291_v40, %v9376_v53  ;;  %v15736_v40 = vld [vmem:[%s20913_s10 + $0x324] ss:$8 sps:$4 sm:$0xff]  }
 0x8cb   : > { %v9280_v42 = vpop.f32.mrf.mxu0 }
 0x8cc   : > { %v9293_v8 = vmax.f32 %v9184_v55, %v9280_v42  ;;  %v9394_v41 = vmax.f32 %v9292_v16, %v9378_v24  ;;  %v15730_v55 = vld [vmem:[%s20913_s10 + $0x334] ss:$8 sps:$4 sm:$0xff]  }
 0x8cd   : > { %v9282_v58 = vpop.f32.mrf.mxu0 }
 0x8ce   : > { %v9294_v30 = vmax.f32 %v9186_v28, %v9282_v58  ;;  %v9395_v21 = vmax.f32 %v9293_v8, %v9382_v4  ;;  %v15723_v8 = vld [vmem:[%s20913_s10 + $0x264] ss:$8 sps:$4 sm:$0xff]  }
 0x8cf   : > { %v9286_v34 = vpop.f32.mrf.mxu0 }
 0x8d0   : > { %v9295_v19 = vmax.f32 %v9190_v10, %v9286_v34  ;;  %v9396_v63 = vmax.f32 %v9294_v30, %v9384_v49  ;;  %v15728_v34 = vld [vmem:[%s20913_s10 + $0x330] ss:$8 sps:$4 sm:$0xff]   ;;  %v15734_v30 = vld [vmem:[%s20913_s10 + $0x320] ss:$8 sps:$4 sm:$0xff]  }
 0x8d1   : > { %v9288_v9 = vpop.f32.mrf.mxu0  ;;  %v15715_v49 = vld [vmem:[%s20913_s10 + $0x270] ss:$8 sps:$4 sm:$0xff]  }
 0x8d2   : > { %v9296_v15 = vmax.f32 %v9192_v47, %v9288_v9  ;;  %v9397_v5 = vmax.f32 %v9295_v19, %v9388_v39  ;;  %v15740_v39 = vld [vmem:[%s20913_s10 + $0x310] ss:$8 sps:$4 sm:$0xff]   ;;  %v15754_v19 = vld [vmem:[%s20913_s10 + $0x3f4] ss:$8 sps:$4 sm:$0xff]  }
 0x8d3   : > { %v9478_v54 = vpop.f32.mrf.mxu0 }
 0x8d4   : > { %v9495_v14 = vmax.f32 %v9393_v61, %v9478_v54  ;;  %v9398_v27 = vmax.f32 %v9296_v15, %v9390_v18  ;;  %v15742_v61 = vld [vmem:[%s20913_s10 + $0x314] ss:$8 sps:$4 sm:$0xff]   ;;  %v15737_v15 = vld [vmem:[%s20913_s10 + $0x240] ss:$8 sps:$4 sm:$0xff]   ;;  %v15743_v18 = vld [vmem:[%s20913_s10 + $0x230] ss:$8 sps:$4 sm:$0xff]  }
 0x8d5   : > { %v9480_v60 = vpop.f32.mrf.mxu0 }
 0x8d6   : > { %v9496_v26 = vmax.f32 %v9394_v41, %v9480_v60  ;;  %v16059_v3 = vpack.c.bf16 %v9495_v14, %v9495_v14  ;;  %v15721_v41 = vld [vmem:[%s20913_s10 + $0x260] ss:$8 sps:$4 sm:$0xff]   ;;  %v15733_v60 = vld [vmem:[%s20913_s10 + $0x254] ss:$8 sps:$4 sm:$0xff]  }
 0x8d7   : > { %v9484_v2 = vpop.f32.mrf.mxu0 }
 0x8d8   : > { %v13638_v6 = vpack.c.bf16 %v9496_v26, %v9495_v14  ;;  %v9497_v45 = vmax.f32 %v9395_v21, %v9484_v2  ;;  %v16060_v25 = vpack.c.bf16 %v9496_v26, %v9496_v26  ;;  %v15748_v14 = vld [vmem:[%s20913_s10 + $0x304] ss:$8 sps:$4 sm:$0xff]   ;;  %v15731_v26 = vld [vmem:[%s20913_s10 + $0x250] ss:$8 sps:$4 sm:$0xff]   ;;  %v15746_v2 = vld [vmem:[%s20913_s10 + $0x300] ss:$8 sps:$4 sm:$0xff]  }
 0x8d9   : > { %v9486_v33 = vpop.f32.mrf.mxu0  ;;  %v15739_v21 = vld [vmem:[%s20913_s10 + $0x244] ss:$8 sps:$4 sm:$0xff]  }
 0x8da   : > { %9521 = vst [vmem:[#allocation4 + $0x10] sm:$0xff] %v13638_v6  ;;  %v9498_v62 = vmax.f32 %v9396_v63, %v9486_v33  ;;  %10012 = vmatprep.mubr.bf16.mxu0 %v16060_v25  ;;  %v15752_v63 = vld [vmem:[%s20913_s10 + $0x3f0] ss:$8 sps:$4 sm:$0xff]   ;;  %v15760_v33 = vld [vmem:[%s20913_s10 + $0x3e4] ss:$8 sps:$4 sm:$0xff]  }
 0x8db   : > { %v9490_v11 = vpop.f32.mrf.mxu0  ;;  %10013 = vmatmul.mubr.bf16.vlgmr.msra.gmra.mxu0 %v16059_v3  ;;  %v15766_v3 = vld [vmem:[%s20913_s10 + $0x3d4] ss:$8 sps:$4 sm:$0xff]   ;;  %v15749_v25 = vld [vmem:[%s20913_s10 + $0x220] ss:$8 sps:$4 sm:$0xff]  }
 0x8dc   : > { %v20119_v37 = vpack.c.bf16 %v9498_v62, %v9497_v45  ;;  %v9499_v43 = vmax.f32 %v9397_v5, %v9490_v11  ;;  %10475 = vmatpush1.bf16.msra.mxu0 %v15700_v50  ;;  %v15751_v45 = vld [vmem:[%s20913_s10 + $0x224] ss:$8 sps:$4 sm:$0xff]   ;;  %v15758_v62 = vld [vmem:[%s20913_s10 + $0x3e0] ss:$8 sps:$4 sm:$0xff]   ;;  %v15757_v50 = vld [vmem:[%s20913_s10 + $0x214] ss:$8 sps:$4 sm:$0xff]  }
 0x8dd   : > { %v9492_v59 = vpop.f32.mrf.mxu0  ;;  %10476 = vmatprep.subr.bf16.mxu0 %v15708_v46  ;;  %v15764_v11 = vld [vmem:[%s20913_s10 + $0x3d0] ss:$8 sps:$4 sm:$0xff]   ;;  %v15772_v46 = vld [vmem:[%s20913_s10 + $0x3c4] ss:$8 sps:$4 sm:$0xff]  }
 0x8de   : > { %9522 = vst [vmem:[#allocation4] sm:$0xff] %v20119_v37  ;;  %v9500_v13 = vmax.f32 %v9398_v27, %v9492_v59  ;;  %v15755_v5 = vld [vmem:[%s20913_s10 + $0x210] ss:$8 sps:$4 sm:$0xff]   ;;  %v15763_v27 = vld [vmem:[%s20913_s10 + $0x204] ss:$8 sps:$4 sm:$0xff]  }
 0x8df   : > { %v15770_v59 = vld [vmem:[%s20913_s10 + $0x3c0] ss:$8 sps:$4 sm:$0xff]  }
 0x8e0   : > { %v13640_v12 = vpack.c.bf16 %v9500_v13, %v9499_v43  ;;  %10477 = vmatpush1.bf16.msra.mxu0 %v15706_v22  ;;  %v15778_v43 = vld [vmem:[%s20913_s10 + $0x3b4] ss:$8 sps:$4 sm:$0xff]   ;;  %v15761_v13 = vld [vmem:[%s20913_s10 + $0x200] ss:$8 sps:$4 sm:$0xff]  }
 0x8e1   : > { %10478 = vmatprep.subr.bf16.mxu0 %v15714_v38  ;;  %v20145_v0 = vld [vmem:[#allocation4 + $0x10] sm:$0xcc]  ;;  %v15769_v22 = vld [vmem:[%s20913_s10 + $0x2f4] ss:$8 sps:$4 sm:$0xff]   ;;  %v15776_v38 = vld [vmem:[%s20913_s10 + $0x3b0] ss:$8 sps:$4 sm:$0xff]  }
 0x8e2   : > { %9523 = vst [vmem:[#allocation4 + $0x8] sm:$0xff] %v13640_v12  ;;  %v20156_v53 = vld [vmem:[#allocation4 + $0x10] sm:$0xee] }
 0x8e3   : > { %v15784_v12 = vld [vmem:[%s20913_s10 + $0x3a4] ss:$8 sps:$4 sm:$0xff]  }
 0x8e4   : > { %10479 = vmatpush1.bf16.msra.mxu0 %v15712_v23  ;;  %v15767_v23 = vld [vmem:[%s20913_s10 + $0x2f0] ss:$8 sps:$4 sm:$0xff]  }
 0x8e5   : > { %v20134_v48 = vld [vmem:[#allocation4] sm:$0x11]  ;;  %10480 = vmatprep.subr.bf16.mxu0 %v15720_v20  ;;  %v15775_v20 = vld [vmem:[%s20913_s10 + $0x2e4] ss:$8 sps:$4 sm:$0xff]  }
 0x8e6   : > { %v20136_v32 = vld [vmem:[#allocation4] sm:$0x33]  ;;  %v13076_v44 = vcombine.low %v13638_v6, %v20134_v48  ;;  %v13077_v1 = vcombine.high %v13638_v6, %v20134_v48  ;;  %v13177_v57 = vcombine.high %v20156_v53, %v20134_v48 }
 0x8e7   : > { %v20138_v31 = vld [vmem:[#allocation4] sm:$0x77]  ;;  %v13243_v36 = vcombine.high %v20145_v0, %v20136_v32 }
 0x8e8   : > { %v20154_v28 = vcombine.low %v20145_v0, %v20138_v31  ;;  %v9602_v10 = vshll.u32 %v13076_v44, 16  ;;  %v9609_v47 = vshll.u32 %v13077_v1, 16  ;;  %v9600_v24 = vshrl.u32 %v13076_v44, 16  ;;  %10481 = vmatpush1.bf16.msra.mxu0 %v15718_v51  ;;  %v15745_v6 = vld [vmem:[%s20913_s10 + $0x234] ss:$8 sps:$4 sm:$0xff]  }
 0x8e9   : > { %v10311_v52 = vrot.slane %v13243_v36, 2  ;;  %v9607_v58 = vshrl.u32 %v13077_v1, 16  ;;  %10482 = vmatprep.subr.bf16.mxu0 %v15730_v55  ;;  %v10061_v54 = vrot.slane %v13177_v57, 1  ;;  %v15782_v44 = vld [vmem:[%s20913_s10 + $0x3a0] ss:$8 sps:$4 sm:$0xff]  }
 0x8ea   : > { %v9604_v42 = vrot.slane %v9602_v10, 1  ;;  %v9611_v4 = vrot.slane %v9609_v47, 1  ;;  %v15790_v1 = vld [vmem:[%s20913_s10 + $0x394] ss:$8 sps:$4 sm:$0xff]   ;;  %v15773_v51 = vld [vmem:[%s20913_s10 + $0x2e0] ss:$8 sps:$4 sm:$0xff]  }
 0x8eb   : > { %10506 = vmatprep.mubr.bf16.mxu0 %v10311_v52  ;;  %v15781_v36 = vld [vmem:[%s20913_s10 + $0x2d4] ss:$8 sps:$4 sm:$0xff]   ;;  %v15788_v55 = vld [vmem:[%s20913_s10 + $0x390] ss:$8 sps:$4 sm:$0xff]   ;;  %v15796_v10 = vld [vmem:[%s20913_s10 + $0x384] ss:$8 sps:$4 sm:$0xff]  }
 0x8ec   : > { %v9605_v16 = vor.u32 %v9604_v42, %v9600_v24  ;;  %v9612_v9 = vor.u32 %v9611_v4, %v9607_v58  ;;  %10483 = vmatpush1.bf16.msra.mxu0 %v15728_v34  ;;  %v15779_v47 = vld [vmem:[%s20913_s10 + $0x2d0] ss:$8 sps:$4 sm:$0xff]   ;;  %v15787_v57 = vld [vmem:[%s20913_s10 + $0x2c4] ss:$8 sps:$4 sm:$0xff]   ;;  %v15794_v52 = vld [vmem:[%s20913_s10 + $0x380] ss:$8 sps:$4 sm:$0xff]   ;;  %v13242_v24 = vcombine.low %v20145_v0, %v20136_v32 }
 0x8ed   : > { %10484 = vmatprep.subr.bf16.mxu0 %v15736_v40  ;;  %v15802_v42 = vld [vmem:[%s20913_s10 + $0x574] ss:$8 sps:$4 sm:$0xff]   ;;  %v20300_v58 = vld [vmem:[#allocation4 + $0x10] sm:$0x88]  ;;  %v15800_v40 = vld [vmem:[%s20913_s10 + $0x570] ss:$8 sps:$4 sm:$0xff]  }
 0x8ee   : > { %9807 = vmatprep.mubr.bf16.mxu1 %v9612_v9  ;;  %v15785_v4 = vld [vmem:[%s20913_s10 + $0x2c0] ss:$8 sps:$4 sm:$0xff]   ;;  %v13375_v34 = vcombine.high %v20300_v58, %v20138_v31  ;;  %v15793_v32 = vld [vmem:[%s20913_s10 + $0x2b4] ss:$8 sps:$4 sm:$0xff]   ;;  %v15811_v9 = vld [vmem:[%s20913_s10 + $0x564] ss:$8 sps:$4 sm:$0xff]  }
 0x8ef   : > { %9808 = vmatmul.mubr.bf16.vlgmr.msra.gmra.mxu1 %v9605_v16  ;;  %v10310_v16 = vrot.slane %v13242_v24, 2  ;;  %v15864_v24 = vld [vmem:[%s20913_s10 + $0x5d0] ss:$8 sps:$4 sm:$0xff]  }
 0x8f0   : > { %10225 = vmatpush1.bf16.msra.mxu1 %v15715_v49  ;;  %10256 = vmatprep.mubr.bf16.mxu1 %v10061_v54  ;;  %v15791_v49 = vld [vmem:[%s20913_s10 + $0x2b0] ss:$8 sps:$4 sm:$0xff]   ;;  %v15799_v54 = vld [vmem:[%s20913_s10 + $0x2a4] ss:$8 sps:$4 sm:$0xff]  }
 0x8f1   : > { %10226 = vmatprep.subr.bf16.mxu1 %v15723_v8  ;;  %10485 = vmatpush1.bf16.msra.mxu0 %v15734_v30  ;;  %v10817_v8 = vrot.slane %v13375_v34, 3  ;;  %v15809_v30 = vld [vmem:[%s20913_s10 + $0x560] ss:$8 sps:$4 sm:$0xff]   ;;  %v15863_v34 = vld [vmem:[%s20913_s10 + $0x404] ss:$8 sps:$4 sm:$0xff]  }
 0x8f2   : > { %10486 = vmatprep.subr.bf16.mxu0 %v15742_v61  ;;  %v15817_v61 = vld [vmem:[%s20913_s10 + $0x554] ss:$8 sps:$4 sm:$0xff]  }
 0x8f4   : > { %10227 = vmatpush1.bf16.msra.mxu1 %v15721_v41  ;;  %v15797_v41 = vld [vmem:[%s20913_s10 + $0x2a0] ss:$8 sps:$4 sm:$0xff]  }
 0x8f5   : > { %10228 = vmatprep.subr.bf16.mxu1 %v15733_v60  ;;  %10487 = vmatpush1.bf16.msra.mxu0 %v15740_v39  ;;  %v15808_v60 = vld [vmem:[%s20913_s10 + $0x294] ss:$8 sps:$4 sm:$0xff]   ;;  %v15815_v39 = vld [vmem:[%s20913_s10 + $0x550] ss:$8 sps:$4 sm:$0xff]  }
 0x8f6   : > { %10488 = vmatprep.subr.bf16.mxu0 %v15748_v14  ;;  %v13309_v14 = vcombine.high %v20145_v0, %v20138_v31  ;;  %v15822_v0 = vld [vmem:[%s20913_s10 + $0x540] ss:$8 sps:$4 sm:$0xff]  }
 0x8f8   : > { %10229 = vmatpush1.bf16.msra.mxu1 %v15731_v26  ;;  %v15824_v26 = vld [vmem:[%s20913_s10 + $0x544] ss:$8 sps:$4 sm:$0xff]  }
 0x8f9   : > { %10230 = vmatprep.subr.bf16.mxu1 %v15739_v21  ;;  %10489 = vmatpush1.bf16.msra.mxu0 %v15746_v2  ;;  %v15806_v21 = vld [vmem:[%s20913_s10 + $0x290] ss:$8 sps:$4 sm:$0xff]   ;;  %v15814_v2 = vld [vmem:[%s20913_s10 + $0x284] ss:$8 sps:$4 sm:$0xff]  }
 0x8fa   : > { %10490 = vmatprep.subr.bf16.mxu0 %v15754_v19  ;;  %v10565_v19 = vshrl.u32 %v13309_v14, 16 }
 0x8fc   : > { %10231 = vmatpush1.bf16.msra.mxu1 %v15737_v15  ;;  %v10568_v15 = vshll.u32 %v13309_v14, 16 }
 0x8fd   : > { %10232 = vmatprep.subr.bf16.mxu1 %v15745_v6  ;;  %10491 = vmatpush2.bf16.msra.mxu0 %v15752_v63  ;;  %v15830_v6 = vld [vmem:[%s20913_s10 + $0x534] ss:$8 sps:$4 sm:$0xff]   ;;  %v15812_v63 = vld [vmem:[%s20913_s10 + $0x280] ss:$8 sps:$4 sm:$0xff]  }
 0x8fe   : > { %10492 = vmatprep.subr.bf16.mxu0 %v15760_v33  ;;  %v13176_v33 = vcombine.low %v20156_v53, %v20134_v48  ;;  %v15818_v48 = vld [vmem:[%s20913_s10 + $0x470] ss:$8 sps:$4 sm:$0xff]  }
 0x900   : > { %10233 = vmatpush1.bf16.msra.mxu1 %v15743_v18  ;;  %v15820_v18 = vld [vmem:[%s20913_s10 + $0x474] ss:$8 sps:$4 sm:$0xff]   ;;  %v10060_v53 = vrot.slane %v13176_v33, 1 }
 0x901   : > { %10234 = vmatprep.subr.bf16.mxu1 %v15751_v45  ;;  %10493 = vmatpush2.bf16.msra.mxu0 %v15758_v62  ;;  %v10567_v45 = vrot.slane %v10565_v19, 2  ;;  %v10570_v62 = vrot.slane %v10568_v15, 3  ;;  %v15879_v19 = vld [vmem:[%s20913_s10 + $0x4d0] ss:$8 sps:$4 sm:$0xff]   ;;  %v15902_v33 = vld [vmem:[%s20913_s10 + $0x774] ss:$8 sps:$4 sm:$0xff]  }
 0x902   : > { %10494 = vmatprep.subr.bf16.mxu0 %v15766_v3  ;;  %v15828_v3 = vld [vmem:[%s20913_s10 + $0x530] ss:$8 sps:$4 sm:$0xff]  }
 0x904   : > { %10235 = vmatpush1.bf16.msra.mxu1 %v15749_v25  ;;  %v15836_v25 = vld [vmem:[%s20913_s10 + $0x524] ss:$8 sps:$4 sm:$0xff]  }
 0x905   : > { %10236 = vmatprep.subr.bf16.mxu1 %v15757_v50  ;;  %10495 = vmatpush2.bf16.msra.mxu0 %v15764_v11  ;;  %v15827_v50 = vld [vmem:[%s20913_s10 + $0x464] ss:$8 sps:$4 sm:$0xff]   ;;  %v10571_v11 = vor.u32 %v10570_v62, %v10567_v45  ;;  %v15893_v62 = vld [vmem:[%s20913_s10 + $0x4b4] ss:$8 sps:$4 sm:$0xff]  }
 0x906   : > { %10496 = vmatprep.subr.bf16.mxu0 %v15772_v46  ;;  %v15834_v46 = vld [vmem:[%s20913_s10 + $0x520] ss:$8 sps:$4 sm:$0xff]  }
 0x908   : > { %10237 = vmatpush1.bf16.msra.mxu1 %v15755_v5  ;;  %v15842_v5 = vld [vmem:[%s20913_s10 + $0x514] ss:$8 sps:$4 sm:$0xff]  }
 0x909   : > { %10238 = vmatprep.subr.bf16.mxu1 %v15763_v27  ;;  %10497 = vmatpush2.bf16.msra.mxu0 %v15770_v59  ;;  %v15825_v27 = vld [vmem:[%s20913_s10 + $0x460] ss:$8 sps:$4 sm:$0xff]   ;;  %v15833_v59 = vld [vmem:[%s20913_s10 + $0x454] ss:$8 sps:$4 sm:$0xff]  }
 0x90a   : > { %10498 = vmatprep.subr.bf16.mxu0 %v15778_v43  ;;  %v15840_v43 = vld [vmem:[%s20913_s10 + $0x510] ss:$8 sps:$4 sm:$0xff]  }
 0x90c   : > { %10239 = vmatpush1.bf16.msra.mxu1 %v15761_v13  ;;  %v15848_v13 = vld [vmem:[%s20913_s10 + $0x504] ss:$8 sps:$4 sm:$0xff]  }
 0x90d   : > { %10240 = vmatprep.subr.bf16.mxu1 %v15769_v22  ;;  %10499 = vmatpush2.bf16.msra.mxu0 %v15776_v38  ;;  %v15831_v22 = vld [vmem:[%s20913_s10 + $0x450] ss:$8 sps:$4 sm:$0xff]   ;;  %v15839_v38 = vld [vmem:[%s20913_s10 + $0x444] ss:$8 sps:$4 sm:$0xff]  }
 0x90e   : > { %10500 = vmatprep.subr.bf16.mxu0 %v15784_v12  ;;  %v15846_v12 = vld [vmem:[%s20913_s10 + $0x500] ss:$8 sps:$4 sm:$0xff]  }
 0x910   : > { %10241 = vmatpush2.bf16.msra.mxu1 %v15767_v23  ;;  %v15854_v23 = vld [vmem:[%s20913_s10 + $0x5f4] ss:$8 sps:$4 sm:$0xff]  }
 0x911   : > { %10242 = vmatprep.subr.bf16.mxu1 %v15775_v20  ;;  %10501 = vmatpush2.bf16.msra.mxu0 %v15782_v44  ;;  %v15837_v20 = vld [vmem:[%s20913_s10 + $0x440] ss:$8 sps:$4 sm:$0xff]   ;;  %v15845_v44 = vld [vmem:[%s20913_s10 + $0x434] ss:$8 sps:$4 sm:$0xff]  }
 0x912   : > { %10502 = vmatprep.subr.bf16.mxu0 %v15790_v1  ;;  %v15852_v1 = vld [vmem:[%s20913_s10 + $0x5f0] ss:$8 sps:$4 sm:$0xff]  }
 0x914   : > { %10243 = vmatpush2.bf16.msra.mxu1 %v15773_v51  ;;  %v15860_v51 = vld [vmem:[%s20913_s10 + $0x5e4] ss:$8 sps:$4 sm:$0xff]  }
 0x915   : > { %10244 = vmatprep.subr.bf16.mxu1 %v15781_v36  ;;  %10503 = vmatpush2.bf16.msra.mxu0 %v15788_v55  ;;  %v15843_v36 = vld [vmem:[%s20913_s10 + $0x430] ss:$8 sps:$4 sm:$0xff]   ;;  %v15851_v55 = vld [vmem:[%s20913_s10 + $0x424] ss:$8 sps:$4 sm:$0xff]  }
 0x916   : > { %10504 = vmatprep.subr.bf16.mxu0 %v15796_v10  ;;  %v15858_v10 = vld [vmem:[%s20913_s10 + $0x5e0] ss:$8 sps:$4 sm:$0xff]  }
 0x918   : > { %10245 = vmatpush2.bf16.msra.mxu1 %v15779_v47  ;;  %v15866_v47 = vld [vmem:[%s20913_s10 + $0x5d4] ss:$8 sps:$4 sm:$0xff]  }
 0x919   : > { %10246 = vmatprep.subr.bf16.mxu1 %v15787_v57  ;;  %10505 = vmatpush2.bf16.msra.mxu0 %v15794_v52  ;;  %v15849_v57 = vld [vmem:[%s20913_s10 + $0x420] ss:$8 sps:$4 sm:$0xff]   ;;  %v15857_v52 = vld [vmem:[%s20913_s10 + $0x414] ss:$8 sps:$4 sm:$0xff]  }
 0x91a   : > { %10980 = vmatprep.subr.bf16.mxu0 %v15802_v42  ;;  %v15872_v42 = vld [vmem:[%s20913_s10 + $0x5c4] ss:$8 sps:$4 sm:$0xff]  }
 0x91c   : > { %10247 = vmatpush2.bf16.msra.mxu1 %v15785_v4  ;;  %10507 = vmatmul.mubr.bf16.vlgmr.msra.gmra.mxu0 %v10310_v16  ;;  %v15855_v4 = vld [vmem:[%s20913_s10 + $0x410] ss:$8 sps:$4 sm:$0xff]   ;;  %v15861_v16 = vld [vmem:[%s20913_s10 + $0x400] ss:$8 sps:$4 sm:$0xff]  }
 0x91d   : > { %10248 = vmatprep.subr.bf16.mxu1 %v15793_v32  ;;  %10981 = vmatpush1.bf16.msra.mxu0 %v15800_v40  ;;  %v15870_v32 = vld [vmem:[%s20913_s10 + $0x5c0] ss:$8 sps:$4 sm:$0xff]   ;;  %v15878_v40 = vld [vmem:[%s20913_s10 + $0x5b4] ss:$8 sps:$4 sm:$0xff]  }
 0x91e   : > { %11012 = vmatprep.mubr.bf16.mxu0 %v10817_v8  ;;  %10982 = vmatprep.subr.bf16.mxu0 %v15811_v9  ;;  %v15869_v9 = vld [vmem:[%s20913_s10 + $0x4f4] ss:$8 sps:$4 sm:$0xff]   ;;  %v15884_v8 = vld [vmem:[%s20913_s10 + $0x5a4] ss:$8 sps:$4 sm:$0xff]  }
 0x920   : > { %10249 = vmatpush2.bf16.msra.mxu1 %v15791_v49  ;;  %v15876_v49 = vld [vmem:[%s20913_s10 + $0x5b0] ss:$8 sps:$4 sm:$0xff]  }
 0x921   : > { %10250 = vmatprep.subr.bf16.mxu1 %v15799_v54  ;;  %10983 = vmatpush1.bf16.msra.mxu0 %v15809_v30  ;;  %v15867_v54 = vld [vmem:[%s20913_s10 + $0x4f0] ss:$8 sps:$4 sm:$0xff]   ;;  %v15875_v30 = vld [vmem:[%s20913_s10 + $0x4e4] ss:$8 sps:$4 sm:$0xff]  }
 0x922   : > { %10984 = vmatprep.subr.bf16.mxu0 %v15817_v61  ;;  %v20470_v61 = vld [vmem:[#allocation4 + $0x8] sm:$0x11] }
 0x923   : > { %v13507_v14 = vcombine.high %v20119_v37, %v20470_v61 }
 0x924   : > { %10251 = vmatpush2.bf16.msra.mxu1 %v15797_v41  ;;  %v15882_v41 = vld [vmem:[%s20913_s10 + $0x5a0] ss:$8 sps:$4 sm:$0xff]  }
 0x925   : > { %10252 = vmatprep.subr.bf16.mxu1 %v15808_v60  ;;  %10985 = vmatpush1.bf16.msra.mxu0 %v15815_v39  ;;  %v15890_v60 = vld [vmem:[%s20913_s10 + $0x594] ss:$8 sps:$4 sm:$0xff]   ;;  %v15873_v39 = vld [vmem:[%s20913_s10 + $0x4e0] ss:$8 sps:$4 sm:$0xff]   ;;  %v11320_v15 = vshll.u32 %v13507_v14, 16 }
 0x926   : > { %10986 = vmatprep.subr.bf16.mxu0 %v15824_v26  ;;  %v15881_v26 = vld [vmem:[%s20913_s10 + $0x4d4] ss:$8 sps:$4 sm:$0xff]  }
 0x927   : > { %v11322_v45 = vrot.slane %v11320_v15, 1  ;;  %v15955_v15 = vld [vmem:[%s20913_s10 + $0x614] ss:$8 sps:$4 sm:$0xff]  }
 0x928   : > { %10253 = vmatpush2.bf16.msra.mxu1 %v15806_v21  ;;  %v15888_v21 = vld [vmem:[%s20913_s10 + $0x590] ss:$8 sps:$4 sm:$0xff]  }
 0x929   : > { %10254 = vmatprep.subr.bf16.mxu1 %v15814_v2  ;;  %10987 = vmatpush1.bf16.msra.mxu0 %v15822_v0  ;;  %v15896_v2 = vld [vmem:[%s20913_s10 + $0x584] ss:$8 sps:$4 sm:$0xff]  }
 0x92a   : > { %10988 = vmatprep.subr.bf16.mxu0 %v15830_v6  ;;  %v15887_v0 = vld [vmem:[%s20913_s10 + $0x4c4] ss:$8 sps:$4 sm:$0xff]   ;;  %v15894_v6 = vld [vmem:[%s20913_s10 + $0x580] ss:$8 sps:$4 sm:$0xff]  }
 0x92c   : > { %10255 = vmatpush2.bf16.msra.mxu1 %v15812_v63  ;;  %v13374_v63 = vcombine.low %v20300_v58, %v20138_v31  ;;  %v15900_v31 = vld [vmem:[%s20913_s10 + $0x770] ss:$8 sps:$4 sm:$0xff]   ;;  %v11318_v58 = vshrl.u32 %v13507_v14, 16 }
 0x92d   : > { %10734 = vmatprep.subr.bf16.mxu1 %v15820_v18  ;;  %10989 = vmatpush1.bf16.msra.mxu0 %v15828_v3  ;;  %v15885_v18 = vld [vmem:[%s20913_s10 + $0x4c0] ss:$8 sps:$4 sm:$0xff]   ;;  %v15941_v14 = vld [vmem:[%s20913_s10 + $0x630] ss:$8 sps:$4 sm:$0xff]  }
 0x92e   : > { %10990 = vmatprep.subr.bf16.mxu0 %v15836_v25  ;;  %v10816_v3 = vrot.slane %v13374_v63, 3  ;;  %v15908_v25 = vld [vmem:[%s20913_s10 + $0x764] ss:$8 sps:$4 sm:$0xff]   ;;  %v15953_v63 = vld [vmem:[%s20913_s10 + $0x610] ss:$8 sps:$4 sm:$0xff]  }
 0x92f   : > { %10257 = vmatmul.mubr.bf16.vlgmr.msra.gmra.mxu1 %v10060_v53  ;;  %v11323_v53 = vor.u32 %v11322_v45, %v11318_v58  ;;  %v15976_v45 = vld [vmem:[%s20913_s10 + $0x7b4] ss:$8 sps:$4 sm:$0xff]   ;;  %v15974_v58 = vld [vmem:[%s20913_s10 + $0x7b0] ss:$8 sps:$4 sm:$0xff]  }
 0x930   : > { %10735 = vmatpush1.bf16.msra.mxu1 %v15818_v48  ;;  %10766 = vmatprep.mubr.bf16.mxu1 %v10571_v11  ;;  %v15891_v48 = vld [vmem:[%s20913_s10 + $0x4b0] ss:$8 sps:$4 sm:$0xff]   ;;  %v15906_v11 = vld [vmem:[%s20913_s10 + $0x760] ss:$8 sps:$4 sm:$0xff]  }
 0x931   : > { %10736 = vmatprep.subr.bf16.mxu1 %v15827_v50  ;;  %10991 = vmatpush1.bf16.msra.mxu0 %v15834_v46  ;;  %v15899_v50 = vld [vmem:[%s20913_s10 + $0x4a4] ss:$8 sps:$4 sm:$0xff]   ;;  %v15914_v46 = vld [vmem:[%s20913_s10 + $0x754] ss:$8 sps:$4 sm:$0xff]  }
 0x932   : > { %10992 = vmatprep.subr.bf16.mxu0 %v15842_v5  ;;  %v15897_v5 = vld [vmem:[%s20913_s10 + $0x4a0] ss:$8 sps:$4 sm:$0xff]  }
 0x934   : > { %10737 = vmatpush1.bf16.msra.mxu1 %v15825_v27  ;;  %v15905_v27 = vld [vmem:[%s20913_s10 + $0x494] ss:$8 sps:$4 sm:$0xff]  }
 0x935   : > { %10738 = vmatprep.subr.bf16.mxu1 %v15833_v59  ;;  %10993 = vmatpush1.bf16.msra.mxu0 %v15840_v43  ;;  %v15912_v59 = vld [vmem:[%s20913_s10 + $0x750] ss:$8 sps:$4 sm:$0xff]   ;;  %v15922_v43 = vld [vmem:[%s20913_s10 + $0x744] ss:$8 sps:$4 sm:$0xff]  }
 0x936   : > { %10994 = vmatprep.subr.bf16.mxu0 %v15848_v13  ;;  %v15903_v13 = vld [vmem:[%s20913_s10 + $0x490] ss:$8 sps:$4 sm:$0xff]  }
 0x938   : > { %10739 = vmatpush1.bf16.msra.mxu1 %v15831_v22  ;;  %v15911_v22 = vld [vmem:[%s20913_s10 + $0x484] ss:$8 sps:$4 sm:$0xff]  }
 0x939   : > { %10740 = vmatprep.subr.bf16.mxu1 %v15839_v38  ;;  %10995 = vmatpush1.bf16.msra.mxu0 %v15846_v12  ;;  %v10557_v38 = vshrl.u32 %v20154_v28, 16  ;;  %v10560_v12 = vshll.u32 %v20154_v28, 16  ;;  %v15917_v28 = vld [vmem:[%s20913_s10 + $0x674] ss:$8 sps:$4 sm:$0xff]  }
 0x93a   : > { %10996 = vmatprep.subr.bf16.mxu0 %v15854_v23  ;;  %v15920_v23 = vld [vmem:[%s20913_s10 + $0x740] ss:$8 sps:$4 sm:$0xff]  }
 0x93c   : > { %10741 = vmatpush1.bf16.msra.mxu1 %v15837_v20  ;;  %v15928_v20 = vld [vmem:[%s20913_s10 + $0x734] ss:$8 sps:$4 sm:$0xff]  }
 0x93d   : > { %10742 = vmatprep.subr.bf16.mxu1 %v15845_v44  ;;  %10997 = vmatpush2.bf16.msra.mxu0 %v15852_v1  ;;  %v15909_v44 = vld [vmem:[%s20913_s10 + $0x480] ss:$8 sps:$4 sm:$0xff]   ;;  %v10559_v1 = vrot.slane %v10557_v38, 2 }
 0x93e   : > { %10998 = vmatprep.subr.bf16.mxu0 %v15860_v51  ;;  %v10562_v51 = vrot.slane %v10560_v12, 3  ;;  %v15983_v12 = vld [vmem:[%s20913_s10 + $0x6c0] ss:$8 sps:$4 sm:$0xff]  }
 0x940   : > { %10743 = vmatpush1.bf16.msra.mxu1 %v15843_v36  ;;  %v15926_v36 = vld [vmem:[%s20913_s10 + $0x730] ss:$8 sps:$4 sm:$0xff]  }
 0x941   : > { %10744 = vmatprep.subr.bf16.mxu1 %v15851_v55  ;;  %10999 = vmatpush2.bf16.msra.mxu0 %v15858_v10  ;;  %v20565_v55 = vld [vmem:[#allocation4] sm:$0xff]  ;;  %v15934_v10 = vld [vmem:[%s20913_s10 + $0x724] ss:$8 sps:$4 sm:$0xff]  }
 0x942   : > { %11000 = vmatprep.subr.bf16.mxu0 %v15866_v47  ;;  %v15915_v47 = vld [vmem:[%s20913_s10 + $0x670] ss:$8 sps:$4 sm:$0xff]  }
 0x944   : > { %10745 = vmatpush1.bf16.msra.mxu1 %v15849_v57  ;;  %v10563_v57 = vor.u32 %v10562_v51, %v10559_v1  ;;  %v15989_v1 = vld [vmem:[%s20913_s10 + $0x6b0] ss:$8 sps:$4 sm:$0xff]   ;;  %v15997_v51 = vld [vmem:[%s20913_s10 + $0x6a4] ss:$8 sps:$4 sm:$0xff]  }
 0x945   : > { %10746 = vmatprep.subr.bf16.mxu1 %v15857_v52  ;;  %11001 = vmatpush2.bf16.msra.mxu0 %v15864_v24  ;;  %v15925_v52 = vld [vmem:[%s20913_s10 + $0x664] ss:$8 sps:$4 sm:$0xff]   ;;  %v13441_v24 = vcombine.high %v20565_v55, %v20565_v55 }
 0x946   : > { %11002 = vmatprep.subr.bf16.mxu0 %v15872_v42  ;;  %v15932_v42 = vld [vmem:[%s20913_s10 + $0x720] ss:$8 sps:$4 sm:$0xff]  }
 0x948   : > { %10747 = vmatpush1.bf16.msra.mxu1 %v15855_v4  ;;  %v15940_v4 = vld [vmem:[%s20913_s10 + $0x714] ss:$8 sps:$4 sm:$0xff]  }
 0x949   : > { %10748 = vmatprep.subr.bf16.mxu1 %v15863_v34  ;;  %11003 = vmatpush2.bf16.msra.mxu0 %v15870_v32  ;;  %v15923_v34 = vld [vmem:[%s20913_s10 + $0x660] ss:$8 sps:$4 sm:$0xff]   ;;  %v15931_v32 = vld [vmem:[%s20913_s10 + $0x654] ss:$8 sps:$4 sm:$0xff]  }
 0x94a   : > { %11004 = vmatprep.subr.bf16.mxu0 %v15878_v40  ;;  %v15938_v40 = vld [vmem:[%s20913_s10 + $0x710] ss:$8 sps:$4 sm:$0xff]  }
 0x94c   : > { %10749 = vmatpush1.bf16.msra.mxu1 %v15861_v16  ;;  %v15946_v16 = vld [vmem:[%s20913_s10 + $0x704] ss:$8 sps:$4 sm:$0xff]  }
 0x94d   : > { %10750 = vmatprep.subr.bf16.mxu1 %v15869_v9  ;;  %11005 = vmatpush2.bf16.msra.mxu0 %v15876_v49  ;;  %v15929_v9 = vld [vmem:[%s20913_s10 + $0x650] ss:$8 sps:$4 sm:$0xff]   ;;  %v15937_v49 = vld [vmem:[%s20913_s10 + $0x644] ss:$8 sps:$4 sm:$0xff]  }
 0x94e   : > { %11006 = vmatprep.subr.bf16.mxu0 %v15884_v8  ;;  %v15944_v8 = vld [vmem:[%s20913_s10 + $0x700] ss:$8 sps:$4 sm:$0xff]  }
 0x950   : > { %10751 = vmatpush2.bf16.msra.mxu1 %v15867_v54  ;;  %v15952_v54 = vld [vmem:[%s20913_s10 + $0x7f4] ss:$8 sps:$4 sm:$0xff]  }
 0x951   : > { %10752 = vmatprep.subr.bf16.mxu1 %v15875_v30  ;;  %11007 = vmatpush2.bf16.msra.mxu0 %v15882_v41  ;;  %v15935_v30 = vld [vmem:[%s20913_s10 + $0x640] ss:$8 sps:$4 sm:$0xff]   ;;  %v15943_v41 = vld [vmem:[%s20913_s10 + $0x634] ss:$8 sps:$4 sm:$0xff]  }
 0x952   : > { %11008 = vmatprep.subr.bf16.mxu0 %v15890_v60  ;;  %v15950_v60 = vld [vmem:[%s20913_s10 + $0x7f0] ss:$8 sps:$4 sm:$0xff]  }
 0x954   : > { %10753 = vmatpush2.bf16.msra.mxu1 %v15873_v39  ;;  %v15958_v39 = vld [vmem:[%s20913_s10 + $0x7e4] ss:$8 sps:$4 sm:$0xff]  }
 0x955   : > { %10754 = vmatprep.subr.bf16.mxu1 %v15881_v26  ;;  %11009 = vmatpush2.bf16.msra.mxu0 %v15888_v21  ;;  %v15949_v26 = vld [vmem:[%s20913_s10 + $0x624] ss:$8 sps:$4 sm:$0xff]   ;;  %v15956_v21 = vld [vmem:[%s20913_s10 + $0x7e0] ss:$8 sps:$4 sm:$0xff]  }
 0x956   : > { %11010 = vmatprep.subr.bf16.mxu0 %v15896_v2  ;;  %v15964_v2 = vld [vmem:[%s20913_s10 + $0x7d4] ss:$8 sps:$4 sm:$0xff]  }
 0x958   : > { %10755 = vmatpush2.bf16.msra.mxu1 %v15879_v19  ;;  %v15947_v19 = vld [vmem:[%s20913_s10 + $0x620] ss:$8 sps:$4 sm:$0xff]  }
 0x959   : > { %10756 = vmatprep.subr.bf16.mxu1 %v15887_v0  ;;  %11011 = vmatpush2.bf16.msra.mxu0 %v15894_v6  ;;  %v15962_v0 = vld [vmem:[%s20913_s10 + $0x7d0] ss:$8 sps:$4 sm:$0xff]   ;;  %v15970_v6 = vld [vmem:[%s20913_s10 + $0x7c4] ss:$8 sps:$4 sm:$0xff]  }
 0x95a   : > { %11486 = vmatprep.subr.bf16.mxu0 %v15902_v33  ;;  %v15961_v33 = vld [vmem:[%s20913_s10 + $0x604] ss:$8 sps:$4 sm:$0xff]  }
 0x95c   : > { %10757 = vmatpush2.bf16.msra.mxu1 %v15885_v18  ;;  %11013 = vmatmul.mubr.bf16.vlgmr.msra.gmra.mxu0 %v10816_v3  ;;  %v15968_v18 = vld [vmem:[%s20913_s10 + $0x7c0] ss:$8 sps:$4 sm:$0xff]   ;;  %v15982_v3 = vld [vmem:[%s20913_s10 + $0x7a4] ss:$8 sps:$4 sm:$0xff]  }
 0x95d   : > { %10758 = vmatprep.subr.bf16.mxu1 %v15893_v62  ;;  %11487 = vmatpush1.bf16.msra.mxu0 %v15900_v31  ;;  %v15959_v62 = vld [vmem:[%s20913_s10 + $0x600] ss:$8 sps:$4 sm:$0xff]   ;;  %v15967_v31 = vld [vmem:[%s20913_s10 + $0x6f4] ss:$8 sps:$4 sm:$0xff]  }
 0x95e   : > { %11518 = vmatprep.mubr.bf16.mxu0 %v11323_v53  ;;  %11488 = vmatprep.subr.bf16.mxu0 %v15908_v25  ;;  %v15965_v25 = vld [vmem:[%s20913_s10 + $0x6f0] ss:$8 sps:$4 sm:$0xff]   ;;  %v15980_v53 = vld [vmem:[%s20913_s10 + $0x7a0] ss:$8 sps:$4 sm:$0xff]  }
 0x960   : > { %10759 = vmatpush2.bf16.msra.mxu1 %v15891_v48  ;;  %v15973_v48 = vld [vmem:[%s20913_s10 + $0x6e4] ss:$8 sps:$4 sm:$0xff]  }
 0x961   : > { %10760 = vmatprep.subr.bf16.mxu1 %v15899_v50  ;;  %11489 = vmatpush1.bf16.msra.mxu0 %v15906_v11  ;;  %v13506_v50 = vcombine.low %v20119_v37, %v20470_v61  ;;  %v15988_v11 = vld [vmem:[%s20913_s10 + $0x794] ss:$8 sps:$4 sm:$0xff]   ;;  %v15986_v37 = vld [vmem:[%s20913_s10 + $0x790] ss:$8 sps:$4 sm:$0xff]  }
 0x962   : > { %11490 = vmatprep.subr.bf16.mxu0 %v15914_v46  ;;  %v15971_v46 = vld [vmem:[%s20913_s10 + $0x6e0] ss:$8 sps:$4 sm:$0xff]  }
 0x964   : > { %10761 = vmatpush2.bf16.msra.mxu1 %v15897_v5  ;;  %v15979_v5 = vld [vmem:[%s20913_s10 + $0x6d4] ss:$8 sps:$4 sm:$0xff]  }
 0x965   : > { %10762 = vmatprep.subr.bf16.mxu1 %v15905_v27  ;;  %11491 = vmatpush1.bf16.msra.mxu0 %v15912_v59  ;;  %v11313_v27 = vshll.u32 %v13506_v50, 16  ;;  %v15994_v59 = vld [vmem:[%s20913_s10 + $0x784] ss:$8 sps:$4 sm:$0xff]  }
 0x966   : > { %11492 = vmatprep.subr.bf16.mxu0 %v15922_v43  ;;  %v15977_v43 = vld [vmem:[%s20913_s10 + $0x6d0] ss:$8 sps:$4 sm:$0xff]  }
 0x967   : > { %v11315_v38 = vrot.slane %v11313_v27, 1 }
 0x968   : > { %10763 = vmatpush2.bf16.msra.mxu1 %v15903_v13  ;;  %v15985_v13 = vld [vmem:[%s20913_s10 + $0x6c4] ss:$8 sps:$4 sm:$0xff]  }
 0x969   : > { %10764 = vmatprep.subr.bf16.mxu1 %v15911_v22  ;;  %11493 = vmatpush1.bf16.msra.mxu0 %v15920_v23  ;;  %v15992_v22 = vld [vmem:[%s20913_s10 + $0x780] ss:$8 sps:$4 sm:$0xff]   ;;  %v11311_v23 = vshrl.u32 %v13506_v50, 16  ;;  %v16041_v50 = vld [vmem:[%s20913_s10 + $0x8c4] ss:$8 sps:$4 sm:$0xff]  }
 0x96a   : > { %11494 = vmatprep.subr.bf16.mxu0 %v15928_v20  ;;  %v15991_v20 = vld [vmem:[%s20913_s10 + $0x6b4] ss:$8 sps:$4 sm:$0xff]  }
 0x96c   : > { %10765 = vmatpush2.bf16.msra.mxu1 %v15909_v44  ;;  %v11316_v44 = vor.u32 %v11315_v38, %v11311_v23  ;;  %v16053_v23 = vld [vmem:[%s20913_s10 + $0x884] ss:$8 sps:$4 sm:$0xff]  }
 0x96d   : > { %11224 = vmatprep.subr.bf16.mxu1 %v15917_v28  ;;  %11495 = vmatpush1.bf16.msra.mxu0 %v15926_v36 }
 0x96e   : > { %11496 = vmatprep.subr.bf16.mxu0 %v15934_v10  ;;  %v15995_v10 = vld [vmem:[%s20913_s10 + $0x6a0] ss:$8 sps:$4 sm:$0xff]  }
 0x96f   : > { %10767 = vmatmul.mubr.bf16.vlgmr.msra.gmra.mxu1 %v10563_v57 }
 0x970   : > { %11225 = vmatpush1.bf16.msra.mxu1 %v15915_v47  ;;  %11256 = vmatprep.mubr.bf16.mxu1 %v13441_v24  ;;  %v16000_v47 = vld [vmem:[%s20913_s10 + $0x694] ss:$8 sps:$4 sm:$0xff]   ;;  %v15998_v24 = vld [vmem:[%s20913_s10 + $0x690] ss:$8 sps:$4 sm:$0xff]  }
 0x971   : > { %11226 = vmatprep.subr.bf16.mxu1 %v15925_v52  ;;  %11497 = vmatpush1.bf16.msra.mxu0 %v15932_v42  ;;  %v16003_v42 = vld [vmem:[%s20913_s10 + $0x684] ss:$8 sps:$4 sm:$0xff]  }
 0x972   : > { %11498 = vmatprep.subr.bf16.mxu0 %v15940_v4  ;;  %v16001_v4 = vld [vmem:[%s20913_s10 + $0x680] ss:$8 sps:$4 sm:$0xff]  }
 0x974   : > { %11227 = vmatpush1.bf16.msra.mxu1 %v15923_v34  ;;  %v16006_v34 = vld [vmem:[%s20913_s10 + $0x874] ss:$8 sps:$4 sm:$0xff]  }
 0x975   : > { %11228 = vmatprep.subr.bf16.mxu1 %v15931_v32  ;;  %11499 = vmatpush1.bf16.msra.mxu0 %v15938_v40  ;;  %v20734_v32 = vld [vmem:[#allocation4] sm:$0xee] }
 0x976   : > { %11500 = vmatprep.subr.bf16.mxu0 %v15946_v16  ;;  %v13573_v40 = vcombine.high %v20734_v32, %v20470_v61  ;;  %v16004_v16 = vld [vmem:[%s20913_s10 + $0x870] ss:$8 sps:$4 sm:$0xff]  }
 0x978   : > { %11229 = vmatpush1.bf16.msra.mxu1 %v15929_v9  ;;  %v13440_v9 = vcombine.low %v20565_v55, %v20565_v55  ;;  %v16014_v55 = vld [vmem:[%s20913_s10 + $0x854] ss:$8 sps:$4 sm:$0xff]  }
 0x979   : > { %11230 = vmatprep.subr.bf16.mxu1 %v15937_v49  ;;  %11501 = vmatpush1.bf16.msra.mxu0 %v15944_v8  ;;  %v16011_v49 = vld [vmem:[%s20913_s10 + $0x864] ss:$8 sps:$4 sm:$0xff]   ;;  %v11569_v8 = vrot.slane %v13573_v40, 1 }
 0x97a   : > { %11502 = vmatprep.subr.bf16.mxu0 %v15952_v54 }
 0x97c   : > { %11231 = vmatpush1.bf16.msra.mxu1 %v15935_v30 }
 0x97d   : > { %11232 = vmatprep.subr.bf16.mxu1 %v15943_v41  ;;  %11503 = vmatpush2.bf16.msra.mxu0 %v15950_v60  ;;  %v16009_v41 = vld [vmem:[%s20913_s10 + $0x860] ss:$8 sps:$4 sm:$0xff]  }
 0x97e   : > { %11504 = vmatprep.subr.bf16.mxu0 %v15958_v39 }
 0x980   : > { %11233 = vmatpush1.bf16.msra.mxu1 %v15941_v14 }
 0x981   : > { %11234 = vmatprep.subr.bf16.mxu1 %v15949_v26  ;;  %11505 = vmatpush2.bf16.msra.mxu0 %v15956_v21  ;;  %v16012_v26 = vld [vmem:[%s20913_s10 + $0x850] ss:$8 sps:$4 sm:$0xff]  }
 0x982   : > { %11506 = vmatprep.subr.bf16.mxu0 %v15964_v2  ;;  %v16017_v2 = vld [vmem:[%s20913_s10 + $0x844] ss:$8 sps:$4 sm:$0xff]  }
 0x984   : > { %11235 = vmatpush1.bf16.msra.mxu1 %v15947_v19  ;;  %v16015_v19 = vld [vmem:[%s20913_s10 + $0x840] ss:$8 sps:$4 sm:$0xff]  }
 0x985   : > { %11236 = vmatprep.subr.bf16.mxu1 %v15955_v15  ;;  %11507 = vmatpush2.bf16.msra.mxu0 %v15962_v0  ;;  %v16020_v15 = vld [vmem:[%s20913_s10 + $0x834] ss:$8 sps:$4 sm:$0xff]   ;;  %v16018_v0 = vld [vmem:[%s20913_s10 + $0x830] ss:$8 sps:$4 sm:$0xff]  }
 0x986   : > { %11508 = vmatprep.subr.bf16.mxu0 %v15970_v6  ;;  %v16023_v6 = vld [vmem:[%s20913_s10 + $0x824] ss:$8 sps:$4 sm:$0xff]  }
 0x988   : > { %11237 = vmatpush1.bf16.msra.mxu1 %v15953_v63  ;;  %v16021_v63 = vld [vmem:[%s20913_s10 + $0x820] ss:$8 sps:$4 sm:$0xff]  }
 0x989   : > { %11238 = vmatprep.subr.bf16.mxu1 %v15961_v33  ;;  %11509 = vmatpush2.bf16.msra.mxu0 %v15968_v18  ;;  %v16026_v33 = vld [vmem:[%s20913_s10 + $0x814] ss:$8 sps:$4 sm:$0xff]   ;;  %v16024_v18 = vld [vmem:[%s20913_s10 + $0x810] ss:$8 sps:$4 sm:$0xff]  }
 0x98a   : > { %11510 = vmatprep.subr.bf16.mxu0 %v15976_v45  ;;  %v16029_v45 = vld [vmem:[%s20913_s10 + $0x804] ss:$8 sps:$4 sm:$0xff]  }
 0x98c   : > { %11239 = vmatpush1.bf16.msra.mxu1 %v15959_v62  ;;  %v16027_v62 = vld [vmem:[%s20913_s10 + $0x800] ss:$8 sps:$4 sm:$0xff]  }
 0x98d   : > { %11240 = vmatprep.subr.bf16.mxu1 %v15967_v31  ;;  %11511 = vmatpush2.bf16.msra.mxu0 %v15974_v58  ;;  %v16032_v31 = vld [vmem:[%s20913_s10 + $0x8f4] ss:$8 sps:$4 sm:$0xff]   ;;  %v16030_v58 = vld [vmem:[%s20913_s10 + $0x8f0] ss:$8 sps:$4 sm:$0xff]  }
 0x98e   : > { %11512 = vmatprep.subr.bf16.mxu0 %v15982_v3  ;;  %v16035_v3 = vld [vmem:[%s20913_s10 + $0x8e4] ss:$8 sps:$4 sm:$0xff]  }
 0x990   : > { %11241 = vmatpush2.bf16.msra.mxu1 %v15965_v25  ;;  %v16033_v25 = vld [vmem:[%s20913_s10 + $0x8e0] ss:$8 sps:$4 sm:$0xff]  }
 0x991   : > { %11242 = vmatprep.subr.bf16.mxu1 %v15973_v48  ;;  %11513 = vmatpush2.bf16.msra.mxu0 %v15980_v53  ;;  %v16038_v48 = vld [vmem:[%s20913_s10 + $0x8d4] ss:$8 sps:$4 sm:$0xff]   ;;  %v16036_v53 = vld [vmem:[%s20913_s10 + $0x8d0] ss:$8 sps:$4 sm:$0xff]  }
 0x992   : > { %11514 = vmatprep.subr.bf16.mxu0 %v15988_v11  ;;  %v16039_v11 = vld [vmem:[%s20913_s10 + $0x8c0] ss:$8 sps:$4 sm:$0xff]  }
 0x994   : > { %11243 = vmatpush2.bf16.msra.mxu1 %v15971_v46  ;;  %v16044_v46 = vld [vmem:[%s20913_s10 + $0x8b4] ss:$8 sps:$4 sm:$0xff]  }
 0x995   : > { %11244 = vmatprep.subr.bf16.mxu1 %v15979_v5  ;;  %11515 = vmatpush2.bf16.msra.mxu0 %v15986_v37  ;;  %v16042_v5 = vld [vmem:[%s20913_s10 + $0x8b0] ss:$8 sps:$4 sm:$0xff]   ;;  %v16047_v37 = vld [vmem:[%s20913_s10 + $0x8a4] ss:$8 sps:$4 sm:$0xff]  }
 0x996   : > { %11516 = vmatprep.subr.bf16.mxu0 %v15994_v59 }
 0x998   : > { %11245 = vmatpush2.bf16.msra.mxu1 %v15977_v43  ;;  %v16045_v43 = vld [vmem:[%s20913_s10 + $0x8a0] ss:$8 sps:$4 sm:$0xff]  }
 0x999   : > { %11246 = vmatprep.subr.bf16.mxu1 %v15985_v13  ;;  %11517 = vmatpush2.bf16.msra.mxu0 %v15992_v22  ;;  %v16050_v13 = vld [vmem:[%s20913_s10 + $0x894] ss:$8 sps:$4 sm:$0xff]  }
 0x99b   : > { %v10014_v28 = vpop.f32.mrf.mxu0 }
 0x99c   : > { %11247 = vmatpush2.bf16.msra.mxu1 %v15983_v12  ;;  %11519 = vmatmul.mubr.bf16.vlgmr.msra.gmra.mxu0 %v11316_v44  ;;  %v16048_v12 = vld [vmem:[%s20913_s10 + $0x890] ss:$8 sps:$4 sm:$0xff]   ;;  %v13572_v44 = vcombine.low %v20734_v32, %v20470_v61 }
 0x99d   : > { %11248 = vmatprep.subr.bf16.mxu1 %v15991_v20  ;;  %11859 = vmatprep.mubr.f32.mxu0 %v21219_v35  ;;  %v10016_v36 = vpop.f32.mrf.mxu0  ;;  %v16051_v20 = vld [vmem:[%s20913_s10 + $0x880] ss:$8 sps:$4 sm:$0xff]  }
 0x99f   : > { %v10018_v57 = vpop.f32.mrf.mxu0 }
 0x9a0   : > { %11249 = vmatpush2.bf16.msra.mxu1 %v15989_v1  ;;  %v11568_v1 = vrot.slane %v13572_v44, 1 }
 0x9a1   : > { %11250 = vmatprep.subr.bf16.mxu1 %v15997_v51  ;;  %v10019_v52 = vpop.f32.mrf.mxu0 }
 0x9a4   : > { %11251 = vmatpush2.bf16.msra.mxu1 %v15995_v10 }
 0x9a5   : > { %11252 = vmatprep.subr.bf16.mxu1 %v16000_v47 }
 0x9a8   : > { %11253 = vmatpush2.bf16.msra.mxu1 %v15998_v24 }
 0x9a9   : > { %11254 = vmatprep.subr.bf16.mxu1 %v16003_v42 }
 0x9ac   : > { %11255 = vmatpush2.bf16.msra.mxu1 %v16001_v4 }
 0x9ad   : > { %11732 = vmatprep.subr.bf16.mxu1 %v16006_v34 }
 0x9af   : > { %11257 = vmatmul.mubr.bf16.vlgmr.msra.gmra.mxu1 %v13440_v9  ;;  %v9809_v54 = vpop.f32.mrf.mxu1 }
 0x9b0   : > { %v20746_v30 = vadd.f32 %v10014_v28, %v9809_v54  ;;  %11733 = vmatpush1.bf16.msra.mxu1 %v16004_v16  ;;  %11764 = vmatprep.mubr.bf16.mxu1 %v11569_v8 }
 0x9b1   : > { %v9811_v60 = vpop.f32.mrf.mxu1  ;;  %11734 = vmatprep.subr.bf16.mxu1 %v16011_v49 }
 0x9b2   : > { %v20754_v39 = vadd.f32 %v10016_v36, %v9811_v60 }
 0x9b3   : > { %v9813_v14 = vpop.f32.mrf.mxu1 }
 0x9b4   : > { %11735 = vmatpush1.bf16.msra.mxu1 %v16009_v41 }
 0x9b5   : > { %v9814_v21 = vpop.f32.mrf.mxu1  ;;  %11736 = vmatprep.subr.bf16.mxu1 %v16014_v55 }
 0x9b8   : > { %11737 = vmatpush1.bf16.msra.mxu1 %v16012_v26 }
 0x9b9   : > { %11738 = vmatprep.subr.bf16.mxu1 %v16017_v2 }
 0x9bc   : > { %11739 = vmatpush1.bf16.msra.mxu1 %v16015_v19 }
 0x9bd   : > { %11740 = vmatprep.subr.bf16.mxu1 %v16020_v15 }
 0x9c0   : > { %11741 = vmatpush1.bf16.msra.mxu1 %v16018_v0 }
 0x9c1   : > { %11742 = vmatprep.subr.bf16.mxu1 %v16023_v6 }
 0x9c4   : > { %11743 = vmatpush1.bf16.msra.mxu1 %v16021_v63  ;;  %v11775_v63 = vld [vmem:[%s20914_s11] sm:$0x3] }
 0x9c5   : > { %11744 = vmatprep.subr.bf16.mxu1 %v16026_v33 }
 0x9c8   : > { %11745 = vmatpush1.bf16.msra.mxu1 %v16024_v18  ;;  %v11780_v18 = vrot.slane %v11775_v63, %v9079_v17  ;;  %v13607_v17 = vld [vmem:[%s20915_s12 + $0x1] sm:$0x1] }
 0x9c9   : > { %11746 = vmatprep.subr.bf16.mxu1 %v16029_v45 }
 0x9cc   : > { %11747 = vmatpush1.bf16.msra.mxu1 %v16027_v62  ;;  %v11784_v62 = vrot.slane %v11775_v63, %v9083_v56  ;;  %v13609_v56 = vld [vmem:[%s20915_s12 + $0x2] sm:$0x1] }
 0x9cd   : > { %11748 = vmatprep.subr.bf16.mxu1 %v16032_v31 }
 0x9d0   : > { %11749 = vmatpush2.bf16.msra.mxu1 %v16030_v58 }
 0x9d1   : > { %11750 = vmatprep.subr.bf16.mxu1 %v16035_v3 }
 0x9d4   : > { %11751 = vmatpush2.bf16.msra.mxu1 %v16033_v25 }
 0x9d5   : > { %11752 = vmatprep.subr.bf16.mxu1 %v16038_v48 }
 0x9d8   : > { %11753 = vmatpush2.bf16.msra.mxu1 %v16036_v53 }
 0x9d9   : > { %11754 = vmatprep.subr.bf16.mxu1 %v16041_v50 }
 0x9dc   : > { %11755 = vmatpush2.bf16.msra.mxu1 %v16039_v11  ;;  %v10508_v27 = vpop.f32.mrf.mxu0 }
 0x9dd   : > { %11756 = vmatprep.subr.bf16.mxu1 %v16044_v46  ;;  %v11791_v46 = vld [vmem:[%s20915_s12] sm:$0x1] }
 0x9de   : > { %v10510_v59 = vpop.f32.mrf.mxu0 }
 0x9e0   : > { %11757 = vmatpush2.bf16.msra.mxu1 %v16042_v5  ;;  %v10512_v22 = vpop.f32.mrf.mxu0  ;;  %v13611_v5 = vld [vmem:[%s20915_s12 + $0x3] sm:$0x1] }
 0x9e1   : > { %11758 = vmatprep.subr.bf16.mxu1 %v16047_v37 }
 0x9e2   : > { %v10513_v38 = vpop.f32.mrf.mxu0 }
 0x9e4   : > { %11759 = vmatpush2.bf16.msra.mxu1 %v16045_v43 }
 0x9e5   : > { %11760 = vmatprep.subr.bf16.mxu1 %v16050_v13  ;;  %v16159_v13 = vmov 1966171168  }
 0x9e6   : > { %v12104_v22 = vunpack.c.l.s4 %v16159_v13 }
 0x9e8   : > { %11761 = vmatpush2.bf16.msra.mxu1 %v16048_v12  ;;  %v12105_v44 = vunpack.c.0.s8 %v12104_v22 }
 0x9e9   : > { %11762 = vmatprep.subr.bf16.mxu1 %v16053_v23 }
 0x9ec   : > { %11763 = vmatpush2.bf16.msra.mxu1 %v16051_v20 }
 0x9ef   : > { %v10258_v51 = vpop.f32.mrf.mxu1  ;;  %11765 = vmatmul.mubr.bf16.vlgmr.msra.gmra.mxu1 %v11568_v1 }
 0x9f0   : > { %v10265_v28 = vadd.f32 %v10258_v51, %v20746_v30 }
 0x9f1   : > { %v10260_v36 = vpop.f32.mrf.mxu1 }
 0x9f2   : > { %v10266_v10 = vadd.f32 %v10260_v36, %v20754_v39  ;;  %v10515_v47 = vadd.f32 %v10508_v27, %v10265_v28 }
 0x9f3   : > { %v10262_v57 = vpop.f32.mrf.mxu1 }
 0x9f4   : > { %v10516_v52 = vadd.f32 %v10510_v59, %v10266_v10 }
 0x9f5   : > { %v10263_v24 = vpop.f32.mrf.mxu1 }
 0xa1c   : > { %v11014_v42 = vpop.f32.mrf.mxu0 }
 0xa1e   : > { %v11016_v4 = vpop.f32.mrf.mxu0 }
 0xa20   : > { %v11018_v34 = vpop.f32.mrf.mxu0 }
 0xa22   : > { %v11019_v40 = vpop.f32.mrf.mxu0 }
 0xa2f   : > { %v10768_v16 = vpop.f32.mrf.mxu1 }
 0xa30   : > { %v10775_v61 = vadd.f32 %v10768_v16, %v10515_v47  ;;  %v12108_v47 = vsub.s32 %v12105_v44, %v19846_v29 }
 0xa31   : > { %v10770_v32 = vpop.f32.mrf.mxu1 }
 0xa32   : > { %v10776_v9 = vadd.f32 %v10770_v32, %v10516_v52  ;;  %v11021_v49 = vadd.f32 %v11014_v42, %v10775_v61 }
 0xa33   : > { %v10772_v8 = vpop.f32.mrf.mxu1 }
 0xa34   : > { %v11022_v54 = vadd.f32 %v11016_v4, %v10776_v9 }
 0xa35   : > { %v10773_v41 = vpop.f32.mrf.mxu1 }
 0xa5c   : > { %v11520_v30 = vpop.f32.mrf.mxu0 }
 0xa5e   : > { %v11522_v60 = vpop.f32.mrf.mxu0 }
 0xa60   : > { %v11524_v55 = vpop.f32.mrf.mxu0 }
 0xa62   : > { %v11525_v39 = vpop.f32.mrf.mxu0 }
 0xa6f   : > { %v11258_v14 = vpop.f32.mrf.mxu1 }
 0xa70   : > { %v11265_v26 = vadd.f32 %v11258_v14, %v11021_v49 }
 0xa71   : > { %v11260_v21 = vpop.f32.mrf.mxu1 }
 0xa72   : > { %v11266_v2 = vadd.f32 %v11260_v21, %v11022_v54  ;;  %v11527_v19 = vadd.f32 %v11520_v30, %v11265_v26 }
 0xa73   : > { %v11262_v15 = vpop.f32.mrf.mxu1 }
 0xa74   : > { %v11528_v0 = vadd.f32 %v11522_v60, %v11266_v2 }
 0xa75   : > { %v11263_v6 = vpop.f32.mrf.mxu1 }
 0xaaf   : > { %v11766_v33 = vpop.f32.mrf.mxu1 }
 0xab0   : > { %v11773_v45 = vadd.f32 %v11766_v33, %v11527_v19 }
 0xab1   : > { %v11768_v31 = vpop.f32.mrf.mxu1 }
 0xab2   : > { %v11774_v58 = vadd.f32 %v11768_v31, %v11528_v0  ;;  %v11787_v3 = vadd.f32 %v11780_v18, %v11773_v45 }
 0xab3   : > { %v11770_v25 = vpop.f32.mrf.mxu1 }
 0xab4   : > { %v11788_v48 = vadd.f32 %v11784_v62, %v11774_v58  ;;  %v11789_v11 = vmax.f32 %v11787_v3, 0.0 }
 0xab5   : > { %v11771_v53 = vpop.f32.mrf.mxu1 }
 0xab6   : > { %v11790_v50 = vmax.f32 %v11788_v48, 0.0 }
 0xab8   : > { %11825 = vmatprep.subr.mxu0 %v11790_v50 }
 0xab9   : > { %11826 = vmatpush1.msra.mxu0 %v11789_v11 }
 0xaba   : > { %13606 = vmatmul.mubr.msk.f32.vlgmr.msra.gmra.mxu0 %vm737_vm1, %v11791_v46  ;;  %11901 = vmatprep.subr.mxu0 %v11790_v50 }
 0xabb   : > { %11902 = vmatpush1.msra.mxu0 %v11789_v11  ;;  %11935 = vmatprep.mubr.f32.mxu0 %v21219_v35 }
 0xabc   : > { %11979 = vmatprep.subr.mxu0 %v11790_v50 }
 0xabe   : > { %13608 = vmatmul.mubr.msk.f32.vlgmr.msra.gmra.mxu0 %vm737_vm1, %v13607_v17 }
 0xabf   : > { %11980 = vmatpush1.msra.mxu0 %v11789_v11  ;;  %12013 = vmatprep.mubr.f32.mxu0 %v21219_v35 }
 0xac0   : > { %12057 = vmatprep.subr.mxu0 %v11790_v50 }
 0xac2   : > { %13610 = vmatmul.mubr.msk.f32.vlgmr.msra.gmra.mxu0 %vm737_vm1, %v13609_v56 }
 0xac3   : > { %12058 = vmatpush1.msra.mxu0 %v11789_v11  ;;  %12091 = vmatprep.mubr.f32.mxu0 %v21219_v35 }
 0xac6   : > { %13612 = vmatmul.mubr.msk.f32.vlgmr.msra.gmra.mxu0 %vm737_vm1, %v13611_v5 }
 0xb7a   : > { %v11861_v37 = vpop.f32.mrf.mxu0 }
 0xb7c   : > { %v11863_v27 = vpop.f32.mrf.mxu0 }
 0xb7e   : > { %v11937_v59 = vpop.f32.mrf.mxu0 }
 0xb7f   : > { %v11942_v23 = vmax.f32 %v11861_v37, %v11937_v59 }
 0xb80   : > { %v11939_v43 = vpop.f32.mrf.mxu0 }
 0xb81   : > { %v11943_v20 = vmax.f32 %v11863_v27, %v11939_v43 }
 0xb82   : > { %v12015_v38 = vpop.f32.mrf.mxu0 }
 0xb83   : > { %v12020_v1 = vmax.f32 %v11942_v23, %v12015_v38 }
 0xb84   : > { %v12017_v12 = vpop.f32.mrf.mxu0 }
 0xb85   : > { %v12021_v51 = vmax.f32 %v11943_v20, %v12017_v12 }
 0xb86   : > { %v12093_v35 = vpop.f32.mrf.mxu0 }
 0xb87   : > { %v12098_v36 = vmax.f32 %v12020_v1, %v12093_v35 }
 0xb88   : > { %v12095_v28 = vpop.f32.mrf.mxu0 }
 0xb89   : > { %v12099_v10 = vmax.f32 %v12021_v51, %v12095_v28 }
 0xb8b   : > { %v12102_v57 = vcombine.low %v12098_v36, %v12099_v10 }
 0xb8d   : > { %v12109_v52 = vrot.slane %v12102_v57, %v12108_v47 }
 0xb8f   : > { %v12116_v24 = vrot.slane %v12109_v52, %v12108_v47 }
 0xb91   : > { %12122 = vst.msk [vmem:[%s448_s20] sm:$0x3] %vm12120_vm15, %v12116_v24 }
 0xb92   : > { %16100 = shalt.err (!%p16097_p0)
}
 0xb93   : > { %s16101_s1 = scalar_lea.hbm %s12136_s30, 32  ;;  %s16105_s20 = scalar_lea.hbm %s20916_s13, 64 }
 0xb94   : > { %p16102_p1 = scmp.ne.s32.totalorder %s12136_s30, %s16101_s1  ;;  %p16106_p4 = scmp.lt.s32.totalorder %s12136_s30, %s20916_s13 }
 0xb95   : > { %p16107_p7 = scmp.lt.s32.totalorder %s16105_s20, %s16101_s1 }
 0xb96   : > { %p16103_p2 = pnand %p16102_p1, %p16269_p5 }
 0xb97   : > { %p16108_p8 = por %p16107_p7, %p16106_p4 }
 0xb98   : > { %p16104_p3 = pneg %p16103_p2 }
 0xb9a   : > { %p16109_p6 = pnand %p16108_p8, %p16104_p3 }
 0xb9c   : > { %16112 = shalt.err (!%p16109_p6)
}
 0xb9d   : > { %15209 = dma.vmem_to_hbm [thread:$0]  (%p16269_p5), %s12139_s22, 32, %s12136_s30, %s12124_s27  }
 0xb9e PF: > { %p15221_p9 = scmp.ge.s32.totalorder %s16151_s28, 2  ;;  %s12150_s17 = sand.u32 1, %s16139_s25  }
 0xb9f   : > { %p21223_p10 = scmp.ne.s32.totalorder %s20939_s19, 0  ;;  %s12151_s16 = scalar_lea.sflag [#allocation7], %s12150_s17 }
 0xba1   : > { %p15216_p11 = pnand %p15221_p9, %p21223_p10 }
 0xba3   : > { %p15217_p12 = pneg %p15216_p11 }
 0xba5   : > { %16134 = dma.done.wait (%p15217_p12), %s12151_s16, 32  }
 0xba6   : > { %16136 = vsyncadd (%p15217_p12), %s12151_s16, 4294967264  ;;  %s21224_s1 = sld [smem:[#allocation11_spill]]  ;;  %p24_p13 = scmp.ge.s32.totalorder %s16256_s14, 4  }
 0xba7   : > { %s21225_s27 = sld [smem:[#allocation12_spill]]  ;;  %s21226_s25 = smov %s16143_s26 }
 0xba8   : > { %s21228_s28 = smov %s16256_s14  ;;  %26 = sbr.rel (!%p24_p13) target bundleno = 7 (0x7), region = 156 }
 0xbac   : > { %s21227_s26 = smov %s21224_s1 }
 0xbad   :  { %12156 = vsyncpa [#allocation6], 1 }
 0xbae   :  { %12158 = vsyncpa [#allocation6 + $0x1], 1 }
 0xbaf   :  { %12159 = vsyncpa [#allocation7], 1 }
 0xbb0   :  { %12161 = vsyncpa [#allocation7 + $0x1], 1 }

</bundles_post_ra>
